<compile_context>
chip_gen: v7x
topology: tpu7x:2x2x1
jax: 0.10.0
libtpu: 0.0.40
codegen_flags: <defaults>
</compile_context>

<pallas_src>
import functools
import math

import numpy as np
import jax
import jax.numpy as jnp
from jax import lax
from jax.experimental import pallas as pl

LN_EPS = 1e-5
BN_EPS = 1e-5
ADD_EPS = 1e-12


# ----------------------------------------------------------------------------
# In-kernel math helpers
# ----------------------------------------------------------------------------
def _erf(x):
    # Abramowitz & Stegun 7.1.26 polynomial, |error| < 1.5e-7.
    a1, a2, a3, a4, a5 = 0.254829592, -0.284496736, 1.421413741, -1.453152027, 1.061405429
    p = 0.3275911
    sgn = jnp.where(x >= 0.0, 1.0, -1.0)
    ax = jnp.abs(x)
    t = 1.0 / (1.0 + p * ax)
    poly = ((((a5 * t + a4) * t + a3) * t + a2) * t + a1) * t
    return sgn * (1.0 - poly * jnp.exp(-ax * ax))


def _gelu(x):
    # exact (erf) GELU, as in torch.nn.GELU()
    return 0.5 * x * (1.0 + _erf(x * (1.0 / math.sqrt(2.0))))


def _layernorm(x, g, b):
    # LayerNorm over the channel (lane) axis; g/b are (1, C).
    mu = jnp.mean(x, axis=-1, keepdims=True)
    xc = x - mu
    var = jnp.mean(xc * xc, axis=-1, keepdims=True)
    return xc * lax.rsqrt(var + LN_EPS) * g + b


# ----------------------------------------------------------------------------
# Kernels (grid-less: full operands live in VMEM)
# ----------------------------------------------------------------------------
def _in_layer_kernel(xt_ref, w_ref, shift_ref, o_ref):
    # Conv1d(1, dim, 15, stride=2, pad=7, no bias) as taps @ W, BN folded, + GELU.
    y = jnp.dot(xt_ref[...], w_ref[...], preferred_element_type=jnp.float32)
    o_ref[...] = _gelu(y + shift_ref[...])


def _lfel_kernel(x_ref, w1_ref, b1_ref, g_ref, wall_ref, bnshift_ref,
                 ln1g_ref, ln1b_ref,
                 wq_ref, bq_ref, wkv_ref, bkv_ref, bsum_ref,
                 wp_ref, bp_ref, c1a_ref,
                 ln2g_ref, ln2b_ref,
                 wf1_ref, bf1_ref, wf2_ref, bf2_ref, c1f_ref,
                 o_ref):
    m, c = o_ref.shape  # m = B*Lo tokens, c = d_out channels

    # ---- Embedding: 1x1 conv (channel-tiled) -> 4 depthwise stride-2 branches
    #      (one gather matmul + 9 tap FMAs, output already channel-concatenated)
    #      -> BatchNorm (scale folded into Wall) -> GELU
    h4 = jnp.dot(x_ref[...], w1_ref[...],
                 preferred_element_type=jnp.float32) + b1_ref[...]           # (B*Lin, C)
    taps = jnp.dot(g_ref[...], h4, preferred_element_type=jnp.float32)       # (9*M, C)
    wall = wall_ref[...]                                                     # (9, C)
    e = taps[0:m, :] * wall[0:1, :]
    for u in range(1, 9):
        e = e + taps[u * m:(u + 1) * m, :] * wall[u:u + 1, :]
    e = _gelu(e + bnshift_ref[...])                                          # (M, C)

    # ---- BA block: LayerNorm -> broadcast attention -> weighted residual add
    xn = _layernorm(e, ln1g_ref[...], ln1b_ref[...])
    q = jnp.dot(xn, wq_ref[...], preferred_element_type=jnp.float32) + bq_ref[...]     # (M, 1)
    kv = jnp.dot(xn, wkv_ref[...], preferred_element_type=jnp.float32) + bkv_ref[...]  # (M, 2C)
    k = kv[:, 0:c]
    v = kv[:, c:2 * c]
    bsum = bsum_ref[...]                          # (M, M) block matrix: per-batch segment sum
    # softmax over L within each batch; a global shift keeps it exact and stable
    q = q - jnp.max(q, axis=0, keepdims=True)
    eq = jnp.exp(q)
    den = jnp.dot(bsum, eq, preferred_element_type=jnp.float32)              # (M, 1)
    p = eq * pl.reciprocal(den, approx=True)                                 # scores
    cv = jnp.dot(bsum, k * p, preferred_element_type=jnp.float32)            # (M, C) context
    ctx = jnp.maximum(v, 0.0) * cv
    attn = jnp.dot(ctx, wp_ref[...], preferred_element_type=jnp.float32) + bp_ref[...]
    x1 = attn + c1a_ref[...] * e                  # Add: coef[0] folded into wp/bp

    # ---- FFN block: LayerNorm -> 1x1 conv -> GELU -> 1x1 conv -> weighted residual add
    yn = _layernorm(x1, ln2g_ref[...], ln2b_ref[...])
    f = _gelu(jnp.dot(yn, wf1_ref[...], preferred_element_type=jnp.float32) + bf1_ref[...])
    f = jnp.dot(f, wf2_ref[...], preferred_element_type=jnp.float32) + bf2_ref[...]
    o_ref[...] = f + c1f_ref[...] * x1            # Add: coef[0] folded into wf2/bf2


def _head_kernel(x_ref, stm_ref, w_ref, b_ref, o_ref):
    # AdaptiveAvgPool1d(1) (reduce first, via constant mean matrix) + Linear.
    mean = jnp.dot(stm_ref[...], x_ref[...], preferred_element_type=jnp.float32)  # (B, C)
    o_ref[...] = jnp.dot(mean, w_ref[...], preferred_element_type=jnp.float32) + b_ref[...]


# ----------------------------------------------------------------------------
# Trace-time constant matrices (numpy -> baked constants under jit)
# ----------------------------------------------------------------------------
@functools.lru_cache(maxsize=None)
def _dw_gather_matrix(batch, lin):
    # Rows ordered u-major / batch / position: taps[u*M + b*Lo + j] = h[b, 2j + u - 4]
    # (zero row when out of range == zero padding).  u=0..8 covers all 4 branch
    # kernels (K = 3,5,7,9 with pad = 1..4) after re-indexing t -> u = t + 3 - i.
    lo = lin // 2
    m = batch * lo
    g = np.zeros((9 * m, batch * lin), dtype=np.float32)
    for u in range(9):
        for b in range(batch):
            for j in range(lo):
                s = 2 * j + u - 4
                if 0 <= s < lin:
                    g[u * m + b * lo + j, b * lin + s] = 1.0
    return g


@functools.lru_cache(maxsize=None)
def _batch_sum_matrix(batch, lo):
    m = batch * lo
    s = np.zeros((m, m), dtype=np.float32)
    for b in range(batch):
        s[b * lo:(b + 1) * lo, b * lo:(b + 1) * lo] = 1.0
    return s


@functools.lru_cache(maxsize=None)
def _batch_mean_matrix(batch, lo):
    m = batch * lo
    s = np.zeros((batch, m), dtype=np.float32)
    for b in range(batch):
        s[b, b * lo:(b + 1) * lo] = 1.0 / lo
    return s


# ----------------------------------------------------------------------------
# Forward (glue): 5 pallas_calls per forward
# ----------------------------------------------------------------------------
def liconvformer_forward(x, prep):
    batch, length = x.shape
    assert length % 4 == 0, "input length must be divisible by 4"
    x = x.astype(jnp.float32)

    # in_layer: AvgPool1d(2,2) + Conv1d(1, dim, 15, stride=2, pad=7) + BN + GELU
    lin0 = length // 2
    lo0 = (lin0 + 2 * 7 - 15) // 2 + 1
    pooled = x.reshape(batch, lin0, 2).mean(axis=-1)                   # (B, L/2)
    xp = jnp.pad(pooled, ((0, 0), (7, 7)))
    taps = jnp.stack([xp[:, t:t + 2 * lo0:2] for t in range(15)], axis=-1)  # (B, Lo, 15)
    xt = taps.reshape(batch * lo0, 15)

    w_in, shift_in = prep["in_layer"]
    h = pl.pallas_call(
        _in_layer_kernel,
        out_shape=jax.ShapeDtypeStruct((batch * lo0, w_in.shape[1]), jnp.float32),
    )(xt, w_in, shift_in)

    lcur = lo0
    for lp in prep["lfels"]:
        assert lcur % 2 == 0
        lo = lcur // 2
        m = batch * lo
        c = lp["wall"].shape[1]
        g = jnp.asarray(_dw_gather_matrix(batch, lcur))
        bsum = jnp.asarray(_batch_sum_matrix(batch, lo))
        h = pl.pallas_call(
            _lfel_kernel,
            out_shape=jax.ShapeDtypeStruct((m, c), jnp.float32),
        )(h, lp["w1"], lp["b1"], g, lp["wall"], lp["bnshift"],
          lp["ln1g"], lp["ln1b"],
          lp["wq"], lp["bq"], lp["wkv"], lp["bkv"], bsum,
          lp["wp"], lp["bp"], lp["c1a"],
          lp["ln2g"], lp["ln2b"],
          lp["wf1"], lp["bf1"], lp["wf2"], lp["bf2"], lp["c1f"])
        lcur = lo

    # AdaptiveAvgPool1d(1) + squeeze + Linear
    w_out, b_out = prep["head"]
    stm = jnp.asarray(_batch_mean_matrix(batch, lcur))
    return pl.pallas_call(
        _head_kernel,
        out_shape=jax.ShapeDtypeStruct((batch, w_out.shape[1]), jnp.float32),
    )(h, stm, w_out, b_out)


# ----------------------------------------------------------------------------
# Parameter preparation: fold BN / Add coefficients, transpose for (tokens, C)
# ----------------------------------------------------------------------------
def _bn_fold(gamma, beta, mean, var):
    scale = gamma / jnp.sqrt(var + BN_EPS)
    shift = beta - mean * scale
    return scale, shift


def _add_coefs(w):
    wr = jnp.maximum(w, 0.0)
    coef = wr / (jnp.sum(wr) + ADD_EPS)
    return coef[0], coef[1]


def prepare_params(params):
    prep = {}

    # in_layer: fold BN scale into conv weight columns
    w = params["in_layer"]["w"].reshape(-1, 15).T.astype(jnp.float32)       # (15, dim)
    scale, shift = _bn_fold(*params["in_layer"]["bn"])
    prep["in_layer"] = (w * scale[None, :], shift.reshape(1, -1))

    lfels = []
    for p in params["lfels"]:
        dh, _ = p["conv1_w"].shape
        d_out = 4 * dh

        # conv1 weight tiled 4x along output channels so each branch block sees h
        w1t = p["conv1_w"].T
        w1 = jnp.concatenate([w1t] * 4, axis=1)                              # (d_in, 4*dh)
        b1 = jnp.tile(p["conv1_b"], 4).reshape(1, d_out)

        # depthwise weights packed into a (9, d_out) tap table, BN scale folded
        e_scale, e_shift = _bn_fold(*p["embed_bn"])
        blocks = []
        for i, wi in enumerate(p["sconv_w"]):                                # (dh, 2i+3)
            blk = jnp.zeros((9, dh), jnp.float32)
            blk = blk.at[3 - i:6 + i, :].set(
                wi.T * e_scale[i * dh:(i + 1) * dh][None, :])
            blocks.append(blk)
        wall = jnp.concatenate(blocks, axis=1)                               # (9, d_out)

        a = p["attn"]
        c0a, c1a = _add_coefs(p["add1_w"])
        c0f, c1f = _add_coefs(p["add2_w"])
        lfels.append(dict(
            w1=w1, b1=b1, wall=wall, bnshift=e_shift.reshape(1, d_out),
            ln1g=p["ln1_g"].reshape(1, d_out), ln1b=p["ln1_b"].reshape(1, d_out),
            wq=a["wq"].reshape(d_out, 1), bq=a["bq"].reshape(1, 1),
            wkv=jnp.concatenate([a["wk"].T, a["wv"].T], axis=1),             # (d_out, 2*d_out)
            bkv=jnp.concatenate([a["bk"], a["bv"]]).reshape(1, 2 * d_out),
            wp=a["wp"].T * c0a, bp=(a["bp"] * c0a).reshape(1, d_out),
            c1a=jnp.reshape(c1a, (1, 1)).astype(jnp.float32),
            ln2g=p["ln2_g"].reshape(1, d_out), ln2b=p["ln2_b"].reshape(1, d_out),
            wf1=p["ffn_w1"].T, bf1=p["ffn_b1"].reshape(1, -1),
            wf2=p["ffn_w2"].T * c0f, bf2=(p["ffn_b2"] * c0f).reshape(1, d_out),
            c1f=jnp.reshape(c1f, (1, 1)).astype(jnp.float32),
        ))
    prep["lfels"] = lfels
    prep["head"] = (params["out_w"].T.astype(jnp.float32),
                    params["out_b"].reshape(1, -1).astype(jnp.float32))
    return prep


# ----------------------------------------------------------------------------
# Deterministic parameter initialization (shapes per the module __init__)
# ----------------------------------------------------------------------------
def init_params(key, out_channel=5, dim=16):
    keys = iter(jax.random.split(key, 256))

    def nrm(shape, std=0.05):
        return (std * jax.random.normal(next(keys), shape)).astype(jnp.float32)

    def bn(c):
        gamma = (1.0 + 0.1 * jax.random.normal(next(keys), (c,))).astype(jnp.float32)
        beta = nrm((c,))
        mean = nrm((c,))
        var = (1.0 + 0.2 * jax.random.uniform(next(keys), (c,))).astype(jnp.float32)
        return (gamma, beta, mean, var)

    params = {"in_layer": {"w": nrm((dim, 1, 15)), "bn": bn(dim)}}
    lfels = []
    d_in = dim
    for stage in range(3):
        d_out = dim * (2 ** (stage + 1))
        dh = d_out // 4
        ffn = d_out // 4
        lp = {
            "conv1_w": nrm((dh, d_in)),
            "conv1_b": nrm((dh,)),
            "sconv_w": [nrm((dh, 2 * i + 3)) for i in range(4)],   # k = 2i + 2*stride - 1
            "embed_bn": bn(d_out),
            "ln1_g": (1.0 + 0.1 * jax.random.normal(next(keys), (d_out,))).astype(jnp.float32),
            "ln1_b": nrm((d_out,)),
            "attn": {
                "wq": nrm((1, d_out)), "bq": nrm((1,)),
                "wk": nrm((d_out, d_out)), "bk": nrm((d_out,)),
                "wv": nrm((d_out, d_out)), "bv": nrm((d_out,)),
                "wp": nrm((d_out, d_out)), "bp": nrm((d_out,)),
            },
            "add1_w": jnp.ones((2,), jnp.float32),   # Add.__init__: torch.ones(2)
            "ln2_g": (1.0 + 0.1 * jax.random.normal(next(keys), (d_out,))).astype(jnp.float32),
            "ln2_b": nrm((d_out,)),
            "ffn_w1": nrm((ffn, d_out)), "ffn_b1": nrm((ffn,)),
            "ffn_w2": nrm((d_out, ffn)), "ffn_b2": nrm((d_out,)),
            "add2_w": jnp.ones((2,), jnp.float32),
        }
        lfels.append(lp)
        d_in = d_out
    params["lfels"] = lfels
    params["out_w"] = nrm((out_channel, 8 * dim))
    params["out_b"] = nrm((out_channel,))
    return params


if __name__ == "__main__":
    key = jax.random.PRNGKey(0)
    pkey, xkey = jax.random.split(key)

    B, L = 2, 256             # input signal: (batch, length)
    out_channel, dim = 5, 16  # Liconvformer(in_channel=1, out_channel=5, dim=16)

    params = init_params(pkey, out_channel=out_channel, dim=dim)
    prep = prepare_params(params)
    x = jax.random.normal(xkey, (B, L), dtype=jnp.float32)

    fwd = jax.jit(liconvformer_forward)
    out = jax.block_until_ready(fwd(x, prep))
    assert out.shape == (B, out_channel), out.shape
    assert bool(jnp.all(jnp.isfinite(out)))
    print("KERNEL_OK")
</pallas_src>

<mosaic_0001>
module attributes {stable_mosaic.version = 11 : i64} {
  func.func @_in_layer_kernel(%arg0: memref<128x15xf32, #tpu.memory_space<vmem>>, %arg1: memref<15x16xf32, #tpu.memory_space<vmem>>, %arg2: memref<1x16xf32, #tpu.memory_space<vmem>>, %arg3: memref<128x16xf32, #tpu.memory_space<vmem>>) attributes {dimension_semantics = [], scalar_prefetch = 0 : i64, scratch_operands = 0 : i64, tpu.core_type = #tpu.core_type<tc>} {
    %c0 = arith.constant 0 : index
    %c0_0 = arith.constant 0 : index
    %0 = vector.load %arg0[%c0, %c0_0] : memref<128x15xf32, #tpu.memory_space<vmem>>, vector<128x15xf32>
    %c0_1 = arith.constant 0 : index
    %c0_2 = arith.constant 0 : index
    %1 = vector.load %arg1[%c0_1, %c0_2] : memref<15x16xf32, #tpu.memory_space<vmem>>, vector<15x16xf32>
    %cst = arith.constant dense<0.000000e+00> : vector<128x16xf32>
    %2 = tpu.matmul %0, %1, %cst {dimension_numbers = #tpu.dot_dimension_numbers<[1], [0], [0], [1], [0, 0, 1, 1], [], []>} : vector<128x15xf32>, vector<15x16xf32>, vector<128x16xf32> -> vector<128x16xf32>
    %c0_3 = arith.constant 0 : index
    %c0_4 = arith.constant 0 : index
    %3 = vector.load %arg2[%c0_3, %c0_4] : memref<1x16xf32, #tpu.memory_space<vmem>>, vector<1x16xf32>
    %4 = vector.broadcast %3 : vector<1x16xf32> to vector<128x16xf32>
    %5 = arith.addf %2, %4 : vector<128x16xf32>
    %cst_5 = arith.constant 5.000000e-01 : f32
    %6 = vector.broadcast %cst_5 : f32 to vector<128x16xf32>
    %7 = arith.mulf %6, %5 : vector<128x16xf32>
    %cst_6 = arith.constant 0.707106769 : f32
    %8 = vector.broadcast %cst_6 : f32 to vector<128x16xf32>
    %9 = arith.mulf %5, %8 : vector<128x16xf32>
    %cst_7 = arith.constant 0.000000e+00 : f32
    %10 = vector.broadcast %cst_7 : f32 to vector<128x16xf32>
    %11 = arith.cmpf oge, %9, %10 : vector<128x16xf32>
    %cst_8 = arith.constant 1.000000e+00 : f32
    %cst_9 = arith.constant -1.000000e+00 : f32
    %12 = vector.broadcast %cst_8 : f32 to vector<128x16xf32>
    %13 = vector.broadcast %cst_9 : f32 to vector<128x16xf32>
    %14 = arith.select %11, %12, %13 : vector<128x16xi1>, vector<128x16xf32>
    %15 = math.absf %9 : vector<128x16xf32>
    %cst_10 = arith.constant 0.327591091 : f32
    %16 = vector.broadcast %cst_10 : f32 to vector<128x16xf32>
    %17 = arith.mulf %16, %15 : vector<128x16xf32>
    %cst_11 = arith.constant 1.000000e+00 : f32
    %18 = vector.broadcast %cst_11 : f32 to vector<128x16xf32>
    %19 = arith.addf %18, %17 : vector<128x16xf32>
    %cst_12 = arith.constant 1.000000e+00 : f32
    %20 = vector.broadcast %cst_12 : f32 to vector<128x16xf32>
    %21 = arith.divf %20, %19 : vector<128x16xf32>
    %cst_13 = arith.constant 1.06140542 : f32
    %22 = vector.broadcast %cst_13 : f32 to vector<128x16xf32>
    %23 = arith.mulf %22, %21 : vector<128x16xf32>
    %cst_14 = arith.constant -1.45315206 : f32
    %24 = vector.broadcast %cst_14 : f32 to vector<128x16xf32>
    %25 = arith.addf %23, %24 : vector<128x16xf32>
    %26 = arith.mulf %25, %21 : vector<128x16xf32>
    %cst_15 = arith.constant 1.42141378 : f32
    %27 = vector.broadcast %cst_15 : f32 to vector<128x16xf32>
    %28 = arith.addf %26, %27 : vector<128x16xf32>
    %29 = arith.mulf %28, %21 : vector<128x16xf32>
    %cst_16 = arith.constant -0.284496725 : f32
    %30 = vector.broadcast %cst_16 : f32 to vector<128x16xf32>
    %31 = arith.addf %29, %30 : vector<128x16xf32>
    %32 = arith.mulf %31, %21 : vector<128x16xf32>
    %cst_17 = arith.constant 0.254829586 : f32
    %33 = vector.broadcast %cst_17 : f32 to vector<128x16xf32>
    %34 = arith.addf %32, %33 : vector<128x16xf32>
    %35 = arith.mulf %34, %21 : vector<128x16xf32>
    %cst_18 = arith.constant 0.000000e+00 : f32
    %36 = vector.broadcast %cst_18 : f32 to vector<128x16xf32>
    %37 = arith.subf %36, %15 : vector<128x16xf32>
    %38 = arith.mulf %37, %15 : vector<128x16xf32>
    %39 = math.exp %38 : vector<128x16xf32>
    %40 = arith.mulf %35, %39 : vector<128x16xf32>
    %cst_19 = arith.constant 1.000000e+00 : f32
    %41 = vector.broadcast %cst_19 : f32 to vector<128x16xf32>
    %42 = arith.subf %41, %40 : vector<128x16xf32>
    %43 = arith.mulf %14, %42 : vector<128x16xf32>
    %cst_20 = arith.constant 1.000000e+00 : f32
    %44 = vector.broadcast %cst_20 : f32 to vector<128x16xf32>
    %45 = arith.addf %44, %43 : vector<128x16xf32>
    %46 = arith.mulf %7, %45 : vector<128x16xf32>
    %c0_21 = arith.constant 0 : index
    %c0_22 = arith.constant 0 : index
    %47 = vector.load %arg3[%c0_21, %c0_22] : memref<128x16xf32, #tpu.memory_space<vmem>>, vector<128x16xf32>
    tpu.vector_store %arg3[%c0_21, %c0_22], %46 {strides = array<i32>} : memref<128x16xf32, #tpu.memory_space<vmem>>, vector<128x16xf32>,
    return
  }
}

module attributes {stable_mosaic.version = 11 : i64} {
  func.func @_lfel_kernel(%arg0: memref<128x16xf32, #tpu.memory_space<vmem>>, %arg1: memref<16x32xf32, #tpu.memory_space<vmem>>, %arg2: memref<1x32xf32, #tpu.memory_space<vmem>>, %arg3: memref<576x128xf32, #tpu.memory_space<vmem>>, %arg4: memref<9x32xf32, #tpu.memory_space<vmem>>, %arg5: memref<1x32xf32, #tpu.memory_space<vmem>>, %arg6: memref<1x32xf32, #tpu.memory_space<vmem>>, %arg7: memref<1x32xf32, #tpu.memory_space<vmem>>, %arg8: memref<32x1xf32, #tpu.memory_space<vmem>>, %arg9: memref<1x1xf32, #tpu.memory_space<vmem>>, %arg10: memref<32x64xf32, #tpu.memory_space<vmem>>, %arg11: memref<1x64xf32, #tpu.memory_space<vmem>>, %arg12: memref<64x64xf32, #tpu.memory_space<vmem>>, %arg13: memref<32x32xf32, #tpu.memory_space<vmem>>, %arg14: memref<1x32xf32, #tpu.memory_space<vmem>>, %arg15: memref<1x1xf32, #tpu.memory_space<vmem>>, %arg16: memref<1x32xf32, #tpu.memory_space<vmem>>, %arg17: memref<1x32xf32, #tpu.memory_space<vmem>>, %arg18: memref<32x8xf32, #tpu.memory_space<vmem>>, %arg19: memref<1x8xf32, #tpu.memory_space<vmem>>, %arg20: memref<8x32xf32, #tpu.memory_space<vmem>>, %arg21: memref<1x32xf32, #tpu.memory_space<vmem>>, %arg22: memref<1x1xf32, #tpu.memory_space<vmem>>, %arg23: memref<64x32xf32, #tpu.memory_space<vmem>>) attributes {dimension_semantics = [], scalar_prefetch = 0 : i64, scratch_operands = 0 : i64, tpu.core_type = #tpu.core_type<tc>} {
    %c0 = arith.constant 0 : index
    %c0_0 = arith.constant 0 : index
    %0 = vector.load %arg0[%c0, %c0_0] : memref<128x16xf32, #tpu.memory_space<vmem>>, vector<128x16xf32>
    %c0_1 = arith.constant 0 : index
    %c0_2 = arith.constant 0 : index
    %1 = vector.load %arg1[%c0_1, %c0_2] : memref<16x32xf32, #tpu.memory_space<vmem>>, vector<16x32xf32>
    %cst = arith.constant dense<0.000000e+00> : vector<128x32xf32>
    %2 = tpu.matmul %0, %1, %cst {dimension_numbers = #tpu.dot_dimension_numbers<[1], [0], [0], [1], [0, 0, 1, 1], [], []>} : vector<128x16xf32>, vector<16x32xf32>, vector<128x32xf32> -> vector<128x32xf32>
    %c0_3 = arith.constant 0 : index
    %c0_4 = arith.constant 0 : index
    %3 = vector.load %arg2[%c0_3, %c0_4] : memref<1x32xf32, #tpu.memory_space<vmem>>, vector<1x32xf32>
    %4 = vector.broadcast %3 : vector<1x32xf32> to vector<128x32xf32>
    %5 = arith.addf %2, %4 : vector<128x32xf32>
    %c0_5 = arith.constant 0 : index
    %c0_6 = arith.constant 0 : index
    %6 = vector.load %arg3[%c0_5, %c0_6] : memref<576x128xf32, #tpu.memory_space<vmem>>, vector<576x128xf32>
    %cst_7 = arith.constant dense<0.000000e+00> : vector<576x32xf32>
    %7 = tpu.matmul %6, %5, %cst_7 {dimension_numbers = #tpu.dot_dimension_numbers<[1], [0], [0], [1], [0, 0, 1, 1], [], []>} : vector<576x128xf32>, vector<128x32xf32>, vector<576x32xf32> -> vector<576x32xf32>
    %c0_8 = arith.constant 0 : index
    %c0_9 = arith.constant 0 : index
    %8 = vector.load %arg4[%c0_8, %c0_9] : memref<9x32xf32, #tpu.memory_space<vmem>>, vector<9x32xf32>
    %9 = vector.extract_strided_slice %7 {offsets = [0, 0], sizes = [64, 32], strides = [1, 1]} : vector<576x32xf32> to vector<64x32xf32>
    %10 = vector.extract_strided_slice %8 {offsets = [0, 0], sizes = [1, 32], strides = [1, 1]} : vector<9x32xf32> to vector<1x32xf32>
    %11 = vector.broadcast %10 : vector<1x32xf32> to vector<64x32xf32>
    %12 = arith.mulf %9, %11 : vector<64x32xf32>
    %13 = vector.extract_strided_slice %7 {offsets = [64, 0], sizes = [64, 32], strides = [1, 1]} : vector<576x32xf32> to vector<64x32xf32>
    %14 = vector.extract_strided_slice %8 {offsets = [1, 0], sizes = [1, 32], strides = [1, 1]} : vector<9x32xf32> to vector<1x32xf32>
    %15 = vector.broadcast %14 : vector<1x32xf32> to vector<64x32xf32>
    %16 = arith.mulf %13, %15 : vector<64x32xf32>
    %17 = arith.addf %12, %16 : vector<64x32xf32>
    %18 = vector.extract_strided_slice %7 {offsets = [128, 0], sizes = [64, 32], strides = [1, 1]} : vector<576x32xf32> to vector<64x32xf32>
    %19 = vector.extract_strided_slice %8 {offsets = [2, 0], sizes = [1, 32], strides = [1, 1]} : vector<9x32xf32> to vector<1x32xf32>
    %20 = vector.broadcast %19 : vector<1x32xf32> to vector<64x32xf32>
    %21 = arith.mulf %18, %20 : vector<64x32xf32>
    %22 = arith.addf %17, %21 : vector<64x32xf32>
    %23 = vector.extract_strided_slice %7 {offsets = [192, 0], sizes = [64, 32], strides = [1, 1]} : vector<576x32xf32> to vector<64x32xf32>
    %24 = vector.extract_strided_slice %8 {offsets = [3, 0], sizes = [1, 32], strides = [1, 1]} : vector<9x32xf32> to vector<1x32xf32>
    %25 = vector.broadcast %24 : vector<1x32xf32> to vector<64x32xf32>
    %26 = arith.mulf %23, %25 : vector<64x32xf32>
    %27 = arith.addf %22, %26 : vector<64x32xf32>
    %28 = vector.extract_strided_slice %7 {offsets = [256, 0], sizes = [64, 32], strides = [1, 1]} : vector<576x32xf32> to vector<64x32xf32>
    %29 = vector.extract_strided_slice %8 {offsets = [4, 0], sizes = [1, 32], strides = [1, 1]} : vector<9x32xf32> to vector<1x32xf32>
    %30 = vector.broadcast %29 : vector<1x32xf32> to vector<64x32xf32>
    %31 = arith.mulf %28, %30 : vector<64x32xf32>
    %32 = arith.addf %27, %31 : vector<64x32xf32>
    %33 = vector.extract_strided_slice %7 {offsets = [320, 0], sizes = [64, 32], strides = [1, 1]} : vector<576x32xf32> to vector<64x32xf32>
    %34 = vector.extract_strided_slice %8 {offsets = [5, 0], sizes = [1, 32], strides = [1, 1]} : vector<9x32xf32> to vector<1x32xf32>
    %35 = vector.broadcast %34 : vector<1x32xf32> to vector<64x32xf32>
    %36 = arith.mulf %33, %35 : vector<64x32xf32>
    %37 = arith.addf %32, %36 : vector<64x32xf32>
    %38 = vector.extract_strided_slice %7 {offsets = [384, 0], sizes = [64, 32], strides = [1, 1]} : vector<576x32xf32> to vector<64x32xf32>
    %39 = vector.extract_strided_slice %8 {offsets = [6, 0], sizes = [1, 32], strides = [1, 1]} : vector<9x32xf32> to vector<1x32xf32>
    %40 = vector.broadcast %39 : vector<1x32xf32> to vector<64x32xf32>
    %41 = arith.mulf %38, %40 : vector<64x32xf32>
    %42 = arith.addf %37, %41 : vector<64x32xf32>
    %43 = vector.extract_strided_slice %7 {offsets = [448, 0], sizes = [64, 32], strides = [1, 1]} : vector<576x32xf32> to vector<64x32xf32>
    %44 = vector.extract_strided_slice %8 {offsets = [7, 0], sizes = [1, 32], strides = [1, 1]} : vector<9x32xf32> to vector<1x32xf32>
    %45 = vector.broadcast %44 : vector<1x32xf32> to vector<64x32xf32>
    %46 = arith.mulf %43, %45 : vector<64x32xf32>
    %47 = arith.addf %42, %46 : vector<64x32xf32>
    %48 = vector.extract_strided_slice %7 {offsets = [512, 0], sizes = [64, 32], strides = [1, 1]} : vector<576x32xf32> to vector<64x32xf32>
    %49 = vector.extract_strided_slice %8 {offsets = [8, 0], sizes = [1, 32], strides = [1, 1]} : vector<9x32xf32> to vector<1x32xf32>
    %50 = vector.broadcast %49 : vector<1x32xf32> to vector<64x32xf32>
    %51 = arith.mulf %48, %50 : vector<64x32xf32>
    %52 = arith.addf %47, %51 : vector<64x32xf32>
    %c0_10 = arith.constant 0 : index
    %c0_11 = arith.constant 0 : index
    %53 = vector.load %arg5[%c0_10, %c0_11] : memref<1x32xf32, #tpu.memory_space<vmem>>, vector<1x32xf32>
    %54 = vector.broadcast %53 : vector<1x32xf32> to vector<64x32xf32>
    %55 = arith.addf %52, %54 : vector<64x32xf32>
    %cst_12 = arith.constant 5.000000e-01 : f32
    %56 = vector.broadcast %cst_12 : f32 to vector<64x32xf32>
    %57 = arith.mulf %56, %55 : vector<64x32xf32>
    %cst_13 = arith.constant 0.707106769 : f32
    %58 = vector.broadcast %cst_13 : f32 to vector<64x32xf32>
    %59 = arith.mulf %55, %58 : vector<64x32xf32>
    %cst_14 = arith.constant 0.000000e+00 : f32
    %60 = vector.broadcast %cst_14 : f32 to vector<64x32xf32>
    %61 = arith.cmpf oge, %59, %60 : vector<64x32xf32>
    %cst_15 = arith.constant 1.000000e+00 : f32
    %cst_16 = arith.constant -1.000000e+00 : f32
    %62 = vector.broadcast %cst_15 : f32 to vector<64x32xf32>
    %63 = vector.broadcast %cst_16 : f32 to vector<64x32xf32>
    %64 = arith.select %61, %62, %63 : vector<64x32xi1>, vector<64x32xf32>
    %65 = math.absf %59 : vector<64x32xf32>
    %cst_17 = arith.constant 0.327591091 : f32
    %66 = vector.broadcast %cst_17 : f32 to vector<64x32xf32>
    %67 = arith.mulf %66, %65 : vector<64x32xf32>
    %cst_18 = arith.constant 1.000000e+00 : f32
    %68 = vector.broadcast %cst_18 : f32 to vector<64x32xf32>
    %69 = arith.addf %68, %67 : vector<64x32xf32>
    %cst_19 = arith.constant 1.000000e+00 : f32
    %70 = vector.broadcast %cst_19 : f32 to vector<64x32xf32>
    %71 = arith.divf %70, %69 : vector<64x32xf32>
    %cst_20 = arith.constant 1.06140542 : f32
    %72 = vector.broadcast %cst_20 : f32 to vector<64x32xf32>
    %73 = arith.mulf %72, %71 : vector<64x32xf32>
    %cst_21 = arith.constant -1.45315206 : f32
    %74 = vector.broadcast %cst_21 : f32 to vector<64x32xf32>
    %75 = arith.addf %73, %74 : vector<64x32xf32>
    %76 = arith.mulf %75, %71 : vector<64x32xf32>
    %cst_22 = arith.constant 1.42141378 : f32
    %77 = vector.broadcast %cst_22 : f32 to vector<64x32xf32>
    %78 = arith.addf %76, %77 : vector<64x32xf32>
    %79 = arith.mulf %78, %71 : vector<64x32xf32>
    %cst_23 = arith.constant -0.284496725 : f32
    %80 = vector.broadcast %cst_23 : f32 to vector<64x32xf32>
    %81 = arith.addf %79, %80 : vector<64x32xf32>
    %82 = arith.mulf %81, %71 : vector<64x32xf32>
    %cst_24 = arith.constant 0.254829586 : f32
    %83 = vector.broadcast %cst_24 : f32 to vector<64x32xf32>
    %84 = arith.addf %82, %83 : vector<64x32xf32>
    %85 = arith.mulf %84, %71 : vector<64x32xf32>
    %cst_25 = arith.constant 0.000000e+00 : f32
    %86 = vector.broadcast %cst_25 : f32 to vector<64x32xf32>
    %87 = arith.subf %86, %65 : vector<64x32xf32>
    %88 = arith.mulf %87, %65 : vector<64x32xf32>
    %89 = math.exp %88 : vector<64x32xf32>
    %90 = arith.mulf %85, %89 : vector<64x32xf32>
    %cst_26 = arith.constant 1.000000e+00 : f32
    %91 = vector.broadcast %cst_26 : f32 to vector<64x32xf32>
    %92 = arith.subf %91, %90 : vector<64x32xf32>
    %93 = arith.mulf %64, %92 : vector<64x32xf32>
    %cst_27 = arith.constant 1.000000e+00 : f32
    %94 = vector.broadcast %cst_27 : f32 to vector<64x32xf32>
    %95 = arith.addf %94, %93 : vector<64x32xf32>
    %96 = arith.mulf %57, %95 : vector<64x32xf32>
    %c0_28 = arith.constant 0 : index
    %c0_29 = arith.constant 0 : index
    %97 = vector.load %arg6[%c0_28, %c0_29] : memref<1x32xf32, #tpu.memory_space<vmem>>, vector<1x32xf32>
    %c0_30 = arith.constant 0 : index
    %c0_31 = arith.constant 0 : index
    %98 = vector.load %arg7[%c0_30, %c0_31] : memref<1x32xf32, #tpu.memory_space<vmem>>, vector<1x32xf32>
    %cst_32 = arith.constant dense<0.000000e+00> : vector<64xf32>
    %99 = vector.multi_reduction <add>, %96, %cst_32 [1] : vector<64x32xf32> to vector<64xf32>
    %100 = vector.shape_cast %99 : vector<64xf32> to vector<64x1xf32>
    %cst_33 = arith.constant 3.200000e+01 : f32
    %101 = vector.broadcast %cst_33 : f32 to vector<64x1xf32>
    %102 = arith.divf %100, %101 : vector<64x1xf32>
    %103 = vector.broadcast %102 : vector<64x1xf32> to vector<64x32xf32>
    %104 = arith.subf %96, %103 : vector<64x32xf32>
    %105 = arith.mulf %104, %104 : vector<64x32xf32>
    %cst_34 = arith.constant dense<0.000000e+00> : vector<64xf32>
    %106 = vector.multi_reduction <add>, %105, %cst_34 [1] : vector<64x32xf32> to vector<64xf32>
    %107 = vector.shape_cast %106 : vector<64xf32> to vector<64x1xf32>
    %cst_35 = arith.constant 3.200000e+01 : f32
    %108 = vector.broadcast %cst_35 : f32 to vector<64x1xf32>
    %109 = arith.divf %107, %108 : vector<64x1xf32>
    %cst_36 = arith.constant 9.99999974E-6 : f32
    %110 = vector.broadcast %cst_36 : f32 to vector<64x1xf32>
    %111 = arith.addf %109, %110 : vector<64x1xf32>
    %112 = math.rsqrt %111 : vector<64x1xf32>
    %113 = vector.broadcast %112 : vector<64x1xf32> to vector<64x32xf32>
    %114 = arith.mulf %104, %113 : vector<64x32xf32>
    %115 = vector.broadcast %97 : vector<1x32xf32> to vector<64x32xf32>
    %116 = arith.mulf %114, %115 : vector<64x32xf32>
    %117 = vector.broadcast %98 : vector<1x32xf32> to vector<64x32xf32>
    %118 = arith.addf %116, %117 : vector<64x32xf32>
    %c0_37 = arith.constant 0 : index
    %c0_38 = arith.constant 0 : index
    %119 = vector.load %arg8[%c0_37, %c0_38] : memref<32x1xf32, #tpu.memory_space<vmem>>, vector<32x1xf32>
    %cst_39 = arith.constant dense<0.000000e+00> : vector<64x1xf32>
    %120 = tpu.matmul %118, %119, %cst_39 {dimension_numbers = #tpu.dot_dimension_numbers<[1], [0], [0], [1], [0, 0, 1, 1], [], []>} : vector<64x32xf32>, vector<32x1xf32>, vector<64x1xf32> -> vector<64x1xf32>
    %c0_40 = arith.constant 0 : index
    %c0_41 = arith.constant 0 : index
    %121 = vector.load %arg9[%c0_40, %c0_41] : memref<1x1xf32, #tpu.memory_space<vmem>>, vector<1x1xf32>
    %122 = vector.broadcast %121 : vector<1x1xf32> to vector<64x1xf32>
    %123 = arith.addf %120, %122 : vector<64x1xf32>
    %c0_42 = arith.constant 0 : index
    %c0_43 = arith.constant 0 : index
    %124 = vector.load %arg10[%c0_42, %c0_43] : memref<32x64xf32, #tpu.memory_space<vmem>>, vector<32x64xf32>
    %cst_44 = arith.constant dense<0.000000e+00> : vector<64x64xf32>
    %125 = tpu.matmul %118, %124, %cst_44 {dimension_numbers = #tpu.dot_dimension_numbers<[1], [0], [0], [1], [0, 0, 1, 1], [], []>} : vector<64x32xf32>, vector<32x64xf32>, vector<64x64xf32> -> vector<64x64xf32>
    %c0_45 = arith.constant 0 : index
    %c0_46 = arith.constant 0 : index
    %126 = vector.load %arg11[%c0_45, %c0_46] : memref<1x64xf32, #tpu.memory_space<vmem>>, vector<1x64xf32>
    %127 = vector.broadcast %126 : vector<1x64xf32> to vector<64x64xf32>
    %128 = arith.addf %125, %127 : vector<64x64xf32>
    %129 = vector.extract_strided_slice %128 {offsets = [0, 0], sizes = [64, 32], strides = [1, 1]} : vector<64x64xf32> to vector<64x32xf32>
    %130 = vector.extract_strided_slice %128 {offsets = [0, 32], sizes = [64, 32], strides = [1, 1]} : vector<64x64xf32> to vector<64x32xf32>
    %c0_47 = arith.constant 0 : index
    %c0_48 = arith.constant 0 : index
    %131 = vector.load %arg12[%c0_47, %c0_48] : memref<64x64xf32, #tpu.memory_space<vmem>>, vector<64x64xf32>
    %cst_49 = arith.constant dense<0xFF800000> : vector<1xf32>
    %132 = vector.multi_reduction <maximumf>, %123, %cst_49 [0] : vector<64x1xf32> to vector<1xf32>
    %133 = vector.shape_cast %132 : vector<1xf32> to vector<1x1xf32>
    %134 = vector.broadcast %133 : vector<1x1xf32> to vector<64x1xf32>
    %135 = arith.subf %123, %134 : vector<64x1xf32>
    %136 = math.exp %135 : vector<64x1xf32>
    %cst_50 = arith.constant dense<0.000000e+00> : vector<64x1xf32>
    %137 = tpu.matmul %131, %136, %cst_50 {dimension_numbers = #tpu.dot_dimension_numbers<[1], [0], [0], [1], [0, 0, 1, 1], [], []>} : vector<64x64xf32>, vector<64x1xf32>, vector<64x1xf32> -> vector<64x1xf32>
    %138 = tpu.reciprocal %137 {approx = true} : vector<64x1xf32> -> vector<64x1xf32>
    %139 = arith.mulf %136, %138 : vector<64x1xf32>
    %140 = vector.broadcast %139 : vector<64x1xf32> to vector<64x32xf32>
    %141 = arith.mulf %129, %140 : vector<64x32xf32>
    %cst_51 = arith.constant dense<0.000000e+00> : vector<64x32xf32>
    %142 = tpu.matmul %131, %141, %cst_51 {dimension_numbers = #tpu.dot_dimension_numbers<[1], [0], [0], [1], [0, 0, 1, 1], [], []>} : vector<64x64xf32>, vector<64x32xf32>, vector<64x32xf32> -> vector<64x32xf32>
    %cst_52 = arith.constant 0.000000e+00 : f32
    %143 = vector.broadcast %cst_52 : f32 to vector<64x32xf32>
    %144 = arith.maximumf %130, %143 : vector<64x32xf32>
    %145 = arith.mulf %144, %142 : vector<64x32xf32>
    %c0_53 = arith.constant 0 : index
    %c0_54 = arith.constant 0 : index
    %146 = vector.load %arg13[%c0_53, %c0_54] : memref<32x32xf32, #tpu.memory_space<vmem>>, vector<32x32xf32>
    %cst_55 = arith.constant dense<0.000000e+00> : vector<64x32xf32>
    %147 = tpu.matmul %145, %146, %cst_55 {dimension_numbers = #tpu.dot_dimension_numbers<[1], [0], [0], [1], [0, 0, 1, 1], [], []>} : vector<64x32xf32>, vector<32x32xf32>, vector<64x32xf32> -> vector<64x32xf32>
    %c0_56 = arith.constant 0 : index
    %c0_57 = arith.constant 0 : index
    %148 = vector.load %arg14[%c0_56, %c0_57] : memref<1x32xf32, #tpu.memory_space<vmem>>, vector<1x32xf32>
    %149 = vector.broadcast %148 : vector<1x32xf32> to vector<64x32xf32>
    %150 = arith.addf %147, %149 : vector<64x32xf32>
    %c0_58 = arith.constant 0 : index
    %c0_59 = arith.constant 0 : index
    %151 = vector.load %arg15[%c0_58, %c0_59] : memref<1x1xf32, #tpu.memory_space<vmem>>, vector<1x1xf32>
    %152 = vector.broadcast %151 : vector<1x1xf32> to vector<64x32xf32>
    %153 = arith.mulf %152, %96 : vector<64x32xf32>
    %154 = arith.addf %150, %153 : vector<64x32xf32>
    %c0_60 = arith.constant 0 : index
    %c0_61 = arith.constant 0 : index
    %155 = vector.load %arg16[%c0_60, %c0_61] : memref<1x32xf32, #tpu.memory_space<vmem>>, vector<1x32xf32>
    %c0_62 = arith.constant 0 : index
    %c0_63 = arith.constant 0 : index
    %156 = vector.load %arg17[%c0_62, %c0_63] : memref<1x32xf32, #tpu.memory_space<vmem>>, vector<1x32xf32>
    %cst_64 = arith.constant dense<0.000000e+00> : vector<64xf32>
    %157 = vector.multi_reduction <add>, %154, %cst_64 [1] : vector<64x32xf32> to vector<64xf32>
    %158 = vector.shape_cast %157 : vector<64xf32> to vector<64x1xf32>
    %cst_65 = arith.constant 3.200000e+01 : f32
    %159 = vector.broadcast %cst_65 : f32 to vector<64x1xf32>
    %160 = arith.divf %158, %159 : vector<64x1xf32>
    %161 = vector.broadcast %160 : vector<64x1xf32> to vector<64x32xf32>
    %162 = arith.subf %154, %161 : vector<64x32xf32>
    %163 = arith.mulf %162, %162 : vector<64x32xf32>
    %cst_66 = arith.constant dense<0.000000e+00> : vector<64xf32>
    %164 = vector.multi_reduction <add>, %163, %cst_66 [1] : vector<64x32xf32> to vector<64xf32>
    %165 = vector.shape_cast %164 : vector<64xf32> to vector<64x1xf32>
    %cst_67 = arith.constant 3.200000e+01 : f32
    %166 = vector.broadcast %cst_67 : f32 to vector<64x1xf32>
    %167 = arith.divf %165, %166 : vector<64x1xf32>
    %cst_68 = arith.constant 9.99999974E-6 : f32
    %168 = vector.broadcast %cst_68 : f32 to vector<64x1xf32>
    %169 = arith.addf %167, %168 : vector<64x1xf32>
    %170 = math.rsqrt %169 : vector<64x1xf32>
    %171 = vector.broadcast %170 : vector<64x1xf32> to vector<64x32xf32>
    %172 = arith.mulf %162, %171 : vector<64x32xf32>
    %173 = vector.broadcast %155 : vector<1x32xf32> to vector<64x32xf32>
    %174 = arith.mulf %172, %173 : vector<64x32xf32>
    %175 = vector.broadcast %156 : vector<1x32xf32> to vector<64x32xf32>
    %176 = arith.addf %174, %175 : vector<64x32xf32>
    %c0_69 = arith.constant 0 : index
    %c0_70 = arith.constant 0 : index
    %177 = vector.load %arg18[%c0_69, %c0_70] : memref<32x8xf32, #tpu.memory_space<vmem>>, vector<32x8xf32>
    %cst_71 = arith.constant dense<0.000000e+00> : vector<64x8xf32>
    %178 = tpu.matmul %176, %177, %cst_71 {dimension_numbers = #tpu.dot_dimension_numbers<[1], [0], [0], [1], [0, 0, 1, 1], [], []>} : vector<64x32xf32>, vector<32x8xf32>, vector<64x8xf32> -> vector<64x8xf32>
    %c0_72 = arith.constant 0 : index
    %c0_73 = arith.constant 0 : index
    %179 = vector.load %arg19[%c0_72, %c0_73] : memref<1x8xf32, #tpu.memory_space<vmem>>, vector<1x8xf32>
    %180 = vector.broadcast %179 : vector<1x8xf32> to vector<64x8xf32>
    %181 = arith.addf %178, %180 : vector<64x8xf32>
    %cst_74 = arith.constant 5.000000e-01 : f32
    %182 = vector.broadcast %cst_74 : f32 to vector<64x8xf32>
    %183 = arith.mulf %182, %181 : vector<64x8xf32>
    %cst_75 = arith.constant 0.707106769 : f32
    %184 = vector.broadcast %cst_75 : f32 to vector<64x8xf32>
    %185 = arith.mulf %181, %184 : vector<64x8xf32>
    %cst_76 = arith.constant 0.000000e+00 : f32
    %186 = vector.broadcast %cst_76 : f32 to vector<64x8xf32>
    %187 = arith.cmpf oge, %185, %186 : vector<64x8xf32>
    %cst_77 = arith.constant 1.000000e+00 : f32
    %cst_78 = arith.constant -1.000000e+00 : f32
    %188 = vector.broadcast %cst_77 : f32 to vector<64x8xf32>
    %189 = vector.broadcast %cst_78 : f32 to vector<64x8xf32>
    %190 = arith.select %187, %188, %189 : vector<64x8xi1>, vector<64x8xf32>
    %191 = math.absf %185 : vector<64x8xf32>
    %cst_79 = arith.constant 0.327591091 : f32
    %192 = vector.broadcast %cst_79 : f32 to vector<64x8xf32>
    %193 = arith.mulf %192, %191 : vector<64x8xf32>
    %cst_80 = arith.constant 1.000000e+00 : f32
    %194 = vector.broadcast %cst_80 : f32 to vector<64x8xf32>
    %195 = arith.addf %194, %193 : vector<64x8xf32>
    %cst_81 = arith.constant 1.000000e+00 : f32
    %196 = vector.broadcast %cst_81 : f32 to vector<64x8xf32>
    %197 = arith.divf %196, %195 : vector<64x8xf32>
    %cst_82 = arith.constant 1.06140542 : f32
    %198 = vector.broadcast %cst_82 : f32 to vector<64x8xf32>
    %199 = arith.mulf %198, %197 : vector<64x8xf32>
    %cst_83 = arith.constant -1.45315206 : f32
    %200 = vector.broadcast %cst_83 : f32 to vector<64x8xf32>
    %201 = arith.addf %199, %200 : vector<64x8xf32>
    %202 = arith.mulf %201, %197 : vector<64x8xf32>
    %cst_84 = arith.constant 1.42141378 : f32
    %203 = vector.broadcast %cst_84 : f32 to vector<64x8xf32>
    %204 = arith.addf %202, %203 : vector<64x8xf32>
    %205 = arith.mulf %204, %197 : vector<64x8xf32>
    %cst_85 = arith.constant -0.284496725 : f32
    %206 = vector.broadcast %cst_85 : f32 to vector<64x8xf32>
    %207 = arith.addf %205, %206 : vector<64x8xf32>
    %208 = arith.mulf %207, %197 : vector<64x8xf32>
    %cst_86 = arith.constant 0.254829586 : f32
    %209 = vector.broadcast %cst_86 : f32 to vector<64x8xf32>
    %210 = arith.addf %208, %209 : vector<64x8xf32>
    %211 = arith.mulf %210, %197 : vector<64x8xf32>
    %cst_87 = arith.constant 0.000000e+00 : f32
    %212 = vector.broadcast %cst_87 : f32 to vector<64x8xf32>
    %213 = arith.subf %212, %191 : vector<64x8xf32>
    %214 = arith.mulf %213, %191 : vector<64x8xf32>
    %215 = math.exp %214 : vector<64x8xf32>
    %216 = arith.mulf %211, %215 : vector<64x8xf32>
    %cst_88 = arith.constant 1.000000e+00 : f32
    %217 = vector.broadcast %cst_88 : f32 to vector<64x8xf32>
    %218 = arith.subf %217, %216 : vector<64x8xf32>
    %219 = arith.mulf %190, %218 : vector<64x8xf32>
    %cst_89 = arith.constant 1.000000e+00 : f32
    %220 = vector.broadcast %cst_89 : f32 to vector<64x8xf32>
    %221 = arith.addf %220, %219 : vector<64x8xf32>
    %222 = arith.mulf %183, %221 : vector<64x8xf32>
    %c0_90 = arith.constant 0 : index
    %c0_91 = arith.constant 0 : index
    %223 = vector.load %arg20[%c0_90, %c0_91] : memref<8x32xf32, #tpu.memory_space<vmem>>, vector<8x32xf32>
    %cst_92 = arith.constant dense<0.000000e+00> : vector<64x32xf32>
    %224 = tpu.matmul %222, %223, %cst_92 {dimension_numbers = #tpu.dot_dimension_numbers<[1], [0], [0], [1], [0, 0, 1, 1], [], []>} : vector<64x8xf32>, vector<8x32xf32>, vector<64x32xf32> -> vector<64x32xf32>
    %c0_93 = arith.constant 0 : index
    %c0_94 = arith.constant 0 : index
    %225 = vector.load %arg21[%c0_93, %c0_94] : memref<1x32xf32, #tpu.memory_space<vmem>>, vector<1x32xf32>
    %226 = vector.broadcast %225 : vector<1x32xf32> to vector<64x32xf32>
    %227 = arith.addf %224, %226 : vector<64x32xf32>
    %c0_95 = arith.constant 0 : index
    %c0_96 = arith.constant 0 : index
    %228 = vector.load %arg22[%c0_95, %c0_96] : memref<1x1xf32, #tpu.memory_space<vmem>>, vector<1x1xf32>
    %229 = vector.broadcast %228 : vector<1x1xf32> to vector<64x32xf32>
    %230 = arith.mulf %229, %154 : vector<64x32xf32>
    %231 = arith.addf %227, %230 : vector<64x32xf32>
    %c0_97 = arith.constant 0 : index
    %c0_98 = arith.constant 0 : index
    %232 = vector.load %arg23[%c0_97, %c0_98] : memref<64x32xf32, #tpu.memory_space<vmem>>, vector<64x32xf32>
    tpu.vector_store %arg23[%c0_97, %c0_98], %231 {strides = array<i32>} : memref<64x32xf32, #tpu.memory_space<vmem>>, vector<64x32xf32>,
    return
  }
}

module attributes {stable_mosaic.version = 11 : i64} {
  func.func @_lfel_kernel(%arg0: memref<64x32xf32, #tpu.memory_space<vmem>>, %arg1: memref<32x64xf32, #tpu.memory_space<vmem>>, %arg2: memref<1x64xf32, #tpu.memory_space<vmem>>, %arg3: memref<288x64xf32, #tpu.memory_space<vmem>>, %arg4: memref<9x64xf32, #tpu.memory_space<vmem>>, %arg5: memref<1x64xf32, #tpu.memory_space<vmem>>, %arg6: memref<1x64xf32, #tpu.memory_space<vmem>>, %arg7: memref<1x64xf32, #tpu.memory_space<vmem>>, %arg8: memref<64x1xf32, #tpu.memory_space<vmem>>, %arg9: memref<1x1xf32, #tpu.memory_space<vmem>>, %arg10: memref<64x128xf32, #tpu.memory_space<vmem>>, %arg11: memref<1x128xf32, #tpu.memory_space<vmem>>, %arg12: memref<32x32xf32, #tpu.memory_space<vmem>>, %arg13: memref<64x64xf32, #tpu.memory_space<vmem>>, %arg14: memref<1x64xf32, #tpu.memory_space<vmem>>, %arg15: memref<1x1xf32, #tpu.memory_space<vmem>>, %arg16: memref<1x64xf32, #tpu.memory_space<vmem>>, %arg17: memref<1x64xf32, #tpu.memory_space<vmem>>, %arg18: memref<64x16xf32, #tpu.memory_space<vmem>>, %arg19: memref<1x16xf32, #tpu.memory_space<vmem>>, %arg20: memref<16x64xf32, #tpu.memory_space<vmem>>, %arg21: memref<1x64xf32, #tpu.memory_space<vmem>>, %arg22: memref<1x1xf32, #tpu.memory_space<vmem>>, %arg23: memref<32x64xf32, #tpu.memory_space<vmem>>) attributes {dimension_semantics = [], scalar_prefetch = 0 : i64, scratch_operands = 0 : i64, tpu.core_type = #tpu.core_type<tc>} {
    %c0 = arith.constant 0 : index
    %c0_0 = arith.constant 0 : index
    %0 = vector.load %arg0[%c0, %c0_0] : memref<64x32xf32, #tpu.memory_space<vmem>>, vector<64x32xf32>
    %c0_1 = arith.constant 0 : index
    %c0_2 = arith.constant 0 : index
    %1 = vector.load %arg1[%c0_1, %c0_2] : memref<32x64xf32, #tpu.memory_space<vmem>>, vector<32x64xf32>
    %cst = arith.constant dense<0.000000e+00> : vector<64x64xf32>
    %2 = tpu.matmul %0, %1, %cst {dimension_numbers = #tpu.dot_dimension_numbers<[1], [0], [0], [1], [0, 0, 1, 1], [], []>} : vector<64x32xf32>, vector<32x64xf32>, vector<64x64xf32> -> vector<64x64xf32>
    %c0_3 = arith.constant 0 : index
    %c0_4 = arith.constant 0 : index
    %3 = vector.load %arg2[%c0_3, %c0_4] : memref<1x64xf32, #tpu.memory_space<vmem>>, vector<1x64xf32>
    %4 = vector.broadcast %3 : vector<1x64xf32> to vector<64x64xf32>
    %5 = arith.addf %2, %4 : vector<64x64xf32>
    %c0_5 = arith.constant 0 : index
    %c0_6 = arith.constant 0 : index
    %6 = vector.load %arg3[%c0_5, %c0_6] : memref<288x64xf32, #tpu.memory_space<vmem>>, vector<288x64xf32>
    %cst_7 = arith.constant dense<0.000000e+00> : vector<288x64xf32>
    %7 = tpu.matmul %6, %5, %cst_7 {dimension_numbers = #tpu.dot_dimension_numbers<[1], [0], [0], [1], [0, 0, 1, 1], [], []>} : vector<288x64xf32>, vector<64x64xf32>, vector<288x64xf32> -> vector<288x64xf32>
    %c0_8 = arith.constant 0 : index
    %c0_9 = arith.constant 0 : index
    %8 = vector.load %arg4[%c0_8, %c0_9] : memref<9x64xf32, #tpu.memory_space<vmem>>, vector<9x64xf32>
    %9 = vector.extract_strided_slice %7 {offsets = [0, 0], sizes = [32, 64], strides = [1, 1]} : vector<288x64xf32> to vector<32x64xf32>
    %10 = vector.extract_strided_slice %8 {offsets = [0, 0], sizes = [1, 64], strides = [1, 1]} : vector<9x64xf32> to vector<1x64xf32>
    %11 = vector.broadcast %10 : vector<1x64xf32> to vector<32x64xf32>
    %12 = arith.mulf %9, %11 : vector<32x64xf32>
    %13 = vector.extract_strided_slice %7 {offsets = [32, 0], sizes = [32, 64], strides = [1, 1]} : vector<288x64xf32> to vector<32x64xf32>
    %14 = vector.extract_strided_slice %8 {offsets = [1, 0], sizes = [1, 64], strides = [1, 1]} : vector<9x64xf32> to vector<1x64xf32>
    %15 = vector.broadcast %14 : vector<1x64xf32> to vector<32x64xf32>
    %16 = arith.mulf %13, %15 : vector<32x64xf32>
    %17 = arith.addf %12, %16 : vector<32x64xf32>
    %18 = vector.extract_strided_slice %7 {offsets = [64, 0], sizes = [32, 64], strides = [1, 1]} : vector<288x64xf32> to vector<32x64xf32>
    %19 = vector.extract_strided_slice %8 {offsets = [2, 0], sizes = [1, 64], strides = [1, 1]} : vector<9x64xf32> to vector<1x64xf32>
    %20 = vector.broadcast %19 : vector<1x64xf32> to vector<32x64xf32>
    %21 = arith.mulf %18, %20 : vector<32x64xf32>
    %22 = arith.addf %17, %21 : vector<32x64xf32>
    %23 = vector.extract_strided_slice %7 {offsets = [96, 0], sizes = [32, 64], strides = [1, 1]} : vector<288x64xf32> to vector<32x64xf32>
    %24 = vector.extract_strided_slice %8 {offsets = [3, 0], sizes = [1, 64], strides = [1, 1]} : vector<9x64xf32> to vector<1x64xf32>
    %25 = vector.broadcast %24 : vector<1x64xf32> to vector<32x64xf32>
    %26 = arith.mulf %23, %25 : vector<32x64xf32>
    %27 = arith.addf %22, %26 : vector<32x64xf32>
    %28 = vector.extract_strided_slice %7 {offsets = [128, 0], sizes = [32, 64], strides = [1, 1]} : vector<288x64xf32> to vector<32x64xf32>
    %29 = vector.extract_strided_slice %8 {offsets = [4, 0], sizes = [1, 64], strides = [1, 1]} : vector<9x64xf32> to vector<1x64xf32>
    %30 = vector.broadcast %29 : vector<1x64xf32> to vector<32x64xf32>
    %31 = arith.mulf %28, %30 : vector<32x64xf32>
    %32 = arith.addf %27, %31 : vector<32x64xf32>
    %33 = vector.extract_strided_slice %7 {offsets = [160, 0], sizes = [32, 64], strides = [1, 1]} : vector<288x64xf32> to vector<32x64xf32>
    %34 = vector.extract_strided_slice %8 {offsets = [5, 0], sizes = [1, 64], strides = [1, 1]} : vector<9x64xf32> to vector<1x64xf32>
    %35 = vector.broadcast %34 : vector<1x64xf32> to vector<32x64xf32>
    %36 = arith.mulf %33, %35 : vector<32x64xf32>
    %37 = arith.addf %32, %36 : vector<32x64xf32>
    %38 = vector.extract_strided_slice %7 {offsets = [192, 0], sizes = [32, 64], strides = [1, 1]} : vector<288x64xf32> to vector<32x64xf32>
    %39 = vector.extract_strided_slice %8 {offsets = [6, 0], sizes = [1, 64], strides = [1, 1]} : vector<9x64xf32> to vector<1x64xf32>
    %40 = vector.broadcast %39 : vector<1x64xf32> to vector<32x64xf32>
    %41 = arith.mulf %38, %40 : vector<32x64xf32>
    %42 = arith.addf %37, %41 : vector<32x64xf32>
    %43 = vector.extract_strided_slice %7 {offsets = [224, 0], sizes = [32, 64], strides = [1, 1]} : vector<288x64xf32> to vector<32x64xf32>
    %44 = vector.extract_strided_slice %8 {offsets = [7, 0], sizes = [1, 64], strides = [1, 1]} : vector<9x64xf32> to vector<1x64xf32>
    %45 = vector.broadcast %44 : vector<1x64xf32> to vector<32x64xf32>
    %46 = arith.mulf %43, %45 : vector<32x64xf32>
    %47 = arith.addf %42, %46 : vector<32x64xf32>
    %48 = vector.extract_strided_slice %7 {offsets = [256, 0], sizes = [32, 64], strides = [1, 1]} : vector<288x64xf32> to vector<32x64xf32>
    %49 = vector.extract_strided_slice %8 {offsets = [8, 0], sizes = [1, 64], strides = [1, 1]} : vector<9x64xf32> to vector<1x64xf32>
    %50 = vector.broadcast %49 : vector<1x64xf32> to vector<32x64xf32>
    %51 = arith.mulf %48, %50 : vector<32x64xf32>
    %52 = arith.addf %47, %51 : vector<32x64xf32>
    %c0_10 = arith.constant 0 : index
    %c0_11 = arith.constant 0 : index
    %53 = vector.load %arg5[%c0_10, %c0_11] : memref<1x64xf32, #tpu.memory_space<vmem>>, vector<1x64xf32>
    %54 = vector.broadcast %53 : vector<1x64xf32> to vector<32x64xf32>
    %55 = arith.addf %52, %54 : vector<32x64xf32>
    %cst_12 = arith.constant 5.000000e-01 : f32
    %56 = vector.broadcast %cst_12 : f32 to vector<32x64xf32>
    %57 = arith.mulf %56, %55 : vector<32x64xf32>
    %cst_13 = arith.constant 0.707106769 : f32
    %58 = vector.broadcast %cst_13 : f32 to vector<32x64xf32>
    %59 = arith.mulf %55, %58 : vector<32x64xf32>
    %cst_14 = arith.constant 0.000000e+00 : f32
    %60 = vector.broadcast %cst_14 : f32 to vector<32x64xf32>
    %61 = arith.cmpf oge, %59, %60 : vector<32x64xf32>
    %cst_15 = arith.constant 1.000000e+00 : f32
    %cst_16 = arith.constant -1.000000e+00 : f32
    %62 = vector.broadcast %cst_15 : f32 to vector<32x64xf32>
    %63 = vector.broadcast %cst_16 : f32 to vector<32x64xf32>
    %64 = arith.select %61, %62, %63 : vector<32x64xi1>, vector<32x64xf32>
    %65 = math.absf %59 : vector<32x64xf32>
    %cst_17 = arith.constant 0.327591091 : f32
    %66 = vector.broadcast %cst_17 : f32 to vector<32x64xf32>
    %67 = arith.mulf %66, %65 : vector<32x64xf32>
    %cst_18 = arith.constant 1.000000e+00 : f32
    %68 = vector.broadcast %cst_18 : f32 to vector<32x64xf32>
    %69 = arith.addf %68, %67 : vector<32x64xf32>
    %cst_19 = arith.constant 1.000000e+00 : f32
    %70 = vector.broadcast %cst_19 : f32 to vector<32x64xf32>
    %71 = arith.divf %70, %69 : vector<32x64xf32>
    %cst_20 = arith.constant 1.06140542 : f32
    %72 = vector.broadcast %cst_20 : f32 to vector<32x64xf32>
    %73 = arith.mulf %72, %71 : vector<32x64xf32>
    %cst_21 = arith.constant -1.45315206 : f32
    %74 = vector.broadcast %cst_21 : f32 to vector<32x64xf32>
    %75 = arith.addf %73, %74 : vector<32x64xf32>
    %76 = arith.mulf %75, %71 : vector<32x64xf32>
    %cst_22 = arith.constant 1.42141378 : f32
    %77 = vector.broadcast %cst_22 : f32 to vector<32x64xf32>
    %78 = arith.addf %76, %77 : vector<32x64xf32>
    %79 = arith.mulf %78, %71 : vector<32x64xf32>
    %cst_23 = arith.constant -0.284496725 : f32
    %80 = vector.broadcast %cst_23 : f32 to vector<32x64xf32>
    %81 = arith.addf %79, %80 : vector<32x64xf32>
    %82 = arith.mulf %81, %71 : vector<32x64xf32>
    %cst_24 = arith.constant 0.254829586 : f32
    %83 = vector.broadcast %cst_24 : f32 to vector<32x64xf32>
    %84 = arith.addf %82, %83 : vector<32x64xf32>
    %85 = arith.mulf %84, %71 : vector<32x64xf32>
    %cst_25 = arith.constant 0.000000e+00 : f32
    %86 = vector.broadcast %cst_25 : f32 to vector<32x64xf32>
    %87 = arith.subf %86, %65 : vector<32x64xf32>
    %88 = arith.mulf %87, %65 : vector<32x64xf32>
    %89 = math.exp %88 : vector<32x64xf32>
    %90 = arith.mulf %85, %89 : vector<32x64xf32>
    %cst_26 = arith.constant 1.000000e+00 : f32
    %91 = vector.broadcast %cst_26 : f32 to vector<32x64xf32>
    %92 = arith.subf %91, %90 : vector<32x64xf32>
    %93 = arith.mulf %64, %92 : vector<32x64xf32>
    %cst_27 = arith.constant 1.000000e+00 : f32
    %94 = vector.broadcast %cst_27 : f32 to vector<32x64xf32>
    %95 = arith.addf %94, %93 : vector<32x64xf32>
    %96 = arith.mulf %57, %95 : vector<32x64xf32>
    %c0_28 = arith.constant 0 : index
    %c0_29 = arith.constant 0 : index
    %97 = vector.load %arg6[%c0_28, %c0_29] : memref<1x64xf32, #tpu.memory_space<vmem>>, vector<1x64xf32>
    %c0_30 = arith.constant 0 : index
    %c0_31 = arith.constant 0 : index
    %98 = vector.load %arg7[%c0_30, %c0_31] : memref<1x64xf32, #tpu.memory_space<vmem>>, vector<1x64xf32>
    %cst_32 = arith.constant dense<0.000000e+00> : vector<32xf32>
    %99 = vector.multi_reduction <add>, %96, %cst_32 [1] : vector<32x64xf32> to vector<32xf32>
    %100 = vector.shape_cast %99 : vector<32xf32> to vector<32x1xf32>
    %cst_33 = arith.constant 6.400000e+01 : f32
    %101 = vector.broadcast %cst_33 : f32 to vector<32x1xf32>
    %102 = arith.divf %100, %101 : vector<32x1xf32>
    %103 = vector.broadcast %102 : vector<32x1xf32> to vector<32x64xf32>
    %104 = arith.subf %96, %103 : vector<32x64xf32>
    %105 = arith.mulf %104, %104 : vector<32x64xf32>
    %cst_34 = arith.constant dense<0.000000e+00> : vector<32xf32>
    %106 = vector.multi_reduction <add>, %105, %cst_34 [1] : vector<32x64xf32> to vector<32xf32>
    %107 = vector.shape_cast %106 : vector<32xf32> to vector<32x1xf32>
    %cst_35 = arith.constant 6.400000e+01 : f32
    %108 = vector.broadcast %cst_35 : f32 to vector<32x1xf32>
    %109 = arith.divf %107, %108 : vector<32x1xf32>
    %cst_36 = arith.constant 9.99999974E-6 : f32
    %110 = vector.broadcast %cst_36 : f32 to vector<32x1xf32>
    %111 = arith.addf %109, %110 : vector<32x1xf32>
    %112 = math.rsqrt %111 : vector<32x1xf32>
    %113 = vector.broadcast %112 : vector<32x1xf32> to vector<32x64xf32>
    %114 = arith.mulf %104, %113 : vector<32x64xf32>
    %115 = vector.broadcast %97 : vector<1x64xf32> to vector<32x64xf32>
    %116 = arith.mulf %114, %115 : vector<32x64xf32>
    %117 = vector.broadcast %98 : vector<1x64xf32> to vector<32x64xf32>
    %118 = arith.addf %116, %117 : vector<32x64xf32>
    %c0_37 = arith.constant 0 : index
    %c0_38 = arith.constant 0 : index
    %119 = vector.load %arg8[%c0_37, %c0_38] : memref<64x1xf32, #tpu.memory_space<vmem>>, vector<64x1xf32>
    %cst_39 = arith.constant dense<0.000000e+00> : vector<32x1xf32>
    %120 = tpu.matmul %118, %119, %cst_39 {dimension_numbers = #tpu.dot_dimension_numbers<[1], [0], [0], [1], [0, 0, 1, 1], [], []>} : vector<32x64xf32>, vector<64x1xf32>, vector<32x1xf32> -> vector<32x1xf32>
    %c0_40 = arith.constant 0 : index
    %c0_41 = arith.constant 0 : index
    %121 = vector.load %arg9[%c0_40, %c0_41] : memref<1x1xf32, #tpu.memory_space<vmem>>, vector<1x1xf32>
    %122 = vector.broadcast %121 : vector<1x1xf32> to vector<32x1xf32>
    %123 = arith.addf %120, %122 : vector<32x1xf32>
    %c0_42 = arith.constant 0 : index
    %c0_43 = arith.constant 0 : index
    %124 = vector.load %arg10[%c0_42, %c0_43] : memref<64x128xf32, #tpu.memory_space<vmem>>, vector<64x128xf32>
    %cst_44 = arith.constant dense<0.000000e+00> : vector<32x128xf32>
    %125 = tpu.matmul %118, %124, %cst_44 {dimension_numbers = #tpu.dot_dimension_numbers<[1], [0], [0], [1], [0, 0, 1, 1], [], []>} : vector<32x64xf32>, vector<64x128xf32>, vector<32x128xf32> -> vector<32x128xf32>
    %c0_45 = arith.constant 0 : index
    %c0_46 = arith.constant 0 : index
    %126 = vector.load %arg11[%c0_45, %c0_46] : memref<1x128xf32, #tpu.memory_space<vmem>>, vector<1x128xf32>
    %127 = vector.broadcast %126 : vector<1x128xf32> to vector<32x128xf32>
    %128 = arith.addf %125, %127 : vector<32x128xf32>
    %129 = vector.extract_strided_slice %128 {offsets = [0, 0], sizes = [32, 64], strides = [1, 1]} : vector<32x128xf32> to vector<32x64xf32>
    %130 = vector.extract_strided_slice %128 {offsets = [0, 64], sizes = [32, 64], strides = [1, 1]} : vector<32x128xf32> to vector<32x64xf32>
    %c0_47 = arith.constant 0 : index
    %c0_48 = arith.constant 0 : index
    %131 = vector.load %arg12[%c0_47, %c0_48] : memref<32x32xf32, #tpu.memory_space<vmem>>, vector<32x32xf32>
    %cst_49 = arith.constant dense<0xFF800000> : vector<1xf32>
    %132 = vector.multi_reduction <maximumf>, %123, %cst_49 [0] : vector<32x1xf32> to vector<1xf32>
    %133 = vector.shape_cast %132 : vector<1xf32> to vector<1x1xf32>
    %134 = vector.broadcast %133 : vector<1x1xf32> to vector<32x1xf32>
    %135 = arith.subf %123, %134 : vector<32x1xf32>
    %136 = math.exp %135 : vector<32x1xf32>
    %cst_50 = arith.constant dense<0.000000e+00> : vector<32x1xf32>
    %137 = tpu.matmul %131, %136, %cst_50 {dimension_numbers = #tpu.dot_dimension_numbers<[1], [0], [0], [1], [0, 0, 1, 1], [], []>} : vector<32x32xf32>, vector<32x1xf32>, vector<32x1xf32> -> vector<32x1xf32>
    %138 = tpu.reciprocal %137 {approx = true} : vector<32x1xf32> -> vector<32x1xf32>
    %139 = arith.mulf %136, %138 : vector<32x1xf32>
    %140 = vector.broadcast %139 : vector<32x1xf32> to vector<32x64xf32>
    %141 = arith.mulf %129, %140 : vector<32x64xf32>
    %cst_51 = arith.constant dense<0.000000e+00> : vector<32x64xf32>
    %142 = tpu.matmul %131, %141, %cst_51 {dimension_numbers = #tpu.dot_dimension_numbers<[1], [0], [0], [1], [0, 0, 1, 1], [], []>} : vector<32x32xf32>, vector<32x64xf32>, vector<32x64xf32> -> vector<32x64xf32>
    %cst_52 = arith.constant 0.000000e+00 : f32
    %143 = vector.broadcast %cst_52 : f32 to vector<32x64xf32>
    %144 = arith.maximumf %130, %143 : vector<32x64xf32>
    %145 = arith.mulf %144, %142 : vector<32x64xf32>
    %c0_53 = arith.constant 0 : index
    %c0_54 = arith.constant 0 : index
    %146 = vector.load %arg13[%c0_53, %c0_54] : memref<64x64xf32, #tpu.memory_space<vmem>>, vector<64x64xf32>
    %cst_55 = arith.constant dense<0.000000e+00> : vector<32x64xf32>
    %147 = tpu.matmul %145, %146, %cst_55 {dimension_numbers = #tpu.dot_dimension_numbers<[1], [0], [0], [1], [0, 0, 1, 1], [], []>} : vector<32x64xf32>, vector<64x64xf32>, vector<32x64xf32> -> vector<32x64xf32>
    %c0_56 = arith.constant 0 : index
    %c0_57 = arith.constant 0 : index
    %148 = vector.load %arg14[%c0_56, %c0_57] : memref<1x64xf32, #tpu.memory_space<vmem>>, vector<1x64xf32>
    %149 = vector.broadcast %148 : vector<1x64xf32> to vector<32x64xf32>
    %150 = arith.addf %147, %149 : vector<32x64xf32>
    %c0_58 = arith.constant 0 : index
    %c0_59 = arith.constant 0 : index
    %151 = vector.load %arg15[%c0_58, %c0_59] : memref<1x1xf32, #tpu.memory_space<vmem>>, vector<1x1xf32>
    %152 = vector.broadcast %151 : vector<1x1xf32> to vector<32x64xf32>
    %153 = arith.mulf %152, %96 : vector<32x64xf32>
    %154 = arith.addf %150, %153 : vector<32x64xf32>
    %c0_60 = arith.constant 0 : index
    %c0_61 = arith.constant 0 : index
    %155 = vector.load %arg16[%c0_60, %c0_61] : memref<1x64xf32, #tpu.memory_space<vmem>>, vector<1x64xf32>
    %c0_62 = arith.constant 0 : index
    %c0_63 = arith.constant 0 : index
    %156 = vector.load %arg17[%c0_62, %c0_63] : memref<1x64xf32, #tpu.memory_space<vmem>>, vector<1x64xf32>
    %cst_64 = arith.constant dense<0.000000e+00> : vector<32xf32>
    %157 = vector.multi_reduction <add>, %154, %cst_64 [1] : vector<32x64xf32> to vector<32xf32>
    %158 = vector.shape_cast %157 : vector<32xf32> to vector<32x1xf32>
    %cst_65 = arith.constant 6.400000e+01 : f32
    %159 = vector.broadcast %cst_65 : f32 to vector<32x1xf32>
    %160 = arith.divf %158, %159 : vector<32x1xf32>
    %161 = vector.broadcast %160 : vector<32x1xf32> to vector<32x64xf32>
    %162 = arith.subf %154, %161 : vector<32x64xf32>
    %163 = arith.mulf %162, %162 : vector<32x64xf32>
    %cst_66 = arith.constant dense<0.000000e+00> : vector<32xf32>
    %164 = vector.multi_reduction <add>, %163, %cst_66 [1] : vector<32x64xf32> to vector<32xf32>
    %165 = vector.shape_cast %164 : vector<32xf32> to vector<32x1xf32>
    %cst_67 = arith.constant 6.400000e+01 : f32
    %166 = vector.broadcast %cst_67 : f32 to vector<32x1xf32>
    %167 = arith.divf %165, %166 : vector<32x1xf32>
    %cst_68 = arith.constant 9.99999974E-6 : f32
    %168 = vector.broadcast %cst_68 : f32 to vector<32x1xf32>
    %169 = arith.addf %167, %168 : vector<32x1xf32>
    %170 = math.rsqrt %169 : vector<32x1xf32>
    %171 = vector.broadcast %170 : vector<32x1xf32> to vector<32x64xf32>
    %172 = arith.mulf %162, %171 : vector<32x64xf32>
    %173 = vector.broadcast %155 : vector<1x64xf32> to vector<32x64xf32>
    %174 = arith.mulf %172, %173 : vector<32x64xf32>
    %175 = vector.broadcast %156 : vector<1x64xf32> to vector<32x64xf32>
    %176 = arith.addf %174, %175 : vector<32x64xf32>
    %c0_69 = arith.constant 0 : index
    %c0_70 = arith.constant 0 : index
    %177 = vector.load %arg18[%c0_69, %c0_70] : memref<64x16xf32, #tpu.memory_space<vmem>>, vector<64x16xf32>
    %cst_71 = arith.constant dense<0.000000e+00> : vector<32x16xf32>
    %178 = tpu.matmul %176, %177, %cst_71 {dimension_numbers = #tpu.dot_dimension_numbers<[1], [0], [0], [1], [0, 0, 1, 1], [], []>} : vector<32x64xf32>, vector<64x16xf32>, vector<32x16xf32> -> vector<32x16xf32>
    %c0_72 = arith.constant 0 : index
    %c0_73 = arith.constant 0 : index
    %179 = vector.load %arg19[%c0_72, %c0_73] : memref<1x16xf32, #tpu.memory_space<vmem>>, vector<1x16xf32>
    %180 = vector.broadcast %179 : vector<1x16xf32> to vector<32x16xf32>
    %181 = arith.addf %178, %180 : vector<32x16xf32>
    %cst_74 = arith.constant 5.000000e-01 : f32
    %182 = vector.broadcast %cst_74 : f32 to vector<32x16xf32>
    %183 = arith.mulf %182, %181 : vector<32x16xf32>
    %cst_75 = arith.constant 0.707106769 : f32
    %184 = vector.broadcast %cst_75 : f32 to vector<32x16xf32>
    %185 = arith.mulf %181, %184 : vector<32x16xf32>
    %cst_76 = arith.constant 0.000000e+00 : f32
    %186 = vector.broadcast %cst_76 : f32 to vector<32x16xf32>
    %187 = arith.cmpf oge, %185, %186 : vector<32x16xf32>
    %cst_77 = arith.constant 1.000000e+00 : f32
    %cst_78 = arith.constant -1.000000e+00 : f32
    %188 = vector.broadcast %cst_77 : f32 to vector<32x16xf32>
    %189 = vector.broadcast %cst_78 : f32 to vector<32x16xf32>
    %190 = arith.select %187, %188, %189 : vector<32x16xi1>, vector<32x16xf32>
    %191 = math.absf %185 : vector<32x16xf32>
    %cst_79 = arith.constant 0.327591091 : f32
    %192 = vector.broadcast %cst_79 : f32 to vector<32x16xf32>
    %193 = arith.mulf %192, %191 : vector<32x16xf32>
    %cst_80 = arith.constant 1.000000e+00 : f32
    %194 = vector.broadcast %cst_80 : f32 to vector<32x16xf32>
    %195 = arith.addf %194, %193 : vector<32x16xf32>
    %cst_81 = arith.constant 1.000000e+00 : f32
    %196 = vector.broadcast %cst_81 : f32 to vector<32x16xf32>
    %197 = arith.divf %196, %195 : vector<32x16xf32>
    %cst_82 = arith.constant 1.06140542 : f32
    %198 = vector.broadcast %cst_82 : f32 to vector<32x16xf32>
    %199 = arith.mulf %198, %197 : vector<32x16xf32>
    %cst_83 = arith.constant -1.45315206 : f32
    %200 = vector.broadcast %cst_83 : f32 to vector<32x16xf32>
    %201 = arith.addf %199, %200 : vector<32x16xf32>
    %202 = arith.mulf %201, %197 : vector<32x16xf32>
    %cst_84 = arith.constant 1.42141378 : f32
    %203 = vector.broadcast %cst_84 : f32 to vector<32x16xf32>
    %204 = arith.addf %202, %203 : vector<32x16xf32>
    %205 = arith.mulf %204, %197 : vector<32x16xf32>
    %cst_85 = arith.constant -0.284496725 : f32
    %206 = vector.broadcast %cst_85 : f32 to vector<32x16xf32>
    %207 = arith.addf %205, %206 : vector<32x16xf32>
    %208 = arith.mulf %207, %197 : vector<32x16xf32>
    %cst_86 = arith.constant 0.254829586 : f32
    %209 = vector.broadcast %cst_86 : f32 to vector<32x16xf32>
    %210 = arith.addf %208, %209 : vector<32x16xf32>
    %211 = arith.mulf %210, %197 : vector<32x16xf32>
    %cst_87 = arith.constant 0.000000e+00 : f32
    %212 = vector.broadcast %cst_87 : f32 to vector<32x16xf32>
    %213 = arith.subf %212, %191 : vector<32x16xf32>
    %214 = arith.mulf %213, %191 : vector<32x16xf32>
    %215 = math.exp %214 : vector<32x16xf32>
    %216 = arith.mulf %211, %215 : vector<32x16xf32>
    %cst_88 = arith.constant 1.000000e+00 : f32
    %217 = vector.broadcast %cst_88 : f32 to vector<32x16xf32>
    %218 = arith.subf %217, %216 : vector<32x16xf32>
    %219 = arith.mulf %190, %218 : vector<32x16xf32>
    %cst_89 = arith.constant 1.000000e+00 : f32
    %220 = vector.broadcast %cst_89 : f32 to vector<32x16xf32>
    %221 = arith.addf %220, %219 : vector<32x16xf32>
    %222 = arith.mulf %183, %221 : vector<32x16xf32>
    %c0_90 = arith.constant 0 : index
    %c0_91 = arith.constant 0 : index
    %223 = vector.load %arg20[%c0_90, %c0_91] : memref<16x64xf32, #tpu.memory_space<vmem>>, vector<16x64xf32>
    %cst_92 = arith.constant dense<0.000000e+00> : vector<32x64xf32>
    %224 = tpu.matmul %222, %223, %cst_92 {dimension_numbers = #tpu.dot_dimension_numbers<[1], [0], [0], [1], [0, 0, 1, 1], [], []>} : vector<32x16xf32>, vector<16x64xf32>, vector<32x64xf32> -> vector<32x64xf32>
    %c0_93 = arith.constant 0 : index
    %c0_94 = arith.constant 0 : index
    %225 = vector.load %arg21[%c0_93, %c0_94] : memref<1x64xf32, #tpu.memory_space<vmem>>, vector<1x64xf32>
    %226 = vector.broadcast %225 : vector<1x64xf32> to vector<32x64xf32>
    %227 = arith.addf %224, %226 : vector<32x64xf32>
    %c0_95 = arith.constant 0 : index
    %c0_96 = arith.constant 0 : index
    %228 = vector.load %arg22[%c0_95, %c0_96] : memref<1x1xf32, #tpu.memory_space<vmem>>, vector<1x1xf32>
    %229 = vector.broadcast %228 : vector<1x1xf32> to vector<32x64xf32>
    %230 = arith.mulf %229, %154 : vector<32x64xf32>
    %231 = arith.addf %227, %230 : vector<32x64xf32>
    %c0_97 = arith.constant 0 : index
    %c0_98 = arith.constant 0 : index
    %232 = vector.load %arg23[%c0_97, %c0_98] : memref<32x64xf32, #tpu.memory_space<vmem>>, vector<32x64xf32>
    tpu.vector_store %arg23[%c0_97, %c0_98], %231 {strides = array<i32>} : memref<32x64xf32, #tpu.memory_space<vmem>>, vector<32x64xf32>,
    return
  }
}

module attributes {stable_mosaic.version = 11 : i64} {
  func.func @_lfel_kernel(%arg0: memref<32x64xf32, #tpu.memory_space<vmem>>, %arg1: memref<64x128xf32, #tpu.memory_space<vmem>>, %arg2: memref<1x128xf32, #tpu.memory_space<vmem>>, %arg3: memref<144x32xf32, #tpu.memory_space<vmem>>, %arg4: memref<9x128xf32, #tpu.memory_space<vmem>>, %arg5: memref<1x128xf32, #tpu.memory_space<vmem>>, %arg6: memref<1x128xf32, #tpu.memory_space<vmem>>, %arg7: memref<1x128xf32, #tpu.memory_space<vmem>>, %arg8: memref<128x1xf32, #tpu.memory_space<vmem>>, %arg9: memref<1x1xf32, #tpu.memory_space<vmem>>, %arg10: memref<128x256xf32, #tpu.memory_space<vmem>>, %arg11: memref<1x256xf32, #tpu.memory_space<vmem>>, %arg12: memref<16x16xf32, #tpu.memory_space<vmem>>, %arg13: memref<128x128xf32, #tpu.memory_space<vmem>>, %arg14: memref<1x128xf32, #tpu.memory_space<vmem>>, %arg15: memref<1x1xf32, #tpu.memory_space<vmem>>, %arg16: memref<1x128xf32, #tpu.memory_space<vmem>>, %arg17: memref<1x128xf32, #tpu.memory_space<vmem>>, %arg18: memref<128x32xf32, #tpu.memory_space<vmem>>, %arg19: memref<1x32xf32, #tpu.memory_space<vmem>>, %arg20: memref<32x128xf32, #tpu.memory_space<vmem>>, %arg21: memref<1x128xf32, #tpu.memory_space<vmem>>, %arg22: memref<1x1xf32, #tpu.memory_space<vmem>>, %arg23: memref<16x128xf32, #tpu.memory_space<vmem>>) attributes {dimension_semantics = [], scalar_prefetch = 0 : i64, scratch_operands = 0 : i64, tpu.core_type = #tpu.core_type<tc>} {
    %c0 = arith.constant 0 : index
    %c0_0 = arith.constant 0 : index
    %0 = vector.load %arg0[%c0, %c0_0] : memref<32x64xf32, #tpu.memory_space<vmem>>, vector<32x64xf32>
    %c0_1 = arith.constant 0 : index
    %c0_2 = arith.constant 0 : index
    %1 = vector.load %arg1[%c0_1, %c0_2] : memref<64x128xf32, #tpu.memory_space<vmem>>, vector<64x128xf32>
    %cst = arith.constant dense<0.000000e+00> : vector<32x128xf32>
    %2 = tpu.matmul %0, %1, %cst {dimension_numbers = #tpu.dot_dimension_numbers<[1], [0], [0], [1], [0, 0, 1, 1], [], []>} : vector<32x64xf32>, vector<64x128xf32>, vector<32x128xf32> -> vector<32x128xf32>
    %c0_3 = arith.constant 0 : index
    %c0_4 = arith.constant 0 : index
    %3 = vector.load %arg2[%c0_3, %c0_4] : memref<1x128xf32, #tpu.memory_space<vmem>>, vector<1x128xf32>
    %4 = vector.broadcast %3 : vector<1x128xf32> to vector<32x128xf32>
    %5 = arith.addf %2, %4 : vector<32x128xf32>
    %c0_5 = arith.constant 0 : index
    %c0_6 = arith.constant 0 : index
    %6 = vector.load %arg3[%c0_5, %c0_6] : memref<144x32xf32, #tpu.memory_space<vmem>>, vector<144x32xf32>
    %cst_7 = arith.constant dense<0.000000e+00> : vector<144x128xf32>
    %7 = tpu.matmul %6, %5, %cst_7 {dimension_numbers = #tpu.dot_dimension_numbers<[1], [0], [0], [1], [0, 0, 1, 1], [], []>} : vector<144x32xf32>, vector<32x128xf32>, vector<144x128xf32> -> vector<144x128xf32>
    %c0_8 = arith.constant 0 : index
    %c0_9 = arith.constant 0 : index
    %8 = vector.load %arg4[%c0_8, %c0_9] : memref<9x128xf32, #tpu.memory_space<vmem>>, vector<9x128xf32>
    %9 = vector.extract_strided_slice %7 {offsets = [0, 0], sizes = [16, 128], strides = [1, 1]} : vector<144x128xf32> to vector<16x128xf32>
    %10 = vector.extract_strided_slice %8 {offsets = [0, 0], sizes = [1, 128], strides = [1, 1]} : vector<9x128xf32> to vector<1x128xf32>
    %11 = vector.broadcast %10 : vector<1x128xf32> to vector<16x128xf32>
    %12 = arith.mulf %9, %11 : vector<16x128xf32>
    %13 = vector.extract_strided_slice %7 {offsets = [16, 0], sizes = [16, 128], strides = [1, 1]} : vector<144x128xf32> to vector<16x128xf32>
    %14 = vector.extract_strided_slice %8 {offsets = [1, 0], sizes = [1, 128], strides = [1, 1]} : vector<9x128xf32> to vector<1x128xf32>
    %15 = vector.broadcast %14 : vector<1x128xf32> to vector<16x128xf32>
    %16 = arith.mulf %13, %15 : vector<16x128xf32>
    %17 = arith.addf %12, %16 : vector<16x128xf32>
    %18 = vector.extract_strided_slice %7 {offsets = [32, 0], sizes = [16, 128], strides = [1, 1]} : vector<144x128xf32> to vector<16x128xf32>
    %19 = vector.extract_strided_slice %8 {offsets = [2, 0], sizes = [1, 128], strides = [1, 1]} : vector<9x128xf32> to vector<1x128xf32>
    %20 = vector.broadcast %19 : vector<1x128xf32> to vector<16x128xf32>
    %21 = arith.mulf %18, %20 : vector<16x128xf32>
    %22 = arith.addf %17, %21 : vector<16x128xf32>
    %23 = vector.extract_strided_slice %7 {offsets = [48, 0], sizes = [16, 128], strides = [1, 1]} : vector<144x128xf32> to vector<16x128xf32>
    %24 = vector.extract_strided_slice %8 {offsets = [3, 0], sizes = [1, 128], strides = [1, 1]} : vector<9x128xf32> to vector<1x128xf32>
    %25 = vector.broadcast %24 : vector<1x128xf32> to vector<16x128xf32>
    %26 = arith.mulf %23, %25 : vector<16x128xf32>
    %27 = arith.addf %22, %26 : vector<16x128xf32>
    %28 = vector.extract_strided_slice %7 {offsets = [64, 0], sizes = [16, 128], strides = [1, 1]} : vector<144x128xf32> to vector<16x128xf32>
    %29 = vector.extract_strided_slice %8 {offsets = [4, 0], sizes = [1, 128], strides = [1, 1]} : vector<9x128xf32> to vector<1x128xf32>
    %30 = vector.broadcast %29 : vector<1x128xf32> to vector<16x128xf32>
    %31 = arith.mulf %28, %30 : vector<16x128xf32>
    %32 = arith.addf %27, %31 : vector<16x128xf32>
    %33 = vector.extract_strided_slice %7 {offsets = [80, 0], sizes = [16, 128], strides = [1, 1]} : vector<144x128xf32> to vector<16x128xf32>
    %34 = vector.extract_strided_slice %8 {offsets = [5, 0], sizes = [1, 128], strides = [1, 1]} : vector<9x128xf32> to vector<1x128xf32>
    %35 = vector.broadcast %34 : vector<1x128xf32> to vector<16x128xf32>
    %36 = arith.mulf %33, %35 : vector<16x128xf32>
    %37 = arith.addf %32, %36 : vector<16x128xf32>
    %38 = vector.extract_strided_slice %7 {offsets = [96, 0], sizes = [16, 128], strides = [1, 1]} : vector<144x128xf32> to vector<16x128xf32>
    %39 = vector.extract_strided_slice %8 {offsets = [6, 0], sizes = [1, 128], strides = [1, 1]} : vector<9x128xf32> to vector<1x128xf32>
    %40 = vector.broadcast %39 : vector<1x128xf32> to vector<16x128xf32>
    %41 = arith.mulf %38, %40 : vector<16x128xf32>
    %42 = arith.addf %37, %41 : vector<16x128xf32>
    %43 = vector.extract_strided_slice %7 {offsets = [112, 0], sizes = [16, 128], strides = [1, 1]} : vector<144x128xf32> to vector<16x128xf32>
    %44 = vector.extract_strided_slice %8 {offsets = [7, 0], sizes = [1, 128], strides = [1, 1]} : vector<9x128xf32> to vector<1x128xf32>
    %45 = vector.broadcast %44 : vector<1x128xf32> to vector<16x128xf32>
    %46 = arith.mulf %43, %45 : vector<16x128xf32>
    %47 = arith.addf %42, %46 : vector<16x128xf32>
    %48 = vector.extract_strided_slice %7 {offsets = [128, 0], sizes = [16, 128], strides = [1, 1]} : vector<144x128xf32> to vector<16x128xf32>
    %49 = vector.extract_strided_slice %8 {offsets = [8, 0], sizes = [1, 128], strides = [1, 1]} : vector<9x128xf32> to vector<1x128xf32>
    %50 = vector.broadcast %49 : vector<1x128xf32> to vector<16x128xf32>
    %51 = arith.mulf %48, %50 : vector<16x128xf32>
    %52 = arith.addf %47, %51 : vector<16x128xf32>
    %c0_10 = arith.constant 0 : index
    %c0_11 = arith.constant 0 : index
    %53 = vector.load %arg5[%c0_10, %c0_11] : memref<1x128xf32, #tpu.memory_space<vmem>>, vector<1x128xf32>
    %54 = vector.broadcast %53 : vector<1x128xf32> to vector<16x128xf32>
    %55 = arith.addf %52, %54 : vector<16x128xf32>
    %cst_12 = arith.constant 5.000000e-01 : f32
    %56 = vector.broadcast %cst_12 : f32 to vector<16x128xf32>
    %57 = arith.mulf %56, %55 : vector<16x128xf32>
    %cst_13 = arith.constant 0.707106769 : f32
    %58 = vector.broadcast %cst_13 : f32 to vector<16x128xf32>
    %59 = arith.mulf %55, %58 : vector<16x128xf32>
    %cst_14 = arith.constant 0.000000e+00 : f32
    %60 = vector.broadcast %cst_14 : f32 to vector<16x128xf32>
    %61 = arith.cmpf oge, %59, %60 : vector<16x128xf32>
    %cst_15 = arith.constant 1.000000e+00 : f32
    %cst_16 = arith.constant -1.000000e+00 : f32
    %62 = vector.broadcast %cst_15 : f32 to vector<16x128xf32>
    %63 = vector.broadcast %cst_16 : f32 to vector<16x128xf32>
    %64 = arith.select %61, %62, %63 : vector<16x128xi1>, vector<16x128xf32>
    %65 = math.absf %59 : vector<16x128xf32>
    %cst_17 = arith.constant 0.327591091 : f32
    %66 = vector.broadcast %cst_17 : f32 to vector<16x128xf32>
    %67 = arith.mulf %66, %65 : vector<16x128xf32>
    %cst_18 = arith.constant 1.000000e+00 : f32
    %68 = vector.broadcast %cst_18 : f32 to vector<16x128xf32>
    %69 = arith.addf %68, %67 : vector<16x128xf32>
    %cst_19 = arith.constant 1.000000e+00 : f32
    %70 = vector.broadcast %cst_19 : f32 to vector<16x128xf32>
    %71 = arith.divf %70, %69 : vector<16x128xf32>
    %cst_20 = arith.constant 1.06140542 : f32
    %72 = vector.broadcast %cst_20 : f32 to vector<16x128xf32>
    %73 = arith.mulf %72, %71 : vector<16x128xf32>
    %cst_21 = arith.constant -1.45315206 : f32
    %74 = vector.broadcast %cst_21 : f32 to vector<16x128xf32>
    %75 = arith.addf %73, %74 : vector<16x128xf32>
    %76 = arith.mulf %75, %71 : vector<16x128xf32>
    %cst_22 = arith.constant 1.42141378 : f32
    %77 = vector.broadcast %cst_22 : f32 to vector<16x128xf32>
    %78 = arith.addf %76, %77 : vector<16x128xf32>
    %79 = arith.mulf %78, %71 : vector<16x128xf32>
    %cst_23 = arith.constant -0.284496725 : f32
    %80 = vector.broadcast %cst_23 : f32 to vector<16x128xf32>
    %81 = arith.addf %79, %80 : vector<16x128xf32>
    %82 = arith.mulf %81, %71 : vector<16x128xf32>
    %cst_24 = arith.constant 0.254829586 : f32
    %83 = vector.broadcast %cst_24 : f32 to vector<16x128xf32>
    %84 = arith.addf %82, %83 : vector<16x128xf32>
    %85 = arith.mulf %84, %71 : vector<16x128xf32>
    %cst_25 = arith.constant 0.000000e+00 : f32
    %86 = vector.broadcast %cst_25 : f32 to vector<16x128xf32>
    %87 = arith.subf %86, %65 : vector<16x128xf32>
    %88 = arith.mulf %87, %65 : vector<16x128xf32>
    %89 = math.exp %88 : vector<16x128xf32>
    %90 = arith.mulf %85, %89 : vector<16x128xf32>
    %cst_26 = arith.constant 1.000000e+00 : f32
    %91 = vector.broadcast %cst_26 : f32 to vector<16x128xf32>
    %92 = arith.subf %91, %90 : vector<16x128xf32>
    %93 = arith.mulf %64, %92 : vector<16x128xf32>
    %cst_27 = arith.constant 1.000000e+00 : f32
    %94 = vector.broadcast %cst_27 : f32 to vector<16x128xf32>
    %95 = arith.addf %94, %93 : vector<16x128xf32>
    %96 = arith.mulf %57, %95 : vector<16x128xf32>
    %c0_28 = arith.constant 0 : index
    %c0_29 = arith.constant 0 : index
    %97 = vector.load %arg6[%c0_28, %c0_29] : memref<1x128xf32, #tpu.memory_space<vmem>>, vector<1x128xf32>
    %c0_30 = arith.constant 0 : index
    %c0_31 = arith.constant 0 : index
    %98 = vector.load %arg7[%c0_30, %c0_31] : memref<1x128xf32, #tpu.memory_space<vmem>>, vector<1x128xf32>
    %cst_32 = arith.constant dense<0.000000e+00> : vector<16xf32>
    %99 = vector.multi_reduction <add>, %96, %cst_32 [1] : vector<16x128xf32> to vector<16xf32>
    %100 = vector.shape_cast %99 : vector<16xf32> to vector<16x1xf32>
    %cst_33 = arith.constant 1.280000e+02 : f32
    %101 = vector.broadcast %cst_33 : f32 to vector<16x1xf32>
    %102 = arith.divf %100, %101 : vector<16x1xf32>
    %103 = vector.broadcast %102 : vector<16x1xf32> to vector<16x128xf32>
    %104 = arith.subf %96, %103 : vector<16x128xf32>
    %105 = arith.mulf %104, %104 : vector<16x128xf32>
    %cst_34 = arith.constant dense<0.000000e+00> : vector<16xf32>
    %106 = vector.multi_reduction <add>, %105, %cst_34 [1] : vector<16x128xf32> to vector<16xf32>
    %107 = vector.shape_cast %106 : vector<16xf32> to vector<16x1xf32>
    %cst_35 = arith.constant 1.280000e+02 : f32
    %108 = vector.broadcast %cst_35 : f32 to vector<16x1xf32>
    %109 = arith.divf %107, %108 : vector<16x1xf32>
    %cst_36 = arith.constant 9.99999974E-6 : f32
    %110 = vector.broadcast %cst_36 : f32 to vector<16x1xf32>
    %111 = arith.addf %109, %110 : vector<16x1xf32>
    %112 = math.rsqrt %111 : vector<16x1xf32>
    %113 = vector.broadcast %112 : vector<16x1xf32> to vector<16x128xf32>
    %114 = arith.mulf %104, %113 : vector<16x128xf32>
    %115 = vector.broadcast %97 : vector<1x128xf32> to vector<16x128xf32>
    %116 = arith.mulf %114, %115 : vector<16x128xf32>
    %117 = vector.broadcast %98 : vector<1x128xf32> to vector<16x128xf32>
    %118 = arith.addf %116, %117 : vector<16x128xf32>
    %c0_37 = arith.constant 0 : index
    %c0_38 = arith.constant 0 : index
    %119 = vector.load %arg8[%c0_37, %c0_38] : memref<128x1xf32, #tpu.memory_space<vmem>>, vector<128x1xf32>
    %cst_39 = arith.constant dense<0.000000e+00> : vector<16x1xf32>
    %120 = tpu.matmul %118, %119, %cst_39 {dimension_numbers = #tpu.dot_dimension_numbers<[1], [0], [0], [1], [0, 0, 1, 1], [], []>} : vector<16x128xf32>, vector<128x1xf32>, vector<16x1xf32> -> vector<16x1xf32>
    %c0_40 = arith.constant 0 : index
    %c0_41 = arith.constant 0 : index
    %121 = vector.load %arg9[%c0_40, %c0_41] : memref<1x1xf32, #tpu.memory_space<vmem>>, vector<1x1xf32>
    %122 = vector.broadcast %121 : vector<1x1xf32> to vector<16x1xf32>
    %123 = arith.addf %120, %122 : vector<16x1xf32>
    %c0_42 = arith.constant 0 : index
    %c0_43 = arith.constant 0 : index
    %124 = vector.load %arg10[%c0_42, %c0_43] : memref<128x256xf32, #tpu.memory_space<vmem>>, vector<128x256xf32>
    %cst_44 = arith.constant dense<0.000000e+00> : vector<16x256xf32>
    %125 = tpu.matmul %118, %124, %cst_44 {dimension_numbers = #tpu.dot_dimension_numbers<[1], [0], [0], [1], [0, 0, 1, 1], [], []>} : vector<16x128xf32>, vector<128x256xf32>, vector<16x256xf32> -> vector<16x256xf32>
    %c0_45 = arith.constant 0 : index
    %c0_46 = arith.constant 0 : index
    %126 = vector.load %arg11[%c0_45, %c0_46] : memref<1x256xf32, #tpu.memory_space<vmem>>, vector<1x256xf32>
    %127 = vector.broadcast %126 : vector<1x256xf32> to vector<16x256xf32>
    %128 = arith.addf %125, %127 : vector<16x256xf32>
    %129 = vector.extract_strided_slice %128 {offsets = [0, 0], sizes = [16, 128], strides = [1, 1]} : vector<16x256xf32> to vector<16x128xf32>
    %130 = vector.extract_strided_slice %128 {offsets = [0, 128], sizes = [16, 128], strides = [1, 1]} : vector<16x256xf32> to vector<16x128xf32>
    %c0_47 = arith.constant 0 : index
    %c0_48 = arith.constant 0 : index
    %131 = vector.load %arg12[%c0_47, %c0_48] : memref<16x16xf32, #tpu.memory_space<vmem>>, vector<16x16xf32>
    %cst_49 = arith.constant dense<0xFF800000> : vector<1xf32>
    %132 = vector.multi_reduction <maximumf>, %123, %cst_49 [0] : vector<16x1xf32> to vector<1xf32>
    %133 = vector.shape_cast %132 : vector<1xf32> to vector<1x1xf32>
    %134 = vector.broadcast %133 : vector<1x1xf32> to vector<16x1xf32>
    %135 = arith.subf %123, %134 : vector<16x1xf32>
    %136 = math.exp %135 : vector<16x1xf32>
    %cst_50 = arith.constant dense<0.000000e+00> : vector<16x1xf32>
    %137 = tpu.matmul %131, %136, %cst_50 {dimension_numbers = #tpu.dot_dimension_numbers<[1], [0], [0], [1], [0, 0, 1, 1], [], []>} : vector<16x16xf32>, vector<16x1xf32>, vector<16x1xf32> -> vector<16x1xf32>
    %138 = tpu.reciprocal %137 {approx = true} : vector<16x1xf32> -> vector<16x1xf32>
    %139 = arith.mulf %136, %138 : vector<16x1xf32>
    %140 = vector.broadcast %139 : vector<16x1xf32> to vector<16x128xf32>
    %141 = arith.mulf %129, %140 : vector<16x128xf32>
    %cst_51 = arith.constant dense<0.000000e+00> : vector<16x128xf32>
    %142 = tpu.matmul %131, %141, %cst_51 {dimension_numbers = #tpu.dot_dimension_numbers<[1], [0], [0], [1], [0, 0, 1, 1], [], []>} : vector<16x16xf32>, vector<16x128xf32>, vector<16x128xf32> -> vector<16x128xf32>
    %cst_52 = arith.constant 0.000000e+00 : f32
    %143 = vector.broadcast %cst_52 : f32 to vector<16x128xf32>
    %144 = arith.maximumf %130, %143 : vector<16x128xf32>
    %145 = arith.mulf %144, %142 : vector<16x128xf32>
    %c0_53 = arith.constant 0 : index
    %c0_54 = arith.constant 0 : index
    %146 = vector.load %arg13[%c0_53, %c0_54] : memref<128x128xf32, #tpu.memory_space<vmem>>, vector<128x128xf32>
    %cst_55 = arith.constant dense<0.000000e+00> : vector<16x128xf32>
    %147 = tpu.matmul %145, %146, %cst_55 {dimension_numbers = #tpu.dot_dimension_numbers<[1], [0], [0], [1], [0, 0, 1, 1], [], []>} : vector<16x128xf32>, vector<128x128xf32>, vector<16x128xf32> -> vector<16x128xf32>
    %c0_56 = arith.constant 0 : index
    %c0_57 = arith.constant 0 : index
    %148 = vector.load %arg14[%c0_56, %c0_57] : memref<1x128xf32, #tpu.memory_space<vmem>>, vector<1x128xf32>
    %149 = vector.broadcast %148 : vector<1x128xf32> to vector<16x128xf32>
    %150 = arith.addf %147, %149 : vector<16x128xf32>
    %c0_58 = arith.constant 0 : index
    %c0_59 = arith.constant 0 : index
    %151 = vector.load %arg15[%c0_58, %c0_59] : memref<1x1xf32, #tpu.memory_space<vmem>>, vector<1x1xf32>
    %152 = vector.broadcast %151 : vector<1x1xf32> to vector<16x128xf32>
    %153 = arith.mulf %152, %96 : vector<16x128xf32>
    %154 = arith.addf %150, %153 : vector<16x128xf32>
    %c0_60 = arith.constant 0 : index
    %c0_61 = arith.constant 0 : index
    %155 = vector.load %arg16[%c0_60, %c0_61] : memref<1x128xf32, #tpu.memory_space<vmem>>, vector<1x128xf32>
    %c0_62 = arith.constant 0 : index
    %c0_63 = arith.constant 0 : index
    %156 = vector.load %arg17[%c0_62, %c0_63] : memref<1x128xf32, #tpu.memory_space<vmem>>, vector<1x128xf32>
    %cst_64 = arith.constant dense<0.000000e+00> : vector<16xf32>
    %157 = vector.multi_reduction <add>, %154, %cst_64 [1] : vector<16x128xf32> to vector<16xf32>
    %158 = vector.shape_cast %157 : vector<16xf32> to vector<16x1xf32>
    %cst_65 = arith.constant 1.280000e+02 : f32
    %159 = vector.broadcast %cst_65 : f32 to vector<16x1xf32>
    %160 = arith.divf %158, %159 : vector<16x1xf32>
    %161 = vector.broadcast %160 : vector<16x1xf32> to vector<16x128xf32>
    %162 = arith.subf %154, %161 : vector<16x128xf32>
    %163 = arith.mulf %162, %162 : vector<16x128xf32>
    %cst_66 = arith.constant dense<0.000000e+00> : vector<16xf32>
    %164 = vector.multi_reduction <add>, %163, %cst_66 [1] : vector<16x128xf32> to vector<16xf32>
    %165 = vector.shape_cast %164 : vector<16xf32> to vector<16x1xf32>
    %cst_67 = arith.constant 1.280000e+02 : f32
    %166 = vector.broadcast %cst_67 : f32 to vector<16x1xf32>
    %167 = arith.divf %165, %166 : vector<16x1xf32>
    %cst_68 = arith.constant 9.99999974E-6 : f32
    %168 = vector.broadcast %cst_68 : f32 to vector<16x1xf32>
    %169 = arith.addf %167, %168 : vector<16x1xf32>
    %170 = math.rsqrt %169 : vector<16x1xf32>
    %171 = vector.broadcast %170 : vector<16x1xf32> to vector<16x128xf32>
    %172 = arith.mulf %162, %171 : vector<16x128xf32>
    %173 = vector.broadcast %155 : vector<1x128xf32> to vector<16x128xf32>
    %174 = arith.mulf %172, %173 : vector<16x128xf32>
    %175 = vector.broadcast %156 : vector<1x128xf32> to vector<16x128xf32>
    %176 = arith.addf %174, %175 : vector<16x128xf32>
    %c0_69 = arith.constant 0 : index
    %c0_70 = arith.constant 0 : index
    %177 = vector.load %arg18[%c0_69, %c0_70] : memref<128x32xf32, #tpu.memory_space<vmem>>, vector<128x32xf32>
    %cst_71 = arith.constant dense<0.000000e+00> : vector<16x32xf32>
    %178 = tpu.matmul %176, %177, %cst_71 {dimension_numbers = #tpu.dot_dimension_numbers<[1], [0], [0], [1], [0, 0, 1, 1], [], []>} : vector<16x128xf32>, vector<128x32xf32>, vector<16x32xf32> -> vector<16x32xf32>
    %c0_72 = arith.constant 0 : index
    %c0_73 = arith.constant 0 : index
    %179 = vector.load %arg19[%c0_72, %c0_73] : memref<1x32xf32, #tpu.memory_space<vmem>>, vector<1x32xf32>
    %180 = vector.broadcast %179 : vector<1x32xf32> to vector<16x32xf32>
    %181 = arith.addf %178, %180 : vector<16x32xf32>
    %cst_74 = arith.constant 5.000000e-01 : f32
    %182 = vector.broadcast %cst_74 : f32 to vector<16x32xf32>
    %183 = arith.mulf %182, %181 : vector<16x32xf32>
    %cst_75 = arith.constant 0.707106769 : f32
    %184 = vector.broadcast %cst_75 : f32 to vector<16x32xf32>
    %185 = arith.mulf %181, %184 : vector<16x32xf32>
    %cst_76 = arith.constant 0.000000e+00 : f32
    %186 = vector.broadcast %cst_76 : f32 to vector<16x32xf32>
    %187 = arith.cmpf oge, %185, %186 : vector<16x32xf32>
    %cst_77 = arith.constant 1.000000e+00 : f32
    %cst_78 = arith.constant -1.000000e+00 : f32
    %188 = vector.broadcast %cst_77 : f32 to vector<16x32xf32>
    %189 = vector.broadcast %cst_78 : f32 to vector<16x32xf32>
    %190 = arith.select %187, %188, %189 : vector<16x32xi1>, vector<16x32xf32>
    %191 = math.absf %185 : vector<16x32xf32>
    %cst_79 = arith.constant 0.327591091 : f32
    %192 = vector.broadcast %cst_79 : f32 to vector<16x32xf32>
    %193 = arith.mulf %192, %191 : vector<16x32xf32>
    %cst_80 = arith.constant 1.000000e+00 : f32
    %194 = vector.broadcast %cst_80 : f32 to vector<16x32xf32>
    %195 = arith.addf %194, %193 : vector<16x32xf32>
    %cst_81 = arith.constant 1.000000e+00 : f32
    %196 = vector.broadcast %cst_81 : f32 to vector<16x32xf32>
    %197 = arith.divf %196, %195 : vector<16x32xf32>
    %cst_82 = arith.constant 1.06140542 : f32
    %198 = vector.broadcast %cst_82 : f32 to vector<16x32xf32>
    %199 = arith.mulf %198, %197 : vector<16x32xf32>
    %cst_83 = arith.constant -1.45315206 : f32
    %200 = vector.broadcast %cst_83 : f32 to vector<16x32xf32>
    %201 = arith.addf %199, %200 : vector<16x32xf32>
    %202 = arith.mulf %201, %197 : vector<16x32xf32>
    %cst_84 = arith.constant 1.42141378 : f32
    %203 = vector.broadcast %cst_84 : f32 to vector<16x32xf32>
    %204 = arith.addf %202, %203 : vector<16x32xf32>
    %205 = arith.mulf %204, %197 : vector<16x32xf32>
    %cst_85 = arith.constant -0.284496725 : f32
    %206 = vector.broadcast %cst_85 : f32 to vector<16x32xf32>
    %207 = arith.addf %205, %206 : vector<16x32xf32>
    %208 = arith.mulf %207, %197 : vector<16x32xf32>
    %cst_86 = arith.constant 0.254829586 : f32
    %209 = vector.broadcast %cst_86 : f32 to vector<16x32xf32>
    %210 = arith.addf %208, %209 : vector<16x32xf32>
    %211 = arith.mulf %210, %197 : vector<16x32xf32>
    %cst_87 = arith.constant 0.000000e+00 : f32
    %212 = vector.broadcast %cst_87 : f32 to vector<16x32xf32>
    %213 = arith.subf %212, %191 : vector<16x32xf32>
    %214 = arith.mulf %213, %191 : vector<16x32xf32>
    %215 = math.exp %214 : vector<16x32xf32>
    %216 = arith.mulf %211, %215 : vector<16x32xf32>
    %cst_88 = arith.constant 1.000000e+00 : f32
    %217 = vector.broadcast %cst_88 : f32 to vector<16x32xf32>
    %218 = arith.subf %217, %216 : vector<16x32xf32>
    %219 = arith.mulf %190, %218 : vector<16x32xf32>
    %cst_89 = arith.constant 1.000000e+00 : f32
    %220 = vector.broadcast %cst_89 : f32 to vector<16x32xf32>
    %221 = arith.addf %220, %219 : vector<16x32xf32>
    %222 = arith.mulf %183, %221 : vector<16x32xf32>
    %c0_90 = arith.constant 0 : index
    %c0_91 = arith.constant 0 : index
    %223 = vector.load %arg20[%c0_90, %c0_91] : memref<32x128xf32, #tpu.memory_space<vmem>>, vector<32x128xf32>
    %cst_92 = arith.constant dense<0.000000e+00> : vector<16x128xf32>
    %224 = tpu.matmul %222, %223, %cst_92 {dimension_numbers = #tpu.dot_dimension_numbers<[1], [0], [0], [1], [0, 0, 1, 1], [], []>} : vector<16x32xf32>, vector<32x128xf32>, vector<16x128xf32> -> vector<16x128xf32>
    %c0_93 = arith.constant 0 : index
    %c0_94 = arith.constant 0 : index
    %225 = vector.load %arg21[%c0_93, %c0_94] : memref<1x128xf32, #tpu.memory_space<vmem>>, vector<1x128xf32>
    %226 = vector.broadcast %225 : vector<1x128xf32> to vector<16x128xf32>
    %227 = arith.addf %224, %226 : vector<16x128xf32>
    %c0_95 = arith.constant 0 : index
    %c0_96 = arith.constant 0 : index
    %228 = vector.load %arg22[%c0_95, %c0_96] : memref<1x1xf32, #tpu.memory_space<vmem>>, vector<1x1xf32>
    %229 = vector.broadcast %228 : vector<1x1xf32> to vector<16x128xf32>
    %230 = arith.mulf %229, %154 : vector<16x128xf32>
    %231 = arith.addf %227, %230 : vector<16x128xf32>
    %c0_97 = arith.constant 0 : index
    %c0_98 = arith.constant 0 : index
    %232 = vector.load %arg23[%c0_97, %c0_98] : memref<16x128xf32, #tpu.memory_space<vmem>>, vector<16x128xf32>
    tpu.vector_store %arg23[%c0_97, %c0_98], %231 {strides = array<i32>} : memref<16x128xf32, #tpu.memory_space<vmem>>, vector<16x128xf32>,
    return
  }
}

module attributes {stable_mosaic.version = 11 : i64} {
  func.func @_head_kernel(%arg0: memref<16x128xf32, #tpu.memory_space<vmem>>, %arg1: memref<2x16xf32, #tpu.memory_space<vmem>>, %arg2: memref<128x5xf32, #tpu.memory_space<vmem>>, %arg3: memref<1x5xf32, #tpu.memory_space<vmem>>, %arg4: memref<2x5xf32, #tpu.memory_space<vmem>>) attributes {dimension_semantics = [], scalar_prefetch = 0 : i64, scratch_operands = 0 : i64, tpu.core_type = #tpu.core_type<tc>} {
    %c0 = arith.constant 0 : index
    %c0_0 = arith.constant 0 : index
    %0 = vector.load %arg1[%c0, %c0_0] : memref<2x16xf32, #tpu.memory_space<vmem>>, vector<2x16xf32>
    %c0_1 = arith.constant 0 : index
    %c0_2 = arith.constant 0 : index
    %1 = vector.load %arg0[%c0_1, %c0_2] : memref<16x128xf32, #tpu.memory_space<vmem>>, vector<16x128xf32>
    %cst = arith.constant dense<0.000000e+00> : vector<2x128xf32>
    %2 = tpu.matmul %0, %1, %cst {dimension_numbers = #tpu.dot_dimension_numbers<[1], [0], [0], [1], [0, 0, 1, 1], [], []>} : vector<2x16xf32>, vector<16x128xf32>, vector<2x128xf32> -> vector<2x128xf32>
    %c0_3 = arith.constant 0 : index
    %c0_4 = arith.constant 0 : index
    %3 = vector.load %arg2[%c0_3, %c0_4] : memref<128x5xf32, #tpu.memory_space<vmem>>, vector<128x5xf32>
    %cst_5 = arith.constant dense<0.000000e+00> : vector<2x5xf32>
    %4 = tpu.matmul %2, %3, %cst_5 {dimension_numbers = #tpu.dot_dimension_numbers<[1], [0], [0], [1], [0, 0, 1, 1], [], []>} : vector<2x128xf32>, vector<128x5xf32>, vector<2x5xf32> -> vector<2x5xf32>
    %c0_6 = arith.constant 0 : index
    %c0_7 = arith.constant 0 : index
    %5 = vector.load %arg3[%c0_6, %c0_7] : memref<1x5xf32, #tpu.memory_space<vmem>>, vector<1x5xf32>
    %6 = vector.broadcast %5 : vector<1x5xf32> to vector<2x5xf32>
    %7 = arith.addf %4, %6 : vector<2x5xf32>
    %c0_8 = arith.constant 0 : index
    %c0_9 = arith.constant 0 : index
    %8 = vector.load %arg4[%c0_8, %c0_9] : memref<2x5xf32, #tpu.memory_space<vmem>>, vector<2x5xf32>
    tpu.vector_store %arg4[%c0_8, %c0_9], %7 {strides = array<i32>} : memref<2x5xf32, #tpu.memory_space<vmem>>, vector<2x5xf32>,
    return
  }
}

</mosaic_0001>

<bundles_post_ra>
// kernel: liconvformer_forward.5
= control target key start
LH: loop header
LB: loop body
LE: loop exit
PB: predicated region body
PF: predicated region fallthrough
CT: control target
= control target key end

     0   :  { %vm88_vm0 = vcmask 1046528   ;;  %vm39_vm1 = vcmask 121856   ;;  %vm828_vm2 = vmmov 1   ;;  %vm669_vm8 = vcmask 130048   ;;  %s1308_s1 = inlined_call_operand.vmem [shape: f32[15,16], index: 1, kind: input, shape index: {}]   ;;  %s1309_s0 = inlined_call_operand.vmem [shape: f32[128,15], index: 0, kind: input, shape index: {}]   ;;  %s1310_s2 = inlined_call_operand.vmem [shape: f32[1,16], index: 2, kind: input, shape index: {}]   ;;  %s1311_s3 = inlined_call_operand.vmem [shape: f32[128,16], index: 3, kind: output, shape index: {}]  }
   0x1   :  { %v30_v0 = vld [vmem:[%s1308_s1] sm:$0xff]  ;;  %v31_v1 = vld [vmem:[%s1308_s1 + $0x8] sm:$0x7f]  ;;  %vm755_vm3 = vmpackc.low %vm88_vm0, %vm828_vm2 }
   0x2   :  { %v754_v2 = vpack.c.bf16 %v31_v1, %v30_v0  ;;  %v14_v3 = vld [vmem:[%s1309_s0] sm:$0xff]  ;;  %v15_v5 = vld [vmem:[%s1309_s0 + $0x8] sm:$0xff]  ;;  %v16_v7 = vld [vmem:[%s1309_s0 + $0x10] sm:$0xff] }
   0x3   :  { %v22_v4 = vld [vmem:[%s1309_s0 + $0x40] sm:$0xff]  ;;  %730 = vmatprep.mubr.msk.f32.mxu0 %vm39_vm1, %v14_v3  ;;  %v23_v6 = vld [vmem:[%s1309_s0 + $0x48] sm:$0xff]  ;;  %v24_v8 = vld [vmem:[%s1309_s0 + $0x50] sm:$0xff] }
   0x4   :  { %742 = vmatprep.mubr.msk.f32.mxu1 %vm39_vm1, %v22_v4  ;;  %756 = vmatprep.subr.msk.bf16.mxu0 %vm755_vm3, %v754_v2  ;;  %v17_v9 = vld [vmem:[%s1309_s0 + $0x18] sm:$0xff]  ;;  %v18_v11 = vld [vmem:[%s1309_s0 + $0x20] sm:$0xff]  ;;  %v19_v13 = vld [vmem:[%s1309_s0 + $0x28] sm:$0xff] }
   0x5   :  { %760 = vmatprep.subr.msk.bf16.mxu1 %vm755_vm3, %v754_v2  ;;  %759 = vmatpush3.bf16.msk.msra.mxu0 %vm755_vm3, %v754_v2  ;;  %v25_v10 = vld [vmem:[%s1309_s0 + $0x58] sm:$0xff]  ;;  %v26_v12 = vld [vmem:[%s1309_s0 + $0x60] sm:$0xff]  ;;  %v27_v14 = vld [vmem:[%s1309_s0 + $0x68] sm:$0xff] }
   0x6   :  { %761 = vmatpush3.bf16.msk.msra.mxu1 %vm755_vm3, %v754_v2  ;;  %v20_v15 = vld [vmem:[%s1309_s0 + $0x30] sm:$0xff]  ;;  %v21_v17 = vld [vmem:[%s1309_s0 + $0x38] sm:$0xff]  ;;  %v923_v19 = vld [vmem:[%s1310_s2] ss:$0 sm:$0xff] }
   0x7   :  { %v28_v16 = vld [vmem:[%s1309_s0 + $0x70] sm:$0xff]  ;;  %v29_v18 = vld [vmem:[%s1309_s0 + $0x78] sm:$0xff] }
   0x8   :  { %731 = vmatmul.mubr.msk.f32.vlgmr.msra.gmra.mrb[0].mxu0 %vm39_vm1, %v15_v5 }
   0x9   :  { %743 = vmatmul.mubr.msk.f32.vlgmr.msra.gmra.mrb[0].mxu1 %vm39_vm1, %v23_v6  ;;  %733 = vmatprep.mubr.msk.f32.mxu0 %vm39_vm1, %v16_v7  ;;  %v829_v7 = vmov -1.0  }
   0xa   :  { %745 = vmatprep.mubr.msk.f32.mxu1 %vm39_vm1, %v24_v8 }
   0xc   :  { %734 = vmatmul.mubr.msk.f32.gmra.mrb[2].mxu0 %vm39_vm1, %v17_v9 }
   0xd   :  { %746 = vmatmul.mubr.msk.f32.gmra.mrb[2].mxu1 %vm39_vm1, %v25_v10  ;;  %736 = vmatprep.mubr.msk.f32.mxu0 %vm39_vm1, %v18_v11 }
   0xe   :  { %748 = vmatprep.mubr.msk.f32.mxu1 %vm39_vm1, %v26_v12 }
  0x10   :  { %737 = vmatmul.mubr.msk.f32.gmra.mrb[4].mxu0 %vm39_vm1, %v19_v13 }
  0x11   :  { %749 = vmatmul.mubr.msk.f32.gmra.mrb[4].mxu1 %vm39_vm1, %v27_v14  ;;  %739 = vmatprep.mubr.msk.f32.mxu0 %vm39_vm1, %v20_v15 }
  0x12   :  { %751 = vmatprep.mubr.msk.f32.mxu1 %vm39_vm1, %v28_v16 }
  0x14   :  { %740 = vmatmul.mubr.msk.f32.gmra.mrb[6].mxu0 %vm39_vm1, %v21_v17 }
  0x15   :  { %752 = vmatmul.mubr.msk.f32.gmra.mrb[6].mxu1 %vm39_vm1, %v29_v18 }
  0xdb   :  { %v732_v20 = vpop.f32.mrb[0].mxu0 }
  0xdc   :  { %v744_v21 = vpop.f32.mrb[0].mxu1  ;;  %v164_v22 = vadd.f32 %v732_v20, %v923_v19  ;;  %v158_v24 = vpop.f32.mrb[1].mxu0 }
  0xdd   :  { %v204_v23 = vadd.f32 %v744_v21, %v923_v19  ;;  %v198_v25 = vpop.f32.mrb[1].mxu1  ;;  %v159_v26 = vadd.f32 %v923_v19, %v158_v24 }
  0xde   :  { %v199_v27 = vadd.f32 %v923_v19, %v198_v25  ;;  %v254_v28 = vmul.f32 0.70710677, %v164_v22  ;;  %v931_v41 = vmul.f32 0.5, %v164_v22 }
  0xdf   :  { %v262_v29 = vmul.f32 0.70710677, %v204_v23  ;;  %v253_v30 = vmul.f32 0.70710677, %v159_v26  ;;  %v735_v35 = vpop.f32.mrb[2].mxu0  ;;  %v933_v46 = vmul.f32 0.5, %v204_v23 }
  0xe0   :  { %v302_v31 = vand.u32 2147483647, %v254_v28  ;;  %v929_v34 = vmul.f32 0.70710677, %v199_v27  ;;  %v747_v40 = vpop.f32.mrb[2].mxu1  ;;  %v168_v44 = vpop.f32.mrb[3].mxu0  ;;  %v941_v53 = vadd.f32 %v735_v35, %v923_v19 }
  0xe1   :  { %v310_v32 = vand.u32 2147483647, %v262_v29  ;;  %v301_v33 = vand.u32 2147483647, %v253_v30  ;;  %v208_v45 = vpop.f32.mrb[3].mxu1  ;;  %vm270_vm4 = vcmp.ge.f32.partialorder %v254_v28, 0.0  ;;  %v955_v61 = vadd.f32 %v747_v40, %v923_v19 }
  0xe2   :  { %v318_v36 = vmul.f32 0.3275911, %v302_v31  ;;  %v526_v37 = vsub.f32 0.0, %v302_v31  ;;  %v309_v48 = vand.u32 2147483647, %v929_v34  ;;  %v947_v56 = vmul.f32 0.5, %v159_v26 }
  0xe3   :  { %v326_v38 = vmul.f32 0.3275911, %v310_v32  ;;  %v317_v39 = vmul.f32 0.3275911, %v301_v33  ;;  %v534_v47 = vsub.f32 0.0, %v310_v32  ;;  %v936_v49 = vpop.f32.mrb[4].mxu0  ;;  %v964_v2 = vadd.f32 %v923_v19, %v168_v44 }
  0xe4   :  { %v334_v42 = vadd.f32 1.0, %v318_v36  ;;  %v938_v50 = vpop.f32.mrb[4].mxu1  ;;  %v542_v51 = vmul.f32 %v526_v37, %v302_v31  ;;  %v943_v54 = vpop.f32.mrb[5].mxu0  ;;  %v325_v57 = vmul.f32 0.3275911, %v309_v48  ;;  %vm278_vm5 = vcmp.ge.f32.partialorder %v262_v29, 0.0 }
  0xe5   :  { %v342_v43 = vadd.f32 1.0, %v326_v38  ;;  %v333_v52 = vadd.f32 1.0, %v317_v39  ;;  %v945_v55 = vpop.f32.mrb[5].mxu1  ;;  %v525_v59 = vsub.f32 0.0, %v301_v33  ;;  %v952_v60 = vmul.f32 0.70710677, %v941_v53 }
  0xe6   :  { %764 = vrcp.f32 %v334_v42  ;;  %vm269_vm6 = vcmp.ge.f32.partialorder %v253_v30, 0.0  ;;  %v961_v0 = vmul.f32 0.5, %v199_v27  ;;  %v341_v1 = vadd.f32 1.0, %v325_v57 }
  0xe7   :  { %766 = vrcp.f32 %v342_v43  ;;  %v949_v58 = vpop.f32.mrb[6].mxu0  ;;  %v559_v4 = vmul.f32 1.442695, %v542_v51  ;;  %v550_v5 = vmul.f32 %v534_v47, %v310_v32  ;;  %v304_v6 = vand.u32 2147483647, %v952_v60 }
  0xe8   :  { %v957_v62 = vpop.f32.mrb[6].mxu1  ;;  %v959_v63 = vpop.f32.mrb[7].mxu0  ;;  %768 = vrcp.f32 %v333_v52  ;;  %v971_v8 = vsel %vm270_vm4, 1.0, %v829_v7  ;;  %v975_v9 = vsel %vm278_vm5, 1.0, %v829_v7  ;;  %v533_v10 = vsub.f32 0.0, %v309_v48 }
  0xe9   :  { %v966_v3 = vpop.f32.mrb[7].mxu1  ;;  %v978_v11 = vmul.f32 0.70710677, %v955_v61  ;;  %v541_v12 = vmul.f32 %v525_v59, %v301_v33  ;;  %770 = vrcp.f32 %v341_v1  ;;  %v320_v13 = vmul.f32 0.3275911, %v304_v6 }
  0xea   :  { %v528_v14 = vsub.f32 0.0, %v304_v6  ;;  %v982_v15 = vsel %vm269_vm6, 1.0, %v829_v7  ;;  %vm277_vm7 = vcmp.ge.f32.partialorder %v929_v34, 0.0  ;;  %v987_v17 = vmul.f32 0.70710677, %v964_v2 }
  0xeb   :  { %v312_v16 = vand.u32 2147483647, %v978_v11  ;;  %772 = vpow2.f32 %v559_v4  ;;  %v575_v18 = vmul.f32 1.442695, %v550_v5  ;;  %v336_v20 = vadd.f32 1.0, %v320_v13 }
  0xec   :  { %v990_v21 = vadd.f32 %v923_v19, %v208_v45  ;;  %v549_v22 = vmul.f32 %v533_v10, %v309_v48  ;;  %v303_v25 = vand.u32 2147483647, %v987_v17  ;;  %v557_v27 = vmul.f32 1.442695, %v541_v12 }
  0xed   :  { %v328_v23 = vmul.f32 0.3275911, %v312_v16  ;;  %v536_v24 = vsub.f32 0.0, %v312_v16  ;;  %v996_v28 = vsel %vm277_vm7, 1.0, %v829_v7  ;;  %774 = vrcp.f32 %v336_v20 }
  0xee   :  { %v544_v29 = vmul.f32 %v528_v14, %v304_v6  ;;  %v319_v34 = vmul.f32 0.3275911, %v303_v25  ;;  %776 = vpow2.f32 %v575_v18  ;;  %v527_v36 = vsub.f32 0.0, %v303_v25 }
  0xef   :  { %v344_v32 = vadd.f32 1.0, %v328_v23  ;;  %v552_v33 = vmul.f32 %v536_v24, %v312_v16  ;;  %v1003_v37 = vmul.f32 0.70710677, %v990_v21  ;;  %v573_v39 = vmul.f32 1.442695, %v549_v22 }
  0xf0   :  { %v993_v26 = vpop.eup %764  ;;  %v335_v40 = vadd.f32 1.0, %v319_v34  ;;  %v1008_v44 = vmul.f32 0.5, %v941_v53  ;;  %v563_v51 = vmul.f32 1.442695, %v544_v29  ;;  %v543_v1 = vmul.f32 %v527_v36, %v303_v25 }
  0xf1   :  { %v998_v30 = vpop.eup %766  ;;  %v382_v31 = vmul.f32 1.0614054, %v993_v26  ;;  %778 = vrcp.f32 %v344_v32  ;;  %v311_v45 = vand.u32 2147483647, %v1003_v37  ;;  %v579_v52 = vmul.f32 1.442695, %v552_v33 }
  0xf2   :  { %v390_v35 = vmul.f32 1.0614054, %v998_v30  ;;  %v1005_v42 = vpop.eup %768  ;;  %780 = vpow2.f32 %v557_v27  ;;  %v1019_v16 = vadd.f32 %v936_v49, %v923_v19  ;;  %v561_v25 = vmul.f32 1.442695, %v543_v1 }
  0xf3   :  { %v398_v38 = vadd.f32 -1.4531521, %v382_v31  ;;  %v381_v48 = vmul.f32 1.0614054, %v1005_v42  ;;  %v1013_v57 = vpop.eup %770  ;;  %782 = vrcp.f32 %v335_v40  ;;  %v327_v4 = vmul.f32 0.3275911, %v311_v45 }
  0xf4   :  { %v406_v43 = vadd.f32 -1.4531521, %v390_v35  ;;  %v389_v53 = vmul.f32 1.0614054, %v1013_v57  ;;  %784 = vpow2.f32 %v573_v39  ;;  %v535_v14 = vsub.f32 0.0, %v311_v45 }
  0xf5   :  { %v414_v47 = vmul.f32 %v993_v26, %v398_v38  ;;  %v397_v6 = vadd.f32 -1.4531521, %v381_v48  ;;  %v773_v10 = vpop.eup %772  ;;  %v343_v13 = vadd.f32 1.0, %v327_v4  ;;  %786 = vpow2.f32 %v563_v51 }
  0xf6   :  { %v422_v59 = vmul.f32 %v998_v30, %v406_v43  ;;  %v405_v22 = vadd.f32 -1.4531521, %v389_v53  ;;  %v551_v27 = vmul.f32 %v535_v14, %v311_v45  ;;  %v1029_v36 = vmul.f32 0.70710677, %v1019_v16 }
  0xf7   :  { %v430_v5 = vadd.f32 1.4214138, %v414_v47  ;;  %v413_v20 = vmul.f32 %v1005_v42, %v397_v6  ;;  %v1023_v23 = vpop.eup %774  ;;  %788 = vrcp.f32 %v343_v13  ;;  %vm272_vm9 = vcmp.ge.f32.partialorder %v952_v60, 0.0 }
  0xf8   :  { %v438_v12 = vadd.f32 1.4214138, %v422_v59  ;;  %v421_v32 = vmul.f32 %v1013_v57, %v405_v22  ;;  %v384_v49 = vmul.f32 1.0614054, %v1023_v23  ;;  %v777_v33 = vpop.eup %776  ;;  %790 = vpow2.f32 %v579_v52 }
  0xf9   :  { %v446_v18 = vmul.f32 %v993_v26, %v430_v5  ;;  %v429_v31 = vadd.f32 1.4214138, %v413_v20  ;;  %v577_v35 = vmul.f32 1.442695, %v551_v27  ;;  %792 = vpow2.f32 %v561_v25 }
  0xfa   :  { %v454_v24 = vmul.f32 %v998_v30, %v438_v12  ;;  %v437_v43 = vadd.f32 1.4214138, %v421_v32  ;;  %v400_v45 = vadd.f32 -1.4531521, %v384_v49  ;;  %v1039_v52 = vadd.f32 %v938_v50, %v923_v19 }
  0xfb   :  { %v462_v29 = vadd.f32 -0.28449672, %v446_v18  ;;  %v1031_v38 = vpop.eup %778  ;;  %v445_v40 = vmul.f32 %v1005_v42, %v429_v31  ;;  %794 = vpow2.f32 %v577_v35  ;;  %v1046_v13 = vand.u32 2147483647, %v1029_v36 }
  0xfc   :  { %v470_v34 = vadd.f32 -0.28449672, %v454_v24  ;;  %v781_v47 = vpop.eup %780  ;;  %v392_v51 = vmul.f32 1.0614054, %v1031_v38  ;;  %v453_v4 = vmul.f32 %v1013_v57, %v437_v43  ;;  %v416_v5 = vmul.f32 %v1023_v23, %v400_v45 }
  0xfd   :  { %v478_v39 = vmul.f32 %v993_v26, %v462_v29  ;;  %v461_v1 = vadd.f32 -0.28449672, %v445_v40  ;;  %v1043_v6 = vpop.eup %782  ;;  %v322_v29 = vmul.f32 0.3275911, %v1046_v13  ;;  %vm280_vm10 = vcmp.ge.f32.partialorder %v978_v11, 0.0 }
  0xfe   :  { %v486_v48 = vmul.f32 %v998_v30, %v470_v34  ;;  %v408_v12 = vadd.f32 -1.4531521, %v392_v51  ;;  %v785_v14 = vpop.eup %784  ;;  %v469_v20 = vadd.f32 -0.28449672, %v453_v4  ;;  %v432_v22 = vadd.f32 1.4214138, %v416_v5 }
  0xff   :  { %v494_v59 = vadd.f32 0.2548296, %v478_v39  ;;  %v477_v50 = vmul.f32 %v1005_v42, %v461_v1  ;;  %v383_v27 = vmul.f32 1.0614054, %v1043_v6  ;;  %v787_v31 = vpop.eup %786  ;;  %v338_v45 = vadd.f32 1.0, %v322_v29 }
 0x100   :  { %v502_v53 = vadd.f32 0.2548296, %v486_v48  ;;  %v424_v25 = vmul.f32 %v1031_v38, %v408_v12  ;;  %v485_v34 = vmul.f32 %v1013_v57, %v469_v20  ;;  %vm271_vm11 = vcmp.ge.f32.partialorder %v987_v17, 0.0 }
 0x101   :  { %v510_v18 = vmul.f32 %v993_v26, %v494_v59  ;;  %v493_v49 = vadd.f32 0.2548296, %v477_v50  ;;  %v448_v26 = vmul.f32 %v1023_v23, %v432_v22  ;;  %v1056_v35 = vpop.eup %788  ;;  %v399_v43 = vadd.f32 -1.4531521, %v383_v27 }
 0x102   :  { %v518_v24 = vmul.f32 %v998_v30, %v502_v53  ;;  %v440_v40 = vadd.f32 1.4214138, %v424_v25  ;;  %v501_v51 = vadd.f32 0.2548296, %v485_v34  ;;  %v791_v1 = vpop.eup %790  ;;  %v391_v53 = vmul.f32 1.0614054, %v1056_v35 }
 0x103   :  { %v590_v32 = vmul.f32 %v773_v10, %v510_v18  ;;  %v509_v48 = vmul.f32 %v1005_v42, %v493_v49  ;;  %v464_v59 = vadd.f32 -0.28449672, %v448_v26  ;;  %v415_v5 = vmul.f32 %v1043_v6, %v399_v43  ;;  %v793_v42 = vpop.eup %792 }
 0x104   :  { %v598_v39 = vmul.f32 %v777_v33, %v518_v24  ;;  %v456_v4 = vmul.f32 %v1031_v38, %v440_v40  ;;  %v517_v18 = vmul.f32 %v1013_v57, %v501_v51  ;;  %v407_v25 = vadd.f32 -1.4531521, %v391_v53 }
 0x105   :  { %v606_v30 = vsub.f32 1.0, %v590_v32  ;;  %v589_v12 = vmul.f32 %v781_v47, %v509_v48  ;;  %v480_v50 = vmul.f32 %v1023_v23, %v464_v59  ;;  %v431_v24 = vadd.f32 1.4214138, %v415_v5  ;;  %v1067_v34 = vpop.eup %794 }
 0x106   :  { %v614_v10 = vsub.f32 1.0, %v598_v39  ;;  %v472_v22 = vadd.f32 -0.28449672, %v456_v4  ;;  %v597_v32 = vmul.f32 %v785_v14, %v517_v18  ;;  %v423_v57 = vmul.f32 %v1056_v35, %v407_v25 }
 0x107   :  { %v622_v33 = vmul.f32 %v606_v30, %v971_v8  ;;  %v605_v29 = vsub.f32 1.0, %v589_v12  ;;  %v496_v49 = vadd.f32 0.2548296, %v480_v50  ;;  %v447_v47 = vmul.f32 %v1043_v6, %v431_v24 }
 0x108   :  { %v630_v20 = vmul.f32 %v614_v10, %v975_v9  ;;  %v488_v8 = vmul.f32 %v1031_v38, %v472_v22  ;;  %v613_v40 = vsub.f32 1.0, %v597_v32  ;;  %v439_v51 = vadd.f32 1.4214138, %v423_v57 }
 0x109   :  { %v638_v27 = vadd.f32 1.0, %v622_v33  ;;  %v621_v9 = vmul.f32 %v605_v29, %v982_v15  ;;  %v512_v43 = vmul.f32 %v1023_v23, %v496_v49  ;;  %v463_v48 = vadd.f32 -0.28449672, %v447_v47 }
 0x10a   :  { %v646_v26 = vadd.f32 1.0, %v630_v20  ;;  %v504_v14 = vadd.f32 0.2548296, %v488_v8  ;;  %v629_v10 = vmul.f32 %v613_v40, %v996_v28  ;;  %796 = vrcp.f32 %v338_v45 }
 0x10b   :  { %v654_v39 = vmul.f32 %v638_v27, %v931_v41  ;;  %v637_v59 = vadd.f32 1.0, %v621_v9  ;;  %v592_v4 = vmul.f32 %v787_v31, %v512_v43  ;;  %v455_v15 = vmul.f32 %v1056_v35, %v439_v51 }
 0x10c   :  { %v662_v30 = vmul.f32 %v646_v26, %v933_v46  ;;  %v520_v41 = vmul.f32 %v1031_v38, %v504_v14  ;;  %v479_v46 = vmul.f32 %v1043_v6, %v463_v48  ;;  %v645_v5 = vadd.f32 1.0, %v629_v10 }
 0x10d   :  { %671 = vst.msk [vmem:[%s1311_s3 + $0x8] sm:$0xff] %vm669_vm8, %v654_v39  ;;  %v653_v23 = vmul.f32 %v637_v59, %v947_v56  ;;  %v608_v53 = vsub.f32 1.0, %v592_v4  ;;  %v1092_v28 = vadd.f32 %v923_v19, %v943_v54  ;;  %v288_v31 = vsel %vm272_vm9, 1.0, %v829_v7 }
 0x10e   :  { %679 = vst.msk [vmem:[%s1311_s3 + $0x48] sm:$0xff] %vm669_vm8, %v662_v30  ;;  %v600_v45 = vmul.f32 %v791_v1, %v520_v41  ;;  %v495_v11 = vadd.f32 0.2548296, %v479_v46  ;;  %v471_v33 = vadd.f32 -0.28449672, %v455_v15  ;;  %v661_v56 = vmul.f32 %v645_v5, %v961_v0 }
 0x10f   :  { %670 = vst.msk [vmem:[%s1311_s3] sm:$0xff] %vm669_vm8, %v653_v23  ;;  %v624_v38 = vmul.f32 %v608_v53, %v288_v31  ;;  %v296_v12 = vsel %vm280_vm10, 1.0, %v829_v7  ;;  %v1104_v54 = vmul.f32 0.70710677, %v1039_v52  ;;  %v530_v0 = vsub.f32 0.0, %v1046_v13 }
 0x110   :  { %v616_v18 = vsub.f32 1.0, %v600_v45  ;;  %v511_v60 = vmul.f32 %v1043_v6, %v495_v11  ;;  %v487_v1 = vmul.f32 %v1056_v35, %v471_v33  ;;  %678 = vst.msk [vmem:[%s1311_s3 + $0x40] sm:$0xff] %vm669_vm8, %v661_v56  ;;  %v1116_v22 = vmul.f32 0.70710677, %v1092_v28 }
 0x111   :  { %v640_v50 = vadd.f32 1.0, %v624_v38  ;;  %v314_v20 = vand.u32 2147483647, %v1104_v54  ;;  %v248_v27 = vmul.f32 0.5, %v955_v61  ;;  %v287_v49 = vsel %vm271_vm11, 1.0, %v829_v7 }
 0x112   :  { %v632_v24 = vmul.f32 %v616_v18, %v296_v12  ;;  %v591_v25 = vmul.f32 %v793_v42, %v511_v60  ;;  %v503_v17 = vadd.f32 0.2548296, %v487_v1  ;;  %vm279_vm12 = vcmp.ge.f32.partialorder %v1003_v37, 0.0 }
 0x113   :  { %v656_v6 = vmul.f32 %v640_v50, %v1008_v44  ;;  %v330_v29 = vmul.f32 0.3275911, %v314_v20  ;;  %v546_v42 = vmul.f32 %v530_v0, %v1046_v13  ;;  %v305_v61 = vand.u32 2147483647, %v1116_v22 }
 0x114   :  { %v648_v32 = vadd.f32 1.0, %v632_v24  ;;  %v607_v26 = vsub.f32 1.0, %v591_v25  ;;  %v519_v8 = vmul.f32 %v1056_v35, %v503_v17  ;;  %v797_v47 = vpop.eup %796  ;;  %v239_v35 = vmul.f32 0.5, %v964_v2 }
 0x115   :  { %673 = vst.msk [vmem:[%s1311_s3 + $0x18] sm:$0xff] %vm669_vm8, %v656_v6  ;;  %v346_v44 = vadd.f32 1.0, %v330_v29  ;;  %v386_v40 = vmul.f32 1.0614054, %v797_v47  ;;  %v321_v43 = vmul.f32 0.3275911, %v305_v61  ;;  %v1137_v48 = vadd.f32 %v923_v19, %v945_v55 }
 0x116   :  { %v664_v57 = vmul.f32 %v648_v32, %v248_v27  ;;  %v623_v39 = vmul.f32 %v607_v26, %v287_v49  ;;  %v599_v9 = vmul.f32 %v1067_v34, %v519_v8  ;;  %v295_v34 = vsel %vm279_vm12, 1.0, %v829_v7 }
 0x117   :  { %798 = vrcp.f32 %v346_v44  ;;  %v402_v13 = vadd.f32 -1.4531521, %v386_v40  ;;  %v567_v51 = vmul.f32 1.442695, %v546_v42  ;;  %v337_v2 = vadd.f32 1.0, %v321_v43 }
 0x118   :  { %681 = vst.msk [vmem:[%s1311_s3 + $0x58] sm:$0xff] %vm669_vm8, %v664_v57  ;;  %v639_v30 = vadd.f32 1.0, %v623_v39  ;;  %v615_v14 = vsub.f32 1.0, %v599_v9  ;;  %v1144_v59 = vadd.f32 %v949_v58, %v923_v19  ;;  %v247_v46 = vmul.f32 0.5, %v990_v21 }
 0x119   :  { %v418_v41 = vmul.f32 %v797_v47, %v402_v13  ;;  %v538_v15 = vsub.f32 0.0, %v314_v20  ;;  %800 = vrcp.f32 %v337_v2  ;;  %v1148_v55 = vmul.f32 0.70710677, %v1137_v48 }
 0x11a   :  { %v655_v10 = vmul.f32 %v639_v30, %v239_v35  ;;  %v631_v4 = vmul.f32 %v615_v14, %v295_v34  ;;  %v1155_v58 = vmul.f32 0.70710677, %v1144_v59  ;;  %v1159_v5 = vadd.f32 %v957_v62, %v923_v19 }
 0x11b   :  { %v434_v23 = vadd.f32 1.4214138, %v418_v41  ;;  %802 = vpow2.f32 %v567_v51  ;;  %v313_v21 = vand.u32 2147483647, %v1148_v55  ;;  %v554_v45 = vmul.f32 %v538_v15, %v314_v20 }
 0x11c   :  { %672 = vst.msk [vmem:[%s1311_s3 + $0x10] sm:$0xff] %vm669_vm8, %v655_v10  ;;  %v647_v37 = vadd.f32 1.0, %v631_v4  ;;  %v308_v33 = vand.u32 2147483647, %v1155_v58  ;;  %v529_v38 = vsub.f32 0.0, %v305_v61  ;;  %v1174_v1 = vadd.f32 %v923_v19, %v959_v63 }
 0x11d   :  { %v450_v31 = vmul.f32 %v797_v47, %v434_v23  ;;  %v329_v11 = vmul.f32 0.3275911, %v313_v21  ;;  %v1168_v12 = vmul.f32 0.70710677, %v1159_v5  ;;  %v583_v24 = vmul.f32 1.442695, %v554_v45 }
 0x11e   :  { %v663_v53 = vmul.f32 %v647_v37, %v247_v46  ;;  %v324_v60 = vmul.f32 0.3275911, %v308_v33  ;;  %v545_v27 = vmul.f32 %v529_v38, %v305_v61  ;;  %v537_v32 = vsub.f32 0.0, %v313_v21 }
 0x11f   :  { %v466_v56 = vadd.f32 -0.28449672, %v450_v31  ;;  %v345_v18 = vadd.f32 1.0, %v329_v11  ;;  %v1178_v20 = vand.u32 2147483647, %v1168_v12  ;;  %vm274_vm13 = vcmp.ge.f32.partialorder %v1029_v36, 0.0 }
 0x120   :  { %680 = vst.msk [vmem:[%s1311_s3 + $0x50] sm:$0xff] %vm669_vm8, %v663_v53  ;;  %v340_v25 = vadd.f32 1.0, %v324_v60  ;;  %v1184_v63 = vmul.f32 0.70710677, %v1174_v1  ;;  %v565_v40 = vmul.f32 1.442695, %v545_v27  ;;  %v553_v35 = vmul.f32 %v537_v32, %v313_v21 }
 0x121   :  { %v1170_v62 = vpop.eup %798  ;;  %v482_v50 = vmul.f32 %v797_v47, %v466_v56  ;;  %804 = vrcp.f32 %v345_v18  ;;  %v332_v49 = vmul.f32 0.3275911, %v1178_v20  ;;  %v290_v13 = vsel %vm274_vm13, 1.0, %v829_v7 }
 0x122   :  { %v394_v0 = vmul.f32 1.0614054, %v1170_v62  ;;  %806 = vrcp.f32 %v340_v25  ;;  %v1190_v43 = vand.u32 2147483647, %v1184_v63  ;;  %v532_v34 = vsub.f32 0.0, %v308_v33 }
 0x123   :  { %v498_v17 = vadd.f32 0.2548296, %v482_v50  ;;  %v1180_v29 = vpop.eup %800  ;;  %808 = vpow2.f32 %v583_v24  ;;  %v348_v57 = vadd.f32 1.0, %v332_v49  ;;  %v540_v45 = vsub.f32 0.0, %v1178_v20 }
 0x124   :  { %v410_v6 = vadd.f32 -1.4531521, %v394_v0  ;;  %v385_v42 = vmul.f32 1.0614054, %v1180_v29  ;;  %v323_v51 = vmul.f32 0.3275911, %v1190_v43  ;;  %v548_v31 = vmul.f32 %v532_v34, %v308_v33 }
 0x125   :  { %v514_v26 = vmul.f32 %v797_v47, %v498_v17  ;;  %v803_v44 = vpop.eup %802  ;;  %810 = vrcp.f32 %v348_v57  ;;  %v1194_v47 = vadd.f32 %v923_v19, %v966_v3  ;;  %v242_v19 = vmul.f32 0.5, %v1019_v16 }
 0x126   :  { %v426_v8 = vmul.f32 %v1170_v62, %v410_v6  ;;  %v401_v9 = vadd.f32 -1.4531521, %v385_v42  ;;  %812 = vpow2.f32 %v565_v40  ;;  %v581_v3 = vmul.f32 1.442695, %v553_v35 }
 0x127   :  { %v594_v61 = vmul.f32 %v803_v44, %v514_v26  ;;  %v1201_v41 = vmul.f32 0.70710677, %v1194_v47  ;;  %v339_v15 = vadd.f32 1.0, %v323_v51  ;;  %vm282_vm14 = vcmp.ge.f32.partialorder %v1104_v54, 0.0 }
 0x128   :  { %v442_v39 = vadd.f32 1.4214138, %v426_v8  ;;  %v417_v36 = vmul.f32 %v1180_v29, %v401_v9  ;;  %v571_v32 = vmul.f32 1.442695, %v548_v31  ;;  %v556_v49 = vmul.f32 %v540_v45, %v1178_v20 }
 0x129   :  { %v610_v30 = vsub.f32 1.0, %v594_v61  ;;  %814 = vrcp.f32 %v339_v15  ;;  %v1211_v11 = vand.u32 2147483647, %v1201_v41  ;;  %vm273_vm15 = vcmp.ge.f32.partialorder %v1116_v22, 0.0 }
 0x12a   :  { %v458_v14 = vmul.f32 %v1170_v62, %v442_v39  ;;  %v433_v4 = vadd.f32 1.4214138, %v417_v36  ;;  %816 = vpow2.f32 %v581_v3  ;;  %v531_v61 = vsub.f32 0.0, %v1190_v43 }
 0x12b   :  { %v626_v2 = vmul.f32 %v610_v30, %v290_v13  ;;  %v1203_v46 = vpop.eup %804  ;;  %v331_v24 = vmul.f32 0.3275911, %v1211_v11  ;;  %v298_v30 = vsel %vm282_vm14, 1.0, %v829_v7  ;;  %v587_v36 = vmul.f32 1.442695, %v556_v49 }
 0x12c   :  { %v474_v10 = vadd.f32 -0.28449672, %v458_v14  ;;  %v449_v21 = vmul.f32 %v1180_v29, %v433_v4  ;;  %v393_v53 = vmul.f32 1.0614054, %v1203_v46  ;;  %v1213_v56 = vpop.eup %806  ;;  %v289_v4 = vsel %vm273_vm15, 1.0, %v829_v7 }
 0x12d   :  { %v642_v37 = vadd.f32 1.0, %v626_v2  ;;  %v809_v50 = vpop.eup %808  ;;  %v388_v0 = vmul.f32 1.0614054, %v1213_v56  ;;  %v347_v26 = vadd.f32 1.0, %v331_v24  ;;  %v547_v54 = vmul.f32 %v531_v61, %v1190_v43 }
 0x12e   :  { %v490_v23 = vmul.f32 %v1170_v62, %v474_v10  ;;  %v465_v18 = vadd.f32 -0.28449672, %v449_v21  ;;  %v409_v60 = vadd.f32 -1.4531521, %v393_v53  ;;  %v539_v31 = vsub.f32 0.0, %v1211_v11 }
 0x12f   :  { %v658_v16 = vmul.f32 %v642_v37, %v242_v19  ;;  %v1225_v6 = vpop.eup %810  ;;  %v404_v27 = vadd.f32 -1.4531521, %v388_v0  ;;  %818 = vrcp.f32 %v347_v26  ;;  %vm281_vm0 = vcmp.ge.f32.partialorder %v1148_v55, 0.0 }
 0x130   :  { %v506_v38 = vadd.f32 0.2548296, %v490_v23  ;;  %v481_v25 = vmul.f32 %v1180_v29, %v465_v18  ;;  %v425_v17 = vmul.f32 %v1203_v46, %v409_v60  ;;  %v396_v57 = vmul.f32 1.0614054, %v1225_v6  ;;  %v813_v20 = vpop.eup %812 }
 0x131   :  { %675 = vst.msk [vmem:[%s1311_s3 + $0x28] sm:$0xff] %vm669_vm8, %v658_v16  ;;  %820 = vpow2.f32 %v571_v32  ;;  %v241_v18 = vmul.f32 0.5, %v1092_v28  ;;  %v555_v28 = vmul.f32 %v539_v31, %v1211_v11  ;;  %vm276_vm1 = vcmp.ge.f32.partialorder %v1155_v58, 0.0 }
 0x132   :  { %v522_v33 = vmul.f32 %v1170_v62, %v506_v38  ;;  %v497_v42 = vadd.f32 0.2548296, %v481_v25  ;;  %v441_v44 = vadd.f32 1.4214138, %v425_v17  ;;  %v420_v62 = vmul.f32 %v1213_v56, %v404_v27 }
 0x133   :  { %v412_v35 = vadd.f32 -1.4531521, %v396_v57  ;;  %v1238_v10 = vpop.eup %814  ;;  %822 = vpow2.f32 %v587_v36  ;;  %v297_v61 = vsel %vm281_vm0, 1.0, %v829_v7  ;;  %v292_v36 = vsel %vm276_vm1, 1.0, %v829_v7 }
 0x134   :  { %v602_v8 = vmul.f32 %v809_v50, %v522_v33  ;;  %v513_v9 = vmul.f32 %v1180_v29, %v497_v42  ;;  %v457_v40 = vmul.f32 %v1203_v46, %v441_v44  ;;  %v436_v14 = vadd.f32 1.4214138, %v420_v62 }
 0x135   :  { %v428_v2 = vmul.f32 %v1225_v6, %v412_v35  ;;  %v250_v29 = vmul.f32 0.5, %v1039_v52  ;;  %v387_v53 = vmul.f32 1.0614054, %v1238_v10  ;;  %v817_v52 = vpop.eup %816  ;;  %v569_v33 = vmul.f32 1.442695, %v547_v54 }
 0x136   :  { %v618_v39 = vsub.f32 1.0, %v602_v8  ;;  %v593_v34 = vmul.f32 %v813_v20, %v513_v9  ;;  %v473_v51 = vadd.f32 -0.28449672, %v457_v40  ;;  %v452_v19 = vmul.f32 %v1213_v56, %v436_v14 }
 0x137   :  { %v444_v23 = vadd.f32 1.4214138, %v428_v2  ;;  %v403_v60 = vadd.f32 -1.4531521, %v387_v53  ;;  %824 = vpow2.f32 %v569_v33  ;;  %v585_v40 = vmul.f32 1.442695, %v555_v28 }
 0x138   :  { %v634_v13 = vmul.f32 %v618_v39, %v298_v30  ;;  %v609_v15 = vsub.f32 1.0, %v593_v34  ;;  %v489_v37 = vmul.f32 %v1203_v46, %v473_v51  ;;  %v468_v21 = vadd.f32 -0.28449672, %v452_v19 }
 0x139   :  { %v460_v38 = vmul.f32 %v1225_v6, %v444_v23  ;;  %v819_v25 = vpop.eup %818  ;;  %v419_v27 = vmul.f32 %v1238_v10, %v403_v60  ;;  %v249_v14 = vmul.f32 0.5, %v1137_v48  ;;  %vm284_vm2 = vcmp.ge.f32.partialorder %v1168_v12, 0.0 }
 0x13a   :  { %v650_v3 = vadd.f32 1.0, %v634_v13  ;;  %v625_v16 = vmul.f32 %v609_v15, %v289_v4  ;;  %v505_v22 = vadd.f32 0.2548296, %v489_v37  ;;  %v484_v43 = vmul.f32 %v1213_v56, %v468_v21 }
 0x13b   :  { %v476_v24 = vadd.f32 -0.28449672, %v460_v38  ;;  %v395_v8 = vmul.f32 1.0614054, %v819_v25  ;;  %v821_v42 = vpop.eup %820  ;;  %v435_v44 = vadd.f32 1.4214138, %v419_v27  ;;  %826 = vpow2.f32 %v585_v40 }
 0x13c   :  { %v666_v45 = vmul.f32 %v650_v3, %v250_v29  ;;  %v641_v50 = vadd.f32 1.0, %v625_v16  ;;  %v521_v0 = vmul.f32 %v1203_v46, %v505_v22  ;;  %v500_v17 = vadd.f32 0.2548296, %v484_v43 }
 0x13d   :  { %v492_v26 = vmul.f32 %v1225_v6, %v476_v24  ;;  %v411_v11 = vadd.f32 -1.4531521, %v395_v8  ;;  %v451_v9 = vmul.f32 %v1238_v10, %v435_v44  ;;  %v823_v30 = vpop.eup %822  ;;  %v244_v48 = vmul.f32 0.5, %v1144_v59 }
 0x13e   :  { %683 = vst.msk [vmem:[%s1311_s3 + $0x68] sm:$0xff] %vm669_vm8, %v666_v45  ;;  %v657_v32 = vmul.f32 %v641_v50, %v241_v18  ;;  %v601_v49 = vmul.f32 %v817_v52, %v521_v0  ;;  %v516_v46 = vmul.f32 %v1213_v56, %v500_v17  ;;  %v300_v58 = vsel %vm284_vm2, 1.0, %v829_v7 }
 0x13f   :  { %v508_v62 = vadd.f32 0.2548296, %v492_v26  ;;  %v427_v20 = vmul.f32 %v819_v25, %v411_v11  ;;  %v467_v34 = vadd.f32 -0.28449672, %v451_v9  ;;  %v252_v31 = vmul.f32 0.5, %v1159_v5 }
 0x140   :  { %674 = vst.msk [vmem:[%s1311_s3 + $0x20] sm:$0xff] %vm669_vm8, %v657_v32  ;;  %v617_v57 = vsub.f32 1.0, %v601_v49  ;;  %v596_v39 = vmul.f32 %v821_v42, %v516_v46  ;;  %vm275_vm3 = vcmp.ge.f32.partialorder %v1184_v63, 0.0  ;;  %vm283_vm4 = vcmp.ge.f32.partialorder %v1201_v41, 0.0 }
 0x141   :  { %v524_v56 = vmul.f32 %v1225_v6, %v508_v62  ;;  %v443_v2 = vadd.f32 1.4214138, %v427_v20  ;;  %v483_v4 = vmul.f32 %v1238_v10, %v467_v34  ;;  %v825_v53 = vpop.eup %824  ;;  %v291_v5 = vsel %vm275_vm3, 1.0, %v829_v7 }
 0x142   :  { %v633_v35 = vmul.f32 %v617_v57, %v297_v61  ;;  %v612_v13 = vsub.f32 1.0, %v596_v39  ;;  %v243_v50 = vmul.f32 0.5, %v1174_v1  ;;  %v299_v33 = vsel %vm283_vm4, 1.0, %v829_v7 }
 0x143   :  { %v604_v55 = vmul.f32 %v823_v30, %v524_v56  ;;  %v459_v54 = vmul.f32 %v819_v25, %v443_v2  ;;  %v499_v15 = vadd.f32 0.2548296, %v483_v4 }
 0x144   :  { %v649_v51 = vadd.f32 1.0, %v633_v35  ;;  %v628_v29 = vmul.f32 %v612_v13, %v292_v36 }
 0x145   :  { %v620_v19 = vsub.f32 1.0, %v604_v55  ;;  %v475_v37 = vadd.f32 -0.28449672, %v459_v54  ;;  %v515_v21 = vmul.f32 %v1238_v10, %v499_v15  ;;  %v827_v18 = vpop.eup %826 }
 0x146   :  { %v665_v6 = vmul.f32 %v649_v51, %v249_v14  ;;  %v644_v3 = vadd.f32 1.0, %v628_v29 }
 0x147   :  { %v636_v12 = vmul.f32 %v620_v19, %v300_v58  ;;  %v491_v45 = vmul.f32 %v819_v25, %v475_v37  ;;  %v595_v59 = vmul.f32 %v825_v53, %v515_v21 }
 0x148   :  { %682 = vst.msk [vmem:[%s1311_s3 + $0x60] sm:$0xff] %vm669_vm8, %v665_v6  ;;  %v660_v23 = vmul.f32 %v644_v3, %v244_v48 }
 0x149   :  { %v652_v52 = vadd.f32 1.0, %v636_v12  ;;  %v507_v22 = vadd.f32 0.2548296, %v491_v45  ;;  %v611_v38 = vsub.f32 1.0, %v595_v59 }
 0x14a   :  { %677 = vst.msk [vmem:[%s1311_s3 + $0x38] sm:$0xff] %vm669_vm8, %v660_v23 }
 0x14b   :  { %v668_v16 = vmul.f32 %v652_v52, %v252_v31  ;;  %v523_v10 = vmul.f32 %v819_v25, %v507_v22  ;;  %v627_v43 = vmul.f32 %v611_v38, %v291_v5  ;;  %v251_v25 = vmul.f32 0.5, %v1194_v47 }
 0x14d   :  { %685 = vst.msk [vmem:[%s1311_s3 + $0x78] sm:$0xff] %vm669_vm8, %v668_v16  ;;  %v603_v60 = vmul.f32 %v827_v18, %v523_v10  ;;  %v643_v63 = vadd.f32 1.0, %v627_v43 }
 0x14f   :  { %v619_v0 = vsub.f32 1.0, %v603_v60  ;;  %v659_v24 = vmul.f32 %v643_v63, %v243_v50 }
 0x151   :  { %v635_v17 = vmul.f32 %v619_v0, %v299_v33  ;;  %676 = vst.msk [vmem:[%s1311_s3 + $0x30] sm:$0xff] %vm669_vm8, %v659_v24 }
 0x153   :  { %v651_v27 = vadd.f32 1.0, %v635_v17 }
 0x155   :  { %v667_v28 = vmul.f32 %v651_v27, %v251_v25 }
 0x157   :  { %684 = vst.msk [vmem:[%s1311_s3 + $0x70] sm:$0xff] %vm669_vm8, %v667_v28 }

// kernel: liconvformer_forward.7
= control target key start
LH: loop header
LB: loop body
LE: loop exit
PB: predicated region body
PF: predicated region fallthrough
CT: control target
= control target key end

     0   :  { %vm99_vm0 = vcmask 261120   ;;  %vm265_vm1 = vcmask 523264   ;;  %vm1135_vm6 = vcmask 7168   ;;  %vm1840_vm9 = vcmask 130048   ;;  %s3285_s1 = inlined_call_operand.vmem [shape: f32[32,64], index: 1, kind: input, shape index: {}]   ;;  %s3286_s0 = inlined_call_operand.vmem [shape: f32[64,32], index: 0, kind: input, shape index: {}]   ;;  %s3287_s3 = inlined_call_operand.vmem [shape: f32[288,64], index: 3, kind: input, shape index: {}]   ;;  %s3288_s2 = inlined_call_operand.vmem [shape: f32[1,64], index: 2, kind: input, shape index: {}]   ;;  %s3289_s4 = inlined_call_operand.vmem [shape: f32[9,64], index: 4, kind: input, shape index: {}]   ;;  %s3290_s5 = inlined_call_operand.vmem [shape: f32[1,64], index: 5, kind: input, shape index: {}]   ;;  %s3291_s8 = inlined_call_operand.vmem [shape: f32[64,1], index: 8, kind: input, shape index: {}]   ;;  %s3292_s10 = inlined_call_operand.vmem [shape: f32[64,128], index: 10, kind: input, shape index: {}]   ;;  %s3293_s9 = inlined_call_operand.<no memory space> [shape: f32[1,1], index: 9, kind: input, shape index: {}]   ;;  %s3294_s6 = inlined_call_operand.vmem [shape: f32[1,64], index: 6, kind: input, shape index: {}]   ;;  %s3295_s7 = inlined_call_operand.vmem [shape: f32[1,64], index: 7, kind: input, shape index: {}]   ;;  %s3296_s12 = inlined_call_operand.vmem [shape: f32[32,32], index: 12, kind: input, shape index: {}]   ;;  %s3297_s11 = inlined_call_operand.vmem [shape: f32[1,128], index: 11, kind: input, shape index: {}]   ;;  %s3298_s15 = inlined_call_operand.<no memory space> [shape: f32[1,1], index: 15, kind: input, shape index: {}]   ;;  %s3299_s13 = inlined_call_operand.vmem [shape: f32[64,64], index: 13, kind: input, shape index: {}]   ;;  %s3300_s14 = inlined_call_operand.vmem [shape: f32[1,64], index: 14, kind: input, shape index: {}]   ;;  %s3301_s22 = inlined_call_operand.<no memory space> [shape: f32[1,1], index: 22, kind: input, shape index: {}]   ;;  %s3302_s18 = inlined_call_operand.vmem [shape: f32[64,16], index: 18, kind: input, shape index: {}]   ;;  %s3303_s20 = inlined_call_operand.vmem [shape: f32[16,64], index: 20, kind: input, shape index: {}]   ;;  %s3304_s16 = inlined_call_operand.vmem [shape: f32[1,64], index: 16, kind: input, shape index: {}]   ;;  %s3305_s17 = inlined_call_operand.vmem [shape: f32[1,64], index: 17, kind: input, shape index: {}]   ;;  %s3306_s19 = inlined_call_operand.vmem [shape: f32[1,16], index: 19, kind: input, shape index: {}]   ;;  %s3307_s21 = inlined_call_operand.vmem [shape: f32[1,64], index: 21, kind: input, shape index: {}]   ;;  %s3308_s23 = inlined_call_operand.vmem [shape: f32[32,64], index: 23, kind: output, shape index: {}]  }
   0x1   :  { %3315 = sst [smem:[#allocation5_spill]] %s3285_s1 }
   0x2   :  { %3316 = sst [smem:[#allocation6_spill]] %s3286_s0  ;;  %s3323_s24 = sld [smem:[#allocation5_spill]] }
   0x3   :  { %3317 = sst [smem:[#allocation7_spill]] %s3287_s3  ;;  %s3324_s28 = sld [smem:[#allocation6_spill]] }
   0x4   :  { %3318 = sst [smem:[#allocation8_spill]] %s3288_s2  ;;  %s3325_s1 = sld [smem:[#allocation7_spill]] }
   0x5   :  { %3319 = sst [smem:[#allocation9_spill]] %s3289_s4 }
   0x6   :  { %3320 = sst [smem:[#allocation10_spill]] %s3290_s5  ;;  %s3327_s5 = sld [smem:[#allocation9_spill]] }
   0x7   :  { %3321 = sst [smem:[#allocation11_spill]] %s3291_s8  ;;  %s3328_s8 = sld [smem:[#allocation10_spill]] }
   0x8   :  { %3322 = sst [smem:[#allocation12_spill]] %s3292_s10  ;;  %v88_v0 = vld [vmem:[%s3323_s24] sm:$0xff]  ;;  %v89_v1 = vld [vmem:[%s3323_s24 + $0x8] sm:$0xff]  ;;  %v90_v2 = vld [vmem:[%s3323_s24 + $0x10] sm:$0xff]  ;;  %s3329_s29 = sld [smem:[#allocation11_spill]] }
   0x9   :  { %v2392_v3 = vpack.c.bf16 %v89_v1, %v88_v0  ;;  %v91_v4 = vld [vmem:[%s3323_s24 + $0x18] sm:$0xff]  ;;  %v80_v5 = vld [vmem:[%s3324_s28] sm:$0xff]  ;;  %v81_v7 = vld [vmem:[%s3324_s28 + $0x8] sm:$0xff]  ;;  %s3326_s24 = sld [smem:[#allocation8_spill]]  ;;  %s3330_s30 = sld [smem:[#allocation12_spill]] }
   0xa   :  { %v2396_v6 = vpack.c.bf16 %v91_v4, %v90_v2  ;;  %2184 = vmatprep.mubr.msk.f32.mxu0 %vm99_vm0, %v80_v5  ;;  %v82_v8 = vld [vmem:[%s3324_s28 + $0x10] sm:$0xff]  ;;  %v83_v9 = vld [vmem:[%s3324_s28 + $0x18] sm:$0xff]  ;;  %v84_v10 = vld [vmem:[%s3324_s28 + $0x20] sm:$0xff] }
   0xb   :  { %2393 = vmatprep.subr.bf16.mxu0 %v2392_v3  ;;  %v85_v11 = vld [vmem:[%s3324_s28 + $0x28] sm:$0xff]  ;;  %v86_v12 = vld [vmem:[%s3324_s28 + $0x30] sm:$0xff]  ;;  %v87_v13 = vld [vmem:[%s3324_s28 + $0x38] sm:$0xff] }
   0xc   :  { %2395 = vmatpush3.bf16.msra.mxu0 %v2392_v3  ;;  %v229_v14 = vld [vmem:[%s3325_s1] sm:$0xff]  ;;  %v230_v36 = vld [vmem:[%s3325_s1 + $0x8] sm:$0xff]  ;;  %v231_v37 = vld [vmem:[%s3325_s1 + $0x10] sm:$0xff] }
   0xd   :  { %2397 = vmatprep.subr.bf16.mxu0 %v2396_v6  ;;  %2212 = vmatprep.mubr.msk.f32.mxu1 %vm265_vm1, %v229_v14  ;;  %v232_v38 = vld [vmem:[%s3325_s1 + $0x18] sm:$0xff]  ;;  %v233_v39 = vld [vmem:[%s3325_s1 + $0x20] sm:$0xff]  ;;  %v234_v40 = vld [vmem:[%s3325_s1 + $0x28] sm:$0xff] }
   0xe   :  { %v235_v41 = vld [vmem:[%s3325_s1 + $0x30] sm:$0xff]  ;;  %v236_v42 = vld [vmem:[%s3325_s1 + $0x38] sm:$0xff]  ;;  %v237_v43 = vld [vmem:[%s3325_s1 + $0x40] sm:$0xff] }
   0xf   :  { %v1964_v15 = vld [vmem:[%s3326_s24] ss:$0 sm:$0xff]  ;;  %v238_v44 = vld [vmem:[%s3325_s1 + $0x48] sm:$0xff]  ;;  %v239_v45 = vld [vmem:[%s3325_s1 + $0x50] sm:$0xff] }
  0x10   :  { %2399 = vmatpush3.bf16.msra.mxu0 %v2396_v6  ;;  %v240_v46 = vld [vmem:[%s3325_s1 + $0x58] sm:$0xff]  ;;  %v241_v47 = vld [vmem:[%s3325_s1 + $0x60] sm:$0xff]  ;;  %v242_v48 = vld [vmem:[%s3325_s1 + $0x68] sm:$0xff] }
  0x11   :  { %v243_v49 = vld [vmem:[%s3325_s1 + $0x70] sm:$0xff]  ;;  %v244_v50 = vld [vmem:[%s3325_s1 + $0x78] sm:$0xff]  ;;  %v245_v51 = vld [vmem:[%s3325_s1 + $0x80] sm:$0xff] }
  0x12   :  { %v246_v52 = vld [vmem:[%s3325_s1 + $0x88] sm:$0xff]  ;;  %v247_v53 = vld [vmem:[%s3325_s1 + $0x90] sm:$0xff]  ;;  %v248_v54 = vld [vmem:[%s3325_s1 + $0x98] sm:$0xff] }
  0x13   :  { %2185 = vmatmul.mubr.msk.f32.vlgmr.msra.gmra.mrb[0].mxu0 %vm99_vm0, %v81_v7  ;;  %v249_v55 = vld [vmem:[%s3325_s1 + $0xa0] sm:$0xff]  ;;  %v250_v56 = vld [vmem:[%s3325_s1 + $0xa8] sm:$0xff]  ;;  %v251_v57 = vld [vmem:[%s3325_s1 + $0xb0] sm:$0xff]  ;;  %v621_v7 = vlaneseq }
  0x14   :  { %2187 = vmatprep.mubr.msk.f32.mxu0 %vm99_vm0, %v82_v8  ;;  %v252_v58 = vld [vmem:[%s3325_s1 + $0xb8] sm:$0xff]  ;;  %v253_v59 = vld [vmem:[%s3325_s1 + $0xc0] sm:$0xff]  ;;  %v254_v60 = vld [vmem:[%s3325_s1 + $0xc8] sm:$0xff] }
  0x15   :  { %v255_v61 = vld [vmem:[%s3325_s1 + $0xd0] sm:$0xff]  ;;  %v256_v62 = vld [vmem:[%s3325_s1 + $0xd8] sm:$0xff]  ;;  %v257_v63 = vld [vmem:[%s3325_s1 + $0xe0] sm:$0xff]  ;;  %v2883_v8 = vshrl.u32 %v621_v7, 7 }
  0x16   :  { %v258_v0 = vld [vmem:[%s3325_s1 + $0xe8] sm:$0xff]  ;;  %v259_v1 = vld [vmem:[%s3325_s1 + $0xf0] sm:$0xff]  ;;  %v260_v2 = vld [vmem:[%s3325_s1 + $0xf8] sm:$0xff] }
  0x17   :  { %2188 = vmatmul.mubr.msk.f32.gmra.mrb[2].mxu0 %vm99_vm0, %v83_v9  ;;  %v261_v3 = vld [vmem:[%s3325_s1 + $0x100] sm:$0xff]  ;;  %v262_v4 = vld [vmem:[%s3325_s1 + $0x108] sm:$0xff]  ;;  %v263_v5 = vld [vmem:[%s3325_s1 + $0x110] sm:$0xff] }
  0x18   :  { %2190 = vmatprep.mubr.msk.f32.mxu0 %vm99_vm0, %v84_v10  ;;  %v264_v6 = vld [vmem:[%s3325_s1 + $0x118] sm:$0xff]  ;;  %v623_v10 = vsub.s32 0, %v2883_v8 }
  0x1b   :  { %2191 = vmatmul.mubr.msk.f32.gmra.mrb[4].mxu0 %vm99_vm0, %v85_v11 }
  0x1c   :  { %2193 = vmatprep.mubr.msk.f32.mxu0 %vm99_vm0, %v86_v12  ;;  %v631_v12 = vsub.s32 1, %v2883_v8 }
  0x1f   :  { %2194 = vmatmul.mubr.msk.f32.gmra.mrb[6].mxu0 %vm99_vm0, %v87_v13  ;;  %v2890_v13 = vld [vmem:[%s3327_s5] sm:$0xff] }
  0xe6   :  { %v2186_v16 = vpop.f32.mrb[0].mxu0 }
  0xe7   :  { %v196_v17 = vadd.f32 %v2186_v16, %v1964_v15  ;;  %v190_v18 = vpop.f32.mrb[1].mxu0 }
  0xe8   :  { %v191_v19 = vadd.f32 %v1964_v15, %v190_v18 }
  0xea   :  { %v2189_v20 = vpop.f32.mrb[2].mxu0  ;;  %v2400_v21 = vpack.c.bf16 %v196_v17, %v191_v19  ;;  %v632_v17 = vrot.slane %v2890_v13, %v631_v12 }
  0xeb   :  { %v206_v22 = vadd.f32 %v2189_v20, %v1964_v15  ;;  %v200_v23 = vpop.f32.mrb[3].mxu0 }
  0xec   :  { %v201_v24 = vadd.f32 %v1964_v15, %v200_v23  ;;  %2401 = vmatprep.subr.bf16.mxu1 %v2400_v21 }
  0xed   :  { %2403 = vmatpush3.bf16.msra.mxu1 %v2400_v21 }
  0xee   :  { %v2404_v25 = vpack.c.bf16 %v206_v22, %v201_v24  ;;  %v2192_v26 = vpop.f32.mrb[4].mxu0  ;;  %v643_v22 = vsub.s32 2, %v2883_v8 }
  0xef   :  { %v216_v27 = vadd.f32 %v2192_v26, %v1964_v15  ;;  %v210_v28 = vpop.f32.mrb[5].mxu0 }
  0xf0   :  { %v211_v29 = vadd.f32 %v1964_v15, %v210_v28  ;;  %2405 = vmatprep.subr.bf16.mxu1 %v2404_v25 }
  0xf1   :  { %2407 = vmatpush3.bf16.msra.mxu1 %v2404_v25 }
  0xf2   :  { %v2408_v30 = vpack.c.bf16 %v216_v27, %v211_v29  ;;  %v2195_v31 = vpop.f32.mrb[6].mxu0 }
  0xf3   :  { %v226_v32 = vadd.f32 %v2195_v31, %v1964_v15  ;;  %v220_v33 = vpop.f32.mrb[7].mxu0  ;;  %v644_v31 = vrot.slane %v2890_v13, %v643_v22 }
  0xf4   :  { %v221_v34 = vadd.f32 %v1964_v15, %v220_v33  ;;  %2409 = vmatprep.subr.bf16.mxu1 %v2408_v30  ;;  %v624_v15 = vrot.slane %v2890_v13, %v623_v10 }
  0xf5   :  { %2411 = vmatpush3.bf16.msra.mxu1 %v2408_v30 }
  0xf6   :  { %v2412_v35 = vpack.c.bf16 %v226_v32, %v221_v34 }
  0xf8   :  { %2413 = vmatprep.subr.bf16.mxu1 %v2412_v35 }
  0xf9   :  { %2415 = vmatpush3.bf16.msra.mxu1 %v2412_v35 }
  0xfc   :  { %2213 = vmatmul.mubr.msk.f32.vlgmr.msra.gmra.mrb[0].mxu1 %vm265_vm1, %v230_v36 }
  0xfd   :  { %2215 = vmatprep.mubr.msk.f32.mxu1 %vm265_vm1, %v231_v37 }
 0x100   :  { %2216 = vmatmul.mubr.msk.f32.gmra.mrb[2].mxu1 %vm265_vm1, %v232_v38 }
 0x101   :  { %2218 = vmatprep.mubr.msk.f32.mxu1 %vm265_vm1, %v233_v39  ;;  %v655_v39 = vsub.s32 3, %v2883_v8 }
 0x104   :  { %2219 = vmatmul.mubr.msk.f32.gmra.mrb[4].mxu1 %vm265_vm1, %v234_v40 }
 0x105   :  { %2221 = vmatprep.mubr.msk.f32.mxu1 %vm265_vm1, %v235_v41 }
 0x108   :  { %2222 = vmatmul.mubr.msk.f32.gmra.mrb[6].mxu1 %vm265_vm1, %v236_v42 }
 0x109   :  { %2224 = vmatprep.mubr.msk.f32.mxu1 %vm265_vm1, %v237_v43 }
 0x10c   :  { %2225 = vmatmul.mubr.msk.f32.gmra.mrb[8].mxu1 %vm265_vm1, %v238_v44 }
 0x10d   :  { %2227 = vmatprep.mubr.msk.f32.mxu1 %vm265_vm1, %v239_v45 }
 0x110   :  { %2228 = vmatmul.mubr.msk.f32.gmra.mrb[10].mxu1 %vm265_vm1, %v240_v46  ;;  %v656_v46 = vrot.slane %v2890_v13, %v655_v39 }
 0x111   :  { %2230 = vmatprep.mubr.msk.f32.mxu1 %vm265_vm1, %v241_v47 }
 0x114   :  { %2231 = vmatmul.mubr.msk.f32.gmra.mrb[12].mxu1 %vm265_vm1, %v242_v48 }
 0x115   :  { %2233 = vmatprep.mubr.msk.f32.mxu1 %vm265_vm1, %v243_v49 }
 0x118   :  { %2234 = vmatmul.mubr.msk.f32.gmra.mrb[14].mxu1 %vm265_vm1, %v244_v50 }
 0x119   :  { %2236 = vmatprep.mubr.msk.f32.mxu1 %vm265_vm1, %v245_v51 }
 0x11c   :  { %2237 = vmatmul.mubr.msk.f32.gmra.mrb[16].mxu1 %vm265_vm1, %v246_v52 }
 0x11d   :  { %2239 = vmatprep.mubr.msk.f32.mxu1 %vm265_vm1, %v247_v53  ;;  %v667_v53 = vsub.s32 4, %v2883_v8 }
 0x120   :  { %2240 = vmatmul.mubr.msk.f32.gmra.mrb[18].mxu1 %vm265_vm1, %v248_v54 }
 0x121   :  { %2242 = vmatprep.mubr.msk.f32.mxu1 %vm265_vm1, %v249_v55 }
 0x124   :  { %2243 = vmatmul.mubr.msk.f32.gmra.mrb[20].mxu1 %vm265_vm1, %v250_v56 }
 0x125   :  { %2245 = vmatprep.mubr.msk.f32.mxu1 %vm265_vm1, %v251_v57 }
 0x128   :  { %2246 = vmatmul.mubr.msk.f32.gmra.mrb[22].mxu1 %vm265_vm1, %v252_v58 }
 0x129   :  { %2248 = vmatprep.mubr.msk.f32.mxu1 %vm265_vm1, %v253_v59 }
 0x12c   :  { %2249 = vmatmul.mubr.msk.f32.gmra.mrb[24].mxu1 %vm265_vm1, %v254_v60  ;;  %v668_v60 = vrot.slane %v2890_v13, %v667_v53  ;;  %v2009_v53 = vld [vmem:[%s3327_s5 + $0x8] ss:$0 sm:$0xff] }
 0x12d   :  { %2251 = vmatprep.mubr.msk.f32.mxu1 %vm265_vm1, %v255_v61 }
 0x130   :  { %2252 = vmatmul.mubr.msk.f32.gmra.mrb[26].mxu1 %vm265_vm1, %v256_v62 }
 0x131   :  { %2254 = vmatprep.mubr.msk.f32.mxu1 %vm265_vm1, %v257_v63 }
 0x134   :  { %2255 = vmatmul.mubr.msk.f32.gmra.mrb[28].mxu1 %vm265_vm1, %v258_v0 }
 0x135   :  { %2257 = vmatprep.mubr.msk.f32.mxu1 %vm265_vm1, %v259_v1 }
 0x138   :  { %2258 = vmatmul.mubr.msk.f32.gmra.mrb[30].mxu1 %vm265_vm1, %v260_v2 }
 0x139   :  { %2260 = vmatprep.mubr.msk.f32.mxu1 %vm265_vm1, %v261_v3  ;;  %v679_v3 = vsub.s32 5, %v2883_v8 }
 0x13c   :  { %2261 = vmatmul.mubr.msk.f32.gmra.mrb[32].mxu1 %vm265_vm1, %v262_v4 }
 0x13d   :  { %2263 = vmatprep.mubr.msk.f32.mxu1 %vm265_vm1, %v263_v5 }
 0x140   :  { %2264 = vmatmul.mubr.msk.f32.gmra.mrb[34].mxu1 %vm265_vm1, %v264_v6 }
 0x1cf   :  { %v2214_v9 = vpop.f32.mrb[0].mxu1 }
 0x1d0   :  { %v440_v11 = vpop.f32.mrb[1].mxu1  ;;  %v626_v19 = vmul.f32 %v2214_v9, %v624_v15 }
 0x1d1   :  { %v625_v23 = vmul.f32 %v624_v15, %v440_v11  ;;  %v680_v11 = vrot.slane %v2890_v13, %v679_v3 }
 0x1d3   :  { %v2217_v14 = vpop.f32.mrb[2].mxu1 }
 0x1d4   :  { %v450_v16 = vpop.f32.mrb[3].mxu1  ;;  %v628_v28 = vmul.f32 %v2217_v14, %v624_v15 }
 0x1d5   :  { %v627_v32 = vmul.f32 %v624_v15, %v450_v16 }
 0x1d7   :  { %v2220_v18 = vpop.f32.mrb[4].mxu1 }
 0x1d8   :  { %v634_v20 = vmul.f32 %v2220_v18, %v632_v17  ;;  %v460_v21 = vpop.f32.mrb[5].mxu1 }
 0x1d9   :  { %v633_v24 = vmul.f32 %v632_v17, %v460_v21 }
 0x1da   :  { %v638_v25 = vadd.f32 %v634_v20, %v626_v19  ;;  %v691_v19 = vsub.s32 6, %v2883_v8 }
 0x1db   :  { %v637_v26 = vadd.f32 %v633_v24, %v625_v23  ;;  %v2223_v27 = vpop.f32.mrb[6].mxu1 }
 0x1dc   :  { %v636_v29 = vmul.f32 %v2223_v27, %v632_v17  ;;  %v470_v30 = vpop.f32.mrb[7].mxu1 }
 0x1dd   :  { %v635_v33 = vmul.f32 %v632_v17, %v470_v30 }
 0x1de   :  { %v640_v34 = vadd.f32 %v636_v29, %v628_v28 }
 0x1df   :  { %v639_v35 = vadd.f32 %v635_v33, %v627_v32  ;;  %v2226_v36 = vpop.f32.mrb[8].mxu1  ;;  %v703_v33 = vsub.s32 7, %v2883_v8 }
 0x1e0   :  { %v646_v37 = vmul.f32 %v2226_v36, %v644_v31  ;;  %v480_v38 = vpop.f32.mrb[9].mxu1 }
 0x1e1   :  { %v645_v40 = vmul.f32 %v644_v31, %v480_v38 }
 0x1e2   :  { %v650_v41 = vadd.f32 %v646_v37, %v638_v25 }
 0x1e3   :  { %v649_v42 = vadd.f32 %v645_v40, %v637_v26  ;;  %v2229_v43 = vpop.f32.mrb[10].mxu1  ;;  %v692_v26 = vrot.slane %v2890_v13, %v691_v19  ;;  %v704_v40 = vrot.slane %v2890_v13, %v703_v33 }
 0x1e4   :  { %v648_v44 = vmul.f32 %v2229_v43, %v644_v31  ;;  %v490_v45 = vpop.f32.mrb[11].mxu1 }
 0x1e5   :  { %v647_v47 = vmul.f32 %v644_v31, %v490_v45 }
 0x1e6   :  { %v652_v48 = vadd.f32 %v648_v44, %v640_v34 }
 0x1e7   :  { %v651_v49 = vadd.f32 %v647_v47, %v639_v35  ;;  %v2232_v50 = vpop.f32.mrb[12].mxu1 }
 0x1e8   :  { %v658_v51 = vmul.f32 %v2232_v50, %v656_v46  ;;  %v500_v52 = vpop.f32.mrb[13].mxu1 }
 0x1e9   :  { %v657_v54 = vmul.f32 %v656_v46, %v500_v52 }
 0x1ea   :  { %v662_v55 = vadd.f32 %v658_v51, %v650_v41 }
 0x1eb   :  { %v661_v56 = vadd.f32 %v657_v54, %v649_v42  ;;  %v2235_v57 = vpop.f32.mrb[14].mxu1 }
 0x1ec   :  { %v660_v58 = vmul.f32 %v2235_v57, %v656_v46  ;;  %v510_v59 = vpop.f32.mrb[15].mxu1 }
 0x1ed   :  { %v659_v61 = vmul.f32 %v656_v46, %v510_v59 }
 0x1ee   :  { %v664_v62 = vadd.f32 %v660_v58, %v652_v48  ;;  %v2010_v58 = vld [vmem:[%s3328_s8] ss:$0 sm:$0xff] }
 0x1ef   :  { %v663_v63 = vadd.f32 %v659_v61, %v651_v49  ;;  %v2238_v0 = vpop.f32.mrb[16].mxu1 }
 0x1f0   :  { %v670_v1 = vmul.f32 %v2238_v0, %v668_v60  ;;  %v520_v2 = vpop.f32.mrb[17].mxu1 }
 0x1f1   :  { %v669_v4 = vmul.f32 %v668_v60, %v520_v2 }
 0x1f2   :  { %v674_v5 = vadd.f32 %v670_v1, %v662_v55 }
 0x1f3   :  { %v673_v6 = vadd.f32 %v669_v4, %v661_v56  ;;  %v2241_v7 = vpop.f32.mrb[18].mxu1 }
 0x1f4   :  { %v672_v9 = vmul.f32 %v2241_v7, %v668_v60  ;;  %v530_v10 = vpop.f32.mrb[19].mxu1 }
 0x1f5   :  { %v671_v12 = vmul.f32 %v668_v60, %v530_v10 }
 0x1f6   :  { %v676_v14 = vadd.f32 %v672_v9, %v664_v62 }
 0x1f7   :  { %v675_v15 = vadd.f32 %v671_v12, %v663_v63  ;;  %v2244_v16 = vpop.f32.mrb[20].mxu1 }
 0x1f8   :  { %v682_v17 = vmul.f32 %v2244_v16, %v680_v11  ;;  %v540_v18 = vpop.f32.mrb[21].mxu1 }
 0x1f9   :  { %v681_v20 = vmul.f32 %v680_v11, %v540_v18 }
 0x1fa   :  { %v686_v21 = vadd.f32 %v682_v17, %v674_v5 }
 0x1fb   :  { %v685_v22 = vadd.f32 %v681_v20, %v673_v6  ;;  %v2247_v23 = vpop.f32.mrb[22].mxu1 }
 0x1fc   :  { %v684_v24 = vmul.f32 %v2247_v23, %v680_v11  ;;  %v550_v25 = vpop.f32.mrb[23].mxu1 }
 0x1fd   :  { %v683_v27 = vmul.f32 %v680_v11, %v550_v25 }
 0x1fe   :  { %v688_v28 = vadd.f32 %v684_v24, %v676_v14 }
 0x1ff   :  { %v687_v29 = vadd.f32 %v683_v27, %v675_v15  ;;  %v2250_v30 = vpop.f32.mrb[24].mxu1 }
 0x200   :  { %v694_v31 = vmul.f32 %v2250_v30, %v692_v26  ;;  %v560_v32 = vpop.f32.mrb[25].mxu1 }
 0x201   :  { %v693_v34 = vmul.f32 %v692_v26, %v560_v32 }
 0x202   :  { %v698_v35 = vadd.f32 %v694_v31, %v686_v21 }
 0x203   :  { %v697_v36 = vadd.f32 %v693_v34, %v685_v22  ;;  %v2253_v37 = vpop.f32.mrb[26].mxu1 }
 0x204   :  { %v696_v38 = vmul.f32 %v2253_v37, %v692_v26  ;;  %v570_v39 = vpop.f32.mrb[27].mxu1 }
 0x205   :  { %v695_v41 = vmul.f32 %v692_v26, %v570_v39 }
 0x206   :  { %v700_v42 = vadd.f32 %v696_v38, %v688_v28 }
 0x207   :  { %v699_v43 = vadd.f32 %v695_v41, %v687_v29  ;;  %v2256_v44 = vpop.f32.mrb[28].mxu1 }
 0x208   :  { %v706_v45 = vmul.f32 %v2256_v44, %v704_v40  ;;  %v580_v46 = vpop.f32.mrb[29].mxu1 }
 0x209   :  { %v705_v47 = vmul.f32 %v704_v40, %v580_v46 }
 0x20a   :  { %v710_v48 = vadd.f32 %v706_v45, %v698_v35 }
 0x20b   :  { %v709_v49 = vadd.f32 %v705_v47, %v697_v36  ;;  %v2259_v50 = vpop.f32.mrb[30].mxu1 }
 0x20c   :  { %v708_v51 = vmul.f32 %v2259_v50, %v704_v40  ;;  %v590_v8 = vpop.f32.mrb[31].mxu1 }
 0x20d   :  { %v707_v52 = vmul.f32 %v704_v40, %v590_v8 }
 0x20e   :  { %v712_v54 = vadd.f32 %v708_v51, %v700_v42 }
 0x20f   :  { %v711_v55 = vadd.f32 %v707_v52, %v699_v43  ;;  %v2262_v13 = vpop.f32.mrb[32].mxu1 }
 0x210   :  { %v718_v56 = vmul.f32 %v2262_v13, %v2009_v53  ;;  %v600_v57 = vpop.f32.mrb[33].mxu1 }
 0x211   :  { %v717_v59 = vmul.f32 %v2009_v53, %v600_v57 }
 0x212   :  { %v722_v60 = vadd.f32 %v718_v56, %v710_v48 }
 0x213   :  { %v721_v61 = vadd.f32 %v717_v59, %v709_v49  ;;  %v2265_v62 = vpop.f32.mrb[34].mxu1 }
 0x214   :  { %v2912_v63 = vadd.f32 %v2010_v58, %v722_v60  ;;  %v720_v0 = vmul.f32 %v2265_v62, %v2009_v53  ;;  %v610_v1 = vpop.f32.mrb[35].mxu1 }
 0x215   :  { %v2914_v2 = vadd.f32 %v2010_v58, %v721_v61  ;;  %v719_v3 = vmul.f32 %v2009_v53, %v610_v1 }
 0x216   :  { %v2917_v4 = vmul.f32 0.70710677, %v2912_v63  ;;  %v724_v5 = vadd.f32 %v720_v0, %v712_v54 }
 0x217   :  { %v2920_v6 = vmul.f32 0.70710677, %v2914_v2  ;;  %v723_v7 = vadd.f32 %v719_v3, %v711_v55 }
 0x218   :  { %v753_v9 = vand.u32 2147483647, %v2917_v4  ;;  %v2923_v10 = vadd.f32 %v2010_v58, %v724_v5  ;;  %vm745_vm2 = vcmp.ge.f32.partialorder %v2917_v4, 0.0 }
 0x219   :  { %v752_v11 = vand.u32 2147483647, %v2920_v6  ;;  %v2926_v12 = vadd.f32 %v2010_v58, %v723_v7  ;;  %vm744_vm3 = vcmp.ge.f32.partialorder %v2920_v6, 0.0 }
 0x21a   :  { %v757_v14 = vmul.f32 0.3275911, %v753_v9  ;;  %v2929_v15 = vmul.f32 0.70710677, %v2923_v10  ;;  %v809_v26 = vsub.f32 0.0, %v753_v9 }
 0x21b   :  { %v756_v16 = vmul.f32 0.3275911, %v752_v11  ;;  %v2932_v17 = vmul.f32 0.70710677, %v2926_v12  ;;  %v808_v27 = vsub.f32 0.0, %v752_v11 }
 0x21c   :  { %v761_v18 = vadd.f32 1.0, %v757_v14  ;;  %v755_v19 = vand.u32 2147483647, %v2929_v15  ;;  %v813_v29 = vmul.f32 %v809_v26, %v753_v9  ;;  %vm747_vm4 = vcmp.ge.f32.partialorder %v2929_v15, 0.0 }
 0x21d   :  { %v760_v20 = vadd.f32 1.0, %v756_v16  ;;  %v754_v21 = vand.u32 2147483647, %v2932_v17  ;;  %v812_v32 = vmul.f32 %v808_v27, %v752_v11  ;;  %vm746_vm5 = vcmp.ge.f32.partialorder %v2932_v17, 0.0 }
 0x21e   :  { %2505 = vrcp.f32 %v761_v18  ;;  %v759_v22 = vmul.f32 0.3275911, %v755_v19  ;;  %v811_v30 = vsub.f32 0.0, %v755_v19  ;;  %v818_v38 = vmul.f32 1.442695, %v813_v29 }
 0x21f   :  { %2507 = vrcp.f32 %v760_v20  ;;  %v758_v23 = vmul.f32 0.3275911, %v754_v21  ;;  %v810_v33 = vsub.f32 0.0, %v754_v21  ;;  %v816_v42 = vmul.f32 1.442695, %v812_v32 }
 0x220   :  { %v763_v24 = vadd.f32 1.0, %v759_v22  ;;  %v815_v39 = vmul.f32 %v811_v30, %v755_v19  ;;  %v2569_v29 = vmov -1.0   ;;  %v737_v15 = vmul.f32 0.5, %v2912_v63 }
 0x221   :  { %v762_v25 = vadd.f32 1.0, %v758_v23  ;;  %v814_v43 = vmul.f32 %v810_v33, %v754_v21  ;;  %v738_v17 = vmul.f32 0.5, %v2926_v12 }
 0x222   :  { %2509 = vrcp.f32 %v763_v24  ;;  %v822_v50 = vmul.f32 1.442695, %v815_v39 }
 0x223   :  { %2511 = vrcp.f32 %v762_v25  ;;  %v820_v52 = vmul.f32 1.442695, %v814_v43 }
 0x224   :  { %2513 = vpow2.f32 %v818_v38 }
 0x225   :  { %2515 = vpow2.f32 %v816_v42 }
 0x226   :  { %2517 = vpow2.f32 %v822_v50 }
 0x227   :  { %2519 = vpow2.f32 %v820_v52 }
 0x228   :  { %v2506_v28 = vpop.eup %2505 }
 0x229   :  { %v2508_v31 = vpop.eup %2507  ;;  %v773_v34 = vmul.f32 1.0614054, %v2506_v28 }
 0x22a   :  { %v772_v35 = vmul.f32 1.0614054, %v2508_v31 }
 0x22b   :  { %v777_v36 = vadd.f32 -1.4531521, %v773_v34 }
 0x22c   :  { %v2510_v37 = vpop.eup %2509  ;;  %v776_v40 = vadd.f32 -1.4531521, %v772_v35  ;;  %v736_v35 = vmul.f32 0.5, %v2914_v2 }
 0x22d   :  { %v2512_v41 = vpop.eup %2511  ;;  %v781_v44 = vmul.f32 %v2506_v28, %v777_v36  ;;  %v775_v45 = vmul.f32 1.0614054, %v2510_v37 }
 0x22e   :  { %v780_v46 = vmul.f32 %v2508_v31, %v776_v40  ;;  %v774_v47 = vmul.f32 1.0614054, %v2512_v41  ;;  %v2514_v14 = vpop.eup %2513  ;;  %v751_v40 = vsel %vm747_vm4, 1.0, %v2569_v29 }
 0x22f   :  { %v785_v48 = vadd.f32 1.4214138, %v781_v44  ;;  %v779_v49 = vadd.f32 -1.4531521, %v775_v45  ;;  %v2516_v19 = vpop.eup %2515 }
 0x230   :  { %v784_v51 = vadd.f32 1.4214138, %v780_v46  ;;  %v778_v8 = vadd.f32 -1.4531521, %v774_v47  ;;  %v2518_v26 = vpop.eup %2517 }
 0x231   :  { %v789_v53 = vmul.f32 %v2506_v28, %v785_v48  ;;  %v783_v54 = vmul.f32 %v2510_v37, %v779_v49  ;;  %v2520_v32 = vpop.eup %2519  ;;  %v739_v48 = vmul.f32 0.5, %v2923_v10 }
 0x232   :  { %v788_v55 = vmul.f32 %v2508_v31, %v784_v51  ;;  %v782_v13 = vmul.f32 %v2512_v41, %v778_v8 }
 0x233   :  { %v793_v56 = vadd.f32 -0.28449672, %v789_v53  ;;  %v787_v57 = vadd.f32 1.4214138, %v783_v54 }
 0x234   :  { %v792_v58 = vadd.f32 -0.28449672, %v788_v55  ;;  %v786_v59 = vadd.f32 1.4214138, %v782_v13 }
 0x235   :  { %v797_v60 = vmul.f32 %v2506_v28, %v793_v56  ;;  %v791_v61 = vmul.f32 %v2510_v37, %v787_v57 }
 0x236   :  { %v796_v62 = vmul.f32 %v2508_v31, %v792_v58  ;;  %v790_v0 = vmul.f32 %v2512_v41, %v786_v59 }
 0x237   :  { %v801_v1 = vadd.f32 0.2548296, %v797_v60  ;;  %v795_v3 = vadd.f32 -0.28449672, %v791_v61 }
 0x238   :  { %v800_v5 = vadd.f32 0.2548296, %v796_v62  ;;  %v794_v7 = vadd.f32 -0.28449672, %v790_v0 }
 0x239   :  { %v805_v9 = vmul.f32 %v2506_v28, %v801_v1  ;;  %v799_v11 = vmul.f32 %v2510_v37, %v795_v3  ;;  %v749_v28 = vsel %vm745_vm2, 1.0, %v2569_v29 }
 0x23a   :  { %v804_v16 = vmul.f32 %v2508_v31, %v800_v5  ;;  %v798_v18 = vmul.f32 %v2512_v41, %v794_v7  ;;  %v748_v31 = vsel %vm744_vm3, 1.0, %v2569_v29 }
 0x23b   :  { %v825_v20 = vmul.f32 %v2514_v14, %v805_v9  ;;  %v803_v21 = vadd.f32 0.2548296, %v799_v11  ;;  %v919_v11 = vld [vmem:[%s3329_s29] sm:$0xff]  ;;  %v920_v14 = vld [vmem:[%s3329_s29 + $0x8] sm:$0xff] }
 0x23c   :  { %v824_v22 = vmul.f32 %v2516_v19, %v804_v16  ;;  %v802_v23 = vadd.f32 0.2548296, %v798_v18  ;;  %v2416_v16 = vpack.c.bf16 %v920_v14, %v919_v11  ;;  %v921_v18 = vld [vmem:[%s3329_s29 + $0x10] sm:$0xff]  ;;  %v922_v19 = vld [vmem:[%s3329_s29 + $0x18] sm:$0xff] }
 0x23d   :  { %v829_v24 = vsub.f32 1.0, %v825_v20  ;;  %v807_v25 = vmul.f32 %v2510_v37, %v803_v21  ;;  %v2420_v20 = vpack.c.bf16 %v922_v19, %v921_v18  ;;  %v923_v21 = vld [vmem:[%s3329_s29 + $0x20] sm:$0xff] }
 0x23e   :  { %v828_v27 = vsub.f32 1.0, %v824_v22  ;;  %v806_v30 = vmul.f32 %v2512_v41, %v802_v23  ;;  %v750_v41 = vsel %vm746_vm5, 1.0, %v2569_v29  ;;  %2417 = vmatprep.subr.bf16.mxu0 %v2416_v16  ;;  %v924_v22 = vld [vmem:[%s3329_s29 + $0x28] sm:$0xff] }
 0x23f   :  { %v833_v4 = vmul.f32 %v829_v24, %v749_v28  ;;  %v827_v33 = vmul.f32 %v2518_v26, %v807_v25  ;;  %2419 = vmatpush3.bf16.msra.mxu0 %v2416_v16  ;;  %v2424_v23 = vpack.c.bf16 %v924_v22, %v923_v21  ;;  %v925_v24 = vld [vmem:[%s3329_s29 + $0x30] sm:$0xff]  ;;  %v926_v25 = vld [vmem:[%s3329_s29 + $0x38] sm:$0xff]  ;;  %v1032_v28 = vld [vmem:[%s3330_s30 + $0x8] sm:$0xff] }
 0x240   :  { %v832_v6 = vmul.f32 %v828_v27, %v748_v31  ;;  %v826_v34 = vmul.f32 %v2520_v32, %v806_v30  ;;  %2421 = vmatprep.subr.bf16.mxu0 %v2420_v20  ;;  %v2428_v26 = vpack.c.bf16 %v926_v25, %v925_v24  ;;  %v1031_v27 = vld [vmem:[%s3330_s30] sm:$0xff]  ;;  %v28_v32 = vstv %s3293_s9 }
 0x241   :  { %v831_v36 = vsub.f32 1.0, %v827_v33  ;;  %v837_v38 = vadd.f32 1.0, %v833_v4  ;;  %v2432_v30 = vpack.c.bf16 %v1032_v28, %v1031_v27  ;;  %29 = vst [vmem:[#allocation2] sm:$0x1] %v28_v32 }
 0x242   :  { %v836_v37 = vadd.f32 1.0, %v832_v6  ;;  %v830_v39 = vsub.f32 1.0, %v826_v34 }
 0x243   :  { %v835_v42 = vmul.f32 %v831_v36, %v751_v40  ;;  %v2951_v2 = vmul.f32 %v837_v38, %v737_v15  ;;  %2423 = vmatpush3.bf16.msra.mxu0 %v2420_v20  ;;  %v2011_v15 = vld [vmem:[%s3294_s6] ss:$0 sm:$0xff] }
 0x244   :  { %v2946_v43 = vmul.f32 %v836_v37, %v736_v35  ;;  %v834_v44 = vmul.f32 %v830_v39, %v750_v41  ;;  %2425 = vmatprep.subr.bf16.mxu0 %v2424_v23 }
 0x245   :  { %v839_v47 = vadd.f32 1.0, %v835_v42  ;;  %v849_v63 = vsel %vm265_vm1, %v2951_v2, 0.0 }
 0x246   :  { %v846_v45 = vsel %vm265_vm1, %v2946_v43, 0.0  ;;  %v838_v46 = vadd.f32 1.0, %v834_v44 }
 0x247   :  { %847 = vadd.xlane.f32.xlu0 %v846_v45  ;;  %v2960_v51 = vmul.f32 %v839_v47, %v739_v48  ;;  %2427 = vmatpush3.bf16.msra.mxu0 %v2424_v23 }
 0x248   :  { %v2954_v49 = vmul.f32 %v838_v46, %v738_v17  ;;  %2429 = vmatprep.subr.bf16.mxu0 %v2428_v26  ;;  %v2012_v17 = vld [vmem:[%s3295_s7] ss:$0 sm:$0xff]  ;;  %s2571_s7 = smov 64  }
 0x249   :  { %v855_v12 = vsel %vm265_vm1, %v2960_v51, 0.0 }
 0x24a   :  { %v852_v50 = vsel %vm265_vm1, %v2954_v49, 0.0 }
 0x24b   :  { %850 = vadd.xlane.f32.xlu0 %v849_v63  ;;  %853 = vadd.xlane.f32.xlu1 %v852_v50 }
 0x24c   :  { %2431 = vmatpush3.bf16.msra.mxu0 %v2428_v26 }
 0x24d   :  { %2433 = vmatprep.subr.bf16.mxu0 %v2432_v30 }
 0x24f   :  { %856 = vadd.xlane.f32.xlu1 %v855_v12 }
 0x2d4   :  { %v848_v8 = vpop.xlane.xlu0 %847 }
 0x2d5   :  { %v859_v52 = vmul.f32 0.015625, %v848_v8  ;;  %v1033_v8 = vld [vmem:[%s3330_s30 + $0x10] sm:$0xff] }
 0x2d7   :  { %v2965_v10 = vsub.f32 %v2946_v43, %v859_v52  ;;  %v1034_v52 = vld [vmem:[%s3330_s30 + $0x18] sm:$0xff] }
 0x2d8   :  { %v851_v53 = vpop.xlane.xlu0 %850  ;;  %v854_v54 = vpop.xlane.xlu1 %853 }
 0x2d9   :  { %v860_v55 = vmul.f32 0.015625, %v851_v53  ;;  %v861_v13 = vmul.f32 0.015625, %v854_v54  ;;  %v867_v56 = vmul.f32 %v2965_v10, %v2965_v10 }
 0x2db   :  { %v2970_v57 = vsub.f32 %v2951_v2, %v860_v55  ;;  %v2973_v58 = vsub.f32 %v2954_v49, %v861_v13  ;;  %v871_v59 = vsel %vm265_vm1, %v867_v56, 0.0  ;;  %v2436_v56 = vpack.c.bf16 %v1034_v52, %v1033_v8  ;;  %v1134_v8 = vld [vmem:[%s3296_s12 + $0x18] sm:$0xff] }
 0x2dc   :  { %872 = vadd.xlane.f32.xlu0 %v871_v59  ;;  %v857_v60 = vpop.xlane.xlu1 %856  ;;  %v1036_v59 = vld [vmem:[%s3330_s30 + $0x28] sm:$0xff]  ;;  %v2570_v52 = vmov 0  }
 0x2dd   :  { %v862_v61 = vmul.f32 0.015625, %v857_v60  ;;  %v868_v62 = vmul.f32 %v2970_v57, %v2970_v57  ;;  %v869_v0 = vmul.f32 %v2973_v58, %v2973_v58  ;;  %2504 = vset.pattern.permute.xlu1 %v2570_v52  ;;  %2503 = vset.pattern.permute.xlu0 %v2570_v52 }
 0x2df   :  { %v2981_v1 = vsub.f32 %v2960_v51, %v862_v61  ;;  %v874_v3 = vsel %vm265_vm1, %v868_v62, 0.0  ;;  %v877_v5 = vsel %vm265_vm1, %v869_v0, 0.0  ;;  %v1037_v62 = vld [vmem:[%s3330_s30 + $0x30] sm:$0xff]  ;;  %v1038_v0 = vld [vmem:[%s3330_s30 + $0x38] sm:$0xff] }
 0x2e0   :  { %875 = vadd.xlane.f32.xlu1 %v874_v3  ;;  %878 = vadd.xlane.f32.xlu0 %v877_v5  ;;  %v1131_v3 = vld [vmem:[%s3296_s12] sm:$0xff] }
 0x2e1   :  { %v870_v7 = vmul.f32 %v2981_v1, %v2981_v1  ;;  %v2013_v5 = vld [vmem:[#allocation2] ss:$0 sm:$0xff] }
 0x2e3   :  { %v880_v9 = vsel %vm265_vm1, %v870_v7, 0.0 }
 0x2e4   :  { %881 = vadd.xlane.f32.xlu1 %v880_v9 }
 0x369   :  { %v873_v31 = vpop.xlane.xlu0 %872 }
 0x36a   :  { %v883_v4 = vmul.f32 0.015625, %v873_v31 }
 0x36c   :  { %v887_v33 = vadd.f32 1e-05, %v883_v4 }
 0x36d   :  { %v879_v6 = vpop.xlane.xlu0 %878  ;;  %v876_v34 = vpop.xlane.xlu1 %875 }
 0x36e   :  { %2521 = vrsqrt.f32 %v887_v33  ;;  %v885_v35 = vmul.f32 0.015625, %v879_v6  ;;  %v884_v36 = vmul.f32 0.015625, %v876_v34 }
 0x370   :  { %v889_v37 = vadd.f32 1e-05, %v885_v35  ;;  %v888_v38 = vadd.f32 1e-05, %v884_v36 }
 0x371   :  { %v882_v39 = vpop.xlane.xlu1 %881 }
 0x372   :  { %2523 = vrsqrt.f32 %v889_v37  ;;  %v886_v40 = vmul.f32 0.015625, %v882_v39 }
 0x373   :  { %2525 = vrsqrt.f32 %v888_v38 }
 0x374   :  { %v890_v41 = vadd.f32 1e-05, %v886_v40 }
 0x376   :  { %2527 = vrsqrt.f32 %v890_v41 }
 0x378   :  { %v2522_v42 = vpop.eup %2521 }
 0x379   :  { %v895_v44 = vmul.f32 %v2522_v42, %v2965_v10 }
 0x37b   :  { %v905_v45 = vmul.f32 %v2011_v15, %v895_v44 }
 0x37c   :  { %v2524_v46 = vpop.eup %2523 }
 0x37d   :  { %v2526_v47 = vpop.eup %2525  ;;  %v915_v48 = vadd.f32 %v2012_v17, %v905_v45  ;;  %v897_v63 = vmul.f32 %v2524_v46, %v2973_v58 }
 0x37e   :  { %v896_v50 = vmul.f32 %v2526_v47, %v2970_v57  ;;  %v1035_v57 = vld [vmem:[%s3330_s30 + $0x20] sm:$0xff] }
 0x37f   :  { %2282 = vmatprep.mubr.msk.f32.mxu0 %vm265_vm1, %v915_v48  ;;  %v907_v12 = vmul.f32 %v2011_v15, %v897_v63  ;;  %v2440_v61 = vpack.c.bf16 %v1036_v59, %v1035_v57 }
 0x380   :  { %v2528_v10 = vpop.eup %2527  ;;  %v906_v53 = vmul.f32 %v2011_v15, %v896_v50  ;;  %v1132_v50 = vld [vmem:[%s3296_s12 + $0x8] sm:$0xff] }
 0x381   :  { %v917_v54 = vadd.f32 %v2012_v17, %v907_v12  ;;  %v898_v55 = vmul.f32 %v2528_v10, %v2981_v1  ;;  %v2444_v1 = vpack.c.bf16 %v1038_v0, %v1037_v62  ;;  %v1133_v12 = vld [vmem:[%s3296_s12 + $0x10] sm:$0xff]  ;;  %v2018_v0 = vld [vmem:[%s3297_s11] ss:$0 sm:$0xff] }
 0x382   :  { %v916_v13 = vadd.f32 %v2012_v17, %v906_v53 }
 0x383   :  { %v908_v58 = vmul.f32 %v2011_v15, %v898_v55 }
 0x384   :  { %2283 = vmatmul.mubr.msk.f32.vlgmr.msra.gmra.mrb[8].mxu0 %vm265_vm1, %v916_v13 }
 0x385   :  { %2435 = vmatpush3.bf16.msra.mxu0 %v2432_v30  ;;  %2285 = vmatprep.mubr.msk.f32.mxu0 %vm265_vm1, %v917_v54  ;;  %v918_v60 = vadd.f32 %v2012_v17, %v908_v58 }
 0x386   :  { %2437 = vmatprep.subr.bf16.mxu0 %v2436_v56 }
 0x388   :  { %2286 = vmatmul.mubr.msk.f32.gmra.mrb[10].mxu0 %vm265_vm1, %v918_v60 }
 0x389   :  { %2439 = vmatpush3.bf16.msra.mxu0 %v2436_v56  ;;  %2304 = vmatprep.mubr.msk.f32.mxu0 %vm265_vm1, %v915_v48 }
 0x38a   :  { %2441 = vmatprep.subr.bf16.mxu0 %v2440_v61 }
 0x38d   :  { %2443 = vmatpush3.bf16.msra.mxu0 %v2440_v61 }
 0x38e   :  { %2445 = vmatprep.subr.bf16.mxu0 %v2444_v1 }
 0x391   :  { %2447 = vmatpush3.bf16.msra.mxu0 %v2444_v1 }
 0x394   :  { %2305 = vmatmul.mubr.msk.f32.vlgmr.msra.gmra.mrb[12].mxu0 %vm265_vm1, %v916_v13 }
 0x395   :  { %2307 = vmatprep.mubr.msk.f32.mxu0 %vm265_vm1, %v917_v54 }
 0x398   :  { %2308 = vmatmul.mubr.msk.f32.gmra.mrb[14].mxu0 %vm265_vm1, %v918_v60 }
 0x399   :  { %2318 = vmatprep.mubr.msk.f32.mxu0 %vm99_vm0, %v1131_v3 }
 0x457   :  { %v2284_v7 = vpop.f32.mrb[8].mxu0 }
 0x458   :  { %v1018_v9 = vadd.f32 %v2284_v7, %v2013_v5  ;;  %v1012_v11 = vpop.f32.mrb[9].mxu0 }
 0x459   :  { %v1013_v14 = vadd.f32 %v2013_v5, %v1012_v11 }
 0x45a   :  { %v1137_v16 = vsel %vm1135_vm6, %v1018_v9, -inf }
 0x45b   :  { %v1136_v18 = vsel %vm1135_vm6, %v1013_v14, -inf  ;;  %v2287_v19 = vpop.f32.mrb[10].mxu0 }
 0x45c   :  { %v1140_v20 = vmax.f32 %v1136_v18, %v1137_v16  ;;  %v1028_v21 = vadd.f32 %v2287_v19, %v2013_v5  ;;  %v1022_v22 = vpop.f32.mrb[11].mxu0 }
 0x45d   :  { %v1023_v23 = vadd.f32 %v2013_v5, %v1022_v22 }
 0x45e   :  { %v1139_v24 = vsel %vm1135_vm6, %v1028_v21, -inf }
 0x45f   :  { %v1138_v25 = vsel %vm1135_vm6, %v1023_v23, -inf }
 0x460   :  { %v1141_v26 = vmax.f32 %v1138_v25, %v1139_v24  ;;  %v30_v24 = vstv %s3298_s15 }
 0x461   :  { %31 = vst [vmem:[#allocation3] sm:$0x1] %v30_v24 }
 0x462   :  { %v1142_v27 = vmax.f32 %v1140_v20, %v1141_v26 }
 0x464   :  { %v1143_v28 = vrot.slane %v1142_v27, 4 }
 0x466   :  { %v1144_v30 = vmax.f32 %v1142_v27, %v1143_v28  ;;  %v1399_v27 = vld [vmem:[%s3299_s13] sm:$0xff]  ;;  %v1400_v28 = vld [vmem:[%s3299_s13 + $0x8] sm:$0xff] }
 0x467   :  { %v2306_v32 = vpop.f32.mrb[12].mxu0 }
 0x468   :  { %v1145_v31 = vrot.slane %v1144_v30, 2  ;;  %v1112_v4 = vpop.f32.mrb[13].mxu0  ;;  %v1118_v1 = vadd.f32 %v2306_v32, %v2018_v0  ;;  %v2464_v32 = vpack.c.bf16 %v1400_v28, %v1399_v27 }
 0x46a   :  { %v1146_v33 = vmax.f32 %v1144_v30, %v1145_v31  ;;  %v1401_v31 = vld [vmem:[%s3299_s13 + $0x10] sm:$0xff] }
 0x46b   :  { %v3061_v6 = vpop.f32.mrb[14].mxu0 }
 0x46c   :  { %v1147_v34 = vrot.slane %v1146_v33, 1  ;;  %v3063_v35 = vpop.f32.mrb[15].mxu0  ;;  %v1128_v18 = vadd.f32 %v3061_v6, %v2018_v0 }
 0x46d   :  { %v1123_v19 = vadd.f32 %v2018_v0, %v3063_v35  ;;  %v1404_v35 = vld [vmem:[%s3299_s13 + $0x28] sm:$0xff] }
 0x46e   :  { %v1148_v36 = vmax.f32 %v1146_v33, %v1147_v34  ;;  %v1403_v34 = vld [vmem:[%s3299_s13 + $0x20] sm:$0xff] }
 0x470   :  { %v1151_v37 = vsub.f32 %v1023_v23, %v1148_v36  ;;  %v1149_v38 = vsub.f32 %v1013_v14, %v1148_v36  ;;  %v1150_v39 = vsub.f32 %v1018_v9, %v1148_v36  ;;  %v1152_v40 = vsub.f32 %v1028_v21, %v1148_v36 }
 0x471   :  { %v2472_v36 = vpack.c.bf16 %v1404_v35, %v1403_v34 }
 0x472   :  { %v1157_v41 = vmul.f32 1.442695, %v1151_v37  ;;  %v1153_v42 = vmul.f32 1.442695, %v1149_v38  ;;  %v1155_v15 = vmul.f32 1.442695, %v1150_v39 }
 0x473   :  { %v1159_v44 = vmul.f32 1.442695, %v1152_v40  ;;  %v1405_v37 = vld [vmem:[%s3299_s13 + $0x30] sm:$0xff]  ;;  %v1406_v38 = vld [vmem:[%s3299_s13 + $0x38] sm:$0xff]  ;;  %v1376_v40 = vmax.f32 %v1118_v1, 0.0 }
 0x474   :  { %2529 = vpow2.f32 %v1157_v41  ;;  %v2476_v39 = vpack.c.bf16 %v1406_v38, %v1405_v37  ;;  %v1611_v37 = vld [vmem:[%s3302_s18] sm:$0xff]  ;;  %v1612_v38 = vld [vmem:[%s3302_s18 + $0x8] sm:$0xff] }
 0x475   :  { %2531 = vpow2.f32 %v1153_v42 }
 0x476   :  { %2533 = vpow2.f32 %v1155_v15 }
 0x477   :  { %2535 = vpow2.f32 %v1159_v44 }
 0x47e   :  { %v2530_v17 = vpop.eup %2529 }
 0x47f   :  { %v2532_v45 = vpop.eup %2531 }
 0x480   :  { %v2534_v46 = vpop.eup %2533 }
 0x481   :  { %v2536_v47 = vpop.eup %2535  ;;  %v2448_v48 = vpack.c.bf16 %v2534_v46, %v2532_v45 }
 0x482   :  { %v2452_v63 = vpack.c.bf16 %v2536_v47, %v2530_v17 }
 0x483   :  { %2449 = vmatprep.subr.bf16.mxu0 %v2448_v48 }
 0x484   :  { %2451 = vmatpush3.bf16.msra.mxu0 %v2448_v48  ;;  %v1378_v48 = vmax.f32 %v1128_v18, 0.0 }
 0x485   :  { %2453 = vmatprep.subr.bf16.mxu0 %v2452_v63 }
 0x488   :  { %2455 = vmatpush3.bf16.msra.mxu0 %v2452_v63 }
 0x48b   :  { %2319 = vmatmul.mubr.msk.f32.vlgmr.msra.gmra.mrb[16].mxu0 %vm99_vm0, %v1132_v50 }
 0x48c   :  { %2321 = vmatprep.mubr.msk.f32.mxu0 %vm99_vm0, %v1133_v12 }
 0x48f   :  { %2322 = vmatmul.mubr.msk.f32.gmra.mrb[18].mxu0 %vm99_vm0, %v1134_v8 }
 0x490   :  { %2332 = vmatprep.mubr.msk.f32.mxu0 %vm99_vm0, %v1131_v3  ;;  %v1113_v3 = vadd.f32 %v2018_v0, %v1112_v4  ;;  %v1402_v4 = vld [vmem:[%s3299_s13 + $0x18] sm:$0xff] }
 0x491   :  { %v2468_v6 = vpack.c.bf16 %v1402_v4, %v1401_v31 }
 0x492   :  { %v1375_v15 = vmax.f32 %v1113_v3, 0.0 }
 0x55e   :  { %v2320_v10 = vpop.f32.mrb[16].mxu0 }
 0x55f   :  { %2537 = vrcp.f32 %v2320_v10  ;;  %v1239_v53 = vpop.f32.mrb[17].mxu0 }
 0x560   :  { %2539 = vrcp.f32 %v1239_v53 }
 0x562   :  { %v2323_v54 = vpop.f32.mrb[18].mxu0 }
 0x563   :  { %v1249_v55 = vpop.f32.mrb[19].mxu0 }
 0x564   :  { %2541 = vrcp.f32 %v1249_v55  ;;  %v2031_v55 = vld [vmem:[%s3300_s14] ss:$0 sm:$0xff] }
 0x565   :  { %2543 = vrcp.f32 %v2323_v54 }
 0x569   :  { %v2538_v13 = vpop.eup %2537 }
 0x56a   :  { %v2540_v56 = vpop.eup %2539  ;;  %v1263_v58 = vmul.f32 %v2538_v13, %v2534_v46 }
 0x56b   :  { %v1262_v57 = vmul.f32 %v2540_v56, %v2532_v45  ;;  %v1377_v45 = vmax.f32 %v1123_v19, 0.0 }
 0x56c   :  { %1273 = vperm.xlu1 %2504, %v1263_v58  }
 0x56d   :  { %1268 = vperm.xlu0 %2503, %v1262_v57  }
 0x56e   :  { %v2542_v59 = vpop.eup %2541 }
 0x56f   :  { %v1264_v60 = vmul.f32 %v2542_v59, %v2530_v17  ;;  %v2544_v61 = vpop.eup %2543 }
 0x570   :  { %v1265_v62 = vmul.f32 %v2544_v61, %v2536_v47 }
 0x571   :  { %1278 = vperm.xlu1 %2504, %v1264_v60  }
 0x575   :  { %1283 = vperm.xlu1 %2504, %v1265_v62  }
 0x5eb   :  { %v1274_v5 = vpop.permute.xlu1 %1273 }
 0x5ec   :  { %v1287_v7 = vmul.f32 %v1274_v5, %v1118_v1  ;;  %v1269_v9 = vpop.permute.xlu0 %1268 }
 0x5ed   :  { %v1286_v11 = vmul.f32 %v1269_v9, %v1113_v3 }
 0x5ef   :  { %v2456_v14 = vpack.c.bf16 %v1287_v7, %v1286_v11 }
 0x5f0   :  { %v1279_v16 = vpop.permute.xlu1 %1278 }
 0x5f1   :  { %2457 = vmatprep.subr.bf16.mxu0 %v2456_v14  ;;  %v1288_v21 = vmul.f32 %v1279_v16, %v1123_v19  ;;  %v32_v19 = vstv %s3301_s22 }
 0x5f2   :  { %2459 = vmatpush3.bf16.msra.mxu0 %v2456_v14  ;;  %33 = vst [vmem:[#allocation4] sm:$0x1] %v32_v19 }
 0x5f4   :  { %v1284_v20 = vpop.permute.xlu1 %1283 }
 0x5f5   :  { %v1289_v22 = vmul.f32 %v1284_v20, %v1128_v18 }
 0x5f7   :  { %v2460_v23 = vpack.c.bf16 %v1289_v22, %v1288_v21 }
 0x5f9   :  { %2461 = vmatprep.subr.bf16.mxu0 %v2460_v23 }
 0x5fa   :  { %2463 = vmatpush3.bf16.msra.mxu0 %v2460_v23 }
 0x5fb   :  { %2465 = vmatprep.subr.bf16.mxu0 %v2464_v32 }
 0x5fd   :  { %2333 = vmatmul.mubr.msk.f32.vlgmr.msra.gmra.mrb[20].mxu0 %vm99_vm0, %v1132_v50  ;;  %v2036_v50 = vld [vmem:[#allocation3] ss:$0 sm:$0xff] }
 0x5fe   :  { %2335 = vmatprep.mubr.msk.f32.mxu0 %vm99_vm0, %v1133_v12  ;;  %2467 = vmatpush3.bf16.msra.mxu0 %v2464_v32 }
 0x5ff   :  { %2469 = vmatprep.subr.bf16.mxu0 %v2468_v6 }
 0x601   :  { %2336 = vmatmul.mubr.msk.f32.gmra.mrb[22].mxu0 %vm99_vm0, %v1134_v8 }
 0x602   :  { %2471 = vmatpush3.bf16.msra.mxu0 %v2468_v6 }
 0x603   :  { %2473 = vmatprep.subr.bf16.mxu0 %v2472_v36 }
 0x606   :  { %2475 = vmatpush3.bf16.msra.mxu0 %v2472_v36 }
 0x607   :  { %2477 = vmatprep.subr.bf16.mxu0 %v2476_v39 }
 0x60a   :  { %2479 = vmatpush3.bf16.msra.mxu0 %v2476_v39  ;;  %v2480_v39 = vpack.c.bf16 %v1612_v38, %v1611_v37 }
 0x60c   :  { %2481 = vmatprep.subr.bf16.mxu0 %v2480_v39 }
 0x6d0   :  { %v2334_v25 = vpop.f32.mrb[20].mxu0 }
 0x6d1   :  { %1385 = vrot.lane.b32.xlu1 %v2334_v25, %s2571_s7  ;;  %v1356_v26 = vpop.f32.mrb[21].mxu0 }
 0x6d4   :  { %v2337_v30 = vpop.f32.mrb[22].mxu0 }
 0x6d5   :  { %1383 = vrot.lane.b32.xlu1 %v1356_v26, %s2571_s7  ;;  %v1366_v33 = vpop.f32.mrb[23].mxu0 }
 0x6d9   :  { %1387 = vrot.lane.b32.xlu1 %v1366_v33, %s2571_s7 }
 0x6dd   :  { %1389 = vrot.lane.b32.xlu1 %v2337_v30, %s2571_s7 }
 0x743   :  { %v1386_v41 = vpop.permute.xlu1 %1385 }
 0x744   :  { %v1396_v42 = vmul.f32 %v1386_v41, %v1376_v40  ;;  %v2049_v40 = vld [vmem:[#allocation4] ss:$0 sm:$0xff]  ;;  %v1613_v41 = vld [vmem:[%s3302_s18 + $0x10] sm:$0xff] }
 0x746   :  { %1420 = vrot.lane.b32.xlu0 %v1396_v42, %s2571_s7  ;;  %v1614_v42 = vld [vmem:[%s3302_s18 + $0x18] sm:$0xff] }
 0x747   :  { %v1384_v44 = vpop.permute.xlu1 %1383 }
 0x748   :  { %v1395_v17 = vmul.f32 %v1384_v44, %v1375_v15  ;;  %v2484_v15 = vpack.c.bf16 %v1614_v42, %v1613_v41  ;;  %v1615_v44 = vld [vmem:[%s3302_s18 + $0x20] sm:$0xff] }
 0x74a   :  { %1418 = vrot.lane.b32.xlu1 %v1395_v17, %s2571_s7  ;;  %v1616_v17 = vld [vmem:[%s3302_s18 + $0x28] sm:$0xff] }
 0x74b   :  { %v1388_v46 = vpop.permute.xlu1 %1387 }
 0x74c   :  { %v1397_v47 = vmul.f32 %v1388_v46, %v1377_v45  ;;  %v2488_v45 = vpack.c.bf16 %v1616_v17, %v1615_v44  ;;  %v1617_v46 = vld [vmem:[%s3302_s18 + $0x30] sm:$0xff] }
 0x74e   :  { %1422 = vrot.lane.b32.xlu1 %v1397_v47, %s2571_s7  ;;  %v1618_v47 = vld [vmem:[%s3302_s18 + $0x38] sm:$0xff] }
 0x74f   :  { %v1390_v63 = vpop.permute.xlu1 %1389 }
 0x750   :  { %v1398_v12 = vmul.f32 %v1390_v63, %v1378_v48  ;;  %v2492_v48 = vpack.c.bf16 %v1618_v47, %v1617_v46  ;;  %v1831_v63 = vld [vmem:[%s3303_s20] sm:$0xff] }
 0x752   :  { %1526 = vperm.xlu1 %2504, %v2036_v50   ;;  %1424 = vrot.lane.b32.xlu0 %v1398_v12, %s2571_s7  ;;  %v1832_v50 = vld [vmem:[%s3303_s20 + $0x8] sm:$0xff] }
 0x753   :  { %v2496_v12 = vpack.c.bf16 %v1832_v50, %v1831_v63 }
 0x755   :  { %2497 = vmatprep.subr.bf16.mxu1 %v2496_v12 }
 0x756   :  { %2499 = vmatpush3.bf16.msra.mxu1 %v2496_v12 }
 0x7b8   :  { %v1421_v52 = vpop.permute.xlu0 %1420 }
 0x7bc   :  { %v1419_v8 = vpop.permute.xlu1 %1418 }
 0x7bd   :  { %2354 = vmatprep.mubr.msk.f32.mxu0 %vm265_vm1, %v1419_v8 }
 0x7be   :  { %2355 = vmatmul.mubr.msk.f32.vlgmr.msra.gmra.mrb[24].mxu0 %vm265_vm1, %v1421_v52 }
 0x7bf   :  { %2483 = vmatpush3.bf16.msra.mxu0 %v2480_v39 }
 0x7c0   :  { %v1423_v10 = vpop.permute.xlu1 %1422  ;;  %2485 = vmatprep.subr.bf16.mxu0 %v2484_v15 }
 0x7c1   :  { %2357 = vmatprep.mubr.msk.f32.mxu0 %vm265_vm1, %v1423_v10 }
 0x7c3   :  { %2487 = vmatpush3.bf16.msra.mxu0 %v2484_v15 }
 0x7c4   :  { %v1425_v53 = vpop.permute.xlu0 %1424  ;;  %2489 = vmatprep.subr.bf16.mxu0 %v2488_v45 }
 0x7c5   :  { %2358 = vmatmul.mubr.msk.f32.gmra.mrb[26].mxu0 %vm265_vm1, %v1425_v53 }
 0x7c7   :  { %2491 = vmatpush3.bf16.msra.mxu0 %v2488_v45 }
 0x7c8   :  { %2493 = vmatprep.subr.bf16.mxu0 %v2492_v48 }
 0x7cb   :  { %2495 = vmatpush3.bf16.msra.mxu0 %v2492_v48 }
 0x7d1   :  { %v1527_v54 = vpop.permute.xlu1 %1526 }
 0x7d2   :  { %v1530_v58 = vmul.f32 %v1527_v54, %v2951_v2  ;;  %v1529_v60 = vmul.f32 %v1527_v54, %v2946_v43  ;;  %v1531_v9 = vmul.f32 %v1527_v54, %v2954_v49  ;;  %v1532_v43 = vmul.f32 %v1527_v54, %v2960_v51 }
 0x891   :  { %v2356_v13 = vpop.f32.mrb[24].mxu0 }
 0x892   :  { %v1506_v56 = vadd.f32 %v2356_v13, %v2031_v55  ;;  %v1500_v57 = vpop.f32.mrb[25].mxu0 }
 0x893   :  { %v1501_v59 = vadd.f32 %v2031_v55, %v1500_v57 }
 0x894   :  { %v3130_v61 = vadd.f32 %v1530_v58, %v1506_v56 }
 0x895   :  { %v3132_v62 = vadd.f32 %v1529_v60, %v1501_v59 }
 0x896   :  { %v1542_v0 = vsel %vm265_vm1, %v3130_v61, 0.0 }
 0x897   :  { %1543 = vadd.xlane.f32.xlu1 %v1542_v0  ;;  %v1539_v1 = vsel %vm265_vm1, %v3132_v62, 0.0  ;;  %v2037_v0 = vld [vmem:[%s3304_s16] ss:$0 sm:$0xff] }
 0x898   :  { %v2359_v3 = vpop.f32.mrb[26].mxu0  ;;  %1540 = vadd.xlane.f32.xlu0 %v1539_v1 }
 0x899   :  { %v1510_v5 = vpop.f32.mrb[27].mxu0  ;;  %v1516_v7 = vadd.f32 %v2359_v3, %v2031_v55 }
 0x89a   :  { %v1511_v2 = vadd.f32 %v2031_v55, %v1510_v5 }
 0x89b   :  { %v3142_v14 = vadd.f32 %v1532_v43, %v1516_v7 }
 0x89c   :  { %v3140_v11 = vadd.f32 %v1531_v9, %v1511_v2  ;;  %v2038_v2 = vld [vmem:[%s3305_s17] ss:$0 sm:$0xff] }
 0x89d   :  { %v1548_v18 = vsel %vm265_vm1, %v3142_v14, 0.0 }
 0x89e   :  { %v1545_v16 = vsel %vm265_vm1, %v3140_v11, 0.0 }
 0x89f   :  { %1546 = vadd.xlane.f32.xlu0 %v1545_v16 }
 0x8a3   :  { %1549 = vadd.xlane.f32.xlu0 %v1548_v18 }
 0x924   :  { %v1544_v49 = vpop.xlane.xlu1 %1543 }
 0x925   :  { %v1552_v20 = vmul.f32 0.015625, %v1544_v49  ;;  %v1541_v51 = vpop.xlane.xlu0 %1540 }
 0x926   :  { %v1551_v21 = vmul.f32 0.015625, %v1541_v51 }
 0x927   :  { %v3152_v22 = vsub.f32 %v3130_v61, %v1552_v20 }
 0x928   :  { %v3155_v23 = vsub.f32 %v3132_v62, %v1551_v21 }
 0x929   :  { %v1560_v24 = vmul.f32 %v3152_v22, %v3152_v22 }
 0x92a   :  { %v1559_v25 = vmul.f32 %v3155_v23, %v3155_v23 }
 0x92b   :  { %v1566_v26 = vsel %vm265_vm1, %v1560_v24, 0.0 }
 0x92c   :  { %1567 = vadd.xlane.f32.xlu0 %v1566_v26  ;;  %v1547_v27 = vpop.xlane.xlu0 %1546  ;;  %v1563_v28 = vsel %vm265_vm1, %v1559_v25, 0.0  ;;  %v2039_v25 = vld [vmem:[%s3306_s19] ss:$0 sm:$0xff] }
 0x92d   :  { %v1553_v30 = vmul.f32 0.015625, %v1547_v27  ;;  %1564 = vadd.xlane.f32.xlu1 %v1563_v28 }
 0x92f   :  { %v3164_v32 = vsub.f32 %v3140_v11, %v1553_v30 }
 0x930   :  { %v1550_v31 = vpop.xlane.xlu0 %1549 }
 0x931   :  { %v1554_v4 = vmul.f32 0.015625, %v1550_v31  ;;  %v1561_v33 = vmul.f32 %v3164_v32, %v3164_v32 }
 0x933   :  { %v3169_v6 = vsub.f32 %v3142_v14, %v1554_v4  ;;  %v1569_v34 = vsel %vm265_vm1, %v1561_v33, 0.0 }
 0x934   :  { %1570 = vadd.xlane.f32.xlu1 %v1569_v34 }
 0x935   :  { %v1562_v35 = vmul.f32 %v3169_v6, %v3169_v6 }
 0x937   :  { %v1572_v36 = vsel %vm265_vm1, %v1562_v35, 0.0 }
 0x938   :  { %1573 = vadd.xlane.f32.xlu0 %v1572_v36 }
 0x945   :  { %1945 = vperm.xlu1 %2504, %v2049_v40  }
 0x9b9   :  { %v1568_v8 = vpop.xlane.xlu0 %1567 }
 0x9ba   :  { %v1576_v52 = vmul.f32 0.015625, %v1568_v8  ;;  %v1565_v10 = vpop.xlane.xlu1 %1564 }
 0x9bb   :  { %v1575_v53 = vmul.f32 0.015625, %v1565_v10 }
 0x9bc   :  { %v1580_v54 = vadd.f32 1e-05, %v1576_v52 }
 0x9bd   :  { %v1579_v55 = vadd.f32 1e-05, %v1575_v53 }
 0x9be   :  { %2545 = vrsqrt.f32 %v1580_v54 }
 0x9bf   :  { %2547 = vrsqrt.f32 %v1579_v55 }
 0x9c1   :  { %v1571_v13 = vpop.xlane.xlu1 %1570 }
 0x9c2   :  { %v1577_v56 = vmul.f32 0.015625, %v1571_v13 }
 0x9c4   :  { %v1581_v58 = vadd.f32 1e-05, %v1577_v56 }
 0x9c5   :  { %v1574_v57 = vpop.xlane.xlu0 %1573 }
 0x9c6   :  { %2549 = vrsqrt.f32 %v1581_v58  ;;  %v1578_v59 = vmul.f32 0.015625, %v1574_v57 }
 0x9c8   :  { %v2546_v60 = vpop.eup %2545  ;;  %v1582_v5 = vadd.f32 1e-05, %v1578_v59 }
 0x9c9   :  { %v2548_v1 = vpop.eup %2547  ;;  %v1588_v3 = vmul.f32 %v2546_v60, %v3152_v22 }
 0x9ca   :  { %v1587_v7 = vmul.f32 %v2548_v1, %v3155_v23  ;;  %2551 = vrsqrt.f32 %v1582_v5 }
 0x9cb   :  { %v1598_v9 = vmul.f32 %v2037_v0, %v1588_v3 }
 0x9cc   :  { %v1597_v43 = vmul.f32 %v2037_v0, %v1587_v7 }
 0x9cd   :  { %v1608_v18 = vadd.f32 %v2038_v2, %v1598_v9 }
 0x9ce   :  { %v1607_v16 = vadd.f32 %v2038_v2, %v1597_v43 }
 0x9d0   :  { %v2550_v19 = vpop.eup %2549  ;;  %2376 = vmatprep.mubr.msk.f32.mxu0 %vm265_vm1, %v1607_v16 }
 0x9d1   :  { %2377 = vmatmul.mubr.msk.f32.vlgmr.msra.gmra.mrb[28].mxu0 %vm265_vm1, %v1608_v18  ;;  %v1589_v49 = vmul.f32 %v2550_v19, %v3164_v32 }
 0x9d3   :  { %v1599_v20 = vmul.f32 %v2037_v0, %v1589_v49 }
 0x9d4   :  { %v2552_v51 = vpop.eup %2551 }
 0x9d5   :  { %v1609_v21 = vadd.f32 %v2038_v2, %v1599_v20  ;;  %v1590_v22 = vmul.f32 %v2552_v51, %v3169_v6 }
 0x9d7   :  { %2379 = vmatprep.mubr.msk.f32.mxu0 %vm265_vm1, %v1609_v21  ;;  %v1600_v23 = vmul.f32 %v2037_v0, %v1590_v22 }
 0x9d9   :  { %v1610_v24 = vadd.f32 %v2038_v2, %v1600_v23 }
 0x9db   :  { %2380 = vmatmul.mubr.msk.f32.gmra.mrb[30].mxu0 %vm265_vm1, %v1610_v24 }
 0xaa4   :  { %v2378_v26 = vpop.f32.mrb[28].mxu0 }
 0xaa5   :  { %v3222_v27 = vadd.f32 %v2378_v26, %v2039_v25  ;;  %v1704_v28 = vpop.f32.mrb[29].mxu0 }
 0xaa6   :  { %v3224_v30 = vadd.f32 %v2039_v25, %v1704_v28 }
 0xaa7   :  { %v3227_v32 = vmul.f32 0.70710677, %v3222_v27 }
 0xaa8   :  { %v3230_v31 = vmul.f32 0.70710677, %v3224_v30 }
 0xaa9   :  { %v1740_v4 = vand.u32 2147483647, %v3227_v32  ;;  %vm1732_vm7 = vcmp.ge.f32.partialorder %v3227_v32, 0.0 }
 0xaaa   :  { %v1739_v33 = vand.u32 2147483647, %v3230_v31  ;;  %vm1731_vm8 = vcmp.ge.f32.partialorder %v3230_v31, 0.0 }
 0xaab   :  { %v1744_v6 = vmul.f32 0.3275911, %v1740_v4  ;;  %v1796_v44 = vsub.f32 0.0, %v1740_v4 }
 0xaac   :  { %v1743_v34 = vmul.f32 0.3275911, %v1739_v33  ;;  %v1795_v45 = vsub.f32 0.0, %v1739_v33 }
 0xaad   :  { %v1748_v35 = vadd.f32 1.0, %v1744_v6  ;;  %v1800_v50 = vmul.f32 %v1796_v44, %v1740_v4 }
 0xaae   :  { %v1747_v36 = vadd.f32 1.0, %v1743_v34  ;;  %v2381_v37 = vpop.f32.mrb[30].mxu0  ;;  %v1799_v10 = vmul.f32 %v1795_v45, %v1739_v33 }
 0xaaf   :  { %2553 = vrcp.f32 %v1748_v35  ;;  %v3234_v38 = vadd.f32 %v2381_v37, %v2039_v25  ;;  %v1714_v39 = vpop.f32.mrb[31].mxu0  ;;  %v1805_v55 = vmul.f32 1.442695, %v1800_v50  ;;  %v1735_v50 = vsel %vm1731_vm8, 1.0, %v2569_v29 }
 0xab0   :  { %2555 = vrcp.f32 %v1747_v36  ;;  %v3236_v40 = vadd.f32 %v2039_v25, %v1714_v39  ;;  %v1803_v58 = vmul.f32 1.442695, %v1799_v10 }
 0xab1   :  { %v3239_v41 = vmul.f32 0.70710677, %v3234_v38 }
 0xab2   :  { %v3242_v42 = vmul.f32 0.70710677, %v3236_v40 }
 0xab3   :  { %v1742_v15 = vand.u32 2147483647, %v3239_v41  ;;  %vm1734_vm10 = vcmp.ge.f32.partialorder %v3239_v41, 0.0 }
 0xab4   :  { %v1741_v17 = vand.u32 2147483647, %v3242_v42  ;;  %vm1733_vm11 = vcmp.ge.f32.partialorder %v3242_v42, 0.0  ;;  %v1946_v42 = vpop.permute.xlu1 %1945 }
 0xab5   :  { %v1746_v46 = vmul.f32 0.3275911, %v1742_v15  ;;  %v1798_v60 = vsub.f32 0.0, %v1742_v15 }
 0xab6   :  { %v1745_v47 = vmul.f32 0.3275911, %v1741_v17  ;;  %v1797_v1 = vsub.f32 0.0, %v1741_v17 }
 0xab7   :  { %v1750_v48 = vadd.f32 1.0, %v1746_v46  ;;  %v1802_v9 = vmul.f32 %v1798_v60, %v1742_v15  ;;  %v1736_v46 = vsel %vm1732_vm7, 1.0, %v2569_v29 }
 0xab8   :  { %v1749_v12 = vadd.f32 1.0, %v1745_v47  ;;  %v1801_v19 = vmul.f32 %v1797_v1, %v1741_v17 }
 0xab9   :  { %v2554_v63 = vpop.eup %2553  ;;  %2557 = vrcp.f32 %v1750_v48  ;;  %v1809_v23 = vmul.f32 1.442695, %v1802_v9 }
 0xaba   :  { %v2556_v8 = vpop.eup %2555  ;;  %v1760_v52 = vmul.f32 1.0614054, %v2554_v63  ;;  %2559 = vrcp.f32 %v1749_v12  ;;  %v1807_v28 = vmul.f32 1.442695, %v1801_v19 }
 0xabb   :  { %v1759_v53 = vmul.f32 1.0614054, %v2556_v8  ;;  %2561 = vpow2.f32 %v1805_v55  ;;  %v1724_v55 = vmul.f32 0.5, %v3222_v27  ;;  %v1738_v27 = vsel %vm1734_vm10, 1.0, %v2569_v29 }
 0xabc   :  { %v1764_v54 = vadd.f32 -1.4531521, %v1760_v52  ;;  %2563 = vpow2.f32 %v1803_v58 }
 0xabd   :  { %v1763_v13 = vadd.f32 -1.4531521, %v1759_v53  ;;  %2565 = vpow2.f32 %v1809_v23  ;;  %v1723_v53 = vmul.f32 0.5, %v3224_v30 }
 0xabe   :  { %v1768_v56 = vmul.f32 %v2554_v63, %v1764_v54  ;;  %2567 = vpow2.f32 %v1807_v28 }
 0xabf   :  { %v1767_v57 = vmul.f32 %v2556_v8, %v1763_v13 }
 0xac0   :  { %v1772_v59 = vadd.f32 1.4214138, %v1768_v56 }
 0xac1   :  { %v1771_v0 = vadd.f32 1.4214138, %v1767_v57 }
 0xac2   :  { %v1776_v3 = vmul.f32 %v2554_v63, %v1772_v59 }
 0xac3   :  { %v1775_v5 = vmul.f32 %v2556_v8, %v1771_v0  ;;  %v2558_v7 = vpop.eup %2557 }
 0xac4   :  { %v1780_v2 = vadd.f32 -0.28449672, %v1776_v3  ;;  %v2560_v43 = vpop.eup %2559  ;;  %v1762_v18 = vmul.f32 1.0614054, %v2558_v7 }
 0xac5   :  { %v1779_v16 = vadd.f32 -0.28449672, %v1775_v5  ;;  %v1761_v20 = vmul.f32 1.0614054, %v2560_v43  ;;  %v2562_v6 = vpop.eup %2561 }
 0xac6   :  { %v1784_v49 = vmul.f32 %v2554_v63, %v1780_v2  ;;  %v1766_v21 = vadd.f32 -1.4531521, %v1762_v18  ;;  %v2564_v36 = vpop.eup %2563  ;;  %v1726_v18 = vmul.f32 0.5, %v3234_v38 }
 0xac7   :  { %v1783_v51 = vmul.f32 %v2556_v8, %v1779_v16  ;;  %v1765_v24 = vadd.f32 -1.4531521, %v1761_v20  ;;  %v2566_v57 = vpop.eup %2565  ;;  %v1725_v16 = vmul.f32 0.5, %v3236_v40  ;;  %v2044_v20 = vld [vmem:[%s3307_s21] ss:$0 sm:$0xff]  ;;  %v1948_v40 = vmul.f32 %v1946_v42, %v3132_v62 }
 0xac8   :  { %v1788_v22 = vadd.f32 0.2548296, %v1784_v49  ;;  %v1770_v26 = vmul.f32 %v2558_v7, %v1766_v21  ;;  %v2568_v0 = vpop.eup %2567  ;;  %v1950_v62 = vmul.f32 %v1946_v42, %v3140_v11 }
 0xac9   :  { %v1787_v25 = vadd.f32 0.2548296, %v1783_v51  ;;  %v1769_v33 = vmul.f32 %v2560_v43, %v1765_v24 }
 0xaca   :  { %v1792_v4 = vmul.f32 %v2554_v63, %v1788_v22  ;;  %v1774_v35 = vadd.f32 1.4214138, %v1770_v26 }
 0xacb   :  { %v1791_v34 = vmul.f32 %v2556_v8, %v1787_v25  ;;  %v1773_v39 = vadd.f32 1.4214138, %v1769_v33 }
 0xacc   :  { %v1812_v37 = vmul.f32 %v2562_v6, %v1792_v4  ;;  %v1778_v44 = vmul.f32 %v2558_v7, %v1774_v35 }
 0xacd   :  { %v1811_v15 = vmul.f32 %v2564_v36, %v1791_v34  ;;  %v1777_v45 = vmul.f32 %v2560_v43, %v1773_v39 }
 0xace   :  { %v1816_v17 = vsub.f32 1.0, %v1812_v37  ;;  %v1782_v48 = vadd.f32 -0.28449672, %v1778_v44 }
 0xacf   :  { %v1815_v47 = vsub.f32 1.0, %v1811_v15  ;;  %v1781_v12 = vadd.f32 -0.28449672, %v1777_v45 }
 0xad0   :  { %v1820_v63 = vmul.f32 %v1816_v17, %v1736_v46  ;;  %v1786_v32 = vmul.f32 %v2558_v7, %v1782_v48 }
 0xad1   :  { %v1819_v8 = vmul.f32 %v1815_v47, %v1735_v50  ;;  %v1785_v10 = vmul.f32 %v2560_v43, %v1781_v12 }
 0xad2   :  { %v1824_v52 = vadd.f32 1.0, %v1820_v63  ;;  %v1790_v54 = vadd.f32 0.2548296, %v1786_v32 }
 0xad3   :  { %v1823_v31 = vadd.f32 1.0, %v1819_v8  ;;  %v1789_v13 = vadd.f32 0.2548296, %v1785_v10 }
 0xad4   :  { %v1794_v58 = vmul.f32 %v2558_v7, %v1790_v54  ;;  %v1828_v59 = vmul.f32 %v1824_v52, %v1724_v55  ;;  %v1737_v7 = vsel %vm1733_vm11, 1.0, %v2569_v29  ;;  %v1949_v29 = vmul.f32 %v1946_v42, %v3130_v61 }
 0xad5   :  { %v1827_v56 = vmul.f32 %v1823_v31, %v1723_v53  ;;  %v1793_v60 = vmul.f32 %v2560_v43, %v1789_v13  ;;  %v1951_v61 = vmul.f32 %v1946_v42, %v3142_v14 }
 0xad6   :  { %v1814_v1 = vmul.f32 %v2566_v57, %v1794_v58 }
 0xad7   :  { %2386 = vmatprep.mubr.msk.f32.mxu1 %vm1840_vm9, %v1827_v56  ;;  %v1813_v30 = vmul.f32 %v2568_v0, %v1793_v60 }
 0xad8   :  { %2387 = vmatmul.mubr.msk.f32.vlgmr.msra.gmra.mrb[36].mxu1 %vm1840_vm9, %v1828_v59  ;;  %v1818_v3 = vsub.f32 1.0, %v1814_v1 }
 0xad9   :  { %v1817_v5 = vsub.f32 1.0, %v1813_v30 }
 0xada   :  { %v1822_v2 = vmul.f32 %v1818_v3, %v1738_v27 }
 0xadb   :  { %v1821_v9 = vmul.f32 %v1817_v5, %v1737_v7 }
 0xadc   :  { %v1826_v43 = vadd.f32 1.0, %v1822_v2 }
 0xadd   :  { %v1825_v41 = vadd.f32 1.0, %v1821_v9 }
 0xade   :  { %v1830_v49 = vmul.f32 %v1826_v43, %v1726_v18 }
 0xadf   :  { %v1829_v19 = vmul.f32 %v1825_v41, %v1725_v16 }
 0xae1   :  { %2389 = vmatprep.mubr.msk.f32.mxu1 %vm1840_vm9, %v1829_v19 }
 0xae2   :  { %2390 = vmatmul.mubr.msk.f32.gmra.mrb[38].mxu1 %vm1840_vm9, %v1830_v49 }
 0xbab   :  { %v2388_v51 = vpop.f32.mrb[36].mxu1 }
 0xbac   :  { %v1925_v21 = vadd.f32 %v2388_v51, %v2044_v20  ;;  %v1919_v22 = vpop.f32.mrb[37].mxu1 }
 0xbad   :  { %v1920_v23 = vadd.f32 %v2044_v20, %v1919_v22 }
 0xbae   :  { %v1953_v38 = vadd.f32 %v1949_v29, %v1925_v21 }
 0xbaf   :  { %v1952_v24 = vadd.f32 %v1948_v40, %v1920_v23 }
 0xbb0   :  { %1957 = vst.msk [vmem:[%s3308_s23 + $0x8] sm:$0xff] %vm265_vm1, %v1953_v38 }
 0xbb1   :  { %1956 = vst.msk [vmem:[%s3308_s23] sm:$0xff] %vm265_vm1, %v1952_v24 }
 0xbb5   :  { %v2391_v25 = vpop.f32.mrb[38].mxu1 }
 0xbb6   :  { %v1935_v26 = vadd.f32 %v2391_v25, %v2044_v20  ;;  %v1929_v28 = vpop.f32.mrb[39].mxu1 }
 0xbb7   :  { %v1930_v4 = vadd.f32 %v2044_v20, %v1929_v28 }
 0xbb8   :  { %v1955_v33 = vadd.f32 %v1951_v61, %v1935_v26 }
 0xbb9   :  { %v1954_v6 = vadd.f32 %v1950_v62, %v1930_v4 }
 0xbba   :  { %1959 = vst.msk [vmem:[%s3308_s23 + $0x18] sm:$0xff] %vm265_vm1, %v1955_v33 }
 0xbbb   :  { %1958 = vst.msk [vmem:[%s3308_s23 + $0x10] sm:$0xff] %vm265_vm1, %v1954_v6 }

// kernel: liconvformer_forward.8
= control target key start
LH: loop header
LB: loop body
LE: loop exit
PB: predicated region body
PF: predicated region fallthrough
CT: control target
= control target key end

     0   :  { %vm99_vm0 = vcmask 523264   ;;  %vm215_vm1 = vcmask 261120   ;;  %v427_v45 = vlaneseq  ;;  %vm838_vm4 = vcmask 130048   ;;  %s2584_s1 = inlined_call_operand.vmem [shape: f32[64,128], index: 1, kind: input, shape index: {}]   ;;  %s2585_s0 = inlined_call_operand.vmem [shape: f32[32,64], index: 0, kind: input, shape index: {}]   ;;  %s2586_s3 = inlined_call_operand.vmem [shape: f32[144,32], index: 3, kind: input, shape index: {}]   ;;  %s2587_s2 = inlined_call_operand.vmem [shape: f32[1,128], index: 2, kind: input, shape index: {}]   ;;  %s2588_s4 = inlined_call_operand.vmem [shape: f32[9,128], index: 4, kind: input, shape index: {}]   ;;  %s2589_s5 = inlined_call_operand.vmem [shape: f32[1,128], index: 5, kind: input, shape index: {}]   ;;  %s2590_s8 = inlined_call_operand.vmem [shape: f32[128,1], index: 8, kind: input, shape index: {}]   ;;  %s2591_s10 = inlined_call_operand.vmem [shape: f32[128,256], index: 10, kind: input, shape index: {}]   ;;  %s2592_s6 = inlined_call_operand.vmem [shape: f32[1,128], index: 6, kind: input, shape index: {}]   ;;  %s2593_s7 = inlined_call_operand.vmem [shape: f32[1,128], index: 7, kind: input, shape index: {}]   ;;  %s2594_s9 = inlined_call_operand.<no memory space> [shape: f32[1,1], index: 9, kind: input, shape index: {}]   ;;  %s2595_s12 = inlined_call_operand.vmem [shape: f32[16,16], index: 12, kind: input, shape index: {}]   ;;  %s2596_s15 = inlined_call_operand.<no memory space> [shape: f32[1,1], index: 15, kind: input, shape index: {}]   ;;  %s2597_s13 = inlined_call_operand.vmem [shape: f32[128,128], index: 13, kind: input, shape index: {}]   ;;  %s2598_s11 = inlined_call_operand.vmem [shape: f32[1,256], index: 11, kind: input, shape index: {}]   ;;  %s2599_s14 = inlined_call_operand.vmem [shape: f32[1,128], index: 14, kind: input, shape index: {}]   ;;  %s2600_s22 = inlined_call_operand.<no memory space> [shape: f32[1,1], index: 22, kind: input, shape index: {}]   ;;  %s2601_s18 = inlined_call_operand.vmem [shape: f32[128,32], index: 18, kind: input, shape index: {}]   ;;  %s2602_s16 = inlined_call_operand.vmem [shape: f32[1,128], index: 16, kind: input, shape index: {}]   ;;  %s2603_s17 = inlined_call_operand.vmem [shape: f32[1,128], index: 17, kind: input, shape index: {}]   ;;  %s2604_s20 = inlined_call_operand.vmem [shape: f32[32,128], index: 20, kind: input, shape index: {}]   ;;  %s2605_s19 = inlined_call_operand.vmem [shape: f32[1,32], index: 19, kind: input, shape index: {}]   ;;  %s2606_s21 = inlined_call_operand.vmem [shape: f32[1,128], index: 21, kind: input, shape index: {}]   ;;  %s2607_s23 = inlined_call_operand.vmem [shape: f32[16,128], index: 23, kind: output, shape index: {}]  }
   0x1   :  { %2614 = sst [smem:[#allocation5_spill]] %s2584_s1  ;;  %vm822_vm5 = vcmask 7168  }
   0x2   :  { %2615 = sst [smem:[#allocation6_spill]] %s2585_s0  ;;  %s2622_s24 = sld [smem:[#allocation5_spill]]  ;;  %v2204_v46 = vshrl.u32 %v427_v45, 7 }
   0x3   :  { %2616 = sst [smem:[#allocation7_spill]] %s2586_s3 }
   0x4   :  { %2617 = sst [smem:[#allocation8_spill]] %s2587_s2  ;;  %s2624_s2 = sld [smem:[#allocation7_spill]]  ;;  %v429_v47 = vsub.s32 0, %v2204_v46  ;;  %v435_v48 = vsub.s32 1, %v2204_v46  ;;  %v443_v54 = vsub.s32 2, %v2204_v46  ;;  %v451_v60 = vsub.s32 3, %v2204_v46 }
   0x5   :  { %2618 = sst [smem:[#allocation9_spill]] %s2588_s4  ;;  %s2623_s4 = sld [smem:[#allocation6_spill]] }
   0x6   :  { %2619 = sst [smem:[#allocation10_spill]] %s2589_s5  ;;  %s2625_s25 = sld [smem:[#allocation8_spill]] }
   0x7   :  { %2620 = sst [smem:[#allocation11_spill]] %s2590_s8  ;;  %s2627_s30 = sld [smem:[#allocation10_spill]] }
   0x8   :  { %2621 = sst [smem:[#allocation12_spill]] %s2591_s10  ;;  %v84_v0 = vld [vmem:[%s2622_s24] sm:$0xff]  ;;  %v85_v1 = vld [vmem:[%s2622_s24 + $0x8] sm:$0xff]  ;;  %v86_v2 = vld [vmem:[%s2622_s24 + $0x10] sm:$0xff]  ;;  %s2628_s5 = sld [smem:[#allocation11_spill]] }
   0x9   :  { %v1761_v3 = vpack.c.bf16 %v85_v1, %v84_v0  ;;  %v87_v4 = vld [vmem:[%s2622_s24 + $0x18] sm:$0xff]  ;;  %v88_v6 = vld [vmem:[%s2622_s24 + $0x20] sm:$0xff]  ;;  %v89_v7 = vld [vmem:[%s2622_s24 + $0x28] sm:$0xff]  ;;  %s2629_s27 = sld [smem:[#allocation12_spill]] }
   0xa   :  { %v1765_v5 = vpack.c.bf16 %v87_v4, %v86_v2  ;;  %v1769_v9 = vpack.c.bf16 %v89_v7, %v88_v6  ;;  %v90_v10 = vld [vmem:[%s2622_s24 + $0x30] sm:$0xff]  ;;  %v91_v11 = vld [vmem:[%s2622_s24 + $0x38] sm:$0xff]  ;;  %v197_v16 = vld [vmem:[%s2624_s2] sm:$0xff]  ;;  %s2626_s24 = sld [smem:[#allocation9_spill]] }
   0xb   :  { %v80_v8 = vld [vmem:[%s2623_s4] sm:$0xff]  ;;  %1762 = vmatprep.subr.bf16.mxu0 %v1761_v3  ;;  %v1773_v12 = vpack.c.bf16 %v91_v11, %v90_v10  ;;  %v81_v13 = vld [vmem:[%s2623_s4 + $0x8] sm:$0xff]  ;;  %v82_v14 = vld [vmem:[%s2623_s4 + $0x10] sm:$0xff]  ;;  %1604 = vmatprep.mubr.msk.f32.mxu1 %vm215_vm1, %v197_v16 }
   0xc   :  { %1590 = vmatprep.mubr.msk.f32.mxu0 %vm99_vm0, %v80_v8  ;;  %1764 = vmatpush3.bf16.msra.mxu0 %v1761_v3  ;;  %v83_v15 = vld [vmem:[%s2623_s4 + $0x18] sm:$0xff]  ;;  %v1431_v17 = vld [vmem:[%s2625_s25] ss:$0 sm:$0xff]  ;;  %v198_v28 = vld [vmem:[%s2624_s2 + $0x8] sm:$0xff] }
   0xd   :  { %1766 = vmatprep.subr.bf16.mxu0 %v1765_v5  ;;  %v199_v29 = vld [vmem:[%s2624_s2 + $0x10] sm:$0xff]  ;;  %v200_v30 = vld [vmem:[%s2624_s2 + $0x18] sm:$0xff]  ;;  %v201_v31 = vld [vmem:[%s2624_s2 + $0x20] sm:$0xff] }
   0xe   :  { %v202_v32 = vld [vmem:[%s2624_s2 + $0x28] sm:$0xff]  ;;  %v203_v33 = vld [vmem:[%s2624_s2 + $0x30] sm:$0xff]  ;;  %v204_v34 = vld [vmem:[%s2624_s2 + $0x38] sm:$0xff] }
   0xf   :  { %v205_v35 = vld [vmem:[%s2624_s2 + $0x40] sm:$0xff]  ;;  %v206_v36 = vld [vmem:[%s2624_s2 + $0x48] sm:$0xff]  ;;  %v207_v37 = vld [vmem:[%s2624_s2 + $0x50] sm:$0xff] }
  0x10   :  { %1768 = vmatpush3.bf16.msra.mxu0 %v1765_v5  ;;  %v208_v38 = vld [vmem:[%s2624_s2 + $0x58] sm:$0xff]  ;;  %v209_v39 = vld [vmem:[%s2624_s2 + $0x60] sm:$0xff]  ;;  %v210_v40 = vld [vmem:[%s2624_s2 + $0x68] sm:$0xff]  ;;  %v459_v5 = vsub.s32 4, %v2204_v46 }
  0x11   :  { %1770 = vmatprep.subr.bf16.mxu0 %v1769_v9  ;;  %v211_v41 = vld [vmem:[%s2624_s2 + $0x70] sm:$0xff]  ;;  %v212_v42 = vld [vmem:[%s2624_s2 + $0x78] sm:$0xff]  ;;  %v213_v43 = vld [vmem:[%s2624_s2 + $0x80] sm:$0xff] }
  0x12   :  { %v214_v44 = vld [vmem:[%s2624_s2 + $0x88] sm:$0xff]  ;;  %v425_v49 = vld [vmem:[%s2626_s24] sm:$0xff] }
  0x13   :  { %v430_v51 = vrot.slane %v425_v49, %v429_v47  ;;  %v436_v53 = vrot.slane %v425_v49, %v435_v48  ;;  %v444_v59 = vrot.slane %v425_v49, %v443_v54  ;;  %v452_v4 = vrot.slane %v425_v49, %v451_v60 }
  0x14   :  { %1772 = vmatpush3.bf16.msra.mxu0 %v1769_v9 }
  0x15   :  { %1774 = vmatprep.subr.bf16.mxu0 %v1773_v12 }
  0x18   :  { %1776 = vmatpush3.bf16.msra.mxu0 %v1773_v12  ;;  %v460_v12 = vrot.slane %v425_v49, %v459_v5 }
  0x1b   :  { %1591 = vmatmul.mubr.msk.f32.vlgmr.msra.gmra.mrb[0].mxu0 %vm99_vm0, %v81_v13  ;;  %v467_v13 = vsub.s32 5, %v2204_v46 }
  0x1c   :  { %1593 = vmatprep.mubr.msk.f32.mxu0 %vm99_vm0, %v82_v14 }
  0x1f   :  { %1594 = vmatmul.mubr.msk.f32.gmra.mrb[2].mxu0 %vm99_vm0, %v83_v15 }
  0xee   :  { %v1592_v18 = vpop.f32.mrb[0].mxu0 }
  0xef   :  { %v184_v19 = vadd.f32 %v1592_v18, %v1431_v17  ;;  %v178_v20 = vpop.f32.mrb[1].mxu0 }
  0xf0   :  { %v179_v21 = vadd.f32 %v1431_v17, %v178_v20  ;;  %v468_v20 = vrot.slane %v425_v49, %v467_v13 }
  0xf2   :  { %v1595_v22 = vpop.f32.mrb[2].mxu0  ;;  %v1777_v23 = vpack.c.bf16 %v184_v19, %v179_v21  ;;  %v475_v21 = vsub.s32 6, %v2204_v46 }
  0xf3   :  { %v194_v24 = vadd.f32 %v1595_v22, %v1431_v17  ;;  %v188_v25 = vpop.f32.mrb[3].mxu0 }
  0xf4   :  { %v189_v26 = vadd.f32 %v1431_v17, %v188_v25  ;;  %1778 = vmatprep.subr.bf16.mxu1 %v1777_v23 }
  0xf5   :  { %1780 = vmatpush3.bf16.msra.mxu1 %v1777_v23 }
  0xf6   :  { %v1781_v27 = vpack.c.bf16 %v194_v24, %v189_v26 }
  0xf8   :  { %1782 = vmatprep.subr.bf16.mxu1 %v1781_v27 }
  0xf9   :  { %1784 = vmatpush3.bf16.msra.mxu1 %v1781_v27 }
  0xfc   :  { %1605 = vmatmul.mubr.msk.f32.vlgmr.msra.gmra.mrb[0].mxu1 %vm215_vm1, %v198_v28  ;;  %v476_v28 = vrot.slane %v425_v49, %v475_v21 }
  0xfd   :  { %1607 = vmatprep.mubr.msk.f32.mxu1 %vm215_vm1, %v199_v29  ;;  %v483_v29 = vsub.s32 7, %v2204_v46 }
 0x100   :  { %1608 = vmatmul.mubr.msk.f32.gmra.mrb[2].mxu1 %vm215_vm1, %v200_v30 }
 0x101   :  { %1610 = vmatprep.mubr.msk.f32.mxu1 %vm215_vm1, %v201_v31 }
 0x104   :  { %1611 = vmatmul.mubr.msk.f32.gmra.mrb[4].mxu1 %vm215_vm1, %v202_v32 }
 0x105   :  { %1613 = vmatprep.mubr.msk.f32.mxu1 %vm215_vm1, %v203_v33 }
 0x108   :  { %1614 = vmatmul.mubr.msk.f32.gmra.mrb[6].mxu1 %vm215_vm1, %v204_v34 }
 0x109   :  { %1616 = vmatprep.mubr.msk.f32.mxu1 %vm215_vm1, %v205_v35 }
 0x10c   :  { %1617 = vmatmul.mubr.msk.f32.gmra.mrb[8].mxu1 %vm215_vm1, %v206_v36  ;;  %v484_v36 = vrot.slane %v425_v49, %v483_v29  ;;  %v1455_v49 = vld [vmem:[%s2627_s30] ss:$0 sm:$0xff] }
 0x10d   :  { %1619 = vmatprep.mubr.msk.f32.mxu1 %vm215_vm1, %v207_v37 }
 0x110   :  { %1620 = vmatmul.mubr.msk.f32.gmra.mrb[10].mxu1 %vm215_vm1, %v208_v38 }
 0x111   :  { %1622 = vmatprep.mubr.msk.f32.mxu1 %vm215_vm1, %v209_v39 }
 0x114   :  { %1623 = vmatmul.mubr.msk.f32.gmra.mrb[12].mxu1 %vm215_vm1, %v210_v40 }
 0x115   :  { %1625 = vmatprep.mubr.msk.f32.mxu1 %vm215_vm1, %v211_v41 }
 0x118   :  { %1626 = vmatmul.mubr.msk.f32.gmra.mrb[14].mxu1 %vm215_vm1, %v212_v42 }
 0x119   :  { %1628 = vmatprep.mubr.msk.f32.mxu1 %vm215_vm1, %v213_v43 }
 0x11c   :  { %1629 = vmatmul.mubr.msk.f32.gmra.mrb[16].mxu1 %vm215_vm1, %v214_v44  ;;  %v1454_v44 = vld [vmem:[%s2626_s24 + $0x8] ss:$0 sm:$0xff] }
 0x1cf   :  { %v1606_v50 = vpop.f32.mrb[0].mxu1 }
 0x1d0   :  { %v336_v52 = vpop.f32.mrb[1].mxu1  ;;  %v432_v56 = vmul.f32 %v1606_v50, %v430_v51 }
 0x1d1   :  { %v431_v61 = vmul.f32 %v430_v51, %v336_v52 }
 0x1d3   :  { %v1609_v55 = vpop.f32.mrb[2].mxu1 }
 0x1d4   :  { %v438_v57 = vmul.f32 %v1609_v55, %v436_v53  ;;  %v346_v58 = vpop.f32.mrb[3].mxu1 }
 0x1d5   :  { %v437_v62 = vmul.f32 %v436_v53, %v346_v58 }
 0x1d6   :  { %v440_v63 = vadd.f32 %v438_v57, %v432_v56 }
 0x1d7   :  { %v439_v0 = vadd.f32 %v437_v62, %v431_v61  ;;  %v1612_v1 = vpop.f32.mrb[4].mxu1 }
 0x1d8   :  { %v446_v2 = vmul.f32 %v1612_v1, %v444_v59  ;;  %v356_v3 = vpop.f32.mrb[5].mxu1 }
 0x1d9   :  { %v445_v6 = vmul.f32 %v444_v59, %v356_v3 }
 0x1da   :  { %v448_v7 = vadd.f32 %v446_v2, %v440_v63 }
 0x1db   :  { %v447_v8 = vadd.f32 %v445_v6, %v439_v0  ;;  %v1615_v9 = vpop.f32.mrb[6].mxu1 }
 0x1dc   :  { %v454_v10 = vmul.f32 %v1615_v9, %v452_v4  ;;  %v366_v11 = vpop.f32.mrb[7].mxu1 }
 0x1dd   :  { %v453_v14 = vmul.f32 %v452_v4, %v366_v11 }
 0x1de   :  { %v456_v15 = vadd.f32 %v454_v10, %v448_v7 }
 0x1df   :  { %v455_v16 = vadd.f32 %v453_v14, %v447_v8  ;;  %v1618_v17 = vpop.f32.mrb[8].mxu1 }
 0x1e0   :  { %v462_v18 = vmul.f32 %v1618_v17, %v460_v12  ;;  %v376_v19 = vpop.f32.mrb[9].mxu1 }
 0x1e1   :  { %v461_v22 = vmul.f32 %v460_v12, %v376_v19 }
 0x1e2   :  { %v464_v23 = vadd.f32 %v462_v18, %v456_v15 }
 0x1e3   :  { %v463_v24 = vadd.f32 %v461_v22, %v455_v16  ;;  %v1621_v25 = vpop.f32.mrb[10].mxu1 }
 0x1e4   :  { %v470_v26 = vmul.f32 %v1621_v25, %v468_v20  ;;  %v386_v27 = vpop.f32.mrb[11].mxu1 }
 0x1e5   :  { %v469_v30 = vmul.f32 %v468_v20, %v386_v27 }
 0x1e6   :  { %v472_v31 = vadd.f32 %v470_v26, %v464_v23 }
 0x1e7   :  { %v471_v32 = vadd.f32 %v469_v30, %v463_v24  ;;  %v1624_v33 = vpop.f32.mrb[12].mxu1 }
 0x1e8   :  { %v478_v34 = vmul.f32 %v1624_v33, %v476_v28  ;;  %v396_v35 = vpop.f32.mrb[13].mxu1 }
 0x1e9   :  { %v477_v37 = vmul.f32 %v476_v28, %v396_v35  ;;  %v1966_v35 = vmov -1.0  }
 0x1ea   :  { %v480_v38 = vadd.f32 %v478_v34, %v472_v31 }
 0x1eb   :  { %v479_v39 = vadd.f32 %v477_v37, %v471_v32  ;;  %v1627_v40 = vpop.f32.mrb[14].mxu1 }
 0x1ec   :  { %v486_v41 = vmul.f32 %v1627_v40, %v484_v36  ;;  %v406_v42 = vpop.f32.mrb[15].mxu1 }
 0x1ed   :  { %v485_v43 = vmul.f32 %v484_v36, %v406_v42 }
 0x1ee   :  { %v488_v45 = vadd.f32 %v486_v41, %v480_v38 }
 0x1ef   :  { %v487_v50 = vadd.f32 %v485_v43, %v479_v39  ;;  %v1630_v51 = vpop.f32.mrb[16].mxu1 }
 0x1f0   :  { %v494_v52 = vmul.f32 %v1630_v51, %v1454_v44  ;;  %v416_v53 = vpop.f32.mrb[17].mxu1  ;;  %v602_v51 = vld [vmem:[%s2628_s5 + $0x8] sm:$0xff] }
 0x1f1   :  { %v493_v54 = vmul.f32 %v1454_v44, %v416_v53 }
 0x1f2   :  { %v496_v55 = vadd.f32 %v494_v52, %v488_v45  ;;  %v700_v52 = vld [vmem:[%s2629_s27 + $0x8] sm:$0xff] }
 0x1f3   :  { %v495_v56 = vadd.f32 %v493_v54, %v487_v50  ;;  %v601_v50 = vld [vmem:[%s2628_s5] sm:$0xff] }
 0x1f4   :  { %v505_v57 = vadd.f32 %v1455_v49, %v496_v55  ;;  %v1785_v53 = vpack.c.bf16 %v602_v51, %v601_v50  ;;  %v699_v54 = vld [vmem:[%s2629_s27] sm:$0xff]  ;;  %v701_v55 = vld [vmem:[%s2629_s27 + $0x10] sm:$0xff] }
 0x1f5   :  { %v504_v58 = vadd.f32 %v1455_v49, %v495_v56  ;;  %v702_v49 = vld [vmem:[%s2629_s27 + $0x18] sm:$0xff]  ;;  %v611_v51 = vld [vmem:[%s2628_s5 + $0x50] sm:$0xff] }
 0x1f6   :  { %v509_v59 = vmul.f32 0.70710677, %v505_v57  ;;  %v507_v44 = vmul.f32 0.5, %v505_v57  ;;  %v1817_v56 = vpack.c.bf16 %v702_v49, %v700_v52  ;;  %v1819_v57 = vpack.c.bf16 %v701_v55, %v699_v54  ;;  %1786 = vmatprep.subr.bf16.mxu1 %v1785_v53  ;;  %v612_v52 = vld [vmem:[%s2628_s5 + $0x58] sm:$0xff]  ;;  %v723_v55 = vld [vmem:[%s2629_s27 + $0xc0] sm:$0xff] }
 0x1f7   :  { %v508_v60 = vmul.f32 0.70710677, %v504_v58  ;;  %v506_v40 = vmul.f32 0.5, %v504_v58  ;;  %v704_v58 = vld [vmem:[%s2629_s27 + $0x28] sm:$0xff]  ;;  %1788 = vmatpush3.bf16.msra.mxu1 %v1785_v53  ;;  %v1805_v49 = vpack.c.bf16 %v612_v52, %v611_v51  ;;  %v726_v54 = vld [vmem:[%s2629_s27 + $0xd8] sm:$0xff] }
 0x1f8   :  { %v515_v61 = vand.u32 2147483647, %v509_v59  ;;  %vm511_vm3 = vcmp.ge.f32.partialorder %v509_v59, 0.0  ;;  %v706_v59 = vld [vmem:[%s2629_s27 + $0x38] sm:$0xff]  ;;  %1818 = vmatprep.subr.bf16.mxu0 %v1817_v56  ;;  %v724_v53 = vld [vmem:[%s2629_s27 + $0xc8] sm:$0xff]  ;;  %v725_v56 = vld [vmem:[%s2629_s27 + $0xd0] sm:$0xff] }
 0x1f9   :  { %v514_v62 = vand.u32 2147483647, %v508_v60  ;;  %vm510_vm2 = vcmp.ge.f32.partialorder %v508_v60, 0.0  ;;  %v513_v37 = vsel %vm511_vm3, 1.0, %v1966_v35  ;;  %v603_v60 = vld [vmem:[%s2628_s5 + $0x10] sm:$0xff]  ;;  %1820 = vmatpush1.bf16.msra.mxu0 %v1819_v57  ;;  %v1967_v57 = vmov 0.0  }
 0x1fa   :  { %v517_v63 = vmul.f32 0.3275911, %v515_v61  ;;  %v543_v3 = vsub.f32 0.0, %v515_v61  ;;  %v512_v36 = vsel %vm510_vm2, 1.0, %v1966_v35  ;;  %807 = vmatprep.mubr.f32.mxu0 %v1967_v57 }
 0x1fb   :  { %v516_v0 = vmul.f32 0.3275911, %v514_v62  ;;  %v542_v4 = vsub.f32 0.0, %v514_v62 }
 0x1fc   :  { %v519_v1 = vadd.f32 1.0, %v517_v63  ;;  %v545_v6 = vmul.f32 %v543_v3, %v515_v61  ;;  %v1821_v61 = vpack.c.bf16 %v706_v59, %v704_v58  ;;  %v703_v63 = vld [vmem:[%s2629_s27 + $0x20] sm:$0xff]  ;;  %v710_v3 = vld [vmem:[%s2629_s27 + $0x58] sm:$0xff]  ;;  %v1841_v58 = vpack.c.bf16 %v726_v54, %v724_v53 }
 0x1fd   :  { %v518_v2 = vadd.f32 1.0, %v516_v0  ;;  %v544_v8 = vmul.f32 %v542_v4, %v514_v62  ;;  %v604_v62 = vld [vmem:[%s2628_s5 + $0x18] sm:$0xff]  ;;  %v705_v0 = vld [vmem:[%s2629_s27 + $0x30] sm:$0xff]  ;;  %v605_v4 = vld [vmem:[%s2628_s5 + $0x20] sm:$0xff] }
 0x1fe   :  { %1934 = vrcp.f32 %v519_v1  ;;  %v548_v12 = vmul.f32 1.442695, %v545_v6  ;;  %v1789_v1 = vpack.c.bf16 %v604_v62, %v603_v60  ;;  %v606_v6 = vld [vmem:[%s2628_s5 + $0x28] sm:$0xff]  ;;  %1822 = vmatprep.subr.bf16.mxu0 %v1821_v61  ;;  %v613_v59 = vld [vmem:[%s2628_s5 + $0x60] sm:$0xff]  ;;  %v1843_v62 = vpack.c.bf16 %v725_v56, %v723_v55 }
 0x1ff   :  { %1936 = vrcp.f32 %v518_v2  ;;  %v546_v14 = vmul.f32 1.442695, %v544_v8  ;;  %v708_v2 = vld [vmem:[%s2629_s27 + $0x48] sm:$0xff]  ;;  %v1793_v8 = vpack.c.bf16 %v606_v6, %v605_v4  ;;  %v615_v4 = vld [vmem:[%s2628_s5 + $0x70] sm:$0xff] }
 0x200   :  { %1938 = vpow2.f32 %v548_v12  ;;  %1790 = vmatprep.subr.bf16.mxu1 %v1789_v1  ;;  %v614_v60 = vld [vmem:[%s2628_s5 + $0x68] sm:$0xff] }
 0x201   :  { %1940 = vpow2.f32 %v546_v14  ;;  %1792 = vmatpush3.bf16.msra.mxu1 %v1789_v1  ;;  %v728_v61 = vld [vmem:[%s2629_s27 + $0xe8] sm:$0xff]  ;;  %v727_v1 = vld [vmem:[%s2629_s27 + $0xe0] sm:$0xff] }
 0x202   :  { %1794 = vmatprep.subr.bf16.mxu1 %v1793_v8 }
 0x205   :  { %1796 = vmatpush3.bf16.msra.mxu1 %v1793_v8 }
 0x208   :  { %v1935_v5 = vpop.eup %1934 }
 0x209   :  { %v1937_v7 = vpop.eup %1936  ;;  %v525_v9 = vmul.f32 1.0614054, %v1935_v5 }
 0x20a   :  { %v524_v10 = vmul.f32 1.0614054, %v1937_v7  ;;  %v1939_v28 = vpop.eup %1938 }
 0x20b   :  { %v527_v11 = vadd.f32 -1.4531521, %v525_v9  ;;  %v1941_v30 = vpop.eup %1940  ;;  %v707_v9 = vld [vmem:[%s2629_s27 + $0x40] sm:$0xff] }
 0x20c   :  { %v526_v13 = vadd.f32 -1.4531521, %v524_v10  ;;  %v709_v10 = vld [vmem:[%s2629_s27 + $0x50] sm:$0xff] }
 0x20d   :  { %v529_v15 = vmul.f32 %v1935_v5, %v527_v11  ;;  %v1827_v11 = vpack.c.bf16 %v709_v10, %v707_v9 }
 0x20e   :  { %v528_v16 = vmul.f32 %v1937_v7, %v526_v13 }
 0x20f   :  { %v531_v17 = vadd.f32 1.4214138, %v529_v15 }
 0x210   :  { %v530_v18 = vadd.f32 1.4214138, %v528_v16 }
 0x211   :  { %v533_v19 = vmul.f32 %v1935_v5, %v531_v17 }
 0x212   :  { %v532_v20 = vmul.f32 %v1937_v7, %v530_v18 }
 0x213   :  { %v535_v21 = vadd.f32 -0.28449672, %v533_v19 }
 0x214   :  { %v534_v22 = vadd.f32 -0.28449672, %v532_v20  ;;  %v712_v20 = vld [vmem:[%s2629_s27 + $0x68] sm:$0xff] }
 0x215   :  { %v537_v23 = vmul.f32 %v1935_v5, %v535_v21  ;;  %v714_v21 = vld [vmem:[%s2629_s27 + $0x78] sm:$0xff] }
 0x216   :  { %v536_v24 = vmul.f32 %v1937_v7, %v534_v22  ;;  %v1829_v22 = vpack.c.bf16 %v714_v21, %v712_v20 }
 0x217   :  { %v539_v25 = vadd.f32 0.2548296, %v537_v23  ;;  %v711_v23 = vld [vmem:[%s2629_s27 + $0x60] sm:$0xff] }
 0x218   :  { %v538_v26 = vadd.f32 0.2548296, %v536_v24  ;;  %v713_v24 = vld [vmem:[%s2629_s27 + $0x70] sm:$0xff] }
 0x219   :  { %v541_v27 = vmul.f32 %v1935_v5, %v539_v25  ;;  %v1823_v5 = vpack.c.bf16 %v705_v0, %v703_v63  ;;  %v1831_v25 = vpack.c.bf16 %v713_v24, %v711_v23  ;;  %v1809_v63 = vpack.c.bf16 %v614_v60, %v613_v59  ;;  %v730_v0 = vld [vmem:[%s2629_s27 + $0xf8] sm:$0xff] }
 0x21a   :  { %v540_v29 = vmul.f32 %v1937_v7, %v538_v26  ;;  %v1825_v7 = vpack.c.bf16 %v710_v3, %v708_v2  ;;  %v607_v26 = vld [vmem:[%s2628_s5 + $0x30] sm:$0xff]  ;;  %v1845_v2 = vpack.c.bf16 %v730_v0, %v728_v61  ;;  %v30_v59 = vstv %s2596_s15 }
 0x21b   :  { %v551_v31 = vmul.f32 %v1939_v28, %v541_v27  ;;  %1824 = vmatpush1.bf16.msra.mxu0 %v1823_v5  ;;  %v608_v27 = vld [vmem:[%s2628_s5 + $0x38] sm:$0xff]  ;;  %v716_v28 = vld [vmem:[%s2629_s27 + $0x88] sm:$0xff]  ;;  %v729_v3 = vld [vmem:[%s2629_s27 + $0xf0] sm:$0xff]  ;;  %31 = vst [vmem:[#allocation3] sm:$0x1] %v30_v59 }
 0x21c   :  { %v550_v32 = vmul.f32 %v1941_v30, %v540_v29  ;;  %1826 = vmatprep.subr.bf16.mxu0 %v1825_v7  ;;  %v1797_v29 = vpack.c.bf16 %v608_v27, %v607_v26  ;;  %v718_v30 = vld [vmem:[%s2629_s27 + $0x98] sm:$0xff]  ;;  %v1847_v6 = vpack.c.bf16 %v729_v3, %v727_v1  ;;  %v820_v26 = vld [vmem:[%s2595_s12] sm:$0xff]  ;;  %v1169_v59 = vld [vmem:[%s2601_s18 + $0x10] sm:$0xff] }
 0x21d   :  { %v553_v33 = vsub.f32 1.0, %v551_v31  ;;  %v715_v31 = vld [vmem:[%s2629_s27 + $0x80] sm:$0xff]  ;;  %v616_v5 = vld [vmem:[%s2628_s5 + $0x78] sm:$0xff] }
 0x21e   :  { %v552_v34 = vsub.f32 1.0, %v550_v32  ;;  %v717_v32 = vld [vmem:[%s2629_s27 + $0x90] sm:$0xff]  ;;  %1798 = vmatprep.subr.bf16.mxu1 %v1797_v29  ;;  %v1813_v7 = vpack.c.bf16 %v616_v5, %v615_v4  ;;  %v1015_v3 = vld [vmem:[%s2597_s13] sm:$0xff]  ;;  %v1016_v4 = vld [vmem:[%s2597_s13 + $0x8] sm:$0xff] }
 0x21f   :  { %v555_v39 = vmul.f32 %v553_v33, %v513_v37  ;;  %1828 = vmatpush1.bf16.msra.mxu0 %v1827_v11  ;;  %v1833_v33 = vpack.c.bf16 %v718_v30, %v716_v28  ;;  %1800 = vmatpush3.bf16.msra.mxu1 %v1797_v29  ;;  %v610_v37 = vld [vmem:[%s2628_s5 + $0x48] sm:$0xff]  ;;  %v1017_v5 = vld [vmem:[%s2597_s13 + $0x10] sm:$0xff] }
 0x220   :  { %v554_v38 = vmul.f32 %v552_v34, %v512_v36  ;;  %1830 = vmatprep.subr.bf16.mxu0 %v1829_v22  ;;  %v1835_v34 = vpack.c.bf16 %v717_v32, %v715_v31  ;;  %v609_v36 = vld [vmem:[%s2628_s5 + $0x40] sm:$0xff] }
 0x221   :  { %v557_v43 = vadd.f32 1.0, %v555_v39  ;;  %v1801_v39 = vpack.c.bf16 %v610_v37, %v609_v36 }
 0x222   :  { %v556_v41 = vadd.f32 1.0, %v554_v38  ;;  %v720_v38 = vld [vmem:[%s2629_s27 + $0xa8] sm:$0xff] }
 0x223   :  { %v2232_v45 = vmul.f32 %v557_v43, %v507_v44  ;;  %1832 = vmatpush1.bf16.msra.mxu0 %v1831_v25  ;;  %v721_v43 = vld [vmem:[%s2629_s27 + $0xb0] sm:$0xff]  ;;  %1802 = vmatprep.subr.bf16.mxu1 %v1801_v39 }
 0x224   :  { %v2229_v42 = vmul.f32 %v556_v41, %v506_v40  ;;  %1834 = vmatprep.subr.bf16.mxu0 %v1833_v33  ;;  %v722_v40 = vld [vmem:[%s2629_s27 + $0xb8] sm:$0xff]  ;;  %v719_v41 = vld [vmem:[%s2629_s27 + $0xa0] sm:$0xff]  ;;  %1804 = vmatpush3.bf16.msra.mxu1 %v1801_v39 }
 0x225   :  { %v1837_v44 = vpack.c.bf16 %v722_v40, %v720_v38  ;;  %v1839_v50 = vpack.c.bf16 %v721_v43, %v719_v41  ;;  %1806 = vmatprep.subr.bf16.mxu1 %v1805_v49 }
 0x226   :  { %562 = vadd.xlane.f32.xlu0 %v2229_v42 }
 0x227   :  { %1836 = vmatpush1.bf16.msra.mxu0 %v1835_v34 }
 0x228   :  { %1838 = vmatprep.subr.bf16.mxu0 %v1837_v44  ;;  %1808 = vmatpush3.bf16.msra.mxu1 %v1805_v49 }
 0x229   :  { %1810 = vmatprep.subr.bf16.mxu1 %v1809_v63 }
 0x22a   :  { %564 = vadd.xlane.f32.xlu0 %v2232_v45 }
 0x22b   :  { %1840 = vmatpush1.bf16.msra.mxu0 %v1839_v50 }
 0x22c   :  { %1842 = vmatprep.subr.bf16.mxu0 %v1841_v58  ;;  %1812 = vmatpush3.bf16.msra.mxu1 %v1809_v63  ;;  %v1968_v58 = vmov 0  }
 0x22d   :  { %1814 = vmatprep.subr.bf16.mxu1 %v1813_v7  ;;  %1933 = vset.pattern.permute.xlu1 %v1968_v58 }
 0x22e   :  { %1932 = vset.pattern.permute.xlu0 %v1968_v58  ;;  %v32_v58 = vstv %s2600_s22 }
 0x22f   :  { %1844 = vmatpush1.bf16.msra.mxu0 %v1843_v62  ;;  %33 = vst [vmem:[#allocation4] sm:$0x1] %v32_v58 }
 0x230   :  { %1846 = vmatprep.subr.bf16.mxu0 %v1845_v2  ;;  %1816 = vmatpush3.bf16.msra.mxu1 %v1813_v7  ;;  %v1464_v2 = vld [vmem:[#allocation3] ss:$0 sm:$0xff]  ;;  %v1018_v7 = vld [vmem:[%s2597_s13 + $0x18] sm:$0xff] }
 0x233   :  { %1848 = vmatpush1.bf16.msra.mxu0 %v1847_v6  ;;  %v1857_v6 = vpack.c.bf16 %v1016_v4, %v1015_v3 }
 0x235   :  { %1858 = vmatprep.subr.bf16.mxu0 %v1857_v6 }
 0x2b3   :  { %v563_v12 = vpop.xlane.xlu0 %562 }
 0x2b4   :  { %v567_v13 = vmul.f32 0.0078125, %v563_v12 }
 0x2b6   :  { %v2290_v14 = vsub.f32 %v2229_v42, %v567_v13 }
 0x2b7   :  { %v565_v15 = vpop.xlane.xlu0 %564 }
 0x2b8   :  { %v568_v16 = vmul.f32 0.0078125, %v565_v15  ;;  %v571_v17 = vmul.f32 %v2290_v14, %v2290_v14 }
 0x2ba   :  { %v2295_v18 = vsub.f32 %v2232_v45, %v568_v16  ;;  %573 = vadd.xlane.f32.xlu1 %v571_v17  ;;  %v1456_v16 = vld [vmem:[%s2592_s6] ss:$0 sm:$0xff] }
 0x2bc   :  { %v572_v19 = vmul.f32 %v2295_v18, %v2295_v18 }
 0x2be   :  { %575 = vadd.xlane.f32.xlu1 %v572_v19  ;;  %v1457_v19 = vld [vmem:[%s2593_s7] ss:$0 sm:$0xff] }
 0x347   :  { %v574_v8 = vpop.xlane.xlu1 %573 }
 0x348   :  { %v577_v9 = vmul.f32 0.0078125, %v574_v8  ;;  %v1861_v8 = vpack.c.bf16 %v1018_v7, %v1017_v5  ;;  %v1171_v7 = vld [vmem:[%s2601_s18 + $0x20] sm:$0xff] }
 0x34a   :  { %v579_v10 = vadd.f32 1e-05, %v577_v9  ;;  %v1019_v9 = vld [vmem:[%s2597_s13 + $0x20] sm:$0xff] }
 0x34b   :  { %v576_v11 = vpop.xlane.xlu1 %575 }
 0x34c   :  { %1942 = vrsqrt.f32 %v579_v10  ;;  %v578_v12 = vmul.f32 0.0078125, %v576_v11  ;;  %v1020_v10 = vld [vmem:[%s2597_s13 + $0x28] sm:$0xff] }
 0x34d   :  { %v1865_v11 = vpack.c.bf16 %v1020_v10, %v1019_v9  ;;  %v1173_v10 = vld [vmem:[%s2601_s18 + $0x30] sm:$0xff] }
 0x34e   :  { %v580_v13 = vadd.f32 1e-05, %v578_v12  ;;  %v1021_v12 = vld [vmem:[%s2597_s13 + $0x30] sm:$0xff] }
 0x350   :  { %1944 = vrsqrt.f32 %v580_v13  ;;  %v1022_v13 = vld [vmem:[%s2597_s13 + $0x38] sm:$0xff] }
 0x356   :  { %v1943_v15 = vpop.eup %1942 }
 0x357   :  { %v583_v17 = vmul.f32 %v1943_v15, %v2290_v14  ;;  %v28_v14 = vstv %s2594_s9  ;;  %v1869_v15 = vpack.c.bf16 %v1022_v13, %v1021_v12  ;;  %v1471_v13 = vld [vmem:[#allocation4] ss:$0 sm:$0xff] }
 0x358   :  { %29 = vst [vmem:[#allocation2] sm:$0x1] %v28_v14  ;;  %v731_v14 = vld [vmem:[%s2598_s11] sm:$0x3] }
 0x359   :  { %v591_v20 = vmul.f32 %v1456_v16, %v583_v17  ;;  %v1024_v17 = vld [vmem:[%s2597_s13 + $0x48] sm:$0xff] }
 0x35a   :  { %v1945_v21 = vpop.eup %1944 }
 0x35b   :  { %v584_v22 = vmul.f32 %v1945_v21, %v2295_v18  ;;  %v599_v23 = vadd.f32 %v1457_v19, %v591_v20  ;;  %v1025_v20 = vld [vmem:[%s2597_s13 + $0x50] sm:$0xff]  ;;  %v1026_v21 = vld [vmem:[%s2597_s13 + $0x58] sm:$0xff] }
 0x35d   :  { %v592_v24 = vmul.f32 %v1456_v16, %v584_v22  ;;  %1663 = vmatprep.mubr.f32.mxu1 %v599_v23  ;;  %808 = vmatmul.mubr.f32.vlgmr.msra.gmra.mrb[4].mxu0 %v599_v23  ;;  %v1023_v16 = vld [vmem:[%s2597_s13 + $0x40] sm:$0xff]  ;;  %v1877_v22 = vpack.c.bf16 %v1026_v21, %v1025_v20  ;;  %v1178_v20 = vld [vmem:[%s2601_s18 + $0x58] sm:$0xff] }
 0x35e   :  { %813 = vmatprep.mubr.f32.mxu0 %v1967_v57  ;;  %v2415_v57 = vld [vmem:[%s2595_s12 + $0x8] sm:$0xff]  ;;  %1860 = vmatpush3.bf16.msra.mxu0 %v1857_v6  ;;  %v1027_v23 = vld [vmem:[%s2597_s13 + $0x60] sm:$0xff] }
 0x35f   :  { %v600_v25 = vadd.f32 %v1457_v19, %v592_v24  ;;  %v1458_v28 = vld [vmem:[#allocation2] ss:$0 sm:$0xff]  ;;  %1862 = vmatprep.subr.bf16.mxu0 %v1861_v8  ;;  %v1873_v19 = vpack.c.bf16 %v1024_v17, %v1023_v16  ;;  %v1028_v24 = vld [vmem:[%s2597_s13 + $0x68] sm:$0xff] }
 0x360   :  { %v1176_v16 = vld [vmem:[%s2601_s18 + $0x48] sm:$0xff]  ;;  %v1179_v21 = vld [vmem:[%s2601_s18 + $0x60] sm:$0xff] }
 0x361   :  { %1664 = vmatmul.mubr.f32.vlgmr.msra.gmra.mrb[18].mxu1 %v600_v25  ;;  %814 = vmatmul.mubr.f32.gmra.mrb[6].mxu0 %v600_v25  ;;  %v1881_v25 = vpack.c.bf16 %v1028_v24, %v1027_v23  ;;  %v1180_v23 = vld [vmem:[%s2601_s18 + $0x68] sm:$0xff] }
 0x362   :  { %1670 = vmatprep.mubr.msk.f32.mxu1 %vm838_vm4, %v820_v26  ;;  %1864 = vmatpush3.bf16.msra.mxu0 %v1861_v8  ;;  %v1172_v8 = vld [vmem:[%s2601_s18 + $0x28] sm:$0xff]  ;;  %v1913_v24 = vpack.c.bf16 %v1180_v23, %v1179_v21 }
 0x363   :  { %1866 = vmatprep.subr.bf16.mxu0 %v1865_v11  ;;  %v1897_v9 = vpack.c.bf16 %v1172_v8, %v1171_v7 }
 0x366   :  { %1868 = vmatpush3.bf16.msra.mxu0 %v1865_v11  ;;  %v1174_v11 = vld [vmem:[%s2601_s18 + $0x38] sm:$0xff] }
 0x367   :  { %1870 = vmatprep.subr.bf16.mxu0 %v1869_v15  ;;  %v1901_v12 = vpack.c.bf16 %v1174_v11, %v1173_v10 }
 0x36a   :  { %1872 = vmatpush3.bf16.msra.mxu0 %v1869_v15  ;;  %v1175_v15 = vld [vmem:[%s2601_s18 + $0x40] sm:$0xff] }
 0x36b   :  { %1874 = vmatprep.subr.bf16.mxu0 %v1873_v19  ;;  %v1905_v17 = vpack.c.bf16 %v1176_v16, %v1175_v15 }
 0x36e   :  { %1876 = vmatpush3.bf16.msra.mxu0 %v1873_v19  ;;  %v1177_v19 = vld [vmem:[%s2601_s18 + $0x50] sm:$0xff] }
 0x36f   :  { %1878 = vmatprep.subr.bf16.mxu0 %v1877_v22 }
 0x372   :  { %1880 = vmatpush3.bf16.msra.mxu0 %v1877_v22  ;;  %v1909_v22 = vpack.c.bf16 %v1178_v20, %v1177_v19 }
 0x373   :  { %1882 = vmatprep.subr.bf16.mxu0 %v1881_v25 }
 0x376   :  { %1884 = vmatpush3.bf16.msra.mxu0 %v1881_v25  ;;  %v1181_v25 = vld [vmem:[%s2601_s18 + $0x70] sm:$0xff] }
 0x430   :  { %v2404_v18 = vpop.f32.mrb[4].mxu0 }
 0x431   :  { %v2406_v27 = vpop.f32.mrb[5].mxu0 }
 0x434   :  { %v1665_v29 = vpop.f32.mrb[18].mxu1  ;;  %v2408_v30 = vpop.f32.mrb[6].mxu0 }
 0x435   :  { %v696_v31 = vadd.f32 %v1665_v29, %v1458_v28  ;;  %v690_v32 = vpop.f32.mrb[19].mxu1  ;;  %v2410_v33 = vpop.f32.mrb[7].mxu0 }
 0x436   :  { %v691_v34 = vadd.f32 %v1458_v28, %v690_v32 }
 0x437   :  { %v824_v36 = vsel %vm822_vm5, %v696_v31, -inf }
 0x438   :  { %v823_v37 = vsel %vm822_vm5, %v691_v34, -inf }
 0x439   :  { %v825_v38 = vmax.f32 %v823_v37, %v824_v36 }
 0x43b   :  { %v826_v39 = vrot.slane %v825_v38, 4 }
 0x43d   :  { %v827_v40 = vmax.f32 %v825_v38, %v826_v39  ;;  %v1029_v38 = vld [vmem:[%s2597_s13 + $0x70] sm:$0xff] }
 0x43f   :  { %v828_v41 = vrot.slane %v827_v40, 2 }
 0x441   :  { %v829_v43 = vmax.f32 %v827_v40, %v828_v41 }
 0x443   :  { %v830_v44 = vrot.slane %v829_v43, 1 }
 0x445   :  { %v831_v50 = vmax.f32 %v829_v43, %v830_v44 }
 0x447   :  { %v832_v51 = vsub.f32 %v691_v34, %v831_v50  ;;  %v833_v52 = vsub.f32 %v696_v31, %v831_v50 }
 0x449   :  { %v834_v53 = vmul.f32 1.442695, %v832_v51  ;;  %v836_v49 = vmul.f32 1.442695, %v833_v52 }
 0x44b   :  { %1946 = vpow2.f32 %v834_v53 }
 0x44c   :  { %1948 = vpow2.f32 %v836_v49  ;;  %v1463_v49 = vld [vmem:[%s2599_s14] ss:$0 sm:$0xff] }
 0x455   :  { %v1947_v54 = vpop.eup %1946 }
 0x456   :  { %v1949_v55 = vpop.eup %1948 }
 0x457   :  { %v1849_v56 = vpack.c.bf16 %v1949_v55, %v1947_v54 }
 0x459   :  { %1850 = vmatprep.subr.bf16.mxu1 %v1849_v56 }
 0x45a   :  { %1852 = vmatpush3.bf16.msra.mxu1 %v1849_v56 }
 0x45d   :  { %1671 = vmatmul.mubr.msk.f32.vlgmr.msra.gmra.mrb[20].mxu1 %vm838_vm4, %v2415_v57 }
 0x45e   :  { %1677 = vmatprep.mubr.msk.f32.mxu1 %vm838_vm4, %v820_v26  ;;  %v736_v26 = vrot.slane %v731_v14, %v429_v47  ;;  %v1030_v47 = vld [vmem:[%s2597_s13 + $0x78] sm:$0xff] }
 0x460   :  { %v816_v28 = vadd.f32 %v2408_v30, %v736_v26  ;;  %v810_v29 = vadd.f32 %v2404_v18, %v736_v26  ;;  %v1885_v30 = vpack.c.bf16 %v1030_v47, %v1029_v38  ;;  %v740_v18 = vrot.slane %v731_v14, %v435_v48  ;;  %v1182_v14 = vld [vmem:[%s2601_s18 + $0x78] sm:$0xff]  ;;  %v1465_v38 = vld [vmem:[%s2602_s16] ss:$0 sm:$0xff] }
 0x461   :  { %v1917_v26 = vpack.c.bf16 %v1182_v14, %v1181_v25 }
 0x462   :  { %1886 = vmatprep.subr.bf16.mxu0 %v1885_v30  ;;  %v818_v39 = vadd.f32 %v2410_v33, %v740_v18  ;;  %v812_v40 = vadd.f32 %v2406_v27, %v740_v18 }
 0x463   :  { %1888 = vmatpush3.bf16.msra.mxu0 %v1885_v30  ;;  %v1466_v30 = vld [vmem:[%s2603_s17] ss:$0 sm:$0xff] }
 0x464   :  { %v1012_v41 = vmax.f32 %v818_v39, 0.0  ;;  %v1011_v43 = vmax.f32 %v812_v40, 0.0 }
 0x530   :  { %v1672_v60 = vpop.f32.mrb[20].mxu1 }
 0x531   :  { %1950 = vrcp.f32 %v1672_v60  ;;  %v911_v61 = vpop.f32.mrb[21].mxu1 }
 0x532   :  { %1952 = vrcp.f32 %v911_v61  ;;  %v1170_v61 = vld [vmem:[%s2601_s18 + $0x18] sm:$0xff] }
 0x53b   :  { %v1951_v62 = vpop.eup %1950 }
 0x53c   :  { %v1953_v63 = vpop.eup %1952  ;;  %v923_v0 = vmul.f32 %v1951_v62, %v1949_v55  ;;  %v1893_v62 = vpack.c.bf16 %v1170_v61, %v1169_v59 }
 0x53d   :  { %v922_v1 = vmul.f32 %v1953_v63, %v1947_v54 }
 0x53e   :  { %931 = vperm.xlu1 %1933, %v923_v0  }
 0x53f   :  { %926 = vperm.xlu0 %1932, %v922_v1  }
 0x542   :  { %1120 = vperm.xlu1 %1933, %v1464_v2  }
 0x5bd   :  { %v932_v31 = vpop.permute.xlu1 %931 }
 0x5be   :  { %v935_v32 = vmul.f32 %v932_v31, %v816_v28  ;;  %v927_v34 = vpop.permute.xlu0 %926 }
 0x5bf   :  { %v934_v36 = vmul.f32 %v927_v34, %v810_v29 }
 0x5c1   :  { %v1853_v37 = vpack.c.bf16 %v935_v32, %v934_v36  ;;  %v1121_v53 = vpop.permute.xlu1 %1120 }
 0x5c2   :  { %v1124_v46 = vmul.f32 %v1121_v53, %v2232_v45  ;;  %v1123_v27 = vmul.f32 %v1121_v53, %v2229_v42  ;;  %v1167_v45 = vld [vmem:[%s2601_s18] sm:$0xff]  ;;  %v1168_v42 = vld [vmem:[%s2601_s18 + $0x8] sm:$0xff]  ;;  %v1321_v53 = vld [vmem:[%s2604_s20 + $0x10] sm:$0xff] }
 0x5c3   :  { %1854 = vmatprep.subr.bf16.mxu1 %v1853_v37  ;;  %v1889_v60 = vpack.c.bf16 %v1168_v42, %v1167_v45 }
 0x5c4   :  { %1856 = vmatpush3.bf16.msra.mxu1 %v1853_v37 }
 0x5c5   :  { %1890 = vmatprep.subr.bf16.mxu1 %v1889_v60 }
 0x5c7   :  { %1678 = vmatmul.mubr.msk.f32.vlgmr.msra.gmra.mrb[22].mxu1 %vm838_vm4, %v2415_v57 }
 0x5c8   :  { %1892 = vmatpush3.bf16.msra.mxu1 %v1889_v60 }
 0x5c9   :  { %1894 = vmatprep.subr.bf16.mxu1 %v1893_v62 }
 0x5cc   :  { %1896 = vmatpush3.bf16.msra.mxu1 %v1893_v62 }
 0x5cd   :  { %1898 = vmatprep.subr.bf16.mxu1 %v1897_v9 }
 0x5d0   :  { %1900 = vmatpush3.bf16.msra.mxu1 %v1897_v9 }
 0x5d1   :  { %1902 = vmatprep.subr.bf16.mxu1 %v1901_v12 }
 0x5d4   :  { %1904 = vmatpush3.bf16.msra.mxu1 %v1901_v12 }
 0x5d5   :  { %1906 = vmatprep.subr.bf16.mxu1 %v1905_v17 }
 0x5d8   :  { %1908 = vmatpush3.bf16.msra.mxu1 %v1905_v17 }
 0x5d9   :  { %1910 = vmatprep.subr.bf16.mxu1 %v1909_v22 }
 0x5dc   :  { %1912 = vmatpush3.bf16.msra.mxu1 %v1909_v22 }
 0x5dd   :  { %1914 = vmatprep.subr.bf16.mxu1 %v1913_v24 }
 0x5e0   :  { %1916 = vmatpush3.bf16.msra.mxu1 %v1913_v24 }
 0x5e1   :  { %1918 = vmatprep.subr.bf16.mxu1 %v1917_v26 }
 0x5e4   :  { %1920 = vmatpush3.bf16.msra.mxu1 %v1917_v26 }
 0x69a   :  { %v1679_v44 = vpop.f32.mrb[22].mxu1 }
 0x69b   :  { %v1014_v50 = vmul.f32 %v1679_v44, %v1012_v41  ;;  %v1002_v51 = vpop.f32.mrb[23].mxu1 }
 0x69c   :  { %v1013_v52 = vmul.f32 %v1011_v43, %v1002_v51  ;;  %v1320_v51 = vld [vmem:[%s2604_s20 + $0x8] sm:$0xff] }
 0x69e   :  { %1712 = vmatprep.mubr.f32.mxu0 %v1013_v52 }
 0x69f   :  { %1713 = vmatmul.mubr.f32.vlgmr.msra.gmra.mrb[8].mxu0 %v1014_v50  ;;  %v1319_v50 = vld [vmem:[%s2604_s20] sm:$0xff] }
 0x6a0   :  { %v1921_v52 = vpack.c.bf16 %v1320_v51, %v1319_v50  ;;  %v1468_v51 = vld [vmem:[%s2606_s21] ss:$0 sm:$0xff] }
 0x6a2   :  { %1922 = vmatprep.subr.bf16.mxu0 %v1921_v52 }
 0x6a3   :  { %1924 = vmatpush3.bf16.msra.mxu0 %v1921_v52 }
 0x772   :  { %v1714_v54 = vpop.f32.mrb[8].mxu0 }
 0x773   :  { %v1110_v48 = vadd.f32 %v1714_v54, %v1463_v49  ;;  %v1104_v33 = vpop.f32.mrb[9].mxu0 }
 0x774   :  { %v1105_v55 = vadd.f32 %v1463_v49, %v1104_v33  ;;  %v1322_v49 = vld [vmem:[%s2604_s20 + $0x18] sm:$0xff] }
 0x775   :  { %v2489_v56 = vadd.f32 %v1124_v46, %v1110_v48  ;;  %v1925_v54 = vpack.c.bf16 %v1322_v49, %v1321_v53  ;;  %v1467_v46 = vld [vmem:[%s2605_s19] ss:$0 sm:$0xff] }
 0x776   :  { %v2491_v57 = vadd.f32 %v1123_v27, %v1105_v55 }
 0x777   :  { %1131 = vadd.xlane.f32.xlu0 %v2489_v56  ;;  %1926 = vmatprep.subr.bf16.mxu0 %v1925_v54 }
 0x778   :  { %1129 = vadd.xlane.f32.xlu1 %v2491_v57  ;;  %1928 = vmatpush3.bf16.msra.mxu0 %v1925_v54 }
 0x804   :  { %v1132_v63 = vpop.xlane.xlu0 %1131 }
 0x805   :  { %v1130_v0 = vpop.xlane.xlu1 %1129  ;;  %v1134_v1 = vmul.f32 0.0078125, %v1132_v63 }
 0x806   :  { %v1133_v2 = vmul.f32 0.0078125, %v1130_v0 }
 0x807   :  { %v1136_v4 = vsub.f32 %v2489_v56, %v1134_v1 }
 0x808   :  { %v1135_v3 = vsub.f32 %v2491_v57, %v1133_v2 }
 0x809   :  { %v1138_v6 = vmul.f32 %v1136_v4, %v1136_v4 }
 0x80a   :  { %v1137_v5 = vmul.f32 %v1135_v3, %v1135_v3 }
 0x80c   :  { %1139 = vadd.xlane.f32.xlu1 %v1137_v5 }
 0x810   :  { %1141 = vadd.xlane.f32.xlu1 %v1138_v6 }
 0x821   :  { %1418 = vperm.xlu1 %1933, %v1471_v13  }
 0x899   :  { %v1140_v28 = vpop.xlane.xlu1 %1139 }
 0x89a   :  { %v1143_v29 = vmul.f32 0.0078125, %v1140_v28 }
 0x89c   :  { %v1145_v31 = vadd.f32 1e-05, %v1143_v29 }
 0x89d   :  { %v1142_v32 = vpop.xlane.xlu1 %1141 }
 0x89e   :  { %1954 = vrsqrt.f32 %v1145_v31  ;;  %v1144_v34 = vmul.f32 0.0078125, %v1142_v32 }
 0x8a0   :  { %v1146_v36 = vadd.f32 1e-05, %v1144_v34 }
 0x8a1   :  { %v1419_v50 = vpop.permute.xlu1 %1418 }
 0x8a2   :  { %1956 = vrsqrt.f32 %v1146_v36  ;;  %v1422_v53 = vmul.f32 %v1419_v50, %v2489_v56  ;;  %v1421_v54 = vmul.f32 %v1419_v50, %v2491_v57 }
 0x8a8   :  { %v1955_v37 = vpop.eup %1954 }
 0x8a9   :  { %v1149_v47 = vmul.f32 %v1955_v37, %v1135_v3 }
 0x8ab   :  { %v1157_v18 = vmul.f32 %v1465_v38, %v1149_v47 }
 0x8ac   :  { %v1957_v39 = vpop.eup %1956 }
 0x8ad   :  { %v1150_v40 = vmul.f32 %v1957_v39, %v1136_v4  ;;  %v1165_v41 = vadd.f32 %v1466_v30, %v1157_v18 }
 0x8af   :  { %v1158_v43 = vmul.f32 %v1465_v38, %v1150_v40  ;;  %1747 = vmatprep.mubr.f32.mxu1 %v1165_v41 }
 0x8b1   :  { %v1166_v44 = vadd.f32 %v1466_v30, %v1158_v43 }
 0x8b3   :  { %1748 = vmatmul.mubr.f32.vlgmr.msra.gmra.mrb[24].mxu1 %v1166_v44 }
 0x986   :  { %v1749_v48 = vpop.f32.mrb[24].mxu1 }
 0x987   :  { %v1262_v33 = vadd.f32 %v1749_v48, %v1467_v46  ;;  %v1256_v27 = vpop.f32.mrb[25].mxu1 }
 0x988   :  { %v1257_v55 = vadd.f32 %v1467_v46, %v1256_v27 }
 0x989   :  { %v1268_v58 = vmul.f32 0.70710677, %v1262_v33  ;;  %v1266_v41 = vmul.f32 0.5, %v1262_v33 }
 0x98a   :  { %v1267_v45 = vmul.f32 0.70710677, %v1257_v55  ;;  %v1265_v39 = vmul.f32 0.5, %v1257_v55 }
 0x98b   :  { %v1274_v42 = vand.u32 2147483647, %v1268_v58  ;;  %vm1270_vm6 = vcmp.ge.f32.partialorder %v1268_v58, 0.0 }
 0x98c   :  { %v1273_v59 = vand.u32 2147483647, %v1267_v45  ;;  %vm1269_vm7 = vcmp.ge.f32.partialorder %v1267_v45, 0.0  ;;  %v1272_v36 = vsel %vm1270_vm6, 1.0, %v1966_v35 }
 0x98d   :  { %v1276_v60 = vmul.f32 0.3275911, %v1274_v42  ;;  %v1302_v0 = vsub.f32 0.0, %v1274_v42  ;;  %v1271_v47 = vsel %vm1269_vm7, 1.0, %v1966_v35 }
 0x98e   :  { %v1275_v61 = vmul.f32 0.3275911, %v1273_v59  ;;  %v1301_v1 = vsub.f32 0.0, %v1273_v59 }
 0x98f   :  { %v1278_v62 = vadd.f32 1.0, %v1276_v60  ;;  %v1304_v3 = vmul.f32 %v1302_v0, %v1274_v42 }
 0x990   :  { %v1277_v63 = vadd.f32 1.0, %v1275_v61  ;;  %v1303_v6 = vmul.f32 %v1301_v1, %v1273_v59 }
 0x991   :  { %1958 = vrcp.f32 %v1278_v62  ;;  %v1307_v9 = vmul.f32 1.442695, %v1304_v3 }
 0x992   :  { %1960 = vrcp.f32 %v1277_v63  ;;  %v1305_v12 = vmul.f32 1.442695, %v1303_v6 }
 0x993   :  { %1962 = vpow2.f32 %v1307_v9 }
 0x994   :  { %1964 = vpow2.f32 %v1305_v12 }
 0x99b   :  { %v1959_v2 = vpop.eup %1958 }
 0x99c   :  { %v1961_v4 = vpop.eup %1960  ;;  %v1284_v5 = vmul.f32 1.0614054, %v1959_v2 }
 0x99d   :  { %v1283_v7 = vmul.f32 1.0614054, %v1961_v4  ;;  %v1963_v26 = vpop.eup %1962 }
 0x99e   :  { %v1286_v8 = vadd.f32 -1.4531521, %v1284_v5  ;;  %v1965_v29 = vpop.eup %1964 }
 0x99f   :  { %v1285_v10 = vadd.f32 -1.4531521, %v1283_v7 }
 0x9a0   :  { %v1288_v11 = vmul.f32 %v1959_v2, %v1286_v8 }
 0x9a1   :  { %v1287_v13 = vmul.f32 %v1961_v4, %v1285_v10 }
 0x9a2   :  { %v1290_v15 = vadd.f32 1.4214138, %v1288_v11 }
 0x9a3   :  { %v1289_v16 = vadd.f32 1.4214138, %v1287_v13 }
 0x9a4   :  { %v1292_v17 = vmul.f32 %v1959_v2, %v1290_v15 }
 0x9a5   :  { %v1291_v19 = vmul.f32 %v1961_v4, %v1289_v16 }
 0x9a6   :  { %v1294_v20 = vadd.f32 -0.28449672, %v1292_v17 }
 0x9a7   :  { %v1293_v21 = vadd.f32 -0.28449672, %v1291_v19 }
 0x9a8   :  { %v1296_v22 = vmul.f32 %v1959_v2, %v1294_v20 }
 0x9a9   :  { %v1295_v23 = vmul.f32 %v1961_v4, %v1293_v21 }
 0x9aa   :  { %v1298_v24 = vadd.f32 0.2548296, %v1296_v22 }
 0x9ab   :  { %v1297_v25 = vadd.f32 0.2548296, %v1295_v23 }
 0x9ac   :  { %v1300_v14 = vmul.f32 %v1959_v2, %v1298_v24 }
 0x9ad   :  { %v1299_v28 = vmul.f32 %v1961_v4, %v1297_v25 }
 0x9ae   :  { %v1310_v31 = vmul.f32 %v1963_v26, %v1300_v14 }
 0x9af   :  { %v1309_v32 = vmul.f32 %v1965_v29, %v1299_v28 }
 0x9b0   :  { %v1312_v34 = vsub.f32 1.0, %v1310_v31 }
 0x9b1   :  { %v1311_v37 = vsub.f32 1.0, %v1309_v32 }
 0x9b2   :  { %v1314_v38 = vmul.f32 %v1312_v34, %v1272_v36 }
 0x9b3   :  { %v1313_v30 = vmul.f32 %v1311_v37, %v1271_v47 }
 0x9b4   :  { %v1316_v18 = vadd.f32 1.0, %v1314_v38 }
 0x9b5   :  { %v1315_v40 = vadd.f32 1.0, %v1313_v30 }
 0x9b6   :  { %v1318_v44 = vmul.f32 %v1316_v18, %v1266_v41 }
 0x9b7   :  { %v1317_v43 = vmul.f32 %v1315_v40, %v1265_v39 }
 0x9b9   :  { %1758 = vmatprep.mubr.msk.f32.mxu0 %vm215_vm1, %v1317_v43 }
 0x9ba   :  { %1759 = vmatmul.mubr.msk.f32.vlgmr.msra.gmra.mrb[10].mxu0 %vm215_vm1, %v1318_v44 }
 0xa8d   :  { %v1760_v52 = vpop.f32.mrb[10].mxu0 }
 0xa8e   :  { %v1408_v35 = vadd.f32 %v1760_v52, %v1468_v51  ;;  %v1402_v49 = vpop.f32.mrb[11].mxu0 }
 0xa8f   :  { %v1403_v46 = vadd.f32 %v1468_v51, %v1402_v49 }
 0xa90   :  { %v1424_v48 = vadd.f32 %v1422_v53, %v1408_v35 }
 0xa91   :  { %v1423_v33 = vadd.f32 %v1421_v54, %v1403_v46 }
 0xa92   :  { %1426 = vst [vmem:[%s2607_s23 + $0x8] sm:$0xff] %v1424_v48 }
 0xa93   :  { %1425 = vst [vmem:[%s2607_s23] sm:$0xff] %v1423_v33 }

// kernel: liconvformer_forward.6
= control target key start
LH: loop header
LB: loop body
LE: loop exit
PB: predicated region body
PF: predicated region fallthrough
CT: control target
= control target key end

     0   :  { %vm105_vm0 = vcmask 130048   ;;  %vm1203_vm5 = vcmask 261120   ;;  %vm1647_vm10 = vcmask 523264   ;;  %vm1601_vm11 = vcmask 7168   ;;  %s4955_s1 = inlined_call_operand.vmem [shape: f32[16,32], index: 1, kind: input, shape index: {}]   ;;  %s4956_s0 = inlined_call_operand.vmem [shape: f32[128,16], index: 0, kind: input, shape index: {}]   ;;  %s4957_s3 = inlined_call_operand.vmem [shape: f32[576,128], index: 3, kind: input, shape index: {}]   ;;  %s4958_s2 = inlined_call_operand.vmem [shape: f32[1,32], index: 2, kind: input, shape index: {}]   ;;  %s4959_s4 = inlined_call_operand.vmem [shape: f32[9,32], index: 4, kind: input, shape index: {}]   ;;  %s4960_s5 = inlined_call_operand.vmem [shape: f32[1,32], index: 5, kind: input, shape index: {}]   ;;  %s4961_s8 = inlined_call_operand.vmem [shape: f32[32,1], index: 8, kind: input, shape index: {}]   ;;  %s4962_s10 = inlined_call_operand.vmem [shape: f32[32,64], index: 10, kind: input, shape index: {}]   ;;  %s4963_s9 = inlined_call_operand.<no memory space> [shape: f32[1,1], index: 9, kind: input, shape index: {}]   ;;  %s4964_s6 = inlined_call_operand.vmem [shape: f32[1,32], index: 6, kind: input, shape index: {}]   ;;  %s4965_s7 = inlined_call_operand.vmem [shape: f32[1,32], index: 7, kind: input, shape index: {}]   ;;  %s4966_s12 = inlined_call_operand.vmem [shape: f32[64,64], index: 12, kind: input, shape index: {}]   ;;  %s4967_s11 = inlined_call_operand.vmem [shape: f32[1,64], index: 11, kind: input, shape index: {}]   ;;  %s4968_s15 = inlined_call_operand.<no memory space> [shape: f32[1,1], index: 15, kind: input, shape index: {}]   ;;  %s4969_s13 = inlined_call_operand.vmem [shape: f32[32,32], index: 13, kind: input, shape index: {}]   ;;  %s4970_s14 = inlined_call_operand.vmem [shape: f32[1,32], index: 14, kind: input, shape index: {}]   ;;  %s4971_s22 = inlined_call_operand.<no memory space> [shape: f32[1,1], index: 22, kind: input, shape index: {}]   ;;  %s4972_s18 = inlined_call_operand.vmem [shape: f32[32,8], index: 18, kind: input, shape index: {}]   ;;  %s4973_s16 = inlined_call_operand.vmem [shape: f32[1,32], index: 16, kind: input, shape index: {}]   ;;  %s4974_s17 = inlined_call_operand.vmem [shape: f32[1,32], index: 17, kind: input, shape index: {}]   ;;  %s4975_s20 = inlined_call_operand.vmem [shape: f32[8,32], index: 20, kind: input, shape index: {}]   ;;  %s4976_s19 = inlined_call_operand.vmem [shape: f32[1,8], index: 19, kind: input, shape index: {}]   ;;  %s4977_s21 = inlined_call_operand.vmem [shape: f32[1,32], index: 21, kind: input, shape index: {}]   ;;  %s4978_s23 = inlined_call_operand.vmem [shape: f32[64,32], index: 23, kind: output, shape index: {}]  }
   0x1   :  { %4985 = sst [smem:[#allocation5_spill]] %s4955_s1  ;;  %vm2674_vm15 = vcmask 64512  }
   0x2   :  { %4986 = sst [smem:[#allocation6_spill]] %s4956_s0  ;;  %s4993_s24 = sld [smem:[#allocation5_spill]] }
   0x3   :  { %4987 = sst [smem:[#allocation7_spill]] %s4957_s3  ;;  %s4994_s3 = sld [smem:[#allocation6_spill]] }
   0x4   :  { %4988 = sst [smem:[#allocation8_spill]] %s4958_s2  ;;  %s4995_s29 = sld [smem:[#allocation7_spill]] }
   0x5   :  { %4989 = sst [smem:[#allocation9_spill]] %s4959_s4 }
   0x6   :  { %4990 = sst [smem:[#allocation10_spill]] %s4960_s5  ;;  %s4997_s5 = sld [smem:[#allocation9_spill]] }
   0x7   :  { %4991 = sst [smem:[#allocation11_spill]] %s4961_s8  ;;  %s4998_s27 = sld [smem:[#allocation10_spill]] }
   0x8   :  { %4992 = sst [smem:[#allocation12_spill]] %s4962_s10  ;;  %v96_v0 = vld [vmem:[%s4993_s24] sm:$0xff]  ;;  %v97_v1 = vld [vmem:[%s4993_s24 + $0x8] sm:$0xff]  ;;  %s4996_s24 = sld [smem:[#allocation8_spill]] }
   0x9   :  { %v80_v2 = vld [vmem:[%s4994_s3] sm:$0xff]  ;;  %v3441_v3 = vpack.c.bf16 %v97_v1, %v96_v0  ;;  %v81_v4 = vld [vmem:[%s4994_s3 + $0x8] sm:$0xff]  ;;  %v82_v5 = vld [vmem:[%s4994_s3 + $0x10] sm:$0xff]  ;;  %s4999_s2 = sld [smem:[#allocation11_spill]]  ;;  %s5000_s0 = sld [smem:[#allocation12_spill]] }
   0xa   :  { %3127 = vmatprep.mubr.msk.f32.mxu0 %vm105_vm0, %v80_v2  ;;  %v83_v6 = vld [vmem:[%s4994_s3 + $0x18] sm:$0xff]  ;;  %v84_v7 = vld [vmem:[%s4994_s3 + $0x20] sm:$0xff]  ;;  %v85_v8 = vld [vmem:[%s4994_s3 + $0x28] sm:$0xff] }
   0xb   :  { %3442 = vmatprep.subr.bf16.mxu0 %v3441_v3  ;;  %v86_v9 = vld [vmem:[%s4994_s3 + $0x30] sm:$0xff]  ;;  %v87_v10 = vld [vmem:[%s4994_s3 + $0x38] sm:$0xff]  ;;  %v88_v11 = vld [vmem:[%s4994_s3 + $0x40] sm:$0xff] }
   0xc   :  { %3444 = vmatpush3.bf16.msra.mxu0 %v3441_v3  ;;  %v89_v12 = vld [vmem:[%s4994_s3 + $0x48] sm:$0xff]  ;;  %v90_v13 = vld [vmem:[%s4994_s3 + $0x50] sm:$0xff]  ;;  %v91_v14 = vld [vmem:[%s4994_s3 + $0x58] sm:$0xff] }
   0xd   :  { %v92_v15 = vld [vmem:[%s4994_s3 + $0x60] sm:$0xff]  ;;  %v93_v16 = vld [vmem:[%s4994_s3 + $0x68] sm:$0xff]  ;;  %v94_v17 = vld [vmem:[%s4994_s3 + $0x70] sm:$0xff] }
   0xe   :  { %v95_v18 = vld [vmem:[%s4994_s3 + $0x78] sm:$0xff]  ;;  %v305_v19 = vld [vmem:[%s4995_s29 + $0x30] sm:$0xff]  ;;  %v299_v20 = vld [vmem:[%s4995_s29] sm:$0xff] }
   0xf   :  { %3128 = vmatmul.mubr.msk.f32.vlgmr.msra.gmra.mrb[0].mxu0 %vm105_vm0, %v81_v4  ;;  %3192 = vmatprep.mubr.f32.mxu1 %v305_v19  ;;  %v3894_v21 = vld [vmem:[%s4996_s24] ss:$0 sm:$0xff]  ;;  %v306_v62 = vld [vmem:[%s4995_s29 + $0x38] sm:$0xff]  ;;  %v300_v63 = vld [vmem:[%s4995_s29 + $0x8] sm:$0xff] }
  0x10   :  { %3130 = vmatprep.mubr.msk.f32.mxu0 %vm105_vm0, %v82_v5  ;;  %v307_v0 = vld [vmem:[%s4995_s29 + $0x40] sm:$0xff]  ;;  %v301_v1 = vld [vmem:[%s4995_s29 + $0x10] sm:$0xff]  ;;  %v308_v2 = vld [vmem:[%s4995_s29 + $0x48] sm:$0xff] }
  0x11   :  { %v302_v3 = vld [vmem:[%s4995_s29 + $0x18] sm:$0xff]  ;;  %v309_v4 = vld [vmem:[%s4995_s29 + $0x50] sm:$0xff]  ;;  %v303_v5 = vld [vmem:[%s4995_s29 + $0x20] sm:$0xff] }
  0x12   :  { %v322_v19 = vld [vmem:[%s4995_s29 + $0xb8] sm:$0xff] }
  0x13   :  { %3131 = vmatmul.mubr.msk.f32.gmra.mrb[2].mxu0 %vm105_vm0, %v83_v6  ;;  %v310_v6 = vld [vmem:[%s4995_s29 + $0x58] sm:$0xff] }
  0x14   :  { %3133 = vmatprep.mubr.msk.f32.mxu0 %vm105_vm0, %v84_v7  ;;  %v304_v7 = vld [vmem:[%s4995_s29 + $0x28] sm:$0xff] }
  0x17   :  { %3134 = vmatmul.mubr.msk.f32.gmra.mrb[4].mxu0 %vm105_vm0, %v85_v8  ;;  %v311_v8 = vld [vmem:[%s4995_s29 + $0x60] sm:$0xff] }
  0x18   :  { %3136 = vmatprep.mubr.msk.f32.mxu0 %vm105_vm0, %v86_v9  ;;  %v312_v9 = vld [vmem:[%s4995_s29 + $0x68] sm:$0xff] }
  0x1b   :  { %3137 = vmatmul.mubr.msk.f32.gmra.mrb[6].mxu0 %vm105_vm0, %v87_v10  ;;  %v313_v10 = vld [vmem:[%s4995_s29 + $0x70] sm:$0xff] }
  0x1c   :  { %3139 = vmatprep.mubr.msk.f32.mxu0 %vm105_vm0, %v88_v11  ;;  %v314_v11 = vld [vmem:[%s4995_s29 + $0x78] sm:$0xff] }
  0x1f   :  { %3140 = vmatmul.mubr.msk.f32.gmra.mrb[8].mxu0 %vm105_vm0, %v89_v12  ;;  %v315_v12 = vld [vmem:[%s4995_s29 + $0x80] sm:$0xff] }
  0x20   :  { %3142 = vmatprep.mubr.msk.f32.mxu0 %vm105_vm0, %v90_v13  ;;  %v316_v13 = vld [vmem:[%s4995_s29 + $0x88] sm:$0xff] }
  0x23   :  { %3143 = vmatmul.mubr.msk.f32.gmra.mrb[10].mxu0 %vm105_vm0, %v91_v14  ;;  %v317_v14 = vld [vmem:[%s4995_s29 + $0x90] sm:$0xff] }
  0x24   :  { %3145 = vmatprep.mubr.msk.f32.mxu0 %vm105_vm0, %v92_v15  ;;  %v318_v15 = vld [vmem:[%s4995_s29 + $0x98] sm:$0xff] }
  0x27   :  { %3146 = vmatmul.mubr.msk.f32.gmra.mrb[12].mxu0 %vm105_vm0, %v93_v16  ;;  %v319_v16 = vld [vmem:[%s4995_s29 + $0xa0] sm:$0xff] }
  0x28   :  { %3148 = vmatprep.mubr.msk.f32.mxu0 %vm105_vm0, %v94_v17  ;;  %v320_v17 = vld [vmem:[%s4995_s29 + $0xa8] sm:$0xff] }
  0x2b   :  { %3149 = vmatmul.mubr.msk.f32.gmra.mrb[14].mxu0 %vm105_vm0, %v95_v18  ;;  %v321_v18 = vld [vmem:[%s4995_s29 + $0xb0] sm:$0xff] }
  0x2c   :  { %3183 = vmatprep.mubr.f32.mxu0 %v299_v20  ;;  %v323_v20 = vld [vmem:[%s4995_s29 + $0xc0] sm:$0xff] }
  0xe2   :  { %v3129_v22 = vpop.f32.mrb[0].mxu0 }
  0xe3   :  { %v226_v23 = vadd.f32 %v3129_v22, %v3894_v21  ;;  %v220_v24 = vpop.f32.mrb[1].mxu0  ;;  %v325_v22 = vld [vmem:[%s4995_s29 + $0xd0] sm:$0xff] }
  0xe4   :  { %v221_v25 = vadd.f32 %v3894_v21, %v220_v24  ;;  %v327_v24 = vld [vmem:[%s4995_s29 + $0xe0] sm:$0xff] }
  0xe6   :  { %v3445_v26 = vpack.c.bf16 %v226_v23, %v221_v25  ;;  %v3132_v27 = vpop.f32.mrb[2].mxu0  ;;  %v326_v23 = vld [vmem:[%s4995_s29 + $0xd8] sm:$0xff]  ;;  %v328_v25 = vld [vmem:[%s4995_s29 + $0xe8] sm:$0xff] }
  0xe7   :  { %v236_v28 = vadd.f32 %v3132_v27, %v3894_v21  ;;  %v230_v29 = vpop.f32.mrb[3].mxu0  ;;  %v330_v27 = vld [vmem:[%s4995_s29 + $0xf8] sm:$0xff] }
  0xe8   :  { %v231_v30 = vadd.f32 %v3894_v21, %v230_v29  ;;  %3446 = vmatprep.subr.bf16.mxu0 %v3445_v26  ;;  %3541 = vmatprep.subr.bf16.mxu1 %v3445_v26  ;;  %v332_v29 = vld [vmem:[%s4995_s29 + $0x108] sm:$0xff] }
  0xe9   :  { %3448 = vmatpush3.bf16.msra.mxu0 %v3445_v26  ;;  %3549 = vmatpush3.bf16.msra.mxu1 %v3445_v26  ;;  %v329_v26 = vld [vmem:[%s4995_s29 + $0xf0] sm:$0xff] }
  0xea   :  { %v3449_v31 = vpack.c.bf16 %v236_v28, %v231_v30  ;;  %v3135_v32 = vpop.f32.mrb[4].mxu0  ;;  %v331_v28 = vld [vmem:[%s4995_s29 + $0x100] sm:$0xff]  ;;  %v333_v30 = vld [vmem:[%s4995_s29 + $0x110] sm:$0xff] }
  0xeb   :  { %v246_v33 = vadd.f32 %v3135_v32, %v3894_v21  ;;  %v240_v34 = vpop.f32.mrb[5].mxu0  ;;  %v335_v32 = vld [vmem:[%s4995_s29 + $0x120] sm:$0xff] }
  0xec   :  { %v241_v35 = vadd.f32 %v3894_v21, %v240_v34  ;;  %3450 = vmatprep.subr.bf16.mxu0 %v3449_v31  ;;  %3542 = vmatprep.subr.bf16.mxu1 %v3449_v31  ;;  %v337_v34 = vld [vmem:[%s4995_s29 + $0x130] sm:$0xff] }
  0xed   :  { %3452 = vmatpush3.bf16.msra.mxu0 %v3449_v31  ;;  %3550 = vmatpush3.bf16.msra.mxu1 %v3449_v31  ;;  %v334_v31 = vld [vmem:[%s4995_s29 + $0x118] sm:$0xff] }
  0xee   :  { %v3453_v36 = vpack.c.bf16 %v246_v33, %v241_v35  ;;  %v3138_v37 = vpop.f32.mrb[6].mxu0  ;;  %v336_v33 = vld [vmem:[%s4995_s29 + $0x128] sm:$0xff]  ;;  %v338_v35 = vld [vmem:[%s4995_s29 + $0x138] sm:$0xff] }
  0xef   :  { %v256_v38 = vadd.f32 %v3138_v37, %v3894_v21  ;;  %v250_v39 = vpop.f32.mrb[7].mxu0  ;;  %v340_v37 = vld [vmem:[%s4995_s29 + $0x148] sm:$0xff] }
  0xf0   :  { %v251_v40 = vadd.f32 %v3894_v21, %v250_v39  ;;  %3454 = vmatprep.subr.bf16.mxu0 %v3453_v36  ;;  %3543 = vmatprep.subr.bf16.mxu1 %v3453_v36  ;;  %v342_v39 = vld [vmem:[%s4995_s29 + $0x158] sm:$0xff] }
  0xf1   :  { %3456 = vmatpush3.bf16.msra.mxu0 %v3453_v36  ;;  %3551 = vmatpush3.bf16.msra.mxu1 %v3453_v36  ;;  %v339_v36 = vld [vmem:[%s4995_s29 + $0x140] sm:$0xff] }
  0xf2   :  { %v3457_v41 = vpack.c.bf16 %v256_v38, %v251_v40  ;;  %v3141_v42 = vpop.f32.mrb[8].mxu0  ;;  %v341_v38 = vld [vmem:[%s4995_s29 + $0x150] sm:$0xff]  ;;  %v343_v40 = vld [vmem:[%s4995_s29 + $0x160] sm:$0xff] }
  0xf3   :  { %v266_v43 = vadd.f32 %v3141_v42, %v3894_v21  ;;  %v260_v44 = vpop.f32.mrb[9].mxu0  ;;  %v345_v42 = vld [vmem:[%s4995_s29 + $0x170] sm:$0xff] }
  0xf4   :  { %v261_v45 = vadd.f32 %v3894_v21, %v260_v44  ;;  %3458 = vmatprep.subr.bf16.mxu0 %v3457_v41  ;;  %3544 = vmatprep.subr.bf16.mxu1 %v3457_v41  ;;  %v347_v44 = vld [vmem:[%s4995_s29 + $0x180] sm:$0xff] }
  0xf5   :  { %3460 = vmatpush3.bf16.msra.mxu0 %v3457_v41  ;;  %3552 = vmatpush3.bf16.msra.mxu1 %v3457_v41  ;;  %v344_v41 = vld [vmem:[%s4995_s29 + $0x168] sm:$0xff] }
  0xf6   :  { %v3461_v46 = vpack.c.bf16 %v266_v43, %v261_v45  ;;  %v3144_v47 = vpop.f32.mrb[10].mxu0  ;;  %v346_v43 = vld [vmem:[%s4995_s29 + $0x178] sm:$0xff]  ;;  %v348_v45 = vld [vmem:[%s4995_s29 + $0x188] sm:$0xff] }
  0xf7   :  { %v276_v48 = vadd.f32 %v3144_v47, %v3894_v21  ;;  %v270_v49 = vpop.f32.mrb[11].mxu0  ;;  %v350_v47 = vld [vmem:[%s4995_s29 + $0x198] sm:$0xff] }
  0xf8   :  { %v271_v50 = vadd.f32 %v3894_v21, %v270_v49  ;;  %3462 = vmatprep.subr.bf16.mxu0 %v3461_v46  ;;  %3545 = vmatprep.subr.bf16.mxu1 %v3461_v46  ;;  %v352_v49 = vld [vmem:[%s4995_s29 + $0x1a8] sm:$0xff] }
  0xf9   :  { %3464 = vmatpush3.bf16.msra.mxu0 %v3461_v46  ;;  %3553 = vmatpush3.bf16.msra.mxu1 %v3461_v46  ;;  %v349_v46 = vld [vmem:[%s4995_s29 + $0x190] sm:$0xff] }
  0xfa   :  { %v3465_v51 = vpack.c.bf16 %v276_v48, %v271_v50  ;;  %v3147_v52 = vpop.f32.mrb[12].mxu0  ;;  %v351_v48 = vld [vmem:[%s4995_s29 + $0x1a0] sm:$0xff]  ;;  %v353_v50 = vld [vmem:[%s4995_s29 + $0x1b0] sm:$0xff] }
  0xfb   :  { %v286_v53 = vadd.f32 %v3147_v52, %v3894_v21  ;;  %v280_v54 = vpop.f32.mrb[13].mxu0  ;;  %v355_v52 = vld [vmem:[%s4995_s29 + $0x1c0] sm:$0xff] }
  0xfc   :  { %v281_v55 = vadd.f32 %v3894_v21, %v280_v54  ;;  %3466 = vmatprep.subr.bf16.mxu0 %v3465_v51  ;;  %3546 = vmatprep.subr.bf16.mxu1 %v3465_v51  ;;  %v357_v54 = vld [vmem:[%s4995_s29 + $0x1d0] sm:$0xff] }
  0xfd   :  { %3468 = vmatpush3.bf16.msra.mxu0 %v3465_v51  ;;  %3554 = vmatpush3.bf16.msra.mxu1 %v3465_v51  ;;  %v354_v51 = vld [vmem:[%s4995_s29 + $0x1b8] sm:$0xff] }
  0xfe   :  { %v3469_v56 = vpack.c.bf16 %v286_v53, %v281_v55  ;;  %v3150_v57 = vpop.f32.mrb[14].mxu0  ;;  %v356_v53 = vld [vmem:[%s4995_s29 + $0x1c8] sm:$0xff]  ;;  %v358_v55 = vld [vmem:[%s4995_s29 + $0x1d8] sm:$0xff] }
  0xff   :  { %v296_v58 = vadd.f32 %v3150_v57, %v3894_v21  ;;  %v290_v59 = vpop.f32.mrb[15].mxu0  ;;  %v360_v57 = vld [vmem:[%s4995_s29 + $0x1e8] sm:$0xff] }
 0x100   :  { %v291_v60 = vadd.f32 %v3894_v21, %v290_v59  ;;  %3470 = vmatprep.subr.bf16.mxu0 %v3469_v56  ;;  %3547 = vmatprep.subr.bf16.mxu1 %v3469_v56  ;;  %v324_v21 = vld [vmem:[%s4995_s29 + $0xc8] sm:$0xff]  ;;  %v362_v59 = vld [vmem:[%s4995_s29 + $0x1f8] sm:$0xff] }
 0x101   :  { %3472 = vmatpush3.bf16.msra.mxu0 %v3469_v56  ;;  %3555 = vmatpush3.bf16.msra.mxu1 %v3469_v56  ;;  %v359_v56 = vld [vmem:[%s4995_s29 + $0x1e0] sm:$0xff] }
 0x102   :  { %v3473_v61 = vpack.c.bf16 %v296_v58, %v291_v60  ;;  %v361_v58 = vld [vmem:[%s4995_s29 + $0x1f0] sm:$0xff]  ;;  %v363_v60 = vld [vmem:[%s4995_s29 + $0x200] sm:$0xff] }
 0x104   :  { %3474 = vmatprep.subr.bf16.mxu0 %v3473_v61  ;;  %3548 = vmatprep.subr.bf16.mxu1 %v3473_v61 }
 0x105   :  { %3476 = vmatpush3.bf16.msra.mxu0 %v3473_v61  ;;  %3556 = vmatpush3.bf16.msra.mxu1 %v3473_v61  ;;  %v364_v61 = vld [vmem:[%s4995_s29 + $0x208] sm:$0xff] }
 0x108   :  { %3193 = vmatmul.mubr.f32.vlgmr.msra.gmra.mrb[0].mxu1 %v306_v62  ;;  %3184 = vmatmul.mubr.f32.vlgmr.msra.gmra.mrb[16].mxu0 %v300_v63  ;;  %v365_v62 = vld [vmem:[%s4995_s29 + $0x210] sm:$0xff]  ;;  %v366_v63 = vld [vmem:[%s4995_s29 + $0x218] sm:$0xff] }
 0x109   :  { %3195 = vmatprep.mubr.f32.mxu1 %v307_v0  ;;  %3186 = vmatprep.mubr.f32.mxu0 %v301_v1  ;;  %v367_v0 = vld [vmem:[%s4995_s29 + $0x220] sm:$0xff]  ;;  %v368_v1 = vld [vmem:[%s4995_s29 + $0x228] sm:$0xff] }
 0x10c   :  { %3196 = vmatmul.mubr.f32.gmra.mrb[2].mxu1 %v308_v2  ;;  %3187 = vmatmul.mubr.f32.gmra.mrb[18].mxu0 %v302_v3  ;;  %v369_v2 = vld [vmem:[%s4995_s29 + $0x230] sm:$0xff]  ;;  %v370_v3 = vld [vmem:[%s4995_s29 + $0x238] sm:$0xff] }
 0x10d   :  { %3198 = vmatprep.mubr.f32.mxu1 %v309_v4  ;;  %3189 = vmatprep.mubr.f32.mxu0 %v303_v5  ;;  %v798_v4 = vlaneseq }
 0x10f   :  { %v4122_v5 = vshrl.u32 %v798_v4, 7 }
 0x110   :  { %3199 = vmatmul.mubr.f32.gmra.mrb[4].mxu1 %v310_v6  ;;  %3190 = vmatmul.mubr.f32.gmra.mrb[20].mxu0 %v304_v7 }
 0x111   :  { %3201 = vmatprep.mubr.f32.mxu1 %v311_v8  ;;  %v800_v6 = vsub.s32 0, %v4122_v5  ;;  %v812_v7 = vsub.s32 1, %v4122_v5  ;;  %v4129_v8 = vld [vmem:[%s4997_s5] sm:$0xff]  ;;  %v852_v4 = vsub.s32 3, %v4122_v5 }
 0x114   :  { %3202 = vmatmul.mubr.f32.gmra.mrb[6].mxu1 %v312_v9 }
 0x115   :  { %3204 = vmatprep.mubr.f32.mxu1 %v313_v10 }
 0x118   :  { %3205 = vmatmul.mubr.f32.gmra.mrb[8].mxu1 %v314_v11  ;;  %v801_v11 = vrot.slane %v4129_v8, %v800_v6 }
 0x119   :  { %3207 = vmatprep.mubr.f32.mxu1 %v315_v12 }
 0x11c   :  { %3208 = vmatmul.mubr.f32.gmra.mrb[10].mxu1 %v316_v13  ;;  %v813_v13 = vrot.slane %v4129_v8, %v812_v7 }
 0x11d   :  { %3210 = vmatprep.mubr.f32.mxu1 %v317_v14 }
 0x120   :  { %3211 = vmatmul.mubr.f32.gmra.mrb[12].mxu1 %v318_v15 }
 0x121   :  { %3213 = vmatprep.mubr.f32.mxu1 %v319_v16 }
 0x124   :  { %3214 = vmatmul.mubr.f32.gmra.mrb[14].mxu1 %v320_v17 }
 0x125   :  { %3216 = vmatprep.mubr.f32.mxu1 %v321_v18 }
 0x128   :  { %3217 = vmatmul.mubr.f32.gmra.mrb[16].mxu1 %v322_v19 }
 0x129   :  { %3219 = vmatprep.mubr.f32.mxu1 %v323_v20 }
 0x12c   :  { %3220 = vmatmul.mubr.f32.gmra.mrb[18].mxu1 %v324_v21 }
 0x12d   :  { %3222 = vmatprep.mubr.f32.mxu1 %v325_v22 }
 0x130   :  { %3223 = vmatmul.mubr.f32.gmra.mrb[20].mxu1 %v326_v23 }
 0x131   :  { %3225 = vmatprep.mubr.f32.mxu1 %v327_v24 }
 0x134   :  { %3226 = vmatmul.mubr.f32.gmra.mrb[22].mxu1 %v328_v25 }
 0x135   :  { %3228 = vmatprep.mubr.f32.mxu1 %v329_v26 }
 0x138   :  { %3229 = vmatmul.mubr.f32.gmra.mrb[24].mxu1 %v330_v27 }
 0x139   :  { %3231 = vmatprep.mubr.f32.mxu1 %v331_v28 }
 0x13c   :  { %3232 = vmatmul.mubr.f32.gmra.mrb[26].mxu1 %v332_v29 }
 0x13d   :  { %3234 = vmatprep.mubr.f32.mxu1 %v333_v30 }
 0x140   :  { %3235 = vmatmul.mubr.f32.gmra.mrb[28].mxu1 %v334_v31 }
 0x141   :  { %3237 = vmatprep.mubr.f32.mxu1 %v335_v32 }
 0x144   :  { %3238 = vmatmul.mubr.f32.gmra.mrb[30].mxu1 %v336_v33 }
 0x145   :  { %3240 = vmatprep.mubr.f32.mxu1 %v337_v34 }
 0x148   :  { %3241 = vmatmul.mubr.f32.gmra.mrb[32].mxu1 %v338_v35 }
 0x149   :  { %3243 = vmatprep.mubr.f32.mxu1 %v339_v36 }
 0x14c   :  { %3244 = vmatmul.mubr.f32.gmra.mrb[34].mxu1 %v340_v37 }
 0x14d   :  { %3246 = vmatprep.mubr.f32.mxu1 %v341_v38 }
 0x150   :  { %3247 = vmatmul.mubr.f32.gmra.mrb[36].mxu1 %v342_v39 }
 0x151   :  { %3249 = vmatprep.mubr.f32.mxu1 %v343_v40  ;;  %v832_v40 = vsub.s32 2, %v4122_v5 }
 0x154   :  { %3250 = vmatmul.mubr.f32.gmra.mrb[38].mxu1 %v344_v41 }
 0x155   :  { %3252 = vmatprep.mubr.f32.mxu1 %v345_v42 }
 0x158   :  { %3253 = vmatmul.mubr.f32.gmra.mrb[40].mxu1 %v346_v43 }
 0x159   :  { %3255 = vmatprep.mubr.f32.mxu1 %v347_v44 }
 0x15c   :  { %3256 = vmatmul.mubr.f32.gmra.mrb[42].mxu1 %v348_v45 }
 0x15d   :  { %3258 = vmatprep.mubr.f32.mxu1 %v349_v46 }
 0x160   :  { %3259 = vmatmul.mubr.f32.gmra.mrb[44].mxu1 %v350_v47 }
 0x161   :  { %3261 = vmatprep.mubr.f32.mxu1 %v351_v48  ;;  %v833_v48 = vrot.slane %v4129_v8, %v832_v40 }
 0x164   :  { %3262 = vmatmul.mubr.f32.gmra.mrb[46].mxu1 %v352_v49 }
 0x165   :  { %3264 = vmatprep.mubr.f32.mxu1 %v353_v50 }
 0x168   :  { %3265 = vmatmul.mubr.f32.gmra.mrb[48].mxu1 %v354_v51 }
 0x169   :  { %3267 = vmatprep.mubr.f32.mxu1 %v355_v52 }
 0x16c   :  { %3268 = vmatmul.mubr.f32.gmra.mrb[50].mxu1 %v356_v53 }
 0x16d   :  { %3270 = vmatprep.mubr.f32.mxu1 %v357_v54 }
 0x170   :  { %3271 = vmatmul.mubr.f32.gmra.mrb[52].mxu1 %v358_v55 }
 0x171   :  { %3273 = vmatprep.mubr.f32.mxu1 %v359_v56 }
 0x174   :  { %3274 = vmatmul.mubr.f32.gmra.mrb[54].mxu1 %v360_v57 }
 0x175   :  { %3276 = vmatprep.mubr.f32.mxu1 %v361_v58 }
 0x178   :  { %3277 = vmatmul.mubr.f32.gmra.mrb[56].mxu1 %v362_v59 }
 0x179   :  { %3279 = vmatprep.mubr.f32.mxu1 %v363_v60 }
 0x17c   :  { %3280 = vmatmul.mubr.f32.gmra.mrb[58].mxu1 %v364_v61 }
 0x17d   :  { %3282 = vmatprep.mubr.f32.mxu1 %v365_v62 }
 0x180   :  { %3283 = vmatmul.mubr.f32.gmra.mrb[60].mxu1 %v366_v63 }
 0x181   :  { %3285 = vmatprep.mubr.f32.mxu1 %v367_v0 }
 0x184   :  { %3286 = vmatmul.mubr.f32.gmra.mrb[62].mxu1 %v368_v1 }
 0x185   :  { %3288 = vmatprep.mubr.f32.mxu1 %v369_v2 }
 0x188   :  { %3289 = vmatmul.mubr.f32.gmra.mrb[64].mxu1 %v370_v3 }
 0x1db   :  { %v3194_v9 = vpop.f32.mrb[0].mxu1  ;;  %v3185_v10 = vpop.f32.mrb[16].mxu0 }
 0x1dc   :  { %v467_v12 = vpop.f32.mrb[1].mxu1  ;;  %v437_v14 = vpop.f32.mrb[17].mxu0  ;;  %v803_v15 = vmul.f32 %v3185_v10, %v801_v11  ;;  %v809_v45 = vmul.f32 %v3194_v9, %v801_v11 }
 0x1dd   :  { %v802_v17 = vmul.f32 %v801_v11, %v437_v14  ;;  %v808_v49 = vmul.f32 %v801_v11, %v467_v12 }
 0x1df   :  { %v3197_v16 = vpop.f32.mrb[2].mxu1  ;;  %v3188_v18 = vpop.f32.mrb[18].mxu0 }
 0x1e0   :  { %v815_v19 = vmul.f32 %v3197_v16, %v813_v13  ;;  %v477_v20 = vpop.f32.mrb[3].mxu1  ;;  %v447_v21 = vpop.f32.mrb[19].mxu0  ;;  %v805_v24 = vmul.f32 %v3188_v18, %v801_v11 }
 0x1e1   :  { %v814_v22 = vmul.f32 %v813_v13, %v477_v20  ;;  %v804_v27 = vmul.f32 %v801_v11, %v447_v21 }
 0x1e2   :  { %v823_v23 = vadd.f32 %v815_v19, %v803_v15 }
 0x1e3   :  { %v822_v25 = vadd.f32 %v814_v22, %v802_v17  ;;  %v3200_v26 = vpop.f32.mrb[4].mxu1  ;;  %v3191_v28 = vpop.f32.mrb[20].mxu0 }
 0x1e4   :  { %v817_v29 = vmul.f32 %v3200_v26, %v813_v13  ;;  %v487_v30 = vpop.f32.mrb[5].mxu1  ;;  %v457_v31 = vpop.f32.mrb[21].mxu0  ;;  %v807_v34 = vmul.f32 %v3191_v28, %v801_v11 }
 0x1e5   :  { %v816_v32 = vmul.f32 %v813_v13, %v487_v30  ;;  %v806_v37 = vmul.f32 %v801_v11, %v457_v31 }
 0x1e6   :  { %v825_v33 = vadd.f32 %v817_v29, %v805_v24 }
 0x1e7   :  { %v824_v35 = vadd.f32 %v816_v32, %v804_v27  ;;  %v3203_v36 = vpop.f32.mrb[6].mxu1  ;;  %v872_v32 = vsub.s32 4, %v4122_v5 }
 0x1e8   :  { %v819_v38 = vmul.f32 %v3203_v36, %v813_v13  ;;  %v497_v39 = vpop.f32.mrb[7].mxu1 }
 0x1e9   :  { %v818_v41 = vmul.f32 %v813_v13, %v497_v39  ;;  %v873_v39 = vrot.slane %v4129_v8, %v872_v32 }
 0x1ea   :  { %v827_v42 = vadd.f32 %v819_v38, %v807_v34 }
 0x1eb   :  { %v826_v43 = vadd.f32 %v818_v41, %v806_v37  ;;  %v3206_v44 = vpop.f32.mrb[8].mxu1 }
 0x1ec   :  { %v821_v46 = vmul.f32 %v3206_v44, %v813_v13  ;;  %v507_v47 = vpop.f32.mrb[9].mxu1 }
 0x1ed   :  { %v820_v50 = vmul.f32 %v813_v13, %v507_v47  ;;  %v853_v13 = vrot.slane %v4129_v8, %v852_v4 }
 0x1ee   :  { %v829_v51 = vadd.f32 %v821_v46, %v809_v45 }
 0x1ef   :  { %v828_v52 = vadd.f32 %v820_v50, %v808_v49  ;;  %v3209_v53 = vpop.f32.mrb[10].mxu1 }
 0x1f0   :  { %v835_v54 = vmul.f32 %v3209_v53, %v833_v48  ;;  %v517_v55 = vpop.f32.mrb[11].mxu1 }
 0x1f1   :  { %v834_v56 = vmul.f32 %v833_v48, %v517_v55 }
 0x1f2   :  { %v843_v57 = vadd.f32 %v835_v54, %v823_v23 }
 0x1f3   :  { %v842_v58 = vadd.f32 %v834_v56, %v822_v25  ;;  %v3212_v59 = vpop.f32.mrb[12].mxu1 }
 0x1f4   :  { %v837_v60 = vmul.f32 %v3212_v59, %v833_v48  ;;  %v527_v61 = vpop.f32.mrb[13].mxu1 }
 0x1f5   :  { %v836_v62 = vmul.f32 %v833_v48, %v527_v61 }
 0x1f6   :  { %v845_v63 = vadd.f32 %v837_v60, %v825_v33 }
 0x1f7   :  { %v844_v0 = vadd.f32 %v836_v62, %v824_v35  ;;  %v3215_v1 = vpop.f32.mrb[14].mxu1 }
 0x1f8   :  { %v839_v2 = vmul.f32 %v3215_v1, %v833_v48  ;;  %v537_v3 = vpop.f32.mrb[15].mxu1 }
 0x1f9   :  { %v838_v6 = vmul.f32 %v833_v48, %v537_v3 }
 0x1fa   :  { %v847_v7 = vadd.f32 %v839_v2, %v827_v42 }
 0x1fb   :  { %v846_v9 = vadd.f32 %v838_v6, %v826_v43  ;;  %v3218_v10 = vpop.f32.mrb[16].mxu1 }
 0x1fc   :  { %v841_v11 = vmul.f32 %v3218_v10, %v833_v48  ;;  %v547_v12 = vpop.f32.mrb[17].mxu1 }
 0x1fd   :  { %v840_v14 = vmul.f32 %v833_v48, %v547_v12 }
 0x1fe   :  { %v849_v15 = vadd.f32 %v841_v11, %v829_v51 }
 0x1ff   :  { %v848_v16 = vadd.f32 %v840_v14, %v828_v52  ;;  %v3221_v17 = vpop.f32.mrb[18].mxu1 }
 0x200   :  { %v855_v18 = vmul.f32 %v3221_v17, %v853_v13  ;;  %v557_v19 = vpop.f32.mrb[19].mxu1 }
 0x201   :  { %v854_v20 = vmul.f32 %v853_v13, %v557_v19 }
 0x202   :  { %v863_v21 = vadd.f32 %v855_v18, %v843_v57 }
 0x203   :  { %v862_v22 = vadd.f32 %v854_v20, %v842_v58  ;;  %v3224_v23 = vpop.f32.mrb[20].mxu1  ;;  %v892_v58 = vsub.s32 5, %v4122_v5 }
 0x204   :  { %v857_v24 = vmul.f32 %v3224_v23, %v853_v13  ;;  %v567_v25 = vpop.f32.mrb[21].mxu1 }
 0x205   :  { %v856_v26 = vmul.f32 %v853_v13, %v567_v25  ;;  %v893_v1 = vrot.slane %v4129_v8, %v892_v58 }
 0x206   :  { %v865_v27 = vadd.f32 %v857_v24, %v845_v63 }
 0x207   :  { %v864_v28 = vadd.f32 %v856_v26, %v844_v0  ;;  %v3227_v29 = vpop.f32.mrb[22].mxu1 }
 0x208   :  { %v859_v30 = vmul.f32 %v3227_v29, %v853_v13  ;;  %v577_v31 = vpop.f32.mrb[23].mxu1 }
 0x209   :  { %v858_v33 = vmul.f32 %v853_v13, %v577_v31 }
 0x20a   :  { %v867_v34 = vadd.f32 %v859_v30, %v847_v7 }
 0x20b   :  { %v866_v35 = vadd.f32 %v858_v33, %v846_v9  ;;  %v3230_v36 = vpop.f32.mrb[24].mxu1 }
 0x20c   :  { %v861_v37 = vmul.f32 %v3230_v36, %v853_v13  ;;  %v587_v38 = vpop.f32.mrb[25].mxu1 }
 0x20d   :  { %v860_v40 = vmul.f32 %v853_v13, %v587_v38 }
 0x20e   :  { %v869_v41 = vadd.f32 %v861_v37, %v849_v15 }
 0x20f   :  { %v868_v42 = vadd.f32 %v860_v40, %v848_v16  ;;  %v3233_v43 = vpop.f32.mrb[26].mxu1 }
 0x210   :  { %v875_v44 = vmul.f32 %v3233_v43, %v873_v39  ;;  %v597_v45 = vpop.f32.mrb[27].mxu1 }
 0x211   :  { %v874_v46 = vmul.f32 %v873_v39, %v597_v45 }
 0x212   :  { %v883_v47 = vadd.f32 %v875_v44, %v863_v21 }
 0x213   :  { %v882_v48 = vadd.f32 %v874_v46, %v862_v22  ;;  %v3236_v49 = vpop.f32.mrb[28].mxu1  ;;  %v912_v22 = vsub.s32 6, %v4122_v5 }
 0x214   :  { %v877_v50 = vmul.f32 %v3236_v49, %v873_v39  ;;  %v607_v51 = vpop.f32.mrb[29].mxu1 }
 0x215   :  { %v876_v52 = vmul.f32 %v873_v39, %v607_v51  ;;  %v913_v29 = vrot.slane %v4129_v8, %v912_v22 }
 0x216   :  { %v885_v53 = vadd.f32 %v877_v50, %v865_v27 }
 0x217   :  { %v884_v54 = vadd.f32 %v876_v52, %v864_v28  ;;  %v3239_v55 = vpop.f32.mrb[30].mxu1 }
 0x218   :  { %v879_v56 = vmul.f32 %v3239_v55, %v873_v39  ;;  %v617_v57 = vpop.f32.mrb[31].mxu1 }
 0x219   :  { %v878_v59 = vmul.f32 %v873_v39, %v617_v57 }
 0x21a   :  { %v887_v60 = vadd.f32 %v879_v56, %v867_v34 }
 0x21b   :  { %v886_v61 = vadd.f32 %v878_v59, %v866_v35  ;;  %v3242_v62 = vpop.f32.mrb[32].mxu1 }
 0x21c   :  { %v881_v63 = vmul.f32 %v3242_v62, %v873_v39  ;;  %v627_v0 = vpop.f32.mrb[33].mxu1 }
 0x21d   :  { %v880_v2 = vmul.f32 %v873_v39, %v627_v0 }
 0x21e   :  { %v889_v3 = vadd.f32 %v881_v63, %v869_v41 }
 0x21f   :  { %v888_v4 = vadd.f32 %v880_v2, %v868_v42  ;;  %v3245_v6 = vpop.f32.mrb[34].mxu1 }
 0x220   :  { %v895_v7 = vmul.f32 %v3245_v6, %v893_v1  ;;  %v637_v9 = vpop.f32.mrb[35].mxu1 }
 0x221   :  { %v894_v10 = vmul.f32 %v893_v1, %v637_v9 }
 0x222   :  { %v903_v11 = vadd.f32 %v895_v7, %v883_v47 }
 0x223   :  { %v902_v12 = vadd.f32 %v894_v10, %v882_v48  ;;  %v3248_v13 = vpop.f32.mrb[36].mxu1  ;;  %v932_v48 = vsub.s32 7, %v4122_v5 }
 0x224   :  { %v897_v14 = vmul.f32 %v3248_v13, %v893_v1  ;;  %v647_v15 = vpop.f32.mrb[37].mxu1 }
 0x225   :  { %v896_v16 = vmul.f32 %v893_v1, %v647_v15  ;;  %v933_v55 = vrot.slane %v4129_v8, %v932_v48 }
 0x226   :  { %v905_v17 = vadd.f32 %v897_v14, %v885_v53 }
 0x227   :  { %v904_v18 = vadd.f32 %v896_v16, %v884_v54  ;;  %v3251_v19 = vpop.f32.mrb[38].mxu1 }
 0x228   :  { %v899_v20 = vmul.f32 %v3251_v19, %v893_v1  ;;  %v657_v21 = vpop.f32.mrb[39].mxu1 }
 0x229   :  { %v898_v23 = vmul.f32 %v893_v1, %v657_v21 }
 0x22a   :  { %v907_v24 = vadd.f32 %v899_v20, %v887_v60 }
 0x22b   :  { %v906_v25 = vadd.f32 %v898_v23, %v886_v61  ;;  %v3254_v26 = vpop.f32.mrb[40].mxu1  ;;  %v4153_v23 = vld [vmem:[%s4998_s27] ss:$0 sm:$0xff]  ;;  %s3694_s27 = smov 96  }
 0x22c   :  { %v901_v27 = vmul.f32 %v3254_v26, %v893_v1  ;;  %v667_v28 = vpop.f32.mrb[41].mxu1 }
 0x22d   :  { %v900_v30 = vmul.f32 %v893_v1, %v667_v28 }
 0x22e   :  { %v909_v31 = vadd.f32 %v901_v27, %v889_v3 }
 0x22f   :  { %v908_v32 = vadd.f32 %v900_v30, %v888_v4  ;;  %v3257_v33 = vpop.f32.mrb[42].mxu1 }
 0x230   :  { %v915_v34 = vmul.f32 %v3257_v33, %v913_v29  ;;  %v677_v35 = vpop.f32.mrb[43].mxu1 }
 0x231   :  { %v914_v36 = vmul.f32 %v913_v29, %v677_v35 }
 0x232   :  { %v923_v37 = vadd.f32 %v915_v34, %v903_v11 }
 0x233   :  { %v922_v38 = vadd.f32 %v914_v36, %v902_v12  ;;  %v3260_v39 = vpop.f32.mrb[44].mxu1 }
 0x234   :  { %v917_v40 = vmul.f32 %v3260_v39, %v913_v29  ;;  %v687_v41 = vpop.f32.mrb[45].mxu1 }
 0x235   :  { %v916_v42 = vmul.f32 %v913_v29, %v687_v41 }
 0x236   :  { %v925_v43 = vadd.f32 %v917_v40, %v905_v17  ;;  %v2859_v17 = vld [vmem:[%s4997_s5 + $0x8] ss:$0 sm:$0xff] }
 0x237   :  { %v924_v44 = vadd.f32 %v916_v42, %v904_v18  ;;  %v3263_v45 = vpop.f32.mrb[46].mxu1 }
 0x238   :  { %v919_v46 = vmul.f32 %v3263_v45, %v913_v29  ;;  %v697_v47 = vpop.f32.mrb[47].mxu1 }
 0x239   :  { %v918_v49 = vmul.f32 %v913_v29, %v697_v47 }
 0x23a   :  { %v927_v50 = vadd.f32 %v919_v46, %v907_v24 }
 0x23b   :  { %v926_v51 = vadd.f32 %v918_v49, %v906_v25  ;;  %v3266_v52 = vpop.f32.mrb[48].mxu1 }
 0x23c   :  { %v921_v53 = vmul.f32 %v3266_v52, %v913_v29  ;;  %v707_v54 = vpop.f32.mrb[49].mxu1 }
 0x23d   :  { %v920_v56 = vmul.f32 %v913_v29, %v707_v54 }
 0x23e   :  { %v929_v57 = vadd.f32 %v921_v53, %v909_v31 }
 0x23f   :  { %v928_v58 = vadd.f32 %v920_v56, %v908_v32  ;;  %v3269_v59 = vpop.f32.mrb[50].mxu1 }
 0x240   :  { %v935_v60 = vmul.f32 %v3269_v59, %v933_v55  ;;  %v717_v61 = vpop.f32.mrb[51].mxu1 }
 0x241   :  { %v934_v62 = vmul.f32 %v933_v55, %v717_v61 }
 0x242   :  { %v943_v63 = vadd.f32 %v935_v60, %v923_v37 }
 0x243   :  { %v942_v0 = vadd.f32 %v934_v62, %v922_v38  ;;  %v3272_v1 = vpop.f32.mrb[52].mxu1 }
 0x244   :  { %v937_v2 = vmul.f32 %v3272_v1, %v933_v55  ;;  %v727_v5 = vpop.f32.mrb[53].mxu1 }
 0x245   :  { %v936_v3 = vmul.f32 %v933_v55, %v727_v5 }
 0x246   :  { %v945_v4 = vadd.f32 %v937_v2, %v925_v43 }
 0x247   :  { %v944_v6 = vadd.f32 %v936_v3, %v924_v44  ;;  %v3275_v7 = vpop.f32.mrb[54].mxu1 }
 0x248   :  { %v939_v9 = vmul.f32 %v3275_v7, %v933_v55  ;;  %v737_v10 = vpop.f32.mrb[55].mxu1 }
 0x249   :  { %v938_v11 = vmul.f32 %v933_v55, %v737_v10 }
 0x24a   :  { %v947_v8 = vadd.f32 %v939_v9, %v927_v50 }
 0x24b   :  { %v946_v12 = vadd.f32 %v938_v11, %v926_v51  ;;  %v3278_v13 = vpop.f32.mrb[56].mxu1 }
 0x24c   :  { %v941_v14 = vmul.f32 %v3278_v13, %v933_v55  ;;  %v747_v15 = vpop.f32.mrb[57].mxu1 }
 0x24d   :  { %v940_v16 = vmul.f32 %v933_v55, %v747_v15 }
 0x24e   :  { %v949_v18 = vadd.f32 %v941_v14, %v929_v57 }
 0x24f   :  { %v4148_v19 = vadd.f32 %v940_v16, %v928_v58  ;;  %v3281_v20 = vpop.f32.mrb[58].mxu1 }
 0x250   :  { %v955_v21 = vmul.f32 %v3281_v20, %v2859_v17  ;;  %v757_v22 = vpop.f32.mrb[59].mxu1 }
 0x251   :  { %v954_v24 = vmul.f32 %v2859_v17, %v757_v22 }
 0x252   :  { %v963_v25 = vadd.f32 %v955_v21, %v943_v63 }
 0x253   :  { %v962_v26 = vadd.f32 %v954_v24, %v942_v0  ;;  %v3284_v27 = vpop.f32.mrb[60].mxu1 }
 0x254   :  { %v978_v28 = vadd.f32 %v4153_v23, %v963_v25  ;;  %v957_v29 = vmul.f32 %v3284_v27, %v2859_v17  ;;  %v767_v30 = vpop.f32.mrb[61].mxu1 }
 0x255   :  { %v977_v31 = vadd.f32 %v4153_v23, %v962_v26  ;;  %v956_v32 = vmul.f32 %v2859_v17, %v767_v30 }
 0x256   :  { %v4157_v33 = vmul.f32 0.70710677, %v978_v28  ;;  %v965_v34 = vadd.f32 %v957_v29, %v945_v4  ;;  %v4187_v9 = vmul.f32 0.5, %v978_v28 }
 0x257   :  { %v4159_v35 = vmul.f32 0.70710677, %v977_v31  ;;  %v964_v36 = vadd.f32 %v956_v32, %v944_v6  ;;  %v3287_v37 = vpop.f32.mrb[62].mxu1  ;;  %v4197_v21 = vmul.f32 0.5, %v977_v31 }
 0x258   :  { %v1018_v38 = vand.u32 2147483647, %v4157_v33  ;;  %v4163_v39 = vadd.f32 %v4153_v23, %v965_v34  ;;  %v959_v40 = vmul.f32 %v3287_v37, %v2859_v17  ;;  %v777_v41 = vpop.f32.mrb[63].mxu1  ;;  %vm1002_vm1 = vcmp.ge.f32.partialorder %v4157_v33, 0.0 }
 0x259   :  { %v1017_v42 = vand.u32 2147483647, %v4159_v35  ;;  %v4167_v43 = vadd.f32 %v4153_v23, %v964_v36  ;;  %v958_v54 = vmul.f32 %v2859_v17, %v777_v41  ;;  %vm1001_vm2 = vcmp.ge.f32.partialorder %v4159_v35, 0.0 }
 0x25a   :  { %v1026_v44 = vmul.f32 0.3275911, %v1018_v38  ;;  %v4170_v45 = vmul.f32 0.70710677, %v4163_v39  ;;  %v967_v48 = vadd.f32 %v959_v40, %v947_v8  ;;  %v1130_v57 = vsub.f32 0.0, %v1018_v38 }
 0x25b   :  { %v1025_v46 = vmul.f32 0.3275911, %v1017_v42  ;;  %v4173_v47 = vmul.f32 0.70710677, %v4167_v43  ;;  %v3290_v49 = vpop.f32.mrb[64].mxu1  ;;  %v1129_v59 = vsub.f32 0.0, %v1017_v42  ;;  %v966_v62 = vadd.f32 %v958_v54, %v946_v12 }
 0x25c   :  { %v1020_v50 = vand.u32 2147483647, %v4170_v45  ;;  %v787_v51 = vpop.f32.mrb[65].mxu1  ;;  %v1034_v55 = vadd.f32 1.0, %v1026_v44  ;;  %v4178_v60 = vadd.f32 %v4153_v23, %v967_v48  ;;  %v1138_v2 = vmul.f32 %v1130_v57, %v1018_v38 }
 0x25d   :  { %v1033_v52 = vadd.f32 1.0, %v1025_v46  ;;  %v1019_v53 = vand.u32 2147483647, %v4173_v47  ;;  %v4184_v5 = vadd.f32 %v4153_v23, %v966_v62  ;;  %v961_v3 = vmul.f32 %v3290_v49, %v2859_v17 }
 0x25e   :  { %v1028_v56 = vmul.f32 0.3275911, %v1020_v50  ;;  %v1132_v0 = vsub.f32 0.0, %v1020_v50  ;;  %v4181_v1 = vmul.f32 0.70710677, %v4178_v60  ;;  %v1137_v4 = vmul.f32 %v1129_v59, %v1017_v42 }
 0x25f   :  { %3563 = vrcp.f32 %v1033_v52  ;;  %v1027_v58 = vmul.f32 0.3275911, %v1019_v53  ;;  %v960_v7 = vmul.f32 %v2859_v17, %v787_v51  ;;  %v1131_v10 = vsub.f32 0.0, %v1019_v53 }
 0x260   :  { %3565 = vrcp.f32 %v1034_v55  ;;  %v1036_v63 = vadd.f32 1.0, %v1028_v56  ;;  %v1022_v6 = vand.u32 2147483647, %v4181_v1  ;;  %v4190_v11 = vmul.f32 0.70710677, %v4184_v5 }
 0x261   :  { %v1035_v61 = vadd.f32 1.0, %v1027_v58  ;;  %v969_v8 = vadd.f32 %v961_v3, %v949_v18  ;;  %v1140_v12 = vmul.f32 %v1132_v0, %v1020_v50  ;;  %v968_v14 = vadd.f32 %v960_v7, %v4148_v19 }
 0x262   :  { %v1030_v13 = vmul.f32 0.3275911, %v1022_v6  ;;  %v1147_v15 = vmul.f32 1.442695, %v1138_v2  ;;  %v1021_v16 = vand.u32 2147483647, %v4190_v11  ;;  %v1139_v25 = vmul.f32 %v1131_v10, %v1019_v53 }
 0x263   :  { %3567 = vrcp.f32 %v1035_v61  ;;  %v4195_v20 = vadd.f32 %v4153_v23, %v969_v8  ;;  %v1145_v17 = vmul.f32 1.442695, %v1137_v4  ;;  %v4201_v24 = vadd.f32 %v4153_v23, %v968_v14 }
 0x264   :  { %3569 = vrcp.f32 %v1036_v63  ;;  %v1038_v22 = vadd.f32 1.0, %v1030_v13  ;;  %v1134_v26 = vsub.f32 0.0, %v1022_v6  ;;  %v1029_v19 = vmul.f32 0.3275911, %v1021_v16 }
 0x265   :  { %v4206_v27 = vmul.f32 0.70710677, %v4195_v20  ;;  %v1151_v28 = vmul.f32 1.442695, %v1140_v12  ;;  %v4210_v29 = vmul.f32 0.70710677, %v4201_v24 }
 0x266   :  { %3571 = vrcp.f32 %v1038_v22  ;;  %vm1003_vm3 = vcmp.ge.f32.partialorder %v4173_v47, 0.0  ;;  %v1037_v23 = vadd.f32 1.0, %v1029_v19  ;;  %v1133_v32 = vsub.f32 0.0, %v1021_v16 }
 0x267   :  { %3573 = vpow2.f32 %v1147_v15  ;;  %v1024_v30 = vand.u32 2147483647, %v4206_v27  ;;  %v1023_v34 = vand.u32 2147483647, %v4210_v29  ;;  %v1149_v38 = vmul.f32 1.442695, %v1139_v25 }
 0x268   :  { %3575 = vpow2.f32 %v1145_v17  ;;  %v1142_v40 = vmul.f32 %v1134_v26, %v1022_v6  ;;  %vm1004_vm4 = vcmp.ge.f32.partialorder %v4170_v45, 0.0  ;;  %v3691_v50 = vmov -1.0  }
 0x269   :  { %v4203_v18 = vpop.eup %3563  ;;  %3577 = vrcp.f32 %v1037_v23  ;;  %v1032_v41 = vmul.f32 0.3275911, %v1024_v30  ;;  %v1136_v42 = vsub.f32 0.0, %v1024_v30  ;;  %v1031_v44 = vmul.f32 0.3275911, %v1023_v34 }
 0x26a   :  { %v4214_v31 = vpop.eup %3565  ;;  %v1057_v36 = vmul.f32 1.0614054, %v4203_v18  ;;  %3579 = vpow2.f32 %v1151_v28  ;;  %v1135_v49 = vsub.f32 0.0, %v1023_v34  ;;  %v4224_v51 = vsel %vm1001_vm2, 1.0, %v3691_v50 }
 0x26b   :  { %v1040_v48 = vadd.f32 1.0, %v1032_v41  ;;  %v1058_v52 = vmul.f32 1.0614054, %v4214_v31  ;;  %v1141_v54 = vmul.f32 %v1133_v32, %v1021_v16  ;;  %v1039_v55 = vadd.f32 1.0, %v1031_v44 }
 0x26c   :  { %v1065_v46 = vadd.f32 -1.4531521, %v1057_v36  ;;  %v1155_v58 = vmul.f32 1.442695, %v1142_v40  ;;  %v4234_v59 = vsel %vm1002_vm1, 1.0, %v3691_v50  ;;  %v1144_v61 = vmul.f32 %v1136_v42, %v1024_v30 }
 0x26d   :  { %v4218_v37 = vpop.eup %3567  ;;  %3581 = vrcp.f32 %v1040_v48  ;;  %v1066_v35 = vadd.f32 -1.4531521, %v1058_v52  ;;  %v1143_v0 = vmul.f32 %v1135_v49, %v1023_v34  ;;  %v4238_v3 = vmul.f32 0.5, %v4167_v43 }
 0x26e   :  { %v4227_v53 = vpop.eup %3569  ;;  %v1073_v56 = vmul.f32 %v4203_v18, %v1065_v46  ;;  %v1059_v57 = vmul.f32 1.0614054, %v4218_v37  ;;  %3583 = vrcp.f32 %v1039_v55  ;;  %v1153_v7 = vmul.f32 1.442695, %v1141_v54 }
 0x26f   :  { %v1074_v2 = vmul.f32 %v4214_v31, %v1066_v35  ;;  %v1060_v4 = vmul.f32 1.0614054, %v4227_v53  ;;  %v4247_v10 = vsel %vm1003_vm3, 1.0, %v3691_v50  ;;  %3585 = vpow2.f32 %v1149_v38 }
 0x270   :  { %v1081_v62 = vadd.f32 1.4214138, %v1073_v56  ;;  %v1067_v63 = vadd.f32 -1.4531521, %v1059_v57  ;;  %v4241_v6 = vpop.eup %3571  ;;  %3587 = vpow2.f32 %v1155_v58  ;;  %v1159_v16 = vmul.f32 1.442695, %v1144_v61 }
 0x271   :  { %v3574_v12 = vpop.eup %3573  ;;  %v1082_v13 = vadd.f32 1.4214138, %v1074_v2  ;;  %v1068_v14 = vadd.f32 -1.4531521, %v1060_v4  ;;  %v1062_v43 = vmul.f32 1.0614054, %v4241_v6  ;;  %3589 = vpow2.f32 %v1153_v7 }
 0x272   :  { %v1089_v33 = vmul.f32 %v4203_v18, %v1081_v62  ;;  %v1075_v8 = vmul.f32 %v4218_v37, %v1067_v63  ;;  %v3576_v15 = vpop.eup %3575  ;;  %v1157_v26 = vmul.f32 1.442695, %v1143_v0  ;;  %v4263_v38 = vsel %vm1004_vm4, 1.0, %v3691_v50 }
 0x273   :  { %v4251_v25 = vpop.eup %3577  ;;  %v1090_v47 = vmul.f32 %v4214_v31, %v1082_v13  ;;  %v1076_v19 = vmul.f32 %v4227_v53, %v1068_v14  ;;  %v1070_v28 = vadd.f32 -1.4531521, %v1062_v43  ;;  %3591 = vpow2.f32 %v1159_v16 }
 0x274   :  { %v1097_v17 = vadd.f32 -0.28449672, %v1089_v33  ;;  %v1083_v22 = vadd.f32 1.4214138, %v1075_v8  ;;  %v4255_v23 = vpop.eup %3579  ;;  %v1061_v34 = vmul.f32 1.0614054, %v4251_v25  ;;  %3593 = vpow2.f32 %v1157_v26 }
 0x275   :  { %v1098_v36 = vadd.f32 -0.28449672, %v1090_v47  ;;  %v1084_v40 = vadd.f32 1.4214138, %v1076_v19  ;;  %v1078_v41 = vmul.f32 %v4241_v6, %v1070_v28  ;;  %vm1006_vm6 = vcmp.ge.f32.partialorder %v4181_v1, 0.0 }
 0x276   :  { %v1105_v30 = vmul.f32 %v4203_v18, %v1097_v17  ;;  %v1091_v32 = vmul.f32 %v4218_v37, %v1083_v22  ;;  %v1069_v46 = vadd.f32 -1.4531521, %v1061_v34  ;;  %vm1005_vm7 = vcmp.ge.f32.partialorder %v4190_v11, 0.0 }
 0x277   :  { %v4266_v48 = vpop.eup %3581  ;;  %v1106_v49 = vmul.f32 %v4214_v31, %v1098_v36  ;;  %v1092_v52 = vmul.f32 %v4227_v53, %v1084_v40  ;;  %v1086_v54 = vadd.f32 1.4214138, %v1078_v41  ;;  %vm1008_vm8 = vcmp.ge.f32.partialorder %v4206_v27, 0.0 }
 0x278   :  { %v1113_v42 = vadd.f32 0.2548296, %v1105_v30  ;;  %v1099_v44 = vadd.f32 -0.28449672, %v1091_v32  ;;  %v4270_v55 = vpop.eup %3583  ;;  %v1077_v57 = vmul.f32 %v4251_v25, %v1069_v46  ;;  %v1064_v58 = vmul.f32 1.0614054, %v4266_v48 }
 0x279   :  { %v1114_v35 = vadd.f32 0.2548296, %v1106_v49  ;;  %v1100_v61 = vadd.f32 -0.28449672, %v1092_v52  ;;  %v1094_v62 = vmul.f32 %v4241_v6, %v1086_v54  ;;  %v1063_v63 = vmul.f32 1.0614054, %v4270_v55  ;;  %v3586_v33 = vpop.eup %3585 }
 0x27a   :  { %v1121_v45 = vmul.f32 %v4203_v18, %v1113_v42  ;;  %v1107_v56 = vmul.f32 %v4218_v37, %v1099_v44  ;;  %v1085_v4 = vadd.f32 1.4214138, %v1077_v57  ;;  %v1072_v7 = vadd.f32 -1.4531521, %v1064_v58  ;;  %v3588_v43 = vpop.eup %3587 }
 0x27b   :  { %v1122_v18 = vmul.f32 %v4214_v31, %v1114_v35  ;;  %v1108_v8 = vmul.f32 %v4227_v53, %v1100_v61  ;;  %v1102_v13 = vadd.f32 -0.28449672, %v1094_v62  ;;  %v1071_v14 = vadd.f32 -1.4531521, %v1063_v63  ;;  %v3590_v30 = vpop.eup %3589 }
 0x27c   :  { %v1161_v0 = vmul.f32 %v3576_v15, %v1121_v45  ;;  %v1115_v2 = vadd.f32 0.2548296, %v1107_v56  ;;  %v1093_v22 = vmul.f32 %v4251_v25, %v1085_v4  ;;  %v1080_v15 = vmul.f32 %v4266_v48, %v1072_v7 }
 0x27d   :  { %v1162_v26 = vmul.f32 %v3574_v12, %v1122_v18  ;;  %v1116_v47 = vadd.f32 0.2548296, %v1108_v8  ;;  %v1110_v19 = vmul.f32 %v4241_v6, %v1102_v13  ;;  %v1079_v28 = vmul.f32 %v4270_v55, %v1071_v14  ;;  %v3592_v44 = vpop.eup %3591 }
 0x27e   :  { %v1169_v16 = vsub.f32 1.0, %v1161_v0  ;;  %v1123_v17 = vmul.f32 %v4218_v37, %v1115_v2  ;;  %v1101_v34 = vadd.f32 -0.28449672, %v1093_v22  ;;  %v1088_v36 = vadd.f32 1.4214138, %v1080_v15  ;;  %v3594_v54 = vpop.eup %3593 }
 0x27f   :  { %v1170_v40 = vsub.f32 1.0, %v1162_v26  ;;  %v1124_v37 = vmul.f32 %v4227_v53, %v1116_v47  ;;  %v1118_v41 = vadd.f32 0.2548296, %v1110_v19  ;;  %v1087_v42 = vadd.f32 1.4214138, %v1079_v28 }
 0x280   :  { %v1177_v31 = vmul.f32 %v1169_v16, %v4224_v51  ;;  %v1163_v32 = vmul.f32 %v3586_v33, %v1123_v17  ;;  %v1109_v49 = vmul.f32 %v4251_v25, %v1101_v34  ;;  %v1096_v52 = vmul.f32 %v4266_v48, %v1088_v36 }
 0x281   :  { %v1178_v45 = vmul.f32 %v1170_v40, %v4234_v59  ;;  %v1164_v51 = vmul.f32 %v4255_v23, %v1124_v37  ;;  %v1126_v56 = vmul.f32 %v4241_v6, %v1118_v41  ;;  %v1095_v57 = vmul.f32 %v4270_v55, %v1087_v42 }
 0x282   :  { %v1185_v12 = vadd.f32 1.0, %v1177_v31  ;;  %v1171_v46 = vsub.f32 1.0, %v1163_v32  ;;  %v1117_v35 = vadd.f32 0.2548296, %v1109_v49  ;;  %v1104_v61 = vadd.f32 -0.28449672, %v1096_v52 }
 0x283   :  { %v1186_v62 = vadd.f32 1.0, %v1178_v45  ;;  %v1172_v63 = vsub.f32 1.0, %v1164_v51  ;;  %v1166_v0 = vmul.f32 %v3588_v43, %v1126_v56  ;;  %v1103_v2 = vadd.f32 -0.28449672, %v1095_v57 }
 0x284   :  { %v4296_v53 = vmul.f32 %v1185_v12, %v4197_v21  ;;  %v1179_v58 = vmul.f32 %v1171_v46, %v4247_v10  ;;  %v1125_v23 = vmul.f32 %v4251_v25, %v1117_v35  ;;  %v1112_v6 = vmul.f32 %v4266_v48, %v1104_v61 }
 0x285   :  { %v4304_v21 = vmul.f32 %v1186_v62, %v4187_v9  ;;  %v1180_v10 = vmul.f32 %v1172_v63, %v4263_v38  ;;  %v1174_v7 = vsub.f32 1.0, %v1166_v0  ;;  %v1111_v33 = vmul.f32 %v4270_v55, %v1103_v2 }
 0x286   :  { %v1204_v59 = vsel %vm1203_vm5, %v4296_v53, 0.0  ;;  %v1187_v4 = vadd.f32 1.0, %v1179_v58  ;;  %v1165_v8 = vmul.f32 %v3590_v30, %v1125_v23  ;;  %v1014_v13 = vsel %vm1006_vm6, 1.0, %v3691_v50 }
 0x287   :  { %1205 = vadd.xlane.f32.xlu0 %v1204_v59  ;;  %v1120_v25 = vadd.f32 0.2548296, %v1112_v6  ;;  %v988_v14 = vmul.f32 0.5, %v4163_v39  ;;  %v1188_v43 = vadd.f32 1.0, %v1180_v10  ;;  %v1182_v16 = vmul.f32 %v1174_v7, %v1014_v13 }
 0x288   :  { %v4309_v18 = vmul.f32 %v1187_v4, %v4238_v3  ;;  %v1119_v9 = vadd.f32 0.2548296, %v1111_v33  ;;  %v1207_v38 = vsel %vm1203_vm5, %v4304_v21, 0.0  ;;  %v1173_v22 = vsub.f32 1.0, %v1165_v8 }
 0x289   :  { %v1128_v3 = vmul.f32 %v4266_v48, %v1120_v25  ;;  %v4320_v15 = vmul.f32 %v1188_v43, %v988_v14  ;;  %v1013_v39 = vsel %vm1005_vm7, 1.0, %v3691_v50  ;;  %v1190_v1 = vadd.f32 1.0, %v1182_v16 }
 0x28a   :  { %v1210_v17 = vsel %vm1203_vm5, %v4309_v18, 0.0  ;;  %v1127_v26 = vmul.f32 %v4270_v55, %v1119_v9  ;;  %v990_v47 = vmul.f32 0.5, %v4178_v60  ;;  %v1181_v19 = vmul.f32 %v1173_v22, %v1013_v39 }
 0x28b   :  { %1208 = vadd.xlane.f32.xlu0 %v1207_v38  ;;  %1211 = vadd.xlane.f32.xlu1 %v1210_v17  ;;  %v1168_v28 = vmul.f32 %v3592_v44, %v1128_v3  ;;  %v989_v30 = vmul.f32 0.5, %v4184_v5  ;;  %vm1007_vm9 = vcmp.ge.f32.partialorder %v4210_v29, 0.0  ;;  %v1213_v31 = vsel %vm1203_vm5, %v4320_v15, 0.0 }
 0x28c   :  { %v1167_v48 = vmul.f32 %v3594_v54, %v1127_v26  ;;  %v1189_v32 = vadd.f32 1.0, %v1181_v19  ;;  %v4332_v11 = vmul.f32 %v1190_v1, %v990_v47  ;;  %v1016_v60 = vsel %vm1008_vm8, 1.0, %v3691_v50 }
 0x28d   :  { %v1176_v34 = vsub.f32 1.0, %v1168_v28  ;;  %v1015_v27 = vsel %vm1007_vm9, 1.0, %v3691_v50  ;;  %v992_v29 = vmul.f32 0.5, %v4195_v20  ;;  %v991_v44 = vmul.f32 0.5, %v4201_v24 }
 0x28e   :  { %v1175_v55 = vsub.f32 1.0, %v1167_v48  ;;  %v4335_v36 = vmul.f32 %v1189_v32, %v989_v30  ;;  %v1219_v41 = vsel %vm1203_vm5, %v4332_v11, 0.0  ;;  %v1337_v32 = vld [vmem:[%s4999_s2] sm:$0xff] }
 0x28f   :  { %1214 = vadd.xlane.f32.xlu1 %v1213_v31  ;;  %v1184_v40 = vmul.f32 %v1176_v34, %v1016_v60  ;;  %v1338_v34 = vld [vmem:[%s4999_s2 + $0x8] sm:$0xff] }
 0x290   :  { %v1183_v5 = vmul.f32 %v1175_v55, %v1015_v27  ;;  %v1216_v37 = vsel %vm1203_vm5, %v4335_v36, 0.0  ;;  %v1339_v55 = vld [vmem:[%s4999_s2 + $0x10] sm:$0xff]  ;;  %v3477_v60 = vpack.c.bf16 %v1338_v34, %v1337_v32  ;;  %v1340_v27 = vld [vmem:[%s4999_s2 + $0x18] sm:$0xff] }
 0x291   :  { %v1192_v42 = vadd.f32 1.0, %v1184_v40  ;;  %1217 = vadd.xlane.f32.xlu0 %v1216_v37  ;;  %v3481_v40 = vpack.c.bf16 %v1340_v27, %v1339_v55 }
 0x292   :  { %v1191_v12 = vadd.f32 1.0, %v1183_v5  ;;  %3478 = vmatprep.subr.bf16.mxu0 %v3477_v60  ;;  %v1477_v5 = vld [vmem:[%s5000_s0] sm:$0xff] }
 0x293   :  { %1220 = vadd.xlane.f32.xlu1 %v1219_v41  ;;  %v4344_v46 = vmul.f32 %v1192_v42, %v992_v29  ;;  %3480 = vmatpush3.bf16.msra.mxu0 %v3477_v60  ;;  %v1478_v29 = vld [vmem:[%s5000_s0 + $0x8] sm:$0xff]  ;;  %v28_v41 = vstv %s4963_s9 }
 0x294   :  { %v4346_v49 = vmul.f32 %v1191_v12, %v991_v44  ;;  %3482 = vmatprep.subr.bf16.mxu0 %v3481_v40  ;;  %v4418_v37 = vpack.c.bf16 %v1478_v29, %v1477_v5  ;;  %29 = vst [vmem:[#allocation2] sm:$0x1] %v28_v41 }
 0x295   :  { %v1225_v52 = vsel %vm1203_vm5, %v4344_v46, 0.0 }
 0x296   :  { %v1222_v20 = vsel %vm1203_vm5, %v4346_v49, 0.0 }
 0x297   :  { %1226 = vadd.xlane.f32.xlu1 %v1225_v52  ;;  %1223 = vadd.xlane.f32.xlu0 %v1222_v20 }
 0x298   :  { %3484 = vmatpush3.bf16.msra.mxu0 %v3481_v40 }
 0x299   :  { %3486 = vmatprep.subr.bf16.mxu0 %v4418_v37 }
 0x314   :  { %v1206_v54 = vpop.xlane.xlu0 %1205 }
 0x315   :  { %v1229_v45 = vmul.f32 0.03125, %v1206_v54 }
 0x317   :  { %v4353_v51 = vsub.f32 %v4296_v53, %v1229_v45 }
 0x318   :  { %v1209_v24 = vpop.xlane.xlu0 %1208  ;;  %v1212_v56 = vpop.xlane.xlu1 %1211 }
 0x319   :  { %v1230_v57 = vmul.f32 0.03125, %v1209_v24  ;;  %v1231_v58 = vmul.f32 0.03125, %v1212_v56  ;;  %v1245_v35 = vmul.f32 %v4353_v51, %v4353_v51 }
 0x31b   :  { %v4358_v61 = vsub.f32 %v4304_v21, %v1230_v57  ;;  %v4361_v62 = vsub.f32 %v4309_v18, %v1231_v58  ;;  %v1253_v63 = vsel %vm1203_vm5, %v1245_v35, 0.0 }
 0x31c   :  { %v1215_v0 = vpop.xlane.xlu1 %1214  ;;  %1254 = vadd.xlane.f32.xlu0 %v1253_v63 }
 0x31d   :  { %v1232_v2 = vmul.f32 0.03125, %v1215_v0  ;;  %v1246_v59 = vmul.f32 %v4358_v61, %v4358_v61  ;;  %v1247_v4 = vmul.f32 %v4361_v62, %v4361_v62 }
 0x31e   :  { %v1218_v7 = vpop.xlane.xlu0 %1217 }
 0x31f   :  { %v4369_v23 = vsub.f32 %v4320_v15, %v1232_v2  ;;  %v1256_v6 = vsel %vm1203_vm5, %v1246_v59, 0.0  ;;  %v1259_v10 = vsel %vm1203_vm5, %v1247_v4, 0.0  ;;  %v1233_v8 = vmul.f32 0.03125, %v1218_v7 }
 0x320   :  { %1257 = vadd.xlane.f32.xlu1 %v1256_v6  ;;  %v1221_v33 = vpop.xlane.xlu1 %1220  ;;  %1260 = vadd.xlane.f32.xlu0 %v1259_v10  ;;  %v2861_v6 = vld [vmem:[%s4964_s6] ss:$0 sm:$0xff] }
 0x321   :  { %v1234_v13 = vmul.f32 0.03125, %v1221_v33  ;;  %v1248_v25 = vmul.f32 %v4369_v23, %v4369_v23  ;;  %v4376_v14 = vsub.f32 %v4335_v36, %v1233_v8 }
 0x323   :  { %v4379_v43 = vsub.f32 %v4332_v11, %v1234_v13  ;;  %v1262_v16 = vsel %vm1203_vm5, %v1248_v25, 0.0  ;;  %v1249_v22 = vmul.f32 %v4376_v14, %v4376_v14  ;;  %v2862_v13 = vld [vmem:[%s4965_s7] ss:$0 sm:$0xff] }
 0x324   :  { %1263 = vadd.xlane.f32.xlu1 %v1262_v16  ;;  %v1227_v9 = vpop.xlane.xlu1 %1226  ;;  %v1224_v38 = vpop.xlane.xlu0 %1223 }
 0x325   :  { %v1236_v17 = vmul.f32 0.03125, %v1227_v9  ;;  %v1250_v3 = vmul.f32 %v4379_v43, %v4379_v43  ;;  %v1235_v39 = vmul.f32 0.03125, %v1224_v38  ;;  %v1265_v26 = vsel %vm1203_vm5, %v1249_v22, 0.0 }
 0x326   :  { %1266 = vadd.xlane.f32.xlu0 %v1265_v26 }
 0x327   :  { %v4387_v1 = vsub.f32 %v4344_v46, %v1236_v17  ;;  %v1268_v47 = vsel %vm1203_vm5, %v1250_v3, 0.0  ;;  %v4392_v19 = vsub.f32 %v4346_v49, %v1235_v39 }
 0x328   :  { %1269 = vadd.xlane.f32.xlu1 %v1268_v47 }
 0x329   :  { %v1252_v28 = vmul.f32 %v4387_v1, %v4387_v1  ;;  %v1251_v30 = vmul.f32 %v4392_v19, %v4392_v19 }
 0x32b   :  { %v1274_v48 = vsel %vm1203_vm5, %v1252_v28, 0.0  ;;  %v1271_v31 = vsel %vm1203_vm5, %v1251_v30, 0.0  ;;  %v1479_v28 = vld [vmem:[%s5000_s0 + $0x10] sm:$0xff]  ;;  %v1480_v30 = vld [vmem:[%s5000_s0 + $0x18] sm:$0xff] }
 0x32c   :  { %1275 = vadd.xlane.f32.xlu1 %v1274_v48  ;;  %1272 = vadd.xlane.f32.xlu0 %v1271_v31  ;;  %v3489_v55 = vpack.c.bf16 %v1480_v30, %v1479_v28 }
 0x3a9   :  { %v1255_v42 = vpop.xlane.xlu0 %1254 }
 0x3aa   :  { %v1277_v44 = vmul.f32 0.03125, %v1255_v42 }
 0x3ac   :  { %v1285_v12 = vadd.f32 1e-05, %v1277_v44 }
 0x3ad   :  { %v1258_v52 = vpop.xlane.xlu1 %1257  ;;  %v1261_v20 = vpop.xlane.xlu0 %1260 }
 0x3ae   :  { %3595 = vrsqrt.f32 %v1285_v12  ;;  %v1278_v54 = vmul.f32 0.03125, %v1258_v52  ;;  %v1279_v45 = vmul.f32 0.03125, %v1261_v20 }
 0x3b0   :  { %v1286_v24 = vadd.f32 1e-05, %v1278_v54  ;;  %v1287_v56 = vadd.f32 1e-05, %v1279_v45 }
 0x3b1   :  { %v1264_v57 = vpop.xlane.xlu1 %1263 }
 0x3b2   :  { %3597 = vrsqrt.f32 %v1286_v24  ;;  %v1280_v58 = vmul.f32 0.03125, %v1264_v57 }
 0x3b3   :  { %3599 = vrsqrt.f32 %v1287_v56  ;;  %v1267_v63 = vpop.xlane.xlu0 %1266 }
 0x3b4   :  { %v1288_v35 = vadd.f32 1e-05, %v1280_v58  ;;  %v1281_v2 = vmul.f32 0.03125, %v1267_v63  ;;  %v2863_v58 = vld [vmem:[#allocation2] ss:$0 sm:$0xff] }
 0x3b5   :  { %v1270_v0 = vpop.xlane.xlu1 %1269 }
 0x3b6   :  { %3601 = vrsqrt.f32 %v1288_v35  ;;  %v1282_v59 = vmul.f32 0.03125, %v1270_v0  ;;  %v1289_v10 = vadd.f32 1e-05, %v1281_v2 }
 0x3b8   :  { %v3596_v4 = vpop.eup %3595  ;;  %v1290_v7 = vadd.f32 1e-05, %v1282_v59  ;;  %3603 = vrsqrt.f32 %v1289_v10 }
 0x3b9   :  { %v1276_v33 = vpop.xlane.xlu1 %1275  ;;  %v1301_v8 = vmul.f32 %v3596_v4, %v4353_v51  ;;  %v1273_v25 = vpop.xlane.xlu0 %1272 }
 0x3ba   :  { %v1284_v16 = vmul.f32 0.03125, %v1276_v33  ;;  %3605 = vrsqrt.f32 %v1290_v7  ;;  %v1283_v9 = vmul.f32 0.03125, %v1273_v25 }
 0x3bb   :  { %v1315_v38 = vmul.f32 %v2861_v6, %v1301_v8 }
 0x3bc   :  { %v3598_v17 = vpop.eup %3597  ;;  %v1292_v22 = vadd.f32 1e-05, %v1284_v16  ;;  %v1291_v26 = vadd.f32 1e-05, %v1283_v9 }
 0x3bd   :  { %v3600_v3 = vpop.eup %3599  ;;  %v1302_v39 = vmul.f32 %v3598_v17, %v4358_v61  ;;  %v1329_v47 = vadd.f32 %v2862_v13, %v1315_v38 }
 0x3be   :  { %3607 = vrsqrt.f32 %v1292_v22  ;;  %v1303_v51 = vmul.f32 %v3600_v3, %v4361_v62 }
 0x3bf   :  { %v1316_v48 = vmul.f32 %v2861_v6, %v1302_v39  ;;  %3609 = vrsqrt.f32 %v1291_v26  ;;  %3299 = vmatprep.mubr.msk.f32.mxu0 %vm1203_vm5, %v1329_v47 }
 0x3c0   :  { %v3602_v31 = vpop.eup %3601  ;;  %v1317_v32 = vmul.f32 %v2861_v6, %v1303_v51 }
 0x3c1   :  { %v1330_v61 = vadd.f32 %v2862_v13, %v1316_v48  ;;  %v1304_v34 = vmul.f32 %v3602_v31, %v4369_v23 }
 0x3c2   :  { %v1331_v60 = vadd.f32 %v2862_v13, %v1317_v32  ;;  %v3604_v27 = vpop.eup %3603 }
 0x3c3   :  { %3300 = vmatmul.mubr.msk.f32.vlgmr.msra.gmra.mrb[22].mxu0 %vm1203_vm5, %v1330_v61  ;;  %v1318_v62 = vmul.f32 %v2861_v6, %v1304_v34  ;;  %v1305_v29 = vmul.f32 %v3604_v27, %v4376_v14 }
 0x3c4   :  { %3302 = vmatprep.mubr.msk.f32.mxu0 %vm1203_vm5, %v1331_v60  ;;  %3488 = vmatpush3.bf16.msra.mxu0 %v4418_v37  ;;  %v3606_v40 = vpop.eup %3605 }
 0x3c5   :  { %v1332_v5 = vadd.f32 %v2862_v13, %v1318_v62  ;;  %3490 = vmatprep.subr.bf16.mxu0 %v3489_v55  ;;  %v1306_v41 = vmul.f32 %v3606_v40, %v4379_v43  ;;  %v1319_v23 = vmul.f32 %v2861_v6, %v1305_v29 }
 0x3c7   :  { %3303 = vmatmul.mubr.msk.f32.gmra.mrb[24].mxu0 %vm1203_vm5, %v1332_v5  ;;  %v1320_v44 = vmul.f32 %v2861_v6, %v1306_v41  ;;  %v1333_v52 = vadd.f32 %v2862_v13, %v1319_v23 }
 0x3c8   :  { %v3608_v42 = vpop.eup %3607  ;;  %3492 = vmatpush3.bf16.msra.mxu0 %v3489_v55 }
 0x3c9   :  { %v3610_v12 = vpop.eup %3609  ;;  %v1308_v20 = vmul.f32 %v3608_v42, %v4387_v1  ;;  %v1334_v54 = vadd.f32 %v2862_v13, %v1320_v44  ;;  %3305 = vmatprep.mubr.msk.f32.mxu0 %vm1203_vm5, %v1333_v52  ;;  %v4464_v1 = vld [vmem:[%s4966_s12] sm:$0xff] }
 0x3ca   :  { %v1307_v37 = vmul.f32 %v3610_v12, %v4392_v19 }
 0x3cb   :  { %v1322_v45 = vmul.f32 %v2861_v6, %v1308_v20  ;;  %3306 = vmatmul.mubr.msk.f32.gmra.mrb[26].mxu0 %vm1203_vm5, %v1334_v54 }
 0x3cc   :  { %v1321_v14 = vmul.f32 %v2861_v6, %v1307_v37 }
 0x3cd   :  { %v1336_v43 = vadd.f32 %v2862_v13, %v1322_v45 }
 0x3ce   :  { %v1335_v24 = vadd.f32 %v2862_v13, %v1321_v14 }
 0x3d0   :  { %3308 = vmatprep.mubr.msk.f32.mxu0 %vm1203_vm5, %v1335_v24 }
 0x3d1   :  { %3309 = vmatmul.mubr.msk.f32.gmra.mrb[28].mxu0 %vm1203_vm5, %v1336_v43 }
 0x3d2   :  { %3319 = vmatprep.mubr.msk.f32.mxu0 %vm1203_vm5, %v1329_v47 }
 0x3d5   :  { %3320 = vmatmul.mubr.msk.f32.vlgmr.msra.gmra.mrb[30].mxu0 %vm1203_vm5, %v1330_v61 }
 0x3d6   :  { %3322 = vmatprep.mubr.msk.f32.mxu0 %vm1203_vm5, %v1331_v60 }
 0x3d9   :  { %3323 = vmatmul.mubr.msk.f32.gmra.mrb[32].mxu0 %vm1203_vm5, %v1332_v5 }
 0x3da   :  { %3325 = vmatprep.mubr.msk.f32.mxu0 %vm1203_vm5, %v1333_v52 }
 0x3dd   :  { %3326 = vmatmul.mubr.msk.f32.gmra.mrb[34].mxu0 %vm1203_vm5, %v1334_v54 }
 0x3de   :  { %3328 = vmatprep.mubr.msk.f32.mxu0 %vm1203_vm5, %v1335_v24 }
 0x3e1   :  { %3329 = vmatmul.mubr.msk.f32.gmra.mrb[36].mxu0 %vm1203_vm5, %v1336_v43 }
 0x3e2   :  { %3347 = vmatprep.mubr.msk.f32.mxu0 %vm1647_vm10, %v4464_v1 }
 0x496   :  { %v3301_v19 = vpop.f32.mrb[22].mxu0 }
 0x497   :  { %v1438_v56 = vpop.f32.mrb[23].mxu0  ;;  %v1444_v63 = vadd.f32 %v3301_v19, %v2863_v58 }
 0x498   :  { %v1439_v0 = vadd.f32 %v2863_v58, %v1438_v56 }
 0x499   :  { %v1603_v10 = vsel %vm1601_vm11, %v1444_v63, -inf }
 0x49a   :  { %v3304_v57 = vpop.f32.mrb[24].mxu0  ;;  %v1602_v33 = vsel %vm1601_vm11, %v1439_v0, -inf }
 0x49b   :  { %v1448_v35 = vpop.f32.mrb[25].mxu0  ;;  %v1454_v8 = vadd.f32 %v3304_v57, %v2863_v58 }
 0x49c   :  { %v1449_v16 = vadd.f32 %v2863_v58, %v1448_v35 }
 0x49d   :  { %v1605_v26 = vsel %vm1601_vm11, %v1454_v8, -inf }
 0x49e   :  { %v3307_v2 = vpop.f32.mrb[26].mxu0  ;;  %v1604_v51 = vsel %vm1601_vm11, %v1449_v16, -inf }
 0x49f   :  { %v1464_v59 = vadd.f32 %v3307_v2, %v2863_v58  ;;  %v1458_v4 = vpop.f32.mrb[27].mxu0 }
 0x4a0   :  { %v1459_v6 = vadd.f32 %v2863_v58, %v1458_v4 }
 0x4a1   :  { %v1608_v7 = vsel %vm1601_vm11, %v1464_v59, -inf }
 0x4a2   :  { %v1609_v13 = vmax.f32 %v1603_v10, %v1608_v7  ;;  %v1606_v25 = vsel %vm1601_vm11, %v1459_v6, -inf }
 0x4a3   :  { %v1607_v9 = vmax.f32 %v1602_v33, %v1606_v25 }
 0x4a4   :  { %v3310_v38 = vpop.f32.mrb[28].mxu0 }
 0x4a5   :  { %v1474_v17 = vadd.f32 %v3310_v38, %v2863_v58  ;;  %v1468_v22 = vpop.f32.mrb[29].mxu0  ;;  %v1614_v3 = vmax.f32 %v1607_v9, %v1609_v13 }
 0x4a6   :  { %v1469_v39 = vadd.f32 %v2863_v58, %v1468_v22  ;;  %v4506_v22 = vld [vmem:[%s4966_s12 + $0x10] sm:$0xff] }
 0x4a7   :  { %v1612_v47 = vsel %vm1601_vm11, %v1474_v17, -inf }
 0x4a8   :  { %v1613_v28 = vmax.f32 %v1605_v26, %v1612_v47  ;;  %v1610_v30 = vsel %vm1601_vm11, %v1469_v39, -inf  ;;  %v4476_v48 = vpop.f32.mrb[30].mxu0  ;;  %v4529_v26 = vld [vmem:[%s4966_s12 + $0x28] sm:$0xff]  ;;  %v4534_v47 = vld [vmem:[%s4966_s12 + $0x30] sm:$0xff] }
 0x4a9   :  { %v1611_v31 = vmax.f32 %v1604_v51, %v1610_v30  ;;  %v4478_v32 = vpop.f32.mrb[31].mxu0  ;;  %v4543_v51 = vld [vmem:[%s4966_s12 + $0x38] sm:$0xff] }
 0x4ab   :  { %v1615_v61 = vmax.f32 %v1611_v31, %v1613_v28  ;;  %v3692_v28 = vmov 0  }
 0x4ac   :  { %v4480_v34 = vpop.f32.mrb[32].mxu0  ;;  %3562 = vset.pattern.permute.xlu1 %v3692_v28  ;;  %3561 = vset.pattern.permute.xlu0 %v3692_v28 }
 0x4ad   :  { %v1616_v55 = vmax.f32 %v1614_v3, %v1615_v61  ;;  %v4482_v60 = vpop.f32.mrb[33].mxu0  ;;  %v4515_v3 = vld [vmem:[%s4966_s12 + $0x18] sm:$0xff] }
 0x4af   :  { %v1617_v62 = vrot.slane %v1616_v55, 4 }
 0x4b0   :  { %v4484_v27 = vpop.f32.mrb[34].mxu0 }
 0x4b1   :  { %v1618_v40 = vmax.f32 %v1616_v55, %v1617_v62  ;;  %v4486_v5 = vpop.f32.mrb[35].mxu0 }
 0x4b3   :  { %v1619_v29 = vrot.slane %v1618_v40, 2 }
 0x4b4   :  { %v4488_v41 = vpop.f32.mrb[36].mxu0 }
 0x4b5   :  { %v1620_v23 = vmax.f32 %v1618_v40, %v1619_v29  ;;  %v4490_v42 = vpop.f32.mrb[37].mxu0 }
 0x4b7   :  { %v1621_v44 = vrot.slane %v1620_v23, 1 }
 0x4b9   :  { %v1622_v12 = vmax.f32 %v1620_v23, %v1621_v44 }
 0x4bb   :  { %v1629_v52 = vsub.f32 %v1469_v39, %v1622_v12  ;;  %v1623_v20 = vsub.f32 %v1439_v0, %v1622_v12  ;;  %v1624_v54 = vsub.f32 %v1444_v63, %v1622_v12  ;;  %v1625_v37 = vsub.f32 %v1449_v16, %v1622_v12  ;;  %v4520_v39 = vld [vmem:[%s4966_s12 + $0x20] sm:$0xff] }
 0x4bc   :  { %v1626_v45 = vsub.f32 %v1454_v8, %v1622_v12  ;;  %v1627_v14 = vsub.f32 %v1459_v6, %v1622_v12  ;;  %v1628_v43 = vsub.f32 %v1464_v59, %v1622_v12  ;;  %v1630_v24 = vsub.f32 %v1474_v17, %v1622_v12  ;;  %v4501_v17 = vld [vmem:[%s4966_s12 + $0x8] sm:$0xff] }
 0x4bd   :  { %v1631_v19 = vmul.f32 1.442695, %v1623_v20  ;;  %v1633_v56 = vmul.f32 1.442695, %v1624_v54  ;;  %v1635_v57 = vmul.f32 1.442695, %v1625_v37 }
 0x4be   :  { %v1637_v58 = vmul.f32 1.442695, %v1626_v45  ;;  %v1639_v35 = vmul.f32 1.442695, %v1627_v14  ;;  %v1641_v2 = vmul.f32 1.442695, %v1628_v43 }
 0x4bf   :  { %3611 = vpow2.f32 %v1631_v19  ;;  %v1643_v4 = vmul.f32 1.442695, %v1629_v52  ;;  %v1645_v0 = vmul.f32 1.442695, %v1630_v24 }
 0x4c0   :  { %3613 = vpow2.f32 %v1633_v56 }
 0x4c1   :  { %3615 = vpow2.f32 %v1635_v57 }
 0x4c2   :  { %3617 = vpow2.f32 %v1637_v58 }
 0x4c3   :  { %3619 = vpow2.f32 %v1639_v35 }
 0x4c4   :  { %3621 = vpow2.f32 %v1641_v2  ;;  %v2872_v2 = vld [vmem:[%s4967_s11] ss:$0 sm:$0xff]  ;;  %s3693_s11 = smov 32  }
 0x4c5   :  { %3623 = vpow2.f32 %v1643_v4  ;;  %v4555_v4 = vadd.f32 %v4476_v48, %v2872_v2  ;;  %v4574_v28 = vadd.f32 %v2872_v2, %v4486_v5 }
 0x4c6   :  { %3625 = vpow2.f32 %v1645_v0  ;;  %v4558_v0 = vadd.f32 %v2872_v2, %v4478_v32 }
 0x4c9   :  { %v3612_v63 = vpop.eup %3611 }
 0x4ca   :  { %v3614_v6 = vpop.eup %3613 }
 0x4cb   :  { %v3616_v59 = vpop.eup %3615  ;;  %v3493_v10 = vpack.c.bf16 %v3614_v6, %v3612_v63 }
 0x4cc   :  { %v3618_v7 = vpop.eup %3617 }
 0x4cd   :  { %v4492_v33 = vpop.eup %3619  ;;  %3494 = vmatprep.subr.bf16.mxu0 %v3493_v10  ;;  %v3497_v8 = vpack.c.bf16 %v3618_v7, %v3616_v59 }
 0x4ce   :  { %v3622_v13 = vpop.eup %3621  ;;  %3496 = vmatpush3.bf16.msra.mxu0 %v3493_v10 }
 0x4cf   :  { %3498 = vmatprep.subr.bf16.mxu0 %v3497_v8  ;;  %v3624_v25 = vpop.eup %3623  ;;  %v3501_v16 = vpack.c.bf16 %v3622_v13, %v4492_v33 }
 0x4d0   :  { %v4495_v9 = vpop.eup %3625 }
 0x4d1   :  { %v3505_v38 = vpack.c.bf16 %v4495_v9, %v3624_v25 }
 0x4d2   :  { %3500 = vmatpush3.bf16.msra.mxu0 %v3497_v8  ;;  %v4563_v8 = vadd.f32 %v4480_v34, %v2872_v2 }
 0x4d3   :  { %3502 = vmatprep.subr.bf16.mxu0 %v3501_v16 }
 0x4d6   :  { %3504 = vmatpush3.bf16.msra.mxu0 %v3501_v16 }
 0x4d7   :  { %3506 = vmatprep.subr.bf16.mxu0 %v3505_v38 }
 0x4da   :  { %3508 = vmatpush3.bf16.msra.mxu0 %v3505_v38  ;;  %v4571_v38 = vadd.f32 %v4484_v27, %v2872_v2 }
 0x4dd   :  { %3348 = vmatmul.mubr.msk.f32.vlgmr.msra.gmra.mrb[38].mxu0 %vm1647_vm10, %v4501_v17 }
 0x4de   :  { %3350 = vmatprep.mubr.msk.f32.mxu0 %vm1647_vm10, %v4506_v22 }
 0x4e1   :  { %3351 = vmatmul.mubr.msk.f32.gmra.mrb[40].mxu0 %vm1647_vm10, %v4515_v3 }
 0x4e2   :  { %3353 = vmatprep.mubr.msk.f32.mxu0 %vm1647_vm10, %v4520_v39 }
 0x4e5   :  { %3354 = vmatmul.mubr.msk.f32.gmra.mrb[42].mxu0 %vm1647_vm10, %v4529_v26 }
 0x4e6   :  { %3356 = vmatprep.mubr.msk.f32.mxu0 %vm1647_vm10, %v4534_v47 }
 0x4e9   :  { %3357 = vmatmul.mubr.msk.f32.gmra.mrb[44].mxu0 %vm1647_vm10, %v4543_v51 }
 0x4ea   :  { %3375 = vmatprep.mubr.msk.f32.mxu0 %vm1647_vm10, %v4464_v1 }
 0x5b0   :  { %v3349_v30 = vpop.f32.mrb[38].mxu0 }
 0x5b1   :  { %3627 = vrcp.f32 %v3349_v30  ;;  %v1738_v31 = vpop.f32.mrb[39].mxu0 }
 0x5b2   :  { %3629 = vrcp.f32 %v1738_v31 }
 0x5b4   :  { %v3352_v61 = vpop.f32.mrb[40].mxu0 }
 0x5b5   :  { %3631 = vrcp.f32 %v3352_v61  ;;  %v1748_v55 = vpop.f32.mrb[41].mxu0 }
 0x5b6   :  { %3633 = vrcp.f32 %v1748_v55  ;;  %v4579_v55 = vadd.f32 %v4488_v41, %v2872_v2 }
 0x5b8   :  { %v3355_v62 = vpop.f32.mrb[42].mxu0 }
 0x5b9   :  { %v1758_v40 = vpop.f32.mrb[43].mxu0  ;;  %3635 = vrcp.f32 %v3355_v62  ;;  %v4582_v62 = vadd.f32 %v2872_v2, %v4490_v42 }
 0x5ba   :  { %3637 = vrcp.f32 %v1758_v40 }
 0x5bb   :  { %v3628_v29 = vpop.eup %3627 }
 0x5bc   :  { %v3630_v23 = vpop.eup %3629  ;;  %v3358_v44 = vpop.f32.mrb[44].mxu0  ;;  %v1786_v12 = vmul.f32 %v3628_v29, %v3614_v6 }
 0x5bd   :  { %v1768_v52 = vpop.f32.mrb[45].mxu0  ;;  %v1785_v1 = vmul.f32 %v3630_v23, %v3612_v63 }
 0x5be   :  { %1800 = vperm.xlu1 %3562, %v1786_v12   ;;  %3639 = vrcp.f32 %v1768_v52  ;;  %v1997_v12 = vld [vmem:[%s4969_s13 + $0x18] sm:$0xff] }
 0x5bf   :  { %v3632_v20 = vpop.eup %3631  ;;  %1795 = vperm.xlu0 %3561, %v1785_v1   ;;  %3641 = vrcp.f32 %v3358_v44 }
 0x5c0   :  { %v1788_v54 = vmul.f32 %v3632_v20, %v3618_v7  ;;  %v3634_v37 = vpop.eup %3633 }
 0x5c1   :  { %v1787_v45 = vmul.f32 %v3634_v37, %v3616_v59 }
 0x5c2   :  { %1810 = vperm.xlu1 %3562, %v1788_v54   ;;  %v1947_v54 = vmax.f32 %v4555_v4, 0.0 }
 0x5c3   :  { %v3636_v14 = vpop.eup %3635 }
 0x5c4   :  { %v1790_v43 = vmul.f32 %v3636_v14, %v3622_v13  ;;  %v3638_v24 = vpop.eup %3637  ;;  %v4566_v13 = vadd.f32 %v2872_v2, %v4482_v60 }
 0x5c5   :  { %v1789_v19 = vmul.f32 %v3638_v24, %v4492_v33 }
 0x5c6   :  { %1805 = vperm.xlu1 %3562, %v1787_v45   ;;  %v1946_v45 = vmax.f32 %v4558_v0, 0.0 }
 0x5c8   :  { %v3640_v56 = vpop.eup %3639 }
 0x5c9   :  { %v1791_v57 = vmul.f32 %v3640_v56, %v3624_v25  ;;  %v3642_v58 = vpop.eup %3641 }
 0x5ca   :  { %1820 = vperm.xlu1 %3562, %v1790_v43   ;;  %v1792_v35 = vmul.f32 %v3642_v58, %v4495_v9 }
 0x5ce   :  { %1815 = vperm.xlu1 %3562, %v1789_v19   ;;  %v1949_v19 = vmax.f32 %v4563_v8, 0.0 }
 0x5d2   :  { %1825 = vperm.xlu1 %3562, %v1791_v57   ;;  %v1948_v57 = vmax.f32 %v4566_v13, 0.0 }
 0x5d6   :  { %1830 = vperm.xlu1 %3562, %v1792_v35  }
 0x63d   :  { %v1801_v63 = vpop.permute.xlu1 %1800 }
 0x63e   :  { %v1834_v6 = vmul.f32 %v1801_v63, %v4555_v4  ;;  %v1796_v59 = vpop.permute.xlu0 %1795  ;;  %v1951_v4 = vmax.f32 %v4571_v38, 0.0 }
 0x63f   :  { %v1833_v10 = vmul.f32 %v1796_v59, %v4558_v0  ;;  %v1950_v0 = vmax.f32 %v4574_v28, 0.0 }
 0x641   :  { %v3509_v7 = vpack.c.bf16 %v1834_v6, %v1833_v10  ;;  %v1811_v33 = vpop.permute.xlu1 %1810 }
 0x642   :  { %v1836_v32 = vmul.f32 %v1811_v33, %v4563_v8  ;;  %v1952_v8 = vmax.f32 %v4582_v62, 0.0 }
 0x643   :  { %3510 = vmatprep.subr.bf16.mxu0 %v3509_v7 }
 0x644   :  { %3512 = vmatpush3.bf16.msra.mxu0 %v3509_v7  ;;  %v1953_v7 = vmax.f32 %v4579_v55, 0.0 }
 0x645   :  { %v1806_v48 = vpop.permute.xlu1 %1805 }
 0x646   :  { %v1835_v25 = vmul.f32 %v1806_v48, %v4566_v13 }
 0x648   :  { %v3513_v16 = vpack.c.bf16 %v1836_v32, %v1835_v25 }
 0x649   :  { %v1821_v9 = vpop.permute.xlu1 %1820 }
 0x64a   :  { %3514 = vmatprep.subr.bf16.mxu0 %v3513_v16  ;;  %v1838_v60 = vmul.f32 %v1821_v9, %v4571_v38 }
 0x64b   :  { %3516 = vmatpush3.bf16.msra.mxu0 %v3513_v16 }
 0x64d   :  { %v1816_v34 = vpop.permute.xlu1 %1815 }
 0x64e   :  { %v1837_v30 = vmul.f32 %v1816_v34, %v4574_v28 }
 0x650   :  { %v3517_v31 = vpack.c.bf16 %v1838_v60, %v1837_v30 }
 0x651   :  { %v1826_v61 = vpop.permute.xlu1 %1825 }
 0x652   :  { %3518 = vmatprep.subr.bf16.mxu0 %v3517_v31  ;;  %v1839_v40 = vmul.f32 %v1826_v61, %v4582_v62 }
 0x653   :  { %3520 = vmatpush3.bf16.msra.mxu0 %v3517_v31 }
 0x655   :  { %v1831_v27 = vpop.permute.xlu1 %1830 }
 0x656   :  { %v1840_v5 = vmul.f32 %v1831_v27, %v4579_v55  ;;  %v2897_v55 = vld [vmem:[%s4970_s14] ss:$0 sm:$0xff] }
 0x658   :  { %v3521_v29 = vpack.c.bf16 %v1840_v5, %v1839_v40 }
 0x65a   :  { %3522 = vmatprep.subr.bf16.mxu0 %v3521_v29 }
 0x65b   :  { %3524 = vmatpush3.bf16.msra.mxu0 %v3521_v29 }
 0x65e   :  { %3376 = vmatmul.mubr.msk.f32.vlgmr.msra.gmra.mrb[46].mxu0 %vm1647_vm10, %v4501_v17 }
 0x65f   :  { %3378 = vmatprep.mubr.msk.f32.mxu0 %vm1647_vm10, %v4506_v22  ;;  %v30_v22 = vstv %s4968_s15 }
 0x660   :  { %31 = vst [vmem:[#allocation3] sm:$0x1] %v30_v22 }
 0x662   :  { %3379 = vmatmul.mubr.msk.f32.gmra.mrb[48].mxu0 %vm1647_vm10, %v4515_v3 }
 0x663   :  { %3381 = vmatprep.mubr.msk.f32.mxu0 %vm1647_vm10, %v4520_v39 }
 0x666   :  { %3382 = vmatmul.mubr.msk.f32.gmra.mrb[50].mxu0 %vm1647_vm10, %v4529_v26  ;;  %v1994_v26 = vld [vmem:[%s4969_s13] sm:$0xff] }
 0x667   :  { %3384 = vmatprep.mubr.msk.f32.mxu0 %vm1647_vm10, %v4534_v47  ;;  %v1995_v47 = vld [vmem:[%s4969_s13 + $0x8] sm:$0xff]  ;;  %v2906_v25 = vld [vmem:[#allocation3] ss:$0 sm:$0xff] }
 0x668   :  { %v3525_v44 = vpack.c.bf16 %v1995_v47, %v1994_v26 }
 0x66a   :  { %3385 = vmatmul.mubr.msk.f32.gmra.mrb[52].mxu0 %vm1647_vm10, %v4543_v51  ;;  %v1996_v51 = vld [vmem:[%s4969_s13 + $0x10] sm:$0xff]  ;;  %3526 = vmatprep.subr.bf16.mxu0 %v3525_v44 }
 0x66b   :  { %v3529_v52 = vpack.c.bf16 %v1997_v12, %v1996_v51  ;;  %3528 = vmatpush3.bf16.msra.mxu0 %v3525_v44 }
 0x66d   :  { %3530 = vmatprep.subr.bf16.mxu0 %v3529_v52 }
 0x66f   :  { %3532 = vmatpush3.bf16.msra.mxu0 %v3529_v52 }
 0x731   :  { %v3377_v41 = vpop.f32.mrb[46].mxu0 }
 0x732   :  { %1964 = vrot.lane.b32.xlu0 %v3377_v41, %s3693_s11  ;;  %v1907_v42 = vpop.f32.mrb[47].mxu0 }
 0x733   :  { %1962 = vrot.lane.b32.xlu1 %v1907_v42, %s3693_s11 }
 0x735   :  { %v3380_v17 = vpop.f32.mrb[48].mxu0 }
 0x736   :  { %1968 = vrot.lane.b32.xlu0 %v3380_v17, %s3693_s11  ;;  %v1917_v3 = vpop.f32.mrb[49].mxu0 }
 0x737   :  { %1966 = vrot.lane.b32.xlu1 %v1917_v3, %s3693_s11 }
 0x739   :  { %v3383_v39 = vpop.f32.mrb[50].mxu0 }
 0x73a   :  { %1972 = vrot.lane.b32.xlu0 %v3383_v39, %s3693_s11  ;;  %v1927_v23 = vpop.f32.mrb[51].mxu0 }
 0x73b   :  { %1970 = vrot.lane.b32.xlu1 %v1927_v23, %s3693_s11 }
 0x73d   :  { %v3386_v1 = vpop.f32.mrb[52].mxu0 }
 0x73e   :  { %1976 = vrot.lane.b32.xlu0 %v3386_v1, %s3693_s11  ;;  %v1937_v20 = vpop.f32.mrb[53].mxu0 }
 0x73f   :  { %1974 = vrot.lane.b32.xlu1 %v1937_v20, %s3693_s11 }
 0x7a4   :  { %v1965_v37 = vpop.permute.xlu0 %1964 }
 0x7a5   :  { %v1987_v14 = vmul.f32 %v1965_v37, %v1947_v54  ;;  %v1963_v43 = vpop.permute.xlu1 %1962 }
 0x7a6   :  { %v1986_v24 = vmul.f32 %v1963_v43, %v1946_v45 }
 0x7a7   :  { %2015 = vrot.lane.b32.xlu0 %v1987_v14, %s3694_s27 }
 0x7a8   :  { %v1969_v56 = vpop.permute.xlu0 %1968  ;;  %2013 = vrot.lane.b32.xlu1 %v1986_v24, %s3694_s27 }
 0x7a9   :  { %v1989_v58 = vmul.f32 %v1969_v56, %v1949_v19  ;;  %v1967_v35 = vpop.permute.xlu1 %1966 }
 0x7aa   :  { %v1988_v2 = vmul.f32 %v1967_v35, %v1948_v57 }
 0x7ab   :  { %2019 = vrot.lane.b32.xlu0 %v1989_v58, %s3694_s27 }
 0x7ac   :  { %v1973_v63 = vpop.permute.xlu0 %1972  ;;  %2017 = vrot.lane.b32.xlu1 %v1988_v2, %s3694_s27 }
 0x7ad   :  { %v1991_v6 = vmul.f32 %v1973_v63, %v1951_v4  ;;  %v1971_v59 = vpop.permute.xlu1 %1970 }
 0x7ae   :  { %v1990_v10 = vmul.f32 %v1971_v59, %v1950_v0 }
 0x7af   :  { %2023 = vrot.lane.b32.xlu0 %v1991_v6, %s3694_s27 }
 0x7b0   :  { %v1977_v33 = vpop.permute.xlu0 %1976  ;;  %2021 = vrot.lane.b32.xlu1 %v1990_v10, %s3694_s27 }
 0x7b1   :  { %v1993_v13 = vmul.f32 %v1977_v33, %v1953_v7  ;;  %v1975_v48 = vpop.permute.xlu1 %1974 }
 0x7b2   :  { %v1992_v32 = vmul.f32 %v1975_v48, %v1952_v8 }
 0x7b3   :  { %2027 = vrot.lane.b32.xlu0 %v1993_v13, %s3694_s27 }
 0x7b4   :  { %2025 = vrot.lane.b32.xlu1 %v1992_v32, %s3694_s27 }
 0x7b8   :  { %2157 = vperm.xlu1 %3562, %v2906_v25  }
 0x819   :  { %v2016_v16 = vpop.permute.xlu0 %2015 }
 0x81a   :  { %v2014_v9 = vpop.permute.xlu1 %2013 }
 0x81b   :  { %3395 = vmatprep.mubr.msk.f32.mxu0 %vm1203_vm5, %v2014_v9 }
 0x81c   :  { %3396 = vmatmul.mubr.msk.f32.vlgmr.msra.gmra.mrb[54].mxu0 %vm1203_vm5, %v2016_v16 }
 0x81d   :  { %v2020_v38 = vpop.permute.xlu0 %2019 }
 0x81e   :  { %v2018_v28 = vpop.permute.xlu1 %2017 }
 0x81f   :  { %3398 = vmatprep.mubr.msk.f32.mxu0 %vm1203_vm5, %v2018_v28 }
 0x820   :  { %3399 = vmatmul.mubr.msk.f32.gmra.mrb[56].mxu0 %vm1203_vm5, %v2020_v38 }
 0x821   :  { %v2024_v34 = vpop.permute.xlu0 %2023 }
 0x822   :  { %v2022_v60 = vpop.permute.xlu1 %2021 }
 0x823   :  { %3401 = vmatprep.mubr.msk.f32.mxu0 %vm1203_vm5, %v2022_v60 }
 0x824   :  { %3402 = vmatmul.mubr.msk.f32.gmra.mrb[58].mxu0 %vm1203_vm5, %v2024_v34 }
 0x825   :  { %v2028_v31 = vpop.permute.xlu0 %2027 }
 0x826   :  { %v2026_v30 = vpop.permute.xlu1 %2025 }
 0x827   :  { %3404 = vmatprep.mubr.msk.f32.mxu0 %vm1203_vm5, %v2026_v30 }
 0x828   :  { %3405 = vmatmul.mubr.msk.f32.gmra.mrb[60].mxu0 %vm1203_vm5, %v2028_v31 }
 0x837   :  { %v2158_v61 = vpop.permute.xlu1 %2157 }
 0x838   :  { %v2161_v40 = vmul.f32 %v2158_v61, %v4304_v21  ;;  %v2160_v41 = vmul.f32 %v2158_v61, %v4296_v53  ;;  %v2162_v51 = vmul.f32 %v2158_v61, %v4309_v18  ;;  %v2163_v23 = vmul.f32 %v2158_v61, %v4320_v15 }
 0x839   :  { %v2164_v54 = vmul.f32 %v2158_v61, %v4335_v36  ;;  %v2165_v37 = vmul.f32 %v2158_v61, %v4332_v11  ;;  %v2166_v43 = vmul.f32 %v2158_v61, %v4346_v49  ;;  %v2167_v11 = vmul.f32 %v2158_v61, %v4344_v46 }
 0x83a   :  { %v32_v46 = vstv %s4971_s22 }
 0x83b   :  { %33 = vst [vmem:[#allocation4] sm:$0x1] %v32_v46 }
 0x8ef   :  { %v3397_v62 = vpop.f32.mrb[54].mxu0 }
 0x8f0   :  { %v2117_v27 = vadd.f32 %v3397_v62, %v2897_v55  ;;  %v2111_v5 = vpop.f32.mrb[55].mxu0 }
 0x8f1   :  { %v2112_v29 = vadd.f32 %v2897_v55, %v2111_v5 }
 0x8f2   :  { %v4636_v42 = vadd.f32 %v2161_v40, %v2117_v27 }
 0x8f3   :  { %v4638_v17 = vadd.f32 %v2160_v41, %v2112_v29  ;;  %v3400_v22 = vpop.f32.mrb[56].mxu0 }
 0x8f4   :  { %v2127_v3 = vadd.f32 %v3400_v22, %v2897_v55  ;;  %v2121_v39 = vpop.f32.mrb[57].mxu0  ;;  %v2181_v26 = vsel %vm1203_vm5, %v4636_v42, 0.0 }
 0x8f5   :  { %v2122_v47 = vadd.f32 %v2897_v55, %v2121_v39  ;;  %2182 = vadd.xlane.f32.xlu1 %v2181_v26  ;;  %v2178_v21 = vsel %vm1203_vm5, %v4638_v17, 0.0 }
 0x8f6   :  { %2179 = vadd.xlane.f32.xlu0 %v2178_v21  ;;  %v4648_v12 = vadd.f32 %v2163_v23, %v2127_v3 }
 0x8f7   :  { %v4646_v53 = vadd.f32 %v2162_v51, %v2122_v47  ;;  %v3403_v44 = vpop.f32.mrb[58].mxu0 }
 0x8f8   :  { %v2131_v52 = vpop.f32.mrb[59].mxu0  ;;  %v2137_v1 = vadd.f32 %v3403_v44, %v2897_v55  ;;  %v2187_v24 = vsel %vm1203_vm5, %v4648_v12, 0.0 }
 0x8f9   :  { %v2132_v20 = vadd.f32 %v2897_v55, %v2131_v52  ;;  %v2184_v18 = vsel %vm1203_vm5, %v4646_v53, 0.0 }
 0x8fa   :  { %2185 = vadd.xlane.f32.xlu0 %v2184_v18  ;;  %v4659_v19 = vadd.f32 %v2165_v37, %v2137_v1  ;;  %v2310_v18 = vld [vmem:[%s4972_s18] sm:$0xff]  ;;  %v2311_v37 = vld [vmem:[%s4972_s18 + $0x8] sm:$0xff] }
 0x8fb   :  { %v4654_v45 = vadd.f32 %v2164_v54, %v2132_v20  ;;  %v3406_v15 = vpop.f32.mrb[60].mxu0  ;;  %v2927_v54 = vld [vmem:[#allocation4] ss:$0 sm:$0xff] }
 0x8fc   :  { %v2141_v14 = vpop.f32.mrb[61].mxu0  ;;  %v2147_v56 = vadd.f32 %v3406_v15, %v2897_v55  ;;  %v2193_v2 = vsel %vm1203_vm5, %v4659_v19, 0.0  ;;  %v3533_v15 = vpack.c.bf16 %v2311_v37, %v2310_v18 }
 0x8fd   :  { %v2142_v57 = vadd.f32 %v2897_v55, %v2141_v14  ;;  %v2190_v36 = vsel %vm1203_vm5, %v4654_v45, 0.0  ;;  %v2312_v14 = vld [vmem:[%s4972_s18 + $0x10] sm:$0xff] }
 0x8fe   :  { %2191 = vadd.xlane.f32.xlu1 %v2190_v36  ;;  %2188 = vadd.xlane.f32.xlu0 %v2187_v24  ;;  %v4666_v35 = vadd.f32 %v2167_v11, %v2147_v56 }
 0x8ff   :  { %v4664_v58 = vadd.f32 %v2166_v43, %v2142_v57  ;;  %v2313_v43 = vld [vmem:[%s4972_s18 + $0x18] sm:$0xff]  ;;  %3534 = vmatprep.subr.bf16.mxu0 %v3533_v15 }
 0x900   :  { %v2199_v4 = vsel %vm1203_vm5, %v4666_v35, 0.0  ;;  %v3537_v24 = vpack.c.bf16 %v2313_v43, %v2312_v14  ;;  %3536 = vmatpush3.bf16.msra.mxu0 %v3533_v15 }
 0x901   :  { %v2196_v49 = vsel %vm1203_vm5, %v4664_v58, 0.0 }
 0x902   :  { %2197 = vadd.xlane.f32.xlu1 %v2196_v49  ;;  %2194 = vadd.xlane.f32.xlu0 %v2193_v2 }
 0x903   :  { %3538 = vmatprep.subr.bf16.mxu0 %v3537_v24 }
 0x904   :  { %3540 = vmatpush3.bf16.msra.mxu0 %v3537_v24 }
 0x906   :  { %2200 = vadd.xlane.f32.xlu0 %v2199_v4 }
 0x982   :  { %v2183_v63 = vpop.xlane.xlu1 %2182 }
 0x983   :  { %v2203_v0 = vmul.f32 0.03125, %v2183_v63  ;;  %v2180_v6 = vpop.xlane.xlu0 %2179 }
 0x984   :  { %v2202_v59 = vmul.f32 0.03125, %v2180_v6 }
 0x985   :  { %v4678_v10 = vsub.f32 %v4636_v42, %v2203_v0 }
 0x986   :  { %v4681_v7 = vsub.f32 %v4638_v17, %v2202_v59 }
 0x987   :  { %v2186_v33 = vpop.xlane.xlu0 %2185  ;;  %v2219_v8 = vmul.f32 %v4678_v10, %v4678_v10 }
 0x988   :  { %v2204_v13 = vmul.f32 0.03125, %v2186_v33  ;;  %v2218_v48 = vmul.f32 %v4681_v7, %v4681_v7 }
 0x989   :  { %v2229_v32 = vsel %vm1203_vm5, %v2219_v8, 0.0 }
 0x98a   :  { %v4689_v25 = vsub.f32 %v4646_v53, %v2204_v13  ;;  %2230 = vadd.xlane.f32.xlu0 %v2229_v32  ;;  %v2226_v16 = vsel %vm1203_vm5, %v2218_v48, 0.0 }
 0x98b   :  { %v2192_v9 = vpop.xlane.xlu1 %2191  ;;  %2227 = vadd.xlane.f32.xlu1 %v2226_v16  ;;  %v2189_v38 = vpop.xlane.xlu0 %2188 }
 0x98c   :  { %v2206_v28 = vmul.f32 0.03125, %v2192_v9  ;;  %v2205_v34 = vmul.f32 0.03125, %v2189_v38  ;;  %v2220_v60 = vmul.f32 %v4689_v25, %v4689_v25 }
 0x98e   :  { %v4695_v30 = vsub.f32 %v4654_v45, %v2206_v28  ;;  %v4698_v31 = vsub.f32 %v4648_v12, %v2205_v34  ;;  %v2232_v61 = vsel %vm1203_vm5, %v2220_v60, 0.0  ;;  %v2907_v28 = vld [vmem:[%s4973_s16] ss:$0 sm:$0xff] }
 0x98f   :  { %v2198_v55 = vpop.xlane.xlu1 %2197  ;;  %2233 = vadd.xlane.f32.xlu1 %v2232_v61  ;;  %v2195_v62 = vpop.xlane.xlu0 %2194 }
 0x990   :  { %v2208_v27 = vmul.f32 0.03125, %v2198_v55  ;;  %v2207_v40 = vmul.f32 0.03125, %v2195_v62  ;;  %v2222_v5 = vmul.f32 %v4695_v30, %v4695_v30  ;;  %v2221_v29 = vmul.f32 %v4698_v31, %v4698_v31 }
 0x992   :  { %v4706_v41 = vsub.f32 %v4664_v58, %v2208_v27  ;;  %v4709_v22 = vsub.f32 %v4659_v19, %v2207_v40  ;;  %v2238_v3 = vsel %vm1203_vm5, %v2222_v5, 0.0  ;;  %v2235_v39 = vsel %vm1203_vm5, %v2221_v29, 0.0  ;;  %v2908_v40 = vld [vmem:[%s4974_s17] ss:$0 sm:$0xff] }
 0x993   :  { %2239 = vadd.xlane.f32.xlu1 %v2238_v3  ;;  %2236 = vadd.xlane.f32.xlu0 %v2235_v39  ;;  %v2201_v26 = vpop.xlane.xlu0 %2200 }
 0x994   :  { %v2209_v47 = vmul.f32 0.03125, %v2201_v26  ;;  %v2224_v51 = vmul.f32 %v4706_v41, %v4706_v41  ;;  %v2223_v21 = vmul.f32 %v4709_v22, %v4709_v22 }
 0x996   :  { %v4718_v23 = vsub.f32 %v4666_v35, %v2209_v47  ;;  %v2244_v44 = vsel %vm1203_vm5, %v2224_v51, 0.0  ;;  %v2241_v52 = vsel %vm1203_vm5, %v2223_v21, 0.0 }
 0x997   :  { %2245 = vadd.xlane.f32.xlu1 %v2244_v44  ;;  %2242 = vadd.xlane.f32.xlu0 %v2241_v52 }
 0x998   :  { %v2225_v1 = vmul.f32 %v4718_v23, %v4718_v23 }
 0x99a   :  { %v2247_v20 = vsel %vm1203_vm5, %v2225_v1, 0.0 }
 0x99b   :  { %2248 = vadd.xlane.f32.xlu0 %v2247_v20 }
 0x9a8   :  { %2811 = vperm.xlu1 %3562, %v2927_v54  }
 0xa17   :  { %v2231_v56 = vpop.xlane.xlu0 %2230 }
 0xa18   :  { %v2251_v57 = vmul.f32 0.03125, %v2231_v56  ;;  %v2228_v36 = vpop.xlane.xlu1 %2227 }
 0xa19   :  { %v2250_v11 = vmul.f32 0.03125, %v2228_v36 }
 0xa1a   :  { %v2259_v49 = vadd.f32 1e-05, %v2251_v57 }
 0xa1b   :  { %v2258_v2 = vadd.f32 1e-05, %v2250_v11 }
 0xa1c   :  { %3643 = vrsqrt.f32 %v2259_v49  ;;  %v2234_v4 = vpop.xlane.xlu1 %2233 }
 0xa1d   :  { %3645 = vrsqrt.f32 %v2258_v2  ;;  %v2252_v46 = vmul.f32 0.03125, %v2234_v4  ;;  %v4765_v2 = vld [vmem:[%s4976_s19] ss:$0 sm:$0xff] }
 0xa1f   :  { %v2260_v63 = vadd.f32 1e-05, %v2252_v46 }
 0xa20   :  { %v2240_v0 = vpop.xlane.xlu1 %2239  ;;  %v2237_v6 = vpop.xlane.xlu0 %2236 }
 0xa21   :  { %3647 = vrsqrt.f32 %v2260_v63  ;;  %v2254_v59 = vmul.f32 0.03125, %v2240_v0  ;;  %v2253_v33 = vmul.f32 0.03125, %v2237_v6 }
 0xa23   :  { %v2262_v8 = vadd.f32 1e-05, %v2254_v59  ;;  %v2261_v13 = vadd.f32 1e-05, %v2253_v33 }
 0xa24   :  { %v2246_v48 = vpop.xlane.xlu1 %2245  ;;  %v2243_v32 = vpop.xlane.xlu0 %2242 }
 0xa25   :  { %3649 = vrsqrt.f32 %v2262_v8  ;;  %v2256_v16 = vmul.f32 0.03125, %v2246_v48  ;;  %v2255_v9 = vmul.f32 0.03125, %v2243_v32 }
 0xa26   :  { %v3644_v38 = vpop.eup %3643  ;;  %3651 = vrsqrt.f32 %v2261_v13 }
 0xa27   :  { %v3646_v34 = vpop.eup %3645  ;;  %v2275_v60 = vmul.f32 %v3644_v38, %v4678_v10  ;;  %v2264_v61 = vadd.f32 1e-05, %v2256_v16  ;;  %v2263_v55 = vadd.f32 1e-05, %v2255_v9 }
 0xa28   :  { %v2249_v62 = vpop.xlane.xlu0 %2248  ;;  %v2274_v27 = vmul.f32 %v3646_v34, %v4681_v7 }
 0xa29   :  { %v2289_v5 = vmul.f32 %v2907_v28, %v2275_v60  ;;  %3653 = vrsqrt.f32 %v2264_v61  ;;  %v2257_v29 = vmul.f32 0.03125, %v2249_v62 }
 0xa2a   :  { %3655 = vrsqrt.f32 %v2263_v55  ;;  %v2288_v3 = vmul.f32 %v2907_v28, %v2274_v27 }
 0xa2b   :  { %v3648_v39 = vpop.eup %3647  ;;  %v2265_v26 = vadd.f32 1e-05, %v2257_v29  ;;  %v2303_v10 = vadd.f32 %v2908_v40, %v2289_v5 }
 0xa2c   :  { %v2302_v47 = vadd.f32 %v2908_v40, %v2288_v3  ;;  %v2276_v51 = vmul.f32 %v3648_v39, %v4689_v25 }
 0xa2d   :  { %3657 = vrsqrt.f32 %v2265_v26 }
 0xa2e   :  { %3415 = vmatprep.mubr.msk.f32.mxu0 %vm1203_vm5, %v2302_v47  ;;  %v2290_v21 = vmul.f32 %v2907_v28, %v2276_v51 }
 0xa2f   :  { %v3650_v7 = vpop.eup %3649  ;;  %3416 = vmatmul.mubr.msk.f32.vlgmr.msra.gmra.mrb[62].mxu0 %vm1203_vm5, %v2303_v10 }
 0xa30   :  { %v3652_v44 = vpop.eup %3651  ;;  %v2304_v52 = vadd.f32 %v2908_v40, %v2290_v21  ;;  %v2278_v1 = vmul.f32 %v3650_v7, %v4695_v30 }
 0xa31   :  { %v2277_v20 = vmul.f32 %v3652_v44, %v4698_v31 }
 0xa32   :  { %3418 = vmatprep.mubr.msk.f32.mxu0 %vm1203_vm5, %v2304_v52  ;;  %v2292_v54 = vmul.f32 %v2907_v28, %v2278_v1 }
 0xa33   :  { %v3654_v18 = vpop.eup %3653  ;;  %v2291_v37 = vmul.f32 %v2907_v28, %v2277_v20 }
 0xa34   :  { %v3656_v25 = vpop.eup %3655  ;;  %v2306_v15 = vadd.f32 %v2908_v40, %v2292_v54  ;;  %v2280_v14 = vmul.f32 %v3654_v18, %v4706_v41 }
 0xa35   :  { %v2305_v43 = vadd.f32 %v2908_v40, %v2291_v37  ;;  %v2279_v24 = vmul.f32 %v3656_v25, %v4709_v22  ;;  %v2666_v22 = vld [vmem:[%s4975_s20] sm:$0xff] }
 0xa36   :  { %v2294_v56 = vmul.f32 %v2907_v28, %v2280_v14  ;;  %3427 = vmatprep.subr.mxu0 %v2666_v22 }
 0xa37   :  { %v3658_v57 = vpop.eup %3657  ;;  %3419 = vmatmul.mubr.msk.f32.gmra.mrb[64].mxu0 %vm1203_vm5, %v2305_v43  ;;  %v2293_v36 = vmul.f32 %v2907_v28, %v2279_v24 }
 0xa38   :  { %3421 = vmatprep.mubr.msk.f32.mxu0 %vm1203_vm5, %v2306_v15  ;;  %v2308_v30 = vadd.f32 %v2908_v40, %v2294_v56  ;;  %v2281_v31 = vmul.f32 %v3658_v57, %v4718_v23  ;;  %3428 = vmatpush3.msra.mxu0 %v2666_v22 }
 0xa39   :  { %v2307_v11 = vadd.f32 %v2908_v40, %v2293_v36 }
 0xa3a   :  { %v2295_v49 = vmul.f32 %v2907_v28, %v2281_v31 }
 0xa3b   :  { %3422 = vmatmul.mubr.msk.f32.gmra.mrb[66].mxu0 %vm1203_vm5, %v2307_v11 }
 0xa3c   :  { %3424 = vmatprep.mubr.msk.f32.mxu0 %vm1203_vm5, %v2308_v30  ;;  %v2309_v41 = vadd.f32 %v2908_v40, %v2295_v49 }
 0xa3f   :  { %3425 = vmatmul.mubr.msk.f32.gmra.mrb[68].mxu0 %vm1203_vm5, %v2309_v41 }
 0xb02   :  { %v3417_v23 = vpop.f32.mrb[62].mxu0 }
 0xb03   :  { %v2417_v4 = vadd.f32 %v3417_v23, %v4765_v2  ;;  %v2411_v46 = vpop.f32.mrb[63].mxu0 }
 0xb04   :  { %v2412_v63 = vadd.f32 %v4765_v2, %v2411_v46 }
 0xb05   :  { %v2459_v0 = vmul.f32 0.70710677, %v2417_v4  ;;  %v4798_v37 = vmul.f32 0.5, %v2417_v4 }
 0xb06   :  { %v2458_v6 = vmul.f32 0.70710677, %v2412_v63  ;;  %v4800_v15 = vmul.f32 0.5, %v2412_v63 }
 0xb07   :  { %v2483_v59 = vand.u32 2147483647, %v2459_v0  ;;  %vm2467_vm12 = vcmp.ge.f32.partialorder %v2459_v0, 0.0 }
 0xb08   :  { %v2482_v33 = vand.u32 2147483647, %v2458_v6  ;;  %vm2466_vm13 = vcmp.ge.f32.partialorder %v2458_v6, 0.0  ;;  %v4812_v36 = vsel %vm2467_vm12, 1.0, %v3691_v50 }
 0xb09   :  { %v2491_v8 = vmul.f32 0.3275911, %v2483_v59  ;;  %v2595_v55 = vsub.f32 0.0, %v2483_v59  ;;  %v4817_v23 = vsel %vm2466_vm13, 1.0, %v3691_v50 }
 0xb0a   :  { %v2490_v13 = vmul.f32 0.3275911, %v2482_v33  ;;  %v3420_v48 = vpop.f32.mrb[64].mxu0  ;;  %v2594_v3 = vsub.f32 0.0, %v2482_v33 }
 0xb0b   :  { %v2499_v32 = vadd.f32 1.0, %v2491_v8  ;;  %v4770_v16 = vadd.f32 %v3420_v48, %v4765_v2  ;;  %v2421_v9 = vpop.f32.mrb[65].mxu0  ;;  %v2603_v51 = vmul.f32 %v2595_v55, %v2483_v59 }
 0xb0c   :  { %v2498_v38 = vadd.f32 1.0, %v2490_v13  ;;  %v4773_v28 = vadd.f32 %v4765_v2, %v2421_v9  ;;  %v2602_v20 = vmul.f32 %v2594_v3, %v2482_v33 }
 0xb0d   :  { %3659 = vrcp.f32 %v2499_v32  ;;  %v4776_v34 = vmul.f32 0.70710677, %v4770_v16  ;;  %v2612_v25 = vmul.f32 1.442695, %v2603_v51 }
 0xb0e   :  { %3661 = vrcp.f32 %v2498_v38  ;;  %v4779_v60 = vmul.f32 0.70710677, %v4773_v28  ;;  %v3423_v61 = vpop.f32.mrb[66].mxu0  ;;  %v2610_v41 = vmul.f32 1.442695, %v2602_v20 }
 0xb0f   :  { %v2485_v62 = vand.u32 2147483647, %v4776_v34  ;;  %v4783_v27 = vadd.f32 %v3423_v61, %v4765_v2  ;;  %v2431_v40 = vpop.f32.mrb[67].mxu0  ;;  %vm2469_vm14 = vcmp.ge.f32.partialorder %v4776_v34, 0.0 }
 0xb10   :  { %v2484_v5 = vand.u32 2147483647, %v4779_v60  ;;  %v4790_v21 = vadd.f32 %v4765_v2, %v2431_v40  ;;  %vm2468_vm0 = vcmp.ge.f32.partialorder %v4779_v60, 0.0  ;;  %v2453_v60 = vmul.f32 0.5, %v4770_v16 }
 0xb11   :  { %v2493_v29 = vmul.f32 0.3275911, %v2485_v62  ;;  %v4787_v26 = vmul.f32 0.70710677, %v4783_v27  ;;  %v2597_v31 = vsub.f32 0.0, %v2485_v62 }
 0xb12   :  { %v2492_v39 = vmul.f32 0.3275911, %v2484_v5  ;;  %v3426_v47 = vpop.f32.mrb[68].mxu0  ;;  %v4803_v14 = vmul.f32 0.70710677, %v4790_v21  ;;  %v2596_v22 = vsub.f32 0.0, %v2484_v5 }
 0xb13   :  { %v2501_v10 = vadd.f32 1.0, %v2493_v29  ;;  %v2441_v7 = vpop.f32.mrb[69].mxu0  ;;  %v2487_v52 = vand.u32 2147483647, %v4787_v26  ;;  %v4794_v1 = vadd.f32 %v3426_v47, %v4765_v2  ;;  %v2605_v8 = vmul.f32 %v2597_v31, %v2485_v62 }
 0xb14   :  { %v2500_v44 = vadd.f32 1.0, %v2492_v39  ;;  %v2486_v11 = vand.u32 2147483647, %v4803_v14  ;;  %v4822_v59 = vadd.f32 %v4765_v2, %v2441_v7  ;;  %v2604_v32 = vmul.f32 %v2596_v22, %v2484_v5 }
 0xb15   :  { %3663 = vrcp.f32 %v2501_v10  ;;  %v2495_v54 = vmul.f32 0.3275911, %v2487_v52  ;;  %v4809_v57 = vmul.f32 0.70710677, %v4794_v1  ;;  %v2599_v46 = vsub.f32 0.0, %v2487_v52 }
 0xb16   :  { %3665 = vrcp.f32 %v2500_v44  ;;  %v2494_v63 = vmul.f32 0.3275911, %v2486_v11  ;;  %v2598_v40 = vsub.f32 0.0, %v2486_v11  ;;  %v4833_v62 = vmul.f32 0.70710677, %v4822_v59 }
 0xb17   :  { %v4796_v18 = vpop.eup %3659  ;;  %v2503_v56 = vadd.f32 1.0, %v2495_v54  ;;  %v2489_v6 = vand.u32 2147483647, %v4809_v57  ;;  %v2607_v55 = vmul.f32 %v2599_v46, %v2487_v52  ;;  %v4839_v5 = vsel %vm2469_vm14, 1.0, %v3691_v50 }
 0xb18   :  { %v4805_v43 = vpop.eup %3661  ;;  %v2523_v24 = vmul.f32 1.0614054, %v4796_v18  ;;  %v2502_v13 = vadd.f32 1.0, %v2494_v63  ;;  %v2616_v51 = vmul.f32 1.442695, %v2605_v8  ;;  %v2606_v31 = vmul.f32 %v2598_v40, %v2486_v11 }
 0xb19   :  { %v2522_v30 = vmul.f32 1.0614054, %v4805_v43  ;;  %3667 = vrcp.f32 %v2503_v56  ;;  %v2497_v9 = vmul.f32 0.3275911, %v2489_v6  ;;  %v2614_v52 = vmul.f32 1.442695, %v2604_v32 }
 0xb1a   :  { %v2531_v49 = vadd.f32 -1.4531521, %v2523_v24  ;;  %3669 = vpow2.f32 %v2612_v25  ;;  %v2620_v25 = vmul.f32 1.442695, %v2607_v55  ;;  %v4847_v34 = vand.u32 2147483647, %v4833_v62 }
 0xb1b   :  { %v2530_v4 = vadd.f32 -1.4531521, %v2522_v30  ;;  %3671 = vpow2.f32 %v2610_v41  ;;  %v2505_v39 = vadd.f32 1.0, %v2497_v9  ;;  %vm2471_vm1 = vcmp.ge.f32.partialorder %v4787_v26, 0.0 }
 0xb1c   :  { %v2539_v0 = vmul.f32 %v4796_v18, %v2531_v49  ;;  %3673 = vrcp.f32 %v2502_v13  ;;  %vm2470_vm2 = vcmp.ge.f32.partialorder %v4803_v14, 0.0  ;;  %v2454_v14 = vmul.f32 0.5, %v4790_v21 }
 0xb1d   :  { %v2538_v33 = vmul.f32 %v4805_v43, %v2530_v4  ;;  %3675 = vrcp.f32 %v2505_v39  ;;  %v2601_v4 = vsub.f32 0.0, %v2489_v6  ;;  %vm2473_vm3 = vcmp.ge.f32.partialorder %v4809_v57, 0.0 }
 0xb1e   :  { %v2547_v48 = vadd.f32 1.4214138, %v2539_v0  ;;  %3677 = vpow2.f32 %v2616_v51  ;;  %vm2472_vm4 = vcmp.ge.f32.partialorder %v4833_v62, 0.0  ;;  %v2456_v57 = vmul.f32 0.5, %v4822_v59  ;;  %v2812_v62 = vpop.permute.xlu1 %2811 }
 0xb1f   :  { %v4826_v38 = vpop.eup %3663  ;;  %v2546_v61 = vadd.f32 1.4214138, %v2538_v33  ;;  %v2496_v33 = vmul.f32 0.3275911, %v4847_v34  ;;  %3679 = vpow2.f32 %v2614_v52 }
 0xb20   :  { %v4828_v29 = vpop.eup %3665  ;;  %v2555_v2 = vmul.f32 %v4796_v18, %v2547_v48  ;;  %v2525_v3 = vmul.f32 1.0614054, %v4826_v38 }
 0xb21   :  { %v2554_v47 = vmul.f32 %v4805_v43, %v2546_v61  ;;  %v2524_v10 = vmul.f32 1.0614054, %v4828_v29  ;;  %v2618_v61 = vmul.f32 1.442695, %v2606_v31  ;;  %v2504_v55 = vadd.f32 1.0, %v2496_v33 }
 0xb22   :  { %v2563_v7 = vadd.f32 -0.28449672, %v2555_v2  ;;  %v2533_v44 = vadd.f32 -1.4531521, %v2525_v3 }
 0xb23   :  { %v2562_v20 = vadd.f32 -0.28449672, %v2554_v47  ;;  %v2532_v54 = vadd.f32 -1.4531521, %v2524_v10  ;;  %v4842_v24 = vpop.eup %3667  ;;  %v2609_v47 = vmul.f32 %v2601_v4, %v2489_v6  ;;  %3681 = vrcp.f32 %v2504_v55 }
 0xb24   :  { %v2571_v56 = vmul.f32 %v4796_v18, %v2563_v7  ;;  %v2541_v30 = vmul.f32 %v4826_v38, %v2533_v44  ;;  %v2527_v22 = vmul.f32 1.0614054, %v4842_v24  ;;  %v3670_v46 = vpop.eup %3669  ;;  %3683 = vpow2.f32 %v2620_v25 }
 0xb25   :  { %v2570_v49 = vmul.f32 %v4805_v43, %v2562_v20  ;;  %v2540_v41 = vmul.f32 %v4828_v29, %v2532_v54  ;;  %v3672_v48 = vpop.eup %3671  ;;  %3685 = vpow2.f32 %v2618_v61  ;;  %v2624_v25 = vmul.f32 1.442695, %v2609_v47 }
 0xb26   :  { %v2579_v63 = vadd.f32 0.2548296, %v2571_v56  ;;  %v2549_v0 = vadd.f32 1.4214138, %v2541_v30  ;;  %v2535_v11 = vadd.f32 -1.4531521, %v2527_v22  ;;  %v4855_v40 = vpop.eup %3673 }
 0xb27   :  { %v2578_v8 = vadd.f32 0.2548296, %v2570_v49  ;;  %v2548_v13 = vadd.f32 1.4214138, %v2540_v41  ;;  %v2526_v7 = vmul.f32 1.0614054, %v4855_v40  ;;  %v4861_v20 = vpop.eup %3675  ;;  %3687 = vpow2.f32 %v2624_v25 }
 0xb28   :  { %v2587_v32 = vmul.f32 %v4796_v18, %v2579_v63  ;;  %v2557_v9 = vmul.f32 %v4826_v38, %v2549_v0  ;;  %v2543_v39 = vmul.f32 %v4842_v24, %v2535_v11  ;;  %v2529_v49 = vmul.f32 1.0614054, %v4861_v20 }
 0xb29   :  { %v2586_v2 = vmul.f32 %v4805_v43, %v2578_v8  ;;  %v2556_v3 = vmul.f32 %v4828_v29, %v2548_v13  ;;  %v2534_v56 = vadd.f32 -1.4531521, %v2526_v7  ;;  %v3678_v8 = vpop.eup %3677 }
 0xb2a   :  { %v2627_v51 = vmul.f32 %v3670_v46, %v2587_v32  ;;  %v2565_v10 = vadd.f32 -0.28449672, %v2557_v9  ;;  %v2551_v52 = vadd.f32 1.4214138, %v2543_v39  ;;  %v2537_v33 = vadd.f32 -1.4531521, %v2529_v49  ;;  %v3680_v9 = vpop.eup %3679 }
 0xb2b   :  { %v2626_v18 = vmul.f32 %v3672_v48, %v2586_v2  ;;  %v2564_v44 = vadd.f32 -0.28449672, %v2556_v3  ;;  %v2542_v4 = vmul.f32 %v4855_v40, %v2534_v56  ;;  %v2600_v32 = vsub.f32 0.0, %v4847_v34 }
 0xb2c   :  { %v2635_v54 = vsub.f32 1.0, %v2627_v51  ;;  %v2573_v43 = vmul.f32 %v4826_v38, %v2565_v10  ;;  %v2559_v31 = vmul.f32 %v4842_v24, %v2551_v52  ;;  %v2545_v2 = vmul.f32 %v4861_v20, %v2537_v33 }
 0xb2d   :  { %v2634_v30 = vsub.f32 1.0, %v2626_v18  ;;  %v2572_v6 = vmul.f32 %v4828_v29, %v2564_v44  ;;  %v2550_v48 = vadd.f32 1.4214138, %v2542_v4  ;;  %v3682_v10 = vpop.eup %3681  ;;  %v2608_v44 = vmul.f32 %v2600_v32, %v4847_v34 }
 0xb2e   :  { %v2643_v41 = vmul.f32 %v2635_v54, %v4812_v36  ;;  %v2581_v22 = vadd.f32 0.2548296, %v2573_v43  ;;  %v2567_v0 = vadd.f32 -0.28449672, %v2559_v31  ;;  %v2553_v51 = vadd.f32 1.4214138, %v2545_v2  ;;  %v3684_v52 = vpop.eup %3683 }
 0xb2f   :  { %v2642_v46 = vmul.f32 %v2634_v30, %v4817_v23  ;;  %v2580_v63 = vadd.f32 0.2548296, %v2572_v6  ;;  %v2558_v23 = vmul.f32 %v4855_v40, %v2550_v48  ;;  %v2528_v30 = vmul.f32 1.0614054, %v3682_v10 }
 0xb30   :  { %v2651_v13 = vadd.f32 1.0, %v2643_v41  ;;  %v2589_v11 = vmul.f32 %v4826_v38, %v2581_v22  ;;  %v2575_v55 = vmul.f32 %v4842_v24, %v2567_v0  ;;  %v2561_v56 = vmul.f32 %v4861_v20, %v2553_v51 }
 0xb31   :  { %v2650_v61 = vadd.f32 1.0, %v2642_v46  ;;  %v2588_v36 = vmul.f32 %v4828_v29, %v2580_v63  ;;  %v2566_v29 = vadd.f32 -0.28449672, %v2558_v23  ;;  %v2452_v31 = vmul.f32 0.5, %v4773_v28 }
 0xb32   :  { %v2629_v3 = vmul.f32 %v3678_v8, %v2589_v11  ;;  %v2583_v47 = vadd.f32 0.2548296, %v2575_v55  ;;  %v2659_v7 = vmul.f32 %v2651_v13, %v4798_v37  ;;  %v2476_v37 = vsel %vm2468_vm0, 1.0, %v3691_v50 }
 0xb33   :  { %v2658_v39 = vmul.f32 %v2650_v61, %v4800_v15  ;;  %v2628_v38 = vmul.f32 %v3680_v9, %v2588_v36  ;;  %v3686_v15 = vpop.eup %3685  ;;  %v2574_v34 = vmul.f32 %v4855_v40, %v2566_v29  ;;  %v2569_v41 = vadd.f32 -0.28449672, %v2561_v56 }
 0xb34   :  { %v2637_v18 = vsub.f32 1.0, %v2629_v3  ;;  %v2591_v43 = vmul.f32 %v4842_v24, %v2583_v47  ;;  %v2536_v22 = vadd.f32 -1.4531521, %v2528_v30  ;;  %v2622_v46 = vmul.f32 1.442695, %v2608_v44  ;;  %v3688_v32 = vpop.eup %3687 }
 0xb35   :  { %v2636_v54 = vsub.f32 1.0, %v2628_v38  ;;  %3429 = vmatprep.mubr.msk.f32.mxu0 %vm2674_vm15, %v2658_v39  ;;  %v2582_v25 = vadd.f32 0.2548296, %v2574_v34  ;;  %v2577_v28 = vmul.f32 %v4861_v20, %v2569_v41  ;;  %v2479_v13 = vsel %vm2471_vm1, 1.0, %v3691_v50  ;;  %v2918_v34 = vld [vmem:[%s4977_s21] ss:$0 sm:$0xff] }
 0xb36   :  { %v2645_v6 = vmul.f32 %v2637_v18, %v4839_v5  ;;  %3430 = vmatmul.mubr.msk.f32.vlgmr.msra.gmra.mrb[70].mxu0 %vm2674_vm15, %v2659_v7  ;;  %v2631_v24 = vmul.f32 %v3684_v52, %v2591_v43  ;;  %v2544_v0 = vmul.f32 %v3682_v10, %v2536_v22  ;;  %3689 = vpow2.f32 %v2622_v46 }
 0xb37   :  { %v2644_v49 = vmul.f32 %v2636_v54, %v2476_v37  ;;  %v2590_v33 = vmul.f32 %v4855_v40, %v2582_v25  ;;  %v2585_v11 = vadd.f32 0.2548296, %v2577_v28  ;;  %v2478_v40 = vsel %vm2470_vm2, 1.0, %v3691_v50 }
 0xb38   :  { %v2653_v4 = vadd.f32 1.0, %v2645_v6  ;;  %v2639_v63 = vsub.f32 1.0, %v2631_v24  ;;  %v2552_v48 = vadd.f32 1.4214138, %v2544_v0  ;;  %v2455_v51 = vmul.f32 0.5, %v4783_v27 }
 0xb39   :  { %v2652_v5 = vadd.f32 1.0, %v2644_v49  ;;  %v2630_v26 = vmul.f32 %v3686_v15, %v2590_v33  ;;  %v2593_v36 = vmul.f32 %v4861_v20, %v2585_v11  ;;  %v2481_v54 = vsel %vm2473_vm3, 1.0, %v3691_v50 }
 0xb3a   :  { %v2661_v9 = vmul.f32 %v2653_v4, %v2453_v60  ;;  %v2647_v61 = vmul.f32 %v2639_v63, %v2479_v13  ;;  %v2560_v55 = vmul.f32 %v3682_v10, %v2552_v48  ;;  %v2480_v27 = vsel %vm2472_vm4, 1.0, %v3691_v50 }
 0xb3b   :  { %v2660_v8 = vmul.f32 %v2652_v5, %v2452_v31  ;;  %v2638_v16 = vsub.f32 1.0, %v2630_v26  ;;  %v2633_v23 = vmul.f32 %v3688_v32, %v2593_v36  ;;  %v2815_v24 = vmul.f32 %v2812_v62, %v4636_v42 }
 0xb3c   :  { %v2568_v2 = vadd.f32 -0.28449672, %v2560_v55  ;;  %v2655_v39 = vadd.f32 1.0, %v2647_v61  ;;  %v2814_v22 = vmul.f32 %v2812_v62, %v4638_v17  ;;  %v2817_v42 = vmul.f32 %v2812_v62, %v4648_v12 }
 0xb3d   :  { %3432 = vmatprep.mubr.msk.f32.mxu0 %vm2674_vm15, %v2660_v8  ;;  %v2646_v3 = vmul.f32 %v2638_v16, %v2478_v40  ;;  %v2641_v18 = vsub.f32 1.0, %v2633_v23  ;;  %v2816_v17 = vmul.f32 %v2812_v62, %v4646_v53  ;;  %v2819_v12 = vmul.f32 %v2812_v62, %v4659_v19 }
 0xb3e   :  { %3433 = vmatmul.mubr.msk.f32.gmra.mrb[72].mxu0 %vm2674_vm15, %v2661_v9  ;;  %v2576_v38 = vmul.f32 %v3682_v10, %v2568_v2  ;;  %v2663_v29 = vmul.f32 %v2655_v39, %v2455_v51  ;;  %v2818_v53 = vmul.f32 %v2812_v62, %v4654_v45  ;;  %v2821_v19 = vmul.f32 %v2812_v62, %v4666_v35 }
 0xb3f   :  { %v2654_v47 = vadd.f32 1.0, %v2646_v3  ;;  %v2649_v21 = vmul.f32 %v2641_v18, %v2481_v54  ;;  %v2820_v45 = vmul.f32 %v2812_v62, %v4664_v58 }
 0xb40   :  { %v2584_v7 = vadd.f32 0.2548296, %v2576_v38  ;;  %v3690_v52 = vpop.eup %3689 }
 0xb41   :  { %v2662_v20 = vmul.f32 %v2654_v47, %v2454_v14  ;;  %v2657_v15 = vadd.f32 1.0, %v2649_v21 }
 0xb42   :  { %v2592_v44 = vmul.f32 %v3682_v10, %v2584_v7  ;;  %v2457_v10 = vmul.f32 0.5, %v4794_v1 }
 0xb43   :  { %3435 = vmatprep.mubr.msk.f32.mxu0 %vm2674_vm15, %v2662_v20 }
 0xb44   :  { %v2632_v43 = vmul.f32 %v3690_v52, %v2592_v44  ;;  %3436 = vmatmul.mubr.msk.f32.gmra.mrb[74].mxu0 %vm2674_vm15, %v2663_v29  ;;  %v2665_v37 = vmul.f32 %v2657_v15, %v2457_v10 }
 0xb46   :  { %v2640_v56 = vsub.f32 1.0, %v2632_v43 }
 0xb48   :  { %v2648_v30 = vmul.f32 %v2640_v56, %v2480_v27 }
 0xb4a   :  { %v2656_v6 = vadd.f32 1.0, %v2648_v30 }
 0xb4c   :  { %v2664_v31 = vmul.f32 %v2656_v6, %v2456_v57 }
 0xb4e   :  { %3438 = vmatprep.mubr.msk.f32.mxu0 %vm2674_vm15, %v2664_v31 }
 0xb4f   :  { %3439 = vmatmul.mubr.msk.f32.gmra.mrb[76].mxu0 %vm2674_vm15, %v2665_v37 }
 0xc09   :  { %v3431_v49 = vpop.f32.mrb[70].mxu0 }
 0xc0a   :  { %v2771_v50 = vadd.f32 %v3431_v49, %v2918_v34  ;;  %v2765_v41 = vpop.f32.mrb[71].mxu0 }
 0xc0b   :  { %v2766_v59 = vadd.f32 %v2918_v34, %v2765_v41 }
 0xc0c   :  { %v2823_v1 = vadd.f32 %v2815_v24, %v2771_v50 }
 0xc0d   :  { %v2822_v4 = vadd.f32 %v2814_v22, %v2766_v59 }
 0xc0e   :  { %2831 = vst.msk [vmem:[%s4978_s23 + $0x8] sm:$0xff] %vm1203_vm5, %v2823_v1 }
 0xc0f   :  { %2830 = vst.msk [vmem:[%s4978_s23] sm:$0xff] %vm1203_vm5, %v2822_v4 }
 0xc11   :  { %v3434_v25 = vpop.f32.mrb[72].mxu0 }
 0xc12   :  { %v2781_v46 = vadd.f32 %v3434_v25, %v2918_v34  ;;  %v2775_v5 = vpop.f32.mrb[73].mxu0 }
 0xc13   :  { %v2776_v63 = vadd.f32 %v2918_v34, %v2775_v5 }
 0xc14   :  { %v2825_v28 = vadd.f32 %v2817_v42, %v2781_v46 }
 0xc15   :  { %v2824_v0 = vadd.f32 %v2816_v17, %v2776_v63 }
 0xc16   :  { %2833 = vst.msk [vmem:[%s4978_s23 + $0x18] sm:$0xff] %vm1203_vm5, %v2825_v28 }
 0xc17   :  { %2832 = vst.msk [vmem:[%s4978_s23 + $0x10] sm:$0xff] %vm1203_vm5, %v2824_v0  ;;  %v3437_v60 = vpop.f32.mrb[74].mxu0 }
 0xc18   :  { %v2791_v33 = vadd.f32 %v3437_v60, %v2918_v34  ;;  %v2785_v8 = vpop.f32.mrb[75].mxu0 }
 0xc19   :  { %v2786_v13 = vadd.f32 %v2918_v34, %v2785_v8 }
 0xc1a   :  { %v2827_v11 = vadd.f32 %v2819_v12, %v2791_v33 }
 0xc1b   :  { %v2826_v48 = vadd.f32 %v2818_v53, %v2786_v13 }
 0xc1c   :  { %2835 = vst.msk [vmem:[%s4978_s23 + $0x28] sm:$0xff] %vm1203_vm5, %v2827_v11 }
 0xc1d   :  { %2834 = vst.msk [vmem:[%s4978_s23 + $0x20] sm:$0xff] %vm1203_vm5, %v2826_v48 }
 0xc22   :  { %v3440_v32 = vpop.f32.mrb[76].mxu0 }
 0xc23   :  { %v2801_v9 = vadd.f32 %v3440_v32, %v2918_v34  ;;  %v2795_v26 = vpop.f32.mrb[77].mxu0 }
 0xc24   :  { %v2796_v61 = vadd.f32 %v2918_v34, %v2795_v26 }
 0xc25   :  { %v2829_v36 = vadd.f32 %v2821_v19, %v2801_v9 }
 0xc26   :  { %v2828_v55 = vadd.f32 %v2820_v45, %v2796_v61 }
 0xc27   :  { %2837 = vst.msk [vmem:[%s4978_s23 + $0x38] sm:$0xff] %vm1203_vm5, %v2829_v36 }
 0xc28   :  { %2836 = vst.msk [vmem:[%s4978_s23 + $0x30] sm:$0xff] %vm1203_vm5, %v2828_v55 }

// kernel: liconvformer_forward.9
= control target key start
LH: loop header
LB: loop body
LE: loop exit
PB: predicated region body
PF: predicated region fallthrough
CT: control target
= control target key end

     0   :  { %v323_v2 = vmov 0.0|0.0   ;;  %vm324_vm0 = vmmov 0   ;;  %v325_v4 = vmov 0.0   ;;  %vm21_vm1 = vcmask 130048   ;;  %s424_s0 = inlined_call_operand.vmem [shape: f32[16,128], index: 0, kind: input, shape index: {}]   ;;  %s425_s1 = inlined_call_operand.vmem [shape: f32[2,16], index: 1, kind: input, shape index: {}]   ;;  %s426_s2 = inlined_call_operand.vmem [shape: f32[128,5], index: 2, kind: input, shape index: {}]   ;;  %s427_s3 = inlined_call_operand.vmem [shape: f32[1,5], index: 3, kind: input, shape index: {}]   ;;  %s428_s4 = inlined_call_operand.hbm [shape: f32[2,5], index: 4, kind: output, shape index: {}]  }
   0x1   :  { %v19_v0 = vld [vmem:[%s424_s0] sm:$0xff]  ;;  %v20_v1 = vld [vmem:[%s424_s0 + $0x8] sm:$0xff]  ;;  %268 = vmatprep.subr.bf16.mxu0 %v323_v2  ;;  %230 = vmatprep.mubr.msk.f32.mxu0 %vm324_vm0, %v325_v4  ;;  %v97_v8 = vld [vmem:[%s426_s2 + $0x10] sm:$0xff] }
   0x2   :  { %v269_v3 = vpack.c.bf16 %v20_v1, %v19_v0  ;;  %v95_v5 = vld [vmem:[%s426_s2] sm:$0xff]  ;;  %v96_v6 = vld [vmem:[%s426_s2 + $0x8] sm:$0xff]  ;;  %271 = vmatprep.subr.bf16.mxu1 %v323_v2  ;;  %v98_v9 = vld [vmem:[%s426_s2 + $0x18] sm:$0xff]  ;;  %265 = vmatprep.mubr.msk.f32.mxu1 %vm324_vm0, %v325_v4 }
   0x3   :  { %v272_v7 = vpack.c.bf16 %v96_v6, %v95_v5  ;;  %v18_v10 = vld [vmem:[%s425_s1] sm:$0x3]  ;;  %v275_v11 = vpack.c.bf16 %v98_v9, %v97_v8  ;;  %v100_v13 = vld [vmem:[%s426_s2 + $0x28] sm:$0xff] }
   0x4   :  { %270 = vmatpush3.bf16.msra.mxu0 %v269_v3  ;;  %v99_v12 = vld [vmem:[%s426_s2 + $0x20] sm:$0xff] }
   0x5   :  { %273 = vmatpush3.bf16.msra.mxu1 %v272_v7 }
   0x6   :  { %274 = vmatprep.subr.bf16.mxu1 %v323_v2 }
   0x7   :  { %231 = vmatmul.mubr.msk.f32.vlgmr.msra.gmra.mrb[0].mxu0 %vm21_vm1, %v18_v10 }
   0x8   :  { %9 = vsyncpa [#allocation3], 0  ;;  %v278_v14 = vpack.c.bf16 %v100_v13, %v99_v12  ;;  %v101_v15 = vld [vmem:[%s426_s2 + $0x30] sm:$0xff]  ;;  %v102_v16 = vld [vmem:[%s426_s2 + $0x38] sm:$0xff]  ;;  %s326_s26 = smov [#allocation2]   ;;  %vm188_vm2 = vcmask 33792  }
   0x9   :  { %276 = vmatpush3.bf16.msra.mxu1 %v275_v11  ;;  %v281_v17 = vpack.c.bf16 %v102_v16, %v101_v15  ;;  %v103_v18 = vld [vmem:[%s426_s2 + $0x40] sm:$0xff]  ;;  %v104_v19 = vld [vmem:[%s426_s2 + $0x48] sm:$0xff]  ;;  %v105_v21 = vld [vmem:[%s426_s2 + $0x50] sm:$0xff]  ;;  %s196_s27 = sshll.u32 %s326_s26, 4  ;;  %s197_s27 = int_to_ptr.vmem [resolvable:$true] %s196_s27 }
   0xa   :  { %277 = vmatprep.subr.bf16.mxu1 %v323_v2  ;;  %v284_v20 = vpack.c.bf16 %v104_v19, %v103_v18  ;;  %v106_v22 = vld [vmem:[%s426_s2 + $0x58] sm:$0xff]  ;;  %v107_v24 = vld [vmem:[%s426_s2 + $0x60] sm:$0xff]  ;;  %v108_v25 = vld [vmem:[%s426_s2 + $0x68] sm:$0xff]  ;;  %p304_p1 = scmp.lt.s32.totalorder %s197_s27, %s197_s27 }
   0xb   :  { %v287_v23 = vpack.c.bf16 %v106_v22, %v105_v21  ;;  %v290_v26 = vpack.c.bf16 %v108_v25, %v107_v24  ;;  %v109_v27 = vld [vmem:[%s426_s2 + $0x70] sm:$0xff]  ;;  %v110_v28 = vld [vmem:[%s426_s2 + $0x78] sm:$0xff]  ;;  %v205_v32 = vld [vmem:[%s427_s3] ss:$0 sm:$0xff]  ;;  %s299_s2 = scalar_lea.vmem %s197_s27, 32 }
   0xc   :  { %v293_v29 = vpack.c.bf16 %v110_v28, %v109_v27  ;;  %p300_p0 = scmp.ne.s32.totalorder %s197_s27, %s299_s2  ;;  %p305_p2 = scmp.lt.s32.totalorder %s299_s2, %s299_s2 }
   0xd   :  { %279 = vmatpush3.bf16.msra.mxu1 %v278_v14 }
   0xe   :  { %280 = vmatprep.subr.bf16.mxu1 %v323_v2  ;;  %p306_p3 = por %p305_p2, %p304_p1 }
  0x10   :  { %p307_p4 = pnand %p306_p3, %p300_p0 }
  0x11   :  { %282 = vmatpush3.bf16.msra.mxu1 %v281_v17 }
  0x12   :  { %283 = vmatprep.subr.bf16.mxu1 %v323_v2 }
  0x15   :  { %285 = vmatpush3.bf16.msra.mxu1 %v284_v20 }
  0x16   :  { %286 = vmatprep.subr.bf16.mxu1 %v323_v2 }
  0x19   :  { %288 = vmatpush3.bf16.msra.mxu1 %v287_v23 }
  0x1a   :  { %289 = vmatprep.subr.bf16.mxu1 %v323_v2 }
  0x1d   :  { %291 = vmatpush3.bf16.msra.mxu1 %v290_v26 }
  0x1e   :  { %292 = vmatprep.subr.bf16.mxu1 %v323_v2 }
  0x21   :  { %294 = vmatpush3.bf16.msra.mxu1 %v293_v29 }
  0xda   :  { %v91_v30 = vpop.f32.mrb[0].mxu0 }
  0xdb   :  { %v232_v31 = vpop.f32.mrb[1].mxu0  ;;  %266 = vmatmul.mubr.f32.vlgmr.msra.gmra.mrb[0].mxu1 %v91_v30 }
 0x1ae   :  { %v184_v33 = vpop.f32.mrb[0].mxu1 }
 0x1af   :  { %v185_v34 = vadd.f32 %v205_v32, %v184_v33  ;;  %v267_v35 = vpop.f32.mrb[1].mxu1 }
 0x1b1   :  { %189 = vst.msk [vmem:[#allocation2] sm:$0x3] %vm188_vm2, %v185_v34 }
 0x1b2   :  { %310 = shalt.err (!%p307_p4)
}
 0x1b3   :  { %s311_s30 = scalar_lea.hbm %s428_s4, 32 }
 0x1b4   :  { %p312_p5 = scmp.ne.s32.totalorder %s428_s4, %s311_s30  ;;  %p315_p6 = scmp.lt.u32.totalorder %s311_s30, %s428_s4 }
 0x1b6   :  { %p317_p7 = pnand %p315_p6, %p312_p5 }
 0x1b8   :  { %320 = shalt.err (!%p317_p7)
}
 0x1b9   :  { %199 = dma.vmem_to_hbm [thread:$0]  %s197_s27, 32, %s428_s4, [#allocation3]  }
 0x1ba   :  { %321 = dma.done.wait [#allocation3], 32  }
 0x1bb   :  { %322 = vsyncadd [#allocation3], 4294967264 }
 0x1bc   :  { %203 = vsyncpa [#allocation3], 1 }

</bundles_post_ra>
